<compile_context>
chip_gen: v5e
topology: v5e:2x2
jax: 0.10.0
libtpu: 0.0.40
codegen_flags: <defaults>
</compile_context>

<pallas_src>
from functools import partial

import jax
import jax.numpy as jnp
from jax.experimental import pallas as pl
from jax.experimental.pallas import tpu as pltpu


# --------------------------------------------------------------------------
# Host-side weight fusion (per-direction gate column order is [i, f, o, g])
# --------------------------------------------------------------------------
def _interleave_gate_cols(w_f, w_b, hidden):
    """(R,4H) fwd + (R,4H) bwd -> (R,8H) fused layout
    [i_f, i_b, f_f, f_b, o_f, o_b, g_f, g_b]."""
    H = hidden
    R = w_f.shape[0]
    stacked = jnp.stack([w_f.reshape(R, 4, H), w_b.reshape(R, 4, H)], axis=2)
    return stacked.reshape(R, 8 * H)


def fuse_bilstm_weights(w_ih_f, w_hh_f, b_f, w_ih_b, w_hh_b, b_b, hidden,
                        x_dtype=jnp.bfloat16):
    """Build fused weights so both directions run as ONE matmul per step.

    Returns:
      wx  (2E, 8H): acts on the paired input [x_t | x_{L-1-t}]; fwd weights in
                    rows 0:E (fwd gate columns), bwd weights in rows E:2E.
      whh (2H, 8H): block placement of recurrent weights; h = [h_fwd | h_bwd].
      b   (1, 8H) : fused bias (b_ih + b_hh already folded per direction).
    """
    H = hidden
    z_ih = jnp.zeros_like(w_ih_f)
    z_hh = jnp.zeros_like(w_hh_f)
    wx = jnp.concatenate([_interleave_gate_cols(w_ih_f, z_ih, H),
                          _interleave_gate_cols(z_ih, w_ih_b, H)], axis=0)
    whh = jnp.concatenate([_interleave_gate_cols(w_hh_f, z_hh, H),
                           _interleave_gate_cols(z_hh, w_hh_b, H)], axis=0)
    b = _interleave_gate_cols(b_f, b_b, H)
    return wx.astype(x_dtype), whh.astype(jnp.float32), b.astype(jnp.float32)


# --------------------------------------------------------------------------
# In-kernel fused BiLSTM (writes (B, L, 2H) outputs into a VMEM scratch ref)
# --------------------------------------------------------------------------
def _fused_bilstm(xpair_ref, lens_ref, wx_ref, whh_ref, b_ref,
                  xw_scr, out_scr, hidden):
    """xpair_ref: (B*L, 2E) bf16 rows [x_t | x_{L-1-t}], batch-major.
    lens_ref: (B, 1) int32.  out_scr: (B, L, 2H) f32 ([fwd | bwd] per row)."""
    H = hidden
    B = lens_ref.shape[0]
    L = xpair_ref.shape[0] // B
    lens = lens_ref[...]                                    # (B, 1) int32

    # Hoisted input projection: ONE big MXU matmul, off the serial chain.
    xw = jnp.dot(xpair_ref[...], wx_ref[...],
                 preferred_element_type=jnp.float32)        # (B*L, 8H)
    xw_scr[...] = (xw + b_ref[...]).reshape(B, L, 8 * H)    # bias hoisted too

    whh = whh_ref[...]                                      # (2H, 8H) f32

    # Hoisted constant for the per-step state-update mask.
    col_is_fwd = jax.lax.broadcasted_iota(jnp.int32, (1, 2 * H), 1) < H

    h = jnp.zeros((B, 2 * H), jnp.float32)                  # [h_fwd | h_bwd]
    c = jnp.zeros((B, 2 * H), jnp.float32)

    # Serial recurrence: ONE matmul + one sigmoid + two tanh per step for BOTH
    # directions.  (For long L, switch this to lax.fori_loop over xw_scr; at
    # the small static L used here a full unroll is fine.)
    for s in range(L):
        gates = xw_scr[:, s, :] + jnp.dot(h, whh,
                                          preferred_element_type=jnp.float32)
        sg = jax.nn.sigmoid(gates[:, :6 * H])   # [i(2H) | f(2H) | o(2H)]
        g = jnp.tanh(gates[:, 6 * H:])          # (B, 2H) = [g_fwd | g_bwd]
        i_g = sg[:, 0:2 * H]
        f_g = sg[:, 2 * H:4 * H]
        o_g = sg[:, 4 * H:6 * H]
        c_new = f_g * c + i_g * g
        h_new = o_g * jnp.tanh(c_new)

        # fwd half is at time step s, bwd half at time step L-1-s.
        thr = jnp.where(col_is_fwd, s, L - 1 - s)           # (1, 2H) int32
        upd = lens > thr                                     # (B, 2H) bool
        c = jnp.where(upd, c_new, c)
        h = jnp.where(upd, h_new, h)

        out_scr[:, s, 0:H] = jnp.where(lens > s, h_new[:, :H], 0.0)
        out_scr[:, L - 1 - s, H:2 * H] = jnp.where(lens > (L - 1 - s),
                                                   h_new[:, H:], 0.0)


# --------------------------------------------------------------------------
# Pallas kernel: fused BiLSTMs + attention + fc
# --------------------------------------------------------------------------
def bilstm_attn_kernel(txt_ref, asp_ref, txt_len_ref, asp_len_ref,
                       t_wx_ref, t_whh_ref, t_b_ref,
                       a_wx_ref, a_whh_ref, a_b_ref,
                       fc_w_ref, fc_b_ref, out_ref,
                       txt_xw_scr, asp_xw_scr, txt_out_scr, asp_out_scr,
                       *, hidden_dim):
    H = hidden_dim
    _fused_bilstm(txt_ref, txt_len_ref, t_wx_ref, t_whh_ref, t_b_ref,
                  txt_xw_scr, txt_out_scr, H)
    _fused_bilstm(asp_ref, asp_len_ref, a_wx_ref, a_whh_ref, a_b_ref,
                  asp_xw_scr, asp_out_scr, H)

    txt_out = txt_out_scr[...]                              # (B, Lt, 2H)
    asp_out = asp_out_scr[...]                              # (B, La, 2H)

    # sum(txt_out @ asp_out^T, axis=2) == txt_out @ sum(asp_out, axis=1)
    asp_sum = jnp.sum(asp_out, axis=1)                      # (B, 2H)
    scores = jnp.sum(txt_out * asp_sum[:, None, :],
                     axis=-1, keepdims=True)                # (B, Lt, 1)
    m = jnp.max(scores, axis=1, keepdims=True)
    e = jnp.exp(scores - m)
    alpha = e / jnp.sum(e, axis=1, keepdims=True)           # (B, Lt, 1)
    weighted = jnp.sum(txt_out * alpha, axis=1)             # (B, 2H)

    out = (jnp.dot(weighted, fc_w_ref[...],
                   preferred_element_type=jnp.float32) + fc_b_ref[...])
    out_ref[...] = out.astype(out_ref.dtype)


# --------------------------------------------------------------------------
# Wrapper (glue: embedding lookup, time-reverse pairing, padding, pallas_call)
# --------------------------------------------------------------------------
def bilstm_attn_forward(text_idx, asp_idx, embed, txt_lstm, asp_lstm,
                        fc_w, fc_b, hidden_dim, *, batch_tile=8):
    H = hidden_dim
    B, Lt = text_idx.shape
    La = asp_idx.shape[1]
    E = embed.shape[1]
    P = fc_w.shape[1]

    txt_len = jnp.sum(text_idx != 0, axis=1).astype(jnp.int32)[:, None]  # (B,1)
    asp_len = jnp.sum(asp_idx != 0, axis=1).astype(jnp.int32)[:, None]   # (B,1)
    txt = jnp.take(embed, text_idx, axis=0)                 # (B, Lt, E)
    asp = jnp.take(embed, asp_idx, axis=0)                  # (B, La, E)

    # Pair each timestep with its time-reversed counterpart so the fused
    # fwd+bwd input projection becomes a single matmul; bf16 halves DMA bytes.
    txt_pair = jnp.concatenate([txt, txt[:, ::-1, :]], -1).astype(jnp.bfloat16)
    asp_pair = jnp.concatenate([asp, asp[:, ::-1, :]], -1).astype(jnp.bfloat16)

    t_wx, t_whh, t_b = fuse_bilstm_weights(*txt_lstm, H)
    a_wx, a_whh, a_b = fuse_bilstm_weights(*asp_lstm, H)
    fc_w = fc_w.astype(jnp.float32)
    fc_b = fc_b.astype(jnp.float32)

    # Pad the batch to a full tile (>= 8 sublanes), shard it over a parallel
    # grid axis (megacore on v7x).  Padded rows have len == 0 -> zero outputs.
    TB = batch_tile
    B_pad = ((B + TB - 1) // TB) * TB

    def pad_b(x):
        return jnp.pad(x, ((0, B_pad - B),) + ((0, 0),) * (x.ndim - 1))

    txt_pair = pad_b(txt_pair).reshape(B_pad * Lt, 2 * E)   # batch-major rows
    asp_pair = pad_b(asp_pair).reshape(B_pad * La, 2 * E)
    txt_len = pad_b(txt_len)
    asp_len = pad_b(asp_len)

    batch2 = lambda i: (i, 0)
    whole = lambda i: (0, 0)

    grid_spec = pltpu.PrefetchScalarGridSpec(
        num_scalar_prefetch=0,
        grid=(B_pad // TB,),
        in_specs=[
            pl.BlockSpec((TB * Lt, 2 * E), batch2),   # txt paired inputs
            pl.BlockSpec((TB * La, 2 * E), batch2),   # asp paired inputs
            pl.BlockSpec((TB, 1), batch2),            # txt lens
            pl.BlockSpec((TB, 1), batch2),            # asp lens
            pl.BlockSpec(t_wx.shape, whole),
            pl.BlockSpec(t_whh.shape, whole),
            pl.BlockSpec(t_b.shape, whole),
            pl.BlockSpec(a_wx.shape, whole),
            pl.BlockSpec(a_whh.shape, whole),
            pl.BlockSpec(a_b.shape, whole),
            pl.BlockSpec(fc_w.shape, whole),
            pl.BlockSpec(fc_b.shape, whole),
        ],
        out_specs=pl.BlockSpec((TB, P), batch2),
        scratch_shapes=[
            pltpu.VMEM((TB, Lt, 8 * H), jnp.float32),   # hoisted txt xW
            pltpu.VMEM((TB, La, 8 * H), jnp.float32),   # hoisted asp xW
            pltpu.VMEM((TB, Lt, 2 * H), jnp.float32),   # txt BiLSTM outputs
            pltpu.VMEM((TB, La, 2 * H), jnp.float32),   # asp BiLSTM outputs
        ],
    )

    out = pl.pallas_call(
        partial(bilstm_attn_kernel, hidden_dim=H),
        out_shape=jax.ShapeDtypeStruct((B_pad, P), jnp.float32),
        grid_spec=grid_spec,
        compiler_params=pltpu.CompilerParams(
            dimension_semantics=("parallel",),
            vmem_limit_bytes=48 * 1024 * 1024),
    )(txt_pair, asp_pair, txt_len, asp_len,
      t_wx, t_whh, t_b, a_wx, a_whh, a_b, fc_w, fc_b)
    return out[:B]


# --------------------------------------------------------------------------
# Deterministic parameter init (shapes follow the PyTorch module __init__)
# --------------------------------------------------------------------------
def init_params(key, vocab, embed_dim, hidden_dim, polarities):
    H = hidden_dim
    s = 1.0 / float(H) ** 0.5
    keys = jax.random.split(key, 12)

    def u(k, shape):
        return jax.random.uniform(k, shape, jnp.float32, -s, s)

    embed = jax.random.normal(keys[0], (vocab, embed_dim), jnp.float32) * 0.1
    embed = embed.at[0].set(0.0)  # padding row

    def lstm_weights(k):
        # per-direction gate column order: [i, f, o, g]
        ks = jax.random.split(k, 8)
        w_ih_f = u(ks[0], (embed_dim, 4 * H))   # W_ih^T (forward dir)
        w_hh_f = u(ks[1], (H, 4 * H))           # W_hh^T (forward dir)
        b_f = u(ks[2], (1, 4 * H)) + u(ks[3], (1, 4 * H))  # b_ih + b_hh
        w_ih_b = u(ks[4], (embed_dim, 4 * H))   # reverse dir
        w_hh_b = u(ks[5], (H, 4 * H))
        b_b = u(ks[6], (1, 4 * H)) + u(ks[7], (1, 4 * H))
        return (w_ih_f, w_hh_f, b_f, w_ih_b, w_hh_b, b_b)

    txt_lstm = lstm_weights(keys[1])
    asp_lstm = lstm_weights(keys[2])
    fc_w = u(keys[3], (2 * H, polarities))  # nn.Linear weight, pre-transposed
    fc_b = u(keys[4], (1, polarities))
    return embed, txt_lstm, asp_lstm, fc_w, fc_b


if __name__ == "__main__":
    B, Lt, La = 2, 8, 4
    vocab, embed_dim, hidden_dim, polarities = 20, 32, 32, 3

    key = jax.random.PRNGKey(0)
    k_param, k_txt, k_asp = jax.random.split(key, 3)
    embed, txt_lstm, asp_lstm, fc_w, fc_b = init_params(
        k_param, vocab, embed_dim, hidden_dim, polarities)

    # Token index inputs with zero padding (index 0 == PAD).
    text_idx = jax.random.randint(k_txt, (B, Lt), 1, vocab)
    asp_idx = jax.random.randint(k_asp, (B, La), 1, vocab)
    txt_lens = jnp.array([Lt, 5])
    asp_lens = jnp.array([2, 3])
    text_idx = jnp.where(jnp.arange(Lt)[None, :] < txt_lens[:, None], text_idx, 0)
    asp_idx = jnp.where(jnp.arange(La)[None, :] < asp_lens[:, None], asp_idx, 0)

    out = bilstm_attn_forward(text_idx, asp_idx, embed, txt_lstm, asp_lstm,
                              fc_w, fc_b, hidden_dim)
    out = jax.block_until_ready(out)
    assert out.shape == (B, polarities), out.shape
    print("KERNEL_OK")
</pallas_src>

<mosaic_0001>
module attributes {stable_mosaic.version = 11 : i64} {
  func.func @bilstm_attn_kernel(%arg0: i32, %arg1: memref<64x64xbf16, #tpu.memory_space<vmem>>, %arg2: memref<32x64xbf16, #tpu.memory_space<vmem>>, %arg3: memref<8x1xi32, #tpu.memory_space<vmem>>, %arg4: memref<8x1xi32, #tpu.memory_space<vmem>>, %arg5: memref<64x256xbf16, #tpu.memory_space<vmem>>, %arg6: memref<64x256xf32, #tpu.memory_space<vmem>>, %arg7: memref<1x256xf32, #tpu.memory_space<vmem>>, %arg8: memref<64x256xbf16, #tpu.memory_space<vmem>>, %arg9: memref<64x256xf32, #tpu.memory_space<vmem>>, %arg10: memref<1x256xf32, #tpu.memory_space<vmem>>, %arg11: memref<64x3xf32, #tpu.memory_space<vmem>>, %arg12: memref<1x3xf32, #tpu.memory_space<vmem>>, %arg13: memref<8x3xf32, #tpu.memory_space<vmem>>, %arg14: memref<8x8x256xf32, #tpu.memory_space<vmem>>, %arg15: memref<8x4x256xf32, #tpu.memory_space<vmem>>, %arg16: memref<8x8x64xf32, #tpu.memory_space<vmem>>, %arg17: memref<8x4x64xf32, #tpu.memory_space<vmem>>) attributes {dimension_semantics = [#tpu.dimension_semantics<parallel>], iteration_bounds = array<i64: 1>, scalar_prefetch = 0 : i64, scratch_operands = 4 : i64, tpu.core_type = #tpu.core_type<tc>, window_params = [{transform_indices = @transform_0, window_bounds = array<i64: 64, 64>}, {transform_indices = @transform_1, window_bounds = array<i64: 32, 64>}, {transform_indices = @transform_2, window_bounds = array<i64: 8, 1>}, {transform_indices = @transform_3, window_bounds = array<i64: 8, 1>}, {pipeline_mode = #tpu.pipeline_mode<synchronous>, transform_indices = @transform_4, window_bounds = array<i64: 64, 256>}, {pipeline_mode = #tpu.pipeline_mode<synchronous>, transform_indices = @transform_5, window_bounds = array<i64: 64, 256>}, {pipeline_mode = #tpu.pipeline_mode<synchronous>, transform_indices = @transform_6, window_bounds = array<i64: 1, 256>}, {pipeline_mode = #tpu.pipeline_mode<synchronous>, transform_indices = @transform_7, window_bounds = array<i64: 64, 256>}, {pipeline_mode = #tpu.pipeline_mode<synchronous>, transform_indices = @transform_8, window_bounds = array<i64: 64, 256>}, {pipeline_mode = #tpu.pipeline_mode<synchronous>, transform_indices = @transform_9, window_bounds = array<i64: 1, 256>}, {pipeline_mode = #tpu.pipeline_mode<synchronous>, transform_indices = @transform_10, window_bounds = array<i64: 64, 3>}, {pipeline_mode = #tpu.pipeline_mode<synchronous>, transform_indices = @transform_11, window_bounds = array<i64: 1, 3>}, {transform_indices = @transform_12, window_bounds = array<i64: 8, 3>}]} {
    %c0 = arith.constant 0 : index
    %c0_0 = arith.constant 0 : index
    %0 = vector.load %arg3[%c0, %c0_0] : memref<8x1xi32, #tpu.memory_space<vmem>>, vector<8x1xi32>
    %c0_1 = arith.constant 0 : index
    %c0_2 = arith.constant 0 : index
    %1 = vector.load %arg1[%c0_1, %c0_2] : memref<64x64xbf16, #tpu.memory_space<vmem>>, vector<64x64xbf16>
    %c0_3 = arith.constant 0 : index
    %c0_4 = arith.constant 0 : index
    %2 = vector.load %arg5[%c0_3, %c0_4] : memref<64x256xbf16, #tpu.memory_space<vmem>>, vector<64x256xbf16>
    %cst = arith.constant dense<0.000000e+00> : vector<64x256xf32>
    %3 = tpu.matmul %1, %2, %cst {dimension_numbers = #tpu.dot_dimension_numbers<[1], [0], [0], [1], [0, 0, 1, 1], [], []>} : vector<64x64xbf16>, vector<64x256xbf16>, vector<64x256xf32> -> vector<64x256xf32>
    %c0_5 = arith.constant 0 : index
    %c0_6 = arith.constant 0 : index
    %4 = vector.load %arg7[%c0_5, %c0_6] : memref<1x256xf32, #tpu.memory_space<vmem>>, vector<1x256xf32>
    %5 = vector.broadcast %4 : vector<1x256xf32> to vector<64x256xf32>
    %6 = arith.addf %3, %5 : vector<64x256xf32>
    %7 = vector.shape_cast %6 : vector<64x256xf32> to vector<8x8x256xf32>
    %c0_7 = arith.constant 0 : index
    %c0_8 = arith.constant 0 : index
    %c0_9 = arith.constant 0 : index
    %8 = vector.load %arg14[%c0_7, %c0_8, %c0_9] : memref<8x8x256xf32, #tpu.memory_space<vmem>>, vector<8x8x256xf32>
    tpu.vector_store %arg14[%c0_7, %c0_8, %c0_9], %7 {strides = array<i32>} : memref<8x8x256xf32, #tpu.memory_space<vmem>>, vector<8x8x256xf32>,
    %c0_10 = arith.constant 0 : index
    %c0_11 = arith.constant 0 : index
    %9 = vector.load %arg6[%c0_10, %c0_11] : memref<64x256xf32, #tpu.memory_space<vmem>>, vector<64x256xf32>
    %10 = tpu.iota {dimensions = array<i32: 1>} : vector<1x64xi32>
    %c32_i32 = arith.constant 32 : i32
    %11 = vector.broadcast %c32_i32 : i32 to vector<1x64xi32>
    %12 = arith.cmpi slt, %10, %11 : vector<1x64xi32>
    %cst_12 = arith.constant 0.000000e+00 : f32
    %13 = vector.broadcast %cst_12 : f32 to vector<8x64xf32>
    %cst_13 = arith.constant 0.000000e+00 : f32
    %14 = vector.broadcast %cst_13 : f32 to vector<8x64xf32>
    %c0_14 = arith.constant 0 : index
    %c0_15 = arith.constant 0 : index
    %c0_16 = arith.constant 0 : index
    %15 = vector.load %arg14[%c0_14, %c0_15, %c0_16] : memref<8x8x256xf32, #tpu.memory_space<vmem>>, vector<8x1x256xf32>
    %16 = vector.shape_cast %15 : vector<8x1x256xf32> to vector<8x256xf32>
    %cst_17 = arith.constant dense<0.000000e+00> : vector<8x256xf32>
    %17 = tpu.matmul %13, %9, %cst_17 {dimension_numbers = #tpu.dot_dimension_numbers<[1], [0], [0], [1], [0, 0, 1, 1], [], []>} : vector<8x64xf32>, vector<64x256xf32>, vector<8x256xf32> -> vector<8x256xf32>
    %18 = arith.addf %16, %17 : vector<8x256xf32>
    %19 = vector.extract_strided_slice %18 {offsets = [0, 0], sizes = [8, 192], strides = [1, 1]} : vector<8x256xf32> to vector<8x192xf32>
    %20 = arith.negf %19 : vector<8x192xf32>
    %21 = math.exp %20 : vector<8x192xf32>
    %cst_18 = arith.constant 1.000000e+00 : f32
    %22 = vector.broadcast %cst_18 : f32 to vector<8x192xf32>
    %23 = arith.addf %22, %21 : vector<8x192xf32>
    %24 = arith.divf %22, %23 : vector<8x192xf32>
    %25 = vector.extract_strided_slice %18 {offsets = [0, 192], sizes = [8, 64], strides = [1, 1]} : vector<8x256xf32> to vector<8x64xf32>
    %26 = math.tanh %25 : vector<8x64xf32>
    %27 = vector.extract_strided_slice %24 {offsets = [0, 0], sizes = [8, 64], strides = [1, 1]} : vector<8x192xf32> to vector<8x64xf32>
    %28 = vector.extract_strided_slice %24 {offsets = [0, 64], sizes = [8, 64], strides = [1, 1]} : vector<8x192xf32> to vector<8x64xf32>
    %29 = vector.extract_strided_slice %24 {offsets = [0, 128], sizes = [8, 64], strides = [1, 1]} : vector<8x192xf32> to vector<8x64xf32>
    %30 = arith.mulf %28, %14 : vector<8x64xf32>
    %31 = arith.mulf %27, %26 : vector<8x64xf32>
    %32 = arith.addf %30, %31 : vector<8x64xf32>
    %33 = math.tanh %32 : vector<8x64xf32>
    %34 = arith.mulf %29, %33 : vector<8x64xf32>
    %c0_i32 = arith.constant 0 : i32
    %c7_i32 = arith.constant 7 : i32
    %35 = vector.broadcast %c0_i32 : i32 to vector<1x64xi32>
    %36 = vector.broadcast %c7_i32 : i32 to vector<1x64xi32>
    %37 = arith.select %12, %35, %36 : vector<1x64xi1>, vector<1x64xi32>
    %38 = vector.broadcast %0 : vector<8x1xi32> to vector<8x64xi32>
    %39 = vector.broadcast %37 : vector<1x64xi32> to vector<8x64xi32>
    %40 = arith.cmpi sgt, %38, %39 : vector<8x64xi32>
    %41 = arith.select %40, %32, %14 : vector<8x64xi1>, vector<8x64xf32>
    %42 = arith.select %40, %34, %13 : vector<8x64xi1>, vector<8x64xf32>
    %c0_i32_19 = arith.constant 0 : i32
    %43 = vector.broadcast %c0_i32_19 : i32 to vector<8x1xi32>
    %44 = arith.cmpi sgt, %0, %43 : vector<8x1xi32>
    %45 = vector.extract_strided_slice %34 {offsets = [0, 0], sizes = [8, 32], strides = [1, 1]} : vector<8x64xf32> to vector<8x32xf32>
    %cst_20 = arith.constant 0.000000e+00 : f32
    %46 = vector.shape_cast %44 : vector<8x1xi1> to vector<8x1xi1>
    %47 = vector.broadcast %46 : vector<8x1xi1> to vector<8x32xi1>
    %48 = vector.broadcast %cst_20 : f32 to vector<8x32xf32>
    %49 = arith.select %47, %45, %48 : vector<8x32xi1>, vector<8x32xf32>
    %c0_21 = arith.constant 0 : index
    %c0_22 = arith.constant 0 : index
    %c0_23 = arith.constant 0 : index
    %50 = vector.load %arg16[%c0_21, %c0_22, %c0_23] : memref<8x8x64xf32, #tpu.memory_space<vmem>>, vector<8x1x32xf32>
    %51 = vector.shape_cast %50 : vector<8x1x32xf32> to vector<8x32xf32>
    %52 = vector.shape_cast %49 : vector<8x32xf32> to vector<8x1x32xf32>
    tpu.vector_store %arg16[%c0_21, %c0_22, %c0_23], %52 {strides = array<i32>} : memref<8x8x64xf32, #tpu.memory_space<vmem>>, vector<8x1x32xf32>,
    %c7_i32_24 = arith.constant 7 : i32
    %53 = vector.broadcast %c7_i32_24 : i32 to vector<8x1xi32>
    %54 = arith.cmpi sgt, %0, %53 : vector<8x1xi32>
    %55 = vector.extract_strided_slice %34 {offsets = [0, 32], sizes = [8, 32], strides = [1, 1]} : vector<8x64xf32> to vector<8x32xf32>
    %cst_25 = arith.constant 0.000000e+00 : f32
    %56 = vector.shape_cast %54 : vector<8x1xi1> to vector<8x1xi1>
    %57 = vector.broadcast %56 : vector<8x1xi1> to vector<8x32xi1>
    %58 = vector.broadcast %cst_25 : f32 to vector<8x32xf32>
    %59 = arith.select %57, %55, %58 : vector<8x32xi1>, vector<8x32xf32>
    %c0_26 = arith.constant 0 : index
    %c7 = arith.constant 7 : index
    %c32 = arith.constant 32 : index
    %60 = vector.load %arg16[%c0_26, %c7, %c32] : memref<8x8x64xf32, #tpu.memory_space<vmem>>, vector<8x1x32xf32>
    %61 = vector.shape_cast %60 : vector<8x1x32xf32> to vector<8x32xf32>
    %62 = vector.shape_cast %59 : vector<8x32xf32> to vector<8x1x32xf32>
    tpu.vector_store %arg16[%c0_26, %c7, %c32], %62 {strides = array<i32>} : memref<8x8x64xf32, #tpu.memory_space<vmem>>, vector<8x1x32xf32>,
    %c0_27 = arith.constant 0 : index
    %c1 = arith.constant 1 : index
    %c0_28 = arith.constant 0 : index
    %63 = vector.load %arg14[%c0_27, %c1, %c0_28] : memref<8x8x256xf32, #tpu.memory_space<vmem>>, vector<8x1x256xf32>
    %64 = vector.shape_cast %63 : vector<8x1x256xf32> to vector<8x256xf32>
    %cst_29 = arith.constant dense<0.000000e+00> : vector<8x256xf32>
    %65 = tpu.matmul %42, %9, %cst_29 {dimension_numbers = #tpu.dot_dimension_numbers<[1], [0], [0], [1], [0, 0, 1, 1], [], []>} : vector<8x64xf32>, vector<64x256xf32>, vector<8x256xf32> -> vector<8x256xf32>
    %66 = arith.addf %64, %65 : vector<8x256xf32>
    %67 = vector.extract_strided_slice %66 {offsets = [0, 0], sizes = [8, 192], strides = [1, 1]} : vector<8x256xf32> to vector<8x192xf32>
    %68 = arith.negf %67 : vector<8x192xf32>
    %69 = math.exp %68 : vector<8x192xf32>
    %cst_30 = arith.constant 1.000000e+00 : f32
    %70 = vector.broadcast %cst_30 : f32 to vector<8x192xf32>
    %71 = arith.addf %70, %69 : vector<8x192xf32>
    %72 = arith.divf %70, %71 : vector<8x192xf32>
    %73 = vector.extract_strided_slice %66 {offsets = [0, 192], sizes = [8, 64], strides = [1, 1]} : vector<8x256xf32> to vector<8x64xf32>
    %74 = math.tanh %73 : vector<8x64xf32>
    %75 = vector.extract_strided_slice %72 {offsets = [0, 0], sizes = [8, 64], strides = [1, 1]} : vector<8x192xf32> to vector<8x64xf32>
    %76 = vector.extract_strided_slice %72 {offsets = [0, 64], sizes = [8, 64], strides = [1, 1]} : vector<8x192xf32> to vector<8x64xf32>
    %77 = vector.extract_strided_slice %72 {offsets = [0, 128], sizes = [8, 64], strides = [1, 1]} : vector<8x192xf32> to vector<8x64xf32>
    %78 = arith.mulf %76, %41 : vector<8x64xf32>
    %79 = arith.mulf %75, %74 : vector<8x64xf32>
    %80 = arith.addf %78, %79 : vector<8x64xf32>
    %81 = math.tanh %80 : vector<8x64xf32>
    %82 = arith.mulf %77, %81 : vector<8x64xf32>
    %c1_i32 = arith.constant 1 : i32
    %c6_i32 = arith.constant 6 : i32
    %83 = vector.broadcast %c1_i32 : i32 to vector<1x64xi32>
    %84 = vector.broadcast %c6_i32 : i32 to vector<1x64xi32>
    %85 = arith.select %12, %83, %84 : vector<1x64xi1>, vector<1x64xi32>
    %86 = vector.broadcast %0 : vector<8x1xi32> to vector<8x64xi32>
    %87 = vector.broadcast %85 : vector<1x64xi32> to vector<8x64xi32>
    %88 = arith.cmpi sgt, %86, %87 : vector<8x64xi32>
    %89 = arith.select %88, %80, %41 : vector<8x64xi1>, vector<8x64xf32>
    %90 = arith.select %88, %82, %42 : vector<8x64xi1>, vector<8x64xf32>
    %c1_i32_31 = arith.constant 1 : i32
    %91 = vector.broadcast %c1_i32_31 : i32 to vector<8x1xi32>
    %92 = arith.cmpi sgt, %0, %91 : vector<8x1xi32>
    %93 = vector.extract_strided_slice %82 {offsets = [0, 0], sizes = [8, 32], strides = [1, 1]} : vector<8x64xf32> to vector<8x32xf32>
    %cst_32 = arith.constant 0.000000e+00 : f32
    %94 = vector.shape_cast %92 : vector<8x1xi1> to vector<8x1xi1>
    %95 = vector.broadcast %94 : vector<8x1xi1> to vector<8x32xi1>
    %96 = vector.broadcast %cst_32 : f32 to vector<8x32xf32>
    %97 = arith.select %95, %93, %96 : vector<8x32xi1>, vector<8x32xf32>
    %c0_33 = arith.constant 0 : index
    %c1_34 = arith.constant 1 : index
    %c0_35 = arith.constant 0 : index
    %98 = vector.load %arg16[%c0_33, %c1_34, %c0_35] : memref<8x8x64xf32, #tpu.memory_space<vmem>>, vector<8x1x32xf32>
    %99 = vector.shape_cast %98 : vector<8x1x32xf32> to vector<8x32xf32>
    %100 = vector.shape_cast %97 : vector<8x32xf32> to vector<8x1x32xf32>
    tpu.vector_store %arg16[%c0_33, %c1_34, %c0_35], %100 {strides = array<i32>} : memref<8x8x64xf32, #tpu.memory_space<vmem>>, vector<8x1x32xf32>,
    %c6_i32_36 = arith.constant 6 : i32
    %101 = vector.broadcast %c6_i32_36 : i32 to vector<8x1xi32>
    %102 = arith.cmpi sgt, %0, %101 : vector<8x1xi32>
    %103 = vector.extract_strided_slice %82 {offsets = [0, 32], sizes = [8, 32], strides = [1, 1]} : vector<8x64xf32> to vector<8x32xf32>
    %cst_37 = arith.constant 0.000000e+00 : f32
    %104 = vector.shape_cast %102 : vector<8x1xi1> to vector<8x1xi1>
    %105 = vector.broadcast %104 : vector<8x1xi1> to vector<8x32xi1>
    %106 = vector.broadcast %cst_37 : f32 to vector<8x32xf32>
    %107 = arith.select %105, %103, %106 : vector<8x32xi1>, vector<8x32xf32>
    %c0_38 = arith.constant 0 : index
    %c6 = arith.constant 6 : index
    %c32_39 = arith.constant 32 : index
    %108 = vector.load %arg16[%c0_38, %c6, %c32_39] : memref<8x8x64xf32, #tpu.memory_space<vmem>>, vector<8x1x32xf32>
    %109 = vector.shape_cast %108 : vector<8x1x32xf32> to vector<8x32xf32>
    %110 = vector.shape_cast %107 : vector<8x32xf32> to vector<8x1x32xf32>
    tpu.vector_store %arg16[%c0_38, %c6, %c32_39], %110 {strides = array<i32>} : memref<8x8x64xf32, #tpu.memory_space<vmem>>, vector<8x1x32xf32>,
    %c0_40 = arith.constant 0 : index
    %c2 = arith.constant 2 : index
    %c0_41 = arith.constant 0 : index
    %111 = vector.load %arg14[%c0_40, %c2, %c0_41] : memref<8x8x256xf32, #tpu.memory_space<vmem>>, vector<8x1x256xf32>
    %112 = vector.shape_cast %111 : vector<8x1x256xf32> to vector<8x256xf32>
    %cst_42 = arith.constant dense<0.000000e+00> : vector<8x256xf32>
    %113 = tpu.matmul %90, %9, %cst_42 {dimension_numbers = #tpu.dot_dimension_numbers<[1], [0], [0], [1], [0, 0, 1, 1], [], []>} : vector<8x64xf32>, vector<64x256xf32>, vector<8x256xf32> -> vector<8x256xf32>
    %114 = arith.addf %112, %113 : vector<8x256xf32>
    %115 = vector.extract_strided_slice %114 {offsets = [0, 0], sizes = [8, 192], strides = [1, 1]} : vector<8x256xf32> to vector<8x192xf32>
    %116 = arith.negf %115 : vector<8x192xf32>
    %117 = math.exp %116 : vector<8x192xf32>
    %cst_43 = arith.constant 1.000000e+00 : f32
    %118 = vector.broadcast %cst_43 : f32 to vector<8x192xf32>
    %119 = arith.addf %118, %117 : vector<8x192xf32>
    %120 = arith.divf %118, %119 : vector<8x192xf32>
    %121 = vector.extract_strided_slice %114 {offsets = [0, 192], sizes = [8, 64], strides = [1, 1]} : vector<8x256xf32> to vector<8x64xf32>
    %122 = math.tanh %121 : vector<8x64xf32>
    %123 = vector.extract_strided_slice %120 {offsets = [0, 0], sizes = [8, 64], strides = [1, 1]} : vector<8x192xf32> to vector<8x64xf32>
    %124 = vector.extract_strided_slice %120 {offsets = [0, 64], sizes = [8, 64], strides = [1, 1]} : vector<8x192xf32> to vector<8x64xf32>
    %125 = vector.extract_strided_slice %120 {offsets = [0, 128], sizes = [8, 64], strides = [1, 1]} : vector<8x192xf32> to vector<8x64xf32>
    %126 = arith.mulf %124, %89 : vector<8x64xf32>
    %127 = arith.mulf %123, %122 : vector<8x64xf32>
    %128 = arith.addf %126, %127 : vector<8x64xf32>
    %129 = math.tanh %128 : vector<8x64xf32>
    %130 = arith.mulf %125, %129 : vector<8x64xf32>
    %c2_i32 = arith.constant 2 : i32
    %c5_i32 = arith.constant 5 : i32
    %131 = vector.broadcast %c2_i32 : i32 to vector<1x64xi32>
    %132 = vector.broadcast %c5_i32 : i32 to vector<1x64xi32>
    %133 = arith.select %12, %131, %132 : vector<1x64xi1>, vector<1x64xi32>
    %134 = vector.broadcast %0 : vector<8x1xi32> to vector<8x64xi32>
    %135 = vector.broadcast %133 : vector<1x64xi32> to vector<8x64xi32>
    %136 = arith.cmpi sgt, %134, %135 : vector<8x64xi32>
    %137 = arith.select %136, %128, %89 : vector<8x64xi1>, vector<8x64xf32>
    %138 = arith.select %136, %130, %90 : vector<8x64xi1>, vector<8x64xf32>
    %c2_i32_44 = arith.constant 2 : i32
    %139 = vector.broadcast %c2_i32_44 : i32 to vector<8x1xi32>
    %140 = arith.cmpi sgt, %0, %139 : vector<8x1xi32>
    %141 = vector.extract_strided_slice %130 {offsets = [0, 0], sizes = [8, 32], strides = [1, 1]} : vector<8x64xf32> to vector<8x32xf32>
    %cst_45 = arith.constant 0.000000e+00 : f32
    %142 = vector.shape_cast %140 : vector<8x1xi1> to vector<8x1xi1>
    %143 = vector.broadcast %142 : vector<8x1xi1> to vector<8x32xi1>
    %144 = vector.broadcast %cst_45 : f32 to vector<8x32xf32>
    %145 = arith.select %143, %141, %144 : vector<8x32xi1>, vector<8x32xf32>
    %c0_46 = arith.constant 0 : index
    %c2_47 = arith.constant 2 : index
    %c0_48 = arith.constant 0 : index
    %146 = vector.load %arg16[%c0_46, %c2_47, %c0_48] : memref<8x8x64xf32, #tpu.memory_space<vmem>>, vector<8x1x32xf32>
    %147 = vector.shape_cast %146 : vector<8x1x32xf32> to vector<8x32xf32>
    %148 = vector.shape_cast %145 : vector<8x32xf32> to vector<8x1x32xf32>
    tpu.vector_store %arg16[%c0_46, %c2_47, %c0_48], %148 {strides = array<i32>} : memref<8x8x64xf32, #tpu.memory_space<vmem>>, vector<8x1x32xf32>,
    %c5_i32_49 = arith.constant 5 : i32
    %149 = vector.broadcast %c5_i32_49 : i32 to vector<8x1xi32>
    %150 = arith.cmpi sgt, %0, %149 : vector<8x1xi32>
    %151 = vector.extract_strided_slice %130 {offsets = [0, 32], sizes = [8, 32], strides = [1, 1]} : vector<8x64xf32> to vector<8x32xf32>
    %cst_50 = arith.constant 0.000000e+00 : f32
    %152 = vector.shape_cast %150 : vector<8x1xi1> to vector<8x1xi1>
    %153 = vector.broadcast %152 : vector<8x1xi1> to vector<8x32xi1>
    %154 = vector.broadcast %cst_50 : f32 to vector<8x32xf32>
    %155 = arith.select %153, %151, %154 : vector<8x32xi1>, vector<8x32xf32>
    %c0_51 = arith.constant 0 : index
    %c5 = arith.constant 5 : index
    %c32_52 = arith.constant 32 : index
    %156 = vector.load %arg16[%c0_51, %c5, %c32_52] : memref<8x8x64xf32, #tpu.memory_space<vmem>>, vector<8x1x32xf32>
    %157 = vector.shape_cast %156 : vector<8x1x32xf32> to vector<8x32xf32>
    %158 = vector.shape_cast %155 : vector<8x32xf32> to vector<8x1x32xf32>
    tpu.vector_store %arg16[%c0_51, %c5, %c32_52], %158 {strides = array<i32>} : memref<8x8x64xf32, #tpu.memory_space<vmem>>, vector<8x1x32xf32>,
    %c0_53 = arith.constant 0 : index
    %c3 = arith.constant 3 : index
    %c0_54 = arith.constant 0 : index
    %159 = vector.load %arg14[%c0_53, %c3, %c0_54] : memref<8x8x256xf32, #tpu.memory_space<vmem>>, vector<8x1x256xf32>
    %160 = vector.shape_cast %159 : vector<8x1x256xf32> to vector<8x256xf32>
    %cst_55 = arith.constant dense<0.000000e+00> : vector<8x256xf32>
    %161 = tpu.matmul %138, %9, %cst_55 {dimension_numbers = #tpu.dot_dimension_numbers<[1], [0], [0], [1], [0, 0, 1, 1], [], []>} : vector<8x64xf32>, vector<64x256xf32>, vector<8x256xf32> -> vector<8x256xf32>
    %162 = arith.addf %160, %161 : vector<8x256xf32>
    %163 = vector.extract_strided_slice %162 {offsets = [0, 0], sizes = [8, 192], strides = [1, 1]} : vector<8x256xf32> to vector<8x192xf32>
    %164 = arith.negf %163 : vector<8x192xf32>
    %165 = math.exp %164 : vector<8x192xf32>
    %cst_56 = arith.constant 1.000000e+00 : f32
    %166 = vector.broadcast %cst_56 : f32 to vector<8x192xf32>
    %167 = arith.addf %166, %165 : vector<8x192xf32>
    %168 = arith.divf %166, %167 : vector<8x192xf32>
    %169 = vector.extract_strided_slice %162 {offsets = [0, 192], sizes = [8, 64], strides = [1, 1]} : vector<8x256xf32> to vector<8x64xf32>
    %170 = math.tanh %169 : vector<8x64xf32>
    %171 = vector.extract_strided_slice %168 {offsets = [0, 0], sizes = [8, 64], strides = [1, 1]} : vector<8x192xf32> to vector<8x64xf32>
    %172 = vector.extract_strided_slice %168 {offsets = [0, 64], sizes = [8, 64], strides = [1, 1]} : vector<8x192xf32> to vector<8x64xf32>
    %173 = vector.extract_strided_slice %168 {offsets = [0, 128], sizes = [8, 64], strides = [1, 1]} : vector<8x192xf32> to vector<8x64xf32>
    %174 = arith.mulf %172, %137 : vector<8x64xf32>
    %175 = arith.mulf %171, %170 : vector<8x64xf32>
    %176 = arith.addf %174, %175 : vector<8x64xf32>
    %177 = math.tanh %176 : vector<8x64xf32>
    %178 = arith.mulf %173, %177 : vector<8x64xf32>
    %c3_i32 = arith.constant 3 : i32
    %c4_i32 = arith.constant 4 : i32
    %179 = vector.broadcast %c3_i32 : i32 to vector<1x64xi32>
    %180 = vector.broadcast %c4_i32 : i32 to vector<1x64xi32>
    %181 = arith.select %12, %179, %180 : vector<1x64xi1>, vector<1x64xi32>
    %182 = vector.broadcast %0 : vector<8x1xi32> to vector<8x64xi32>
    %183 = vector.broadcast %181 : vector<1x64xi32> to vector<8x64xi32>
    %184 = arith.cmpi sgt, %182, %183 : vector<8x64xi32>
    %185 = arith.select %184, %176, %137 : vector<8x64xi1>, vector<8x64xf32>
    %186 = arith.select %184, %178, %138 : vector<8x64xi1>, vector<8x64xf32>
    %c3_i32_57 = arith.constant 3 : i32
    %187 = vector.broadcast %c3_i32_57 : i32 to vector<8x1xi32>
    %188 = arith.cmpi sgt, %0, %187 : vector<8x1xi32>
    %189 = vector.extract_strided_slice %178 {offsets = [0, 0], sizes = [8, 32], strides = [1, 1]} : vector<8x64xf32> to vector<8x32xf32>
    %cst_58 = arith.constant 0.000000e+00 : f32
    %190 = vector.shape_cast %188 : vector<8x1xi1> to vector<8x1xi1>
    %191 = vector.broadcast %190 : vector<8x1xi1> to vector<8x32xi1>
    %192 = vector.broadcast %cst_58 : f32 to vector<8x32xf32>
    %193 = arith.select %191, %189, %192 : vector<8x32xi1>, vector<8x32xf32>
    %c0_59 = arith.constant 0 : index
    %c3_60 = arith.constant 3 : index
    %c0_61 = arith.constant 0 : index
    %194 = vector.load %arg16[%c0_59, %c3_60, %c0_61] : memref<8x8x64xf32, #tpu.memory_space<vmem>>, vector<8x1x32xf32>
    %195 = vector.shape_cast %194 : vector<8x1x32xf32> to vector<8x32xf32>
    %196 = vector.shape_cast %193 : vector<8x32xf32> to vector<8x1x32xf32>
    tpu.vector_store %arg16[%c0_59, %c3_60, %c0_61], %196 {strides = array<i32>} : memref<8x8x64xf32, #tpu.memory_space<vmem>>, vector<8x1x32xf32>,
    %c4_i32_62 = arith.constant 4 : i32
    %197 = vector.broadcast %c4_i32_62 : i32 to vector<8x1xi32>
    %198 = arith.cmpi sgt, %0, %197 : vector<8x1xi32>
    %199 = vector.extract_strided_slice %178 {offsets = [0, 32], sizes = [8, 32], strides = [1, 1]} : vector<8x64xf32> to vector<8x32xf32>
    %cst_63 = arith.constant 0.000000e+00 : f32
    %200 = vector.shape_cast %198 : vector<8x1xi1> to vector<8x1xi1>
    %201 = vector.broadcast %200 : vector<8x1xi1> to vector<8x32xi1>
    %202 = vector.broadcast %cst_63 : f32 to vector<8x32xf32>
    %203 = arith.select %201, %199, %202 : vector<8x32xi1>, vector<8x32xf32>
    %c0_64 = arith.constant 0 : index
    %c4 = arith.constant 4 : index
    %c32_65 = arith.constant 32 : index
    %204 = vector.load %arg16[%c0_64, %c4, %c32_65] : memref<8x8x64xf32, #tpu.memory_space<vmem>>, vector<8x1x32xf32>
    %205 = vector.shape_cast %204 : vector<8x1x32xf32> to vector<8x32xf32>
    %206 = vector.shape_cast %203 : vector<8x32xf32> to vector<8x1x32xf32>
    tpu.vector_store %arg16[%c0_64, %c4, %c32_65], %206 {strides = array<i32>} : memref<8x8x64xf32, #tpu.memory_space<vmem>>, vector<8x1x32xf32>,
    %c0_66 = arith.constant 0 : index
    %c4_67 = arith.constant 4 : index
    %c0_68 = arith.constant 0 : index
    %207 = vector.load %arg14[%c0_66, %c4_67, %c0_68] : memref<8x8x256xf32, #tpu.memory_space<vmem>>, vector<8x1x256xf32>
    %208 = vector.shape_cast %207 : vector<8x1x256xf32> to vector<8x256xf32>
    %cst_69 = arith.constant dense<0.000000e+00> : vector<8x256xf32>
    %209 = tpu.matmul %186, %9, %cst_69 {dimension_numbers = #tpu.dot_dimension_numbers<[1], [0], [0], [1], [0, 0, 1, 1], [], []>} : vector<8x64xf32>, vector<64x256xf32>, vector<8x256xf32> -> vector<8x256xf32>
    %210 = arith.addf %208, %209 : vector<8x256xf32>
    %211 = vector.extract_strided_slice %210 {offsets = [0, 0], sizes = [8, 192], strides = [1, 1]} : vector<8x256xf32> to vector<8x192xf32>
    %212 = arith.negf %211 : vector<8x192xf32>
    %213 = math.exp %212 : vector<8x192xf32>
    %cst_70 = arith.constant 1.000000e+00 : f32
    %214 = vector.broadcast %cst_70 : f32 to vector<8x192xf32>
    %215 = arith.addf %214, %213 : vector<8x192xf32>
    %216 = arith.divf %214, %215 : vector<8x192xf32>
    %217 = vector.extract_strided_slice %210 {offsets = [0, 192], sizes = [8, 64], strides = [1, 1]} : vector<8x256xf32> to vector<8x64xf32>
    %218 = math.tanh %217 : vector<8x64xf32>
    %219 = vector.extract_strided_slice %216 {offsets = [0, 0], sizes = [8, 64], strides = [1, 1]} : vector<8x192xf32> to vector<8x64xf32>
    %220 = vector.extract_strided_slice %216 {offsets = [0, 64], sizes = [8, 64], strides = [1, 1]} : vector<8x192xf32> to vector<8x64xf32>
    %221 = vector.extract_strided_slice %216 {offsets = [0, 128], sizes = [8, 64], strides = [1, 1]} : vector<8x192xf32> to vector<8x64xf32>
    %222 = arith.mulf %220, %185 : vector<8x64xf32>
    %223 = arith.mulf %219, %218 : vector<8x64xf32>
    %224 = arith.addf %222, %223 : vector<8x64xf32>
    %225 = math.tanh %224 : vector<8x64xf32>
    %226 = arith.mulf %221, %225 : vector<8x64xf32>
    %c4_i32_71 = arith.constant 4 : i32
    %c3_i32_72 = arith.constant 3 : i32
    %227 = vector.broadcast %c4_i32_71 : i32 to vector<1x64xi32>
    %228 = vector.broadcast %c3_i32_72 : i32 to vector<1x64xi32>
    %229 = arith.select %12, %227, %228 : vector<1x64xi1>, vector<1x64xi32>
    %230 = vector.broadcast %0 : vector<8x1xi32> to vector<8x64xi32>
    %231 = vector.broadcast %229 : vector<1x64xi32> to vector<8x64xi32>
    %232 = arith.cmpi sgt, %230, %231 : vector<8x64xi32>
    %233 = arith.select %232, %224, %185 : vector<8x64xi1>, vector<8x64xf32>
    %234 = arith.select %232, %226, %186 : vector<8x64xi1>, vector<8x64xf32>
    %c4_i32_73 = arith.constant 4 : i32
    %235 = vector.broadcast %c4_i32_73 : i32 to vector<8x1xi32>
    %236 = arith.cmpi sgt, %0, %235 : vector<8x1xi32>
    %237 = vector.extract_strided_slice %226 {offsets = [0, 0], sizes = [8, 32], strides = [1, 1]} : vector<8x64xf32> to vector<8x32xf32>
    %cst_74 = arith.constant 0.000000e+00 : f32
    %238 = vector.shape_cast %236 : vector<8x1xi1> to vector<8x1xi1>
    %239 = vector.broadcast %238 : vector<8x1xi1> to vector<8x32xi1>
    %240 = vector.broadcast %cst_74 : f32 to vector<8x32xf32>
    %241 = arith.select %239, %237, %240 : vector<8x32xi1>, vector<8x32xf32>
    %c0_75 = arith.constant 0 : index
    %c4_76 = arith.constant 4 : index
    %c0_77 = arith.constant 0 : index
    %242 = vector.load %arg16[%c0_75, %c4_76, %c0_77] : memref<8x8x64xf32, #tpu.memory_space<vmem>>, vector<8x1x32xf32>
    %243 = vector.shape_cast %242 : vector<8x1x32xf32> to vector<8x32xf32>
    %244 = vector.shape_cast %241 : vector<8x32xf32> to vector<8x1x32xf32>
    tpu.vector_store %arg16[%c0_75, %c4_76, %c0_77], %244 {strides = array<i32>} : memref<8x8x64xf32, #tpu.memory_space<vmem>>, vector<8x1x32xf32>,
    %c3_i32_78 = arith.constant 3 : i32
    %245 = vector.broadcast %c3_i32_78 : i32 to vector<8x1xi32>
    %246 = arith.cmpi sgt, %0, %245 : vector<8x1xi32>
    %247 = vector.extract_strided_slice %226 {offsets = [0, 32], sizes = [8, 32], strides = [1, 1]} : vector<8x64xf32> to vector<8x32xf32>
    %cst_79 = arith.constant 0.000000e+00 : f32
    %248 = vector.shape_cast %246 : vector<8x1xi1> to vector<8x1xi1>
    %249 = vector.broadcast %248 : vector<8x1xi1> to vector<8x32xi1>
    %250 = vector.broadcast %cst_79 : f32 to vector<8x32xf32>
    %251 = arith.select %249, %247, %250 : vector<8x32xi1>, vector<8x32xf32>
    %c0_80 = arith.constant 0 : index
    %c3_81 = arith.constant 3 : index
    %c32_82 = arith.constant 32 : index
    %252 = vector.load %arg16[%c0_80, %c3_81, %c32_82] : memref<8x8x64xf32, #tpu.memory_space<vmem>>, vector<8x1x32xf32>
    %253 = vector.shape_cast %252 : vector<8x1x32xf32> to vector<8x32xf32>
    %254 = vector.shape_cast %251 : vector<8x32xf32> to vector<8x1x32xf32>
    tpu.vector_store %arg16[%c0_80, %c3_81, %c32_82], %254 {strides = array<i32>} : memref<8x8x64xf32, #tpu.memory_space<vmem>>, vector<8x1x32xf32>,
    %c0_83 = arith.constant 0 : index
    %c5_84 = arith.constant 5 : index
    %c0_85 = arith.constant 0 : index
    %255 = vector.load %arg14[%c0_83, %c5_84, %c0_85] : memref<8x8x256xf32, #tpu.memory_space<vmem>>, vector<8x1x256xf32>
    %256 = vector.shape_cast %255 : vector<8x1x256xf32> to vector<8x256xf32>
    %cst_86 = arith.constant dense<0.000000e+00> : vector<8x256xf32>
    %257 = tpu.matmul %234, %9, %cst_86 {dimension_numbers = #tpu.dot_dimension_numbers<[1], [0], [0], [1], [0, 0, 1, 1], [], []>} : vector<8x64xf32>, vector<64x256xf32>, vector<8x256xf32> -> vector<8x256xf32>
    %258 = arith.addf %256, %257 : vector<8x256xf32>
    %259 = vector.extract_strided_slice %258 {offsets = [0, 0], sizes = [8, 192], strides = [1, 1]} : vector<8x256xf32> to vector<8x192xf32>
    %260 = arith.negf %259 : vector<8x192xf32>
    %261 = math.exp %260 : vector<8x192xf32>
    %cst_87 = arith.constant 1.000000e+00 : f32
    %262 = vector.broadcast %cst_87 : f32 to vector<8x192xf32>
    %263 = arith.addf %262, %261 : vector<8x192xf32>
    %264 = arith.divf %262, %263 : vector<8x192xf32>
    %265 = vector.extract_strided_slice %258 {offsets = [0, 192], sizes = [8, 64], strides = [1, 1]} : vector<8x256xf32> to vector<8x64xf32>
    %266 = math.tanh %265 : vector<8x64xf32>
    %267 = vector.extract_strided_slice %264 {offsets = [0, 0], sizes = [8, 64], strides = [1, 1]} : vector<8x192xf32> to vector<8x64xf32>
    %268 = vector.extract_strided_slice %264 {offsets = [0, 64], sizes = [8, 64], strides = [1, 1]} : vector<8x192xf32> to vector<8x64xf32>
    %269 = vector.extract_strided_slice %264 {offsets = [0, 128], sizes = [8, 64], strides = [1, 1]} : vector<8x192xf32> to vector<8x64xf32>
    %270 = arith.mulf %268, %233 : vector<8x64xf32>
    %271 = arith.mulf %267, %266 : vector<8x64xf32>
    %272 = arith.addf %270, %271 : vector<8x64xf32>
    %273 = math.tanh %272 : vector<8x64xf32>
    %274 = arith.mulf %269, %273 : vector<8x64xf32>
    %c5_i32_88 = arith.constant 5 : i32
    %c2_i32_89 = arith.constant 2 : i32
    %275 = vector.broadcast %c5_i32_88 : i32 to vector<1x64xi32>
    %276 = vector.broadcast %c2_i32_89 : i32 to vector<1x64xi32>
    %277 = arith.select %12, %275, %276 : vector<1x64xi1>, vector<1x64xi32>
    %278 = vector.broadcast %0 : vector<8x1xi32> to vector<8x64xi32>
    %279 = vector.broadcast %277 : vector<1x64xi32> to vector<8x64xi32>
    %280 = arith.cmpi sgt, %278, %279 : vector<8x64xi32>
    %281 = arith.select %280, %272, %233 : vector<8x64xi1>, vector<8x64xf32>
    %282 = arith.select %280, %274, %234 : vector<8x64xi1>, vector<8x64xf32>
    %c5_i32_90 = arith.constant 5 : i32
    %283 = vector.broadcast %c5_i32_90 : i32 to vector<8x1xi32>
    %284 = arith.cmpi sgt, %0, %283 : vector<8x1xi32>
    %285 = vector.extract_strided_slice %274 {offsets = [0, 0], sizes = [8, 32], strides = [1, 1]} : vector<8x64xf32> to vector<8x32xf32>
    %cst_91 = arith.constant 0.000000e+00 : f32
    %286 = vector.shape_cast %284 : vector<8x1xi1> to vector<8x1xi1>
    %287 = vector.broadcast %286 : vector<8x1xi1> to vector<8x32xi1>
    %288 = vector.broadcast %cst_91 : f32 to vector<8x32xf32>
    %289 = arith.select %287, %285, %288 : vector<8x32xi1>, vector<8x32xf32>
    %c0_92 = arith.constant 0 : index
    %c5_93 = arith.constant 5 : index
    %c0_94 = arith.constant 0 : index
    %290 = vector.load %arg16[%c0_92, %c5_93, %c0_94] : memref<8x8x64xf32, #tpu.memory_space<vmem>>, vector<8x1x32xf32>
    %291 = vector.shape_cast %290 : vector<8x1x32xf32> to vector<8x32xf32>
    %292 = vector.shape_cast %289 : vector<8x32xf32> to vector<8x1x32xf32>
    tpu.vector_store %arg16[%c0_92, %c5_93, %c0_94], %292 {strides = array<i32>} : memref<8x8x64xf32, #tpu.memory_space<vmem>>, vector<8x1x32xf32>,
    %c2_i32_95 = arith.constant 2 : i32
    %293 = vector.broadcast %c2_i32_95 : i32 to vector<8x1xi32>
    %294 = arith.cmpi sgt, %0, %293 : vector<8x1xi32>
    %295 = vector.extract_strided_slice %274 {offsets = [0, 32], sizes = [8, 32], strides = [1, 1]} : vector<8x64xf32> to vector<8x32xf32>
    %cst_96 = arith.constant 0.000000e+00 : f32
    %296 = vector.shape_cast %294 : vector<8x1xi1> to vector<8x1xi1>
    %297 = vector.broadcast %296 : vector<8x1xi1> to vector<8x32xi1>
    %298 = vector.broadcast %cst_96 : f32 to vector<8x32xf32>
    %299 = arith.select %297, %295, %298 : vector<8x32xi1>, vector<8x32xf32>
    %c0_97 = arith.constant 0 : index
    %c2_98 = arith.constant 2 : index
    %c32_99 = arith.constant 32 : index
    %300 = vector.load %arg16[%c0_97, %c2_98, %c32_99] : memref<8x8x64xf32, #tpu.memory_space<vmem>>, vector<8x1x32xf32>
    %301 = vector.shape_cast %300 : vector<8x1x32xf32> to vector<8x32xf32>
    %302 = vector.shape_cast %299 : vector<8x32xf32> to vector<8x1x32xf32>
    tpu.vector_store %arg16[%c0_97, %c2_98, %c32_99], %302 {strides = array<i32>} : memref<8x8x64xf32, #tpu.memory_space<vmem>>, vector<8x1x32xf32>,
    %c0_100 = arith.constant 0 : index
    %c6_101 = arith.constant 6 : index
    %c0_102 = arith.constant 0 : index
    %303 = vector.load %arg14[%c0_100, %c6_101, %c0_102] : memref<8x8x256xf32, #tpu.memory_space<vmem>>, vector<8x1x256xf32>
    %304 = vector.shape_cast %303 : vector<8x1x256xf32> to vector<8x256xf32>
    %cst_103 = arith.constant dense<0.000000e+00> : vector<8x256xf32>
    %305 = tpu.matmul %282, %9, %cst_103 {dimension_numbers = #tpu.dot_dimension_numbers<[1], [0], [0], [1], [0, 0, 1, 1], [], []>} : vector<8x64xf32>, vector<64x256xf32>, vector<8x256xf32> -> vector<8x256xf32>
    %306 = arith.addf %304, %305 : vector<8x256xf32>
    %307 = vector.extract_strided_slice %306 {offsets = [0, 0], sizes = [8, 192], strides = [1, 1]} : vector<8x256xf32> to vector<8x192xf32>
    %308 = arith.negf %307 : vector<8x192xf32>
    %309 = math.exp %308 : vector<8x192xf32>
    %cst_104 = arith.constant 1.000000e+00 : f32
    %310 = vector.broadcast %cst_104 : f32 to vector<8x192xf32>
    %311 = arith.addf %310, %309 : vector<8x192xf32>
    %312 = arith.divf %310, %311 : vector<8x192xf32>
    %313 = vector.extract_strided_slice %306 {offsets = [0, 192], sizes = [8, 64], strides = [1, 1]} : vector<8x256xf32> to vector<8x64xf32>
    %314 = math.tanh %313 : vector<8x64xf32>
    %315 = vector.extract_strided_slice %312 {offsets = [0, 0], sizes = [8, 64], strides = [1, 1]} : vector<8x192xf32> to vector<8x64xf32>
    %316 = vector.extract_strided_slice %312 {offsets = [0, 64], sizes = [8, 64], strides = [1, 1]} : vector<8x192xf32> to vector<8x64xf32>
    %317 = vector.extract_strided_slice %312 {offsets = [0, 128], sizes = [8, 64], strides = [1, 1]} : vector<8x192xf32> to vector<8x64xf32>
    %318 = arith.mulf %316, %281 : vector<8x64xf32>
    %319 = arith.mulf %315, %314 : vector<8x64xf32>
    %320 = arith.addf %318, %319 : vector<8x64xf32>
    %321 = math.tanh %320 : vector<8x64xf32>
    %322 = arith.mulf %317, %321 : vector<8x64xf32>
    %c6_i32_105 = arith.constant 6 : i32
    %c1_i32_106 = arith.constant 1 : i32
    %323 = vector.broadcast %c6_i32_105 : i32 to vector<1x64xi32>
    %324 = vector.broadcast %c1_i32_106 : i32 to vector<1x64xi32>
    %325 = arith.select %12, %323, %324 : vector<1x64xi1>, vector<1x64xi32>
    %326 = vector.broadcast %0 : vector<8x1xi32> to vector<8x64xi32>
    %327 = vector.broadcast %325 : vector<1x64xi32> to vector<8x64xi32>
    %328 = arith.cmpi sgt, %326, %327 : vector<8x64xi32>
    %329 = arith.select %328, %320, %281 : vector<8x64xi1>, vector<8x64xf32>
    %330 = arith.select %328, %322, %282 : vector<8x64xi1>, vector<8x64xf32>
    %c6_i32_107 = arith.constant 6 : i32
    %331 = vector.broadcast %c6_i32_107 : i32 to vector<8x1xi32>
    %332 = arith.cmpi sgt, %0, %331 : vector<8x1xi32>
    %333 = vector.extract_strided_slice %322 {offsets = [0, 0], sizes = [8, 32], strides = [1, 1]} : vector<8x64xf32> to vector<8x32xf32>
    %cst_108 = arith.constant 0.000000e+00 : f32
    %334 = vector.shape_cast %332 : vector<8x1xi1> to vector<8x1xi1>
    %335 = vector.broadcast %334 : vector<8x1xi1> to vector<8x32xi1>
    %336 = vector.broadcast %cst_108 : f32 to vector<8x32xf32>
    %337 = arith.select %335, %333, %336 : vector<8x32xi1>, vector<8x32xf32>
    %c0_109 = arith.constant 0 : index
    %c6_110 = arith.constant 6 : index
    %c0_111 = arith.constant 0 : index
    %338 = vector.load %arg16[%c0_109, %c6_110, %c0_111] : memref<8x8x64xf32, #tpu.memory_space<vmem>>, vector<8x1x32xf32>
    %339 = vector.shape_cast %338 : vector<8x1x32xf32> to vector<8x32xf32>
    %340 = vector.shape_cast %337 : vector<8x32xf32> to vector<8x1x32xf32>
    tpu.vector_store %arg16[%c0_109, %c6_110, %c0_111], %340 {strides = array<i32>} : memref<8x8x64xf32, #tpu.memory_space<vmem>>, vector<8x1x32xf32>,
    %c1_i32_112 = arith.constant 1 : i32
    %341 = vector.broadcast %c1_i32_112 : i32 to vector<8x1xi32>
    %342 = arith.cmpi sgt, %0, %341 : vector<8x1xi32>
    %343 = vector.extract_strided_slice %322 {offsets = [0, 32], sizes = [8, 32], strides = [1, 1]} : vector<8x64xf32> to vector<8x32xf32>
    %cst_113 = arith.constant 0.000000e+00 : f32
    %344 = vector.shape_cast %342 : vector<8x1xi1> to vector<8x1xi1>
    %345 = vector.broadcast %344 : vector<8x1xi1> to vector<8x32xi1>
    %346 = vector.broadcast %cst_113 : f32 to vector<8x32xf32>
    %347 = arith.select %345, %343, %346 : vector<8x32xi1>, vector<8x32xf32>
    %c0_114 = arith.constant 0 : index
    %c1_115 = arith.constant 1 : index
    %c32_116 = arith.constant 32 : index
    %348 = vector.load %arg16[%c0_114, %c1_115, %c32_116] : memref<8x8x64xf32, #tpu.memory_space<vmem>>, vector<8x1x32xf32>
    %349 = vector.shape_cast %348 : vector<8x1x32xf32> to vector<8x32xf32>
    %350 = vector.shape_cast %347 : vector<8x32xf32> to vector<8x1x32xf32>
    tpu.vector_store %arg16[%c0_114, %c1_115, %c32_116], %350 {strides = array<i32>} : memref<8x8x64xf32, #tpu.memory_space<vmem>>, vector<8x1x32xf32>,
    %c0_117 = arith.constant 0 : index
    %c7_118 = arith.constant 7 : index
    %c0_119 = arith.constant 0 : index
    %351 = vector.load %arg14[%c0_117, %c7_118, %c0_119] : memref<8x8x256xf32, #tpu.memory_space<vmem>>, vector<8x1x256xf32>
    %352 = vector.shape_cast %351 : vector<8x1x256xf32> to vector<8x256xf32>
    %cst_120 = arith.constant dense<0.000000e+00> : vector<8x256xf32>
    %353 = tpu.matmul %330, %9, %cst_120 {dimension_numbers = #tpu.dot_dimension_numbers<[1], [0], [0], [1], [0, 0, 1, 1], [], []>} : vector<8x64xf32>, vector<64x256xf32>, vector<8x256xf32> -> vector<8x256xf32>
    %354 = arith.addf %352, %353 : vector<8x256xf32>
    %355 = vector.extract_strided_slice %354 {offsets = [0, 0], sizes = [8, 192], strides = [1, 1]} : vector<8x256xf32> to vector<8x192xf32>
    %356 = arith.negf %355 : vector<8x192xf32>
    %357 = math.exp %356 : vector<8x192xf32>
    %cst_121 = arith.constant 1.000000e+00 : f32
    %358 = vector.broadcast %cst_121 : f32 to vector<8x192xf32>
    %359 = arith.addf %358, %357 : vector<8x192xf32>
    %360 = arith.divf %358, %359 : vector<8x192xf32>
    %361 = vector.extract_strided_slice %354 {offsets = [0, 192], sizes = [8, 64], strides = [1, 1]} : vector<8x256xf32> to vector<8x64xf32>
    %362 = math.tanh %361 : vector<8x64xf32>
    %363 = vector.extract_strided_slice %360 {offsets = [0, 0], sizes = [8, 64], strides = [1, 1]} : vector<8x192xf32> to vector<8x64xf32>
    %364 = vector.extract_strided_slice %360 {offsets = [0, 64], sizes = [8, 64], strides = [1, 1]} : vector<8x192xf32> to vector<8x64xf32>
    %365 = vector.extract_strided_slice %360 {offsets = [0, 128], sizes = [8, 64], strides = [1, 1]} : vector<8x192xf32> to vector<8x64xf32>
    %366 = arith.mulf %364, %329 : vector<8x64xf32>
    %367 = arith.mulf %363, %362 : vector<8x64xf32>
    %368 = arith.addf %366, %367 : vector<8x64xf32>
    %369 = math.tanh %368 : vector<8x64xf32>
    %370 = arith.mulf %365, %369 : vector<8x64xf32>
    %c7_i32_122 = arith.constant 7 : i32
    %371 = vector.broadcast %c7_i32_122 : i32 to vector<8x1xi32>
    %372 = arith.cmpi sgt, %0, %371 : vector<8x1xi32>
    %373 = vector.extract_strided_slice %370 {offsets = [0, 0], sizes = [8, 32], strides = [1, 1]} : vector<8x64xf32> to vector<8x32xf32>
    %cst_123 = arith.constant 0.000000e+00 : f32
    %374 = vector.shape_cast %372 : vector<8x1xi1> to vector<8x1xi1>
    %375 = vector.broadcast %374 : vector<8x1xi1> to vector<8x32xi1>
    %376 = vector.broadcast %cst_123 : f32 to vector<8x32xf32>
    %377 = arith.select %375, %373, %376 : vector<8x32xi1>, vector<8x32xf32>
    %c0_124 = arith.constant 0 : index
    %c7_125 = arith.constant 7 : index
    %c0_126 = arith.constant 0 : index
    %378 = vector.load %arg16[%c0_124, %c7_125, %c0_126] : memref<8x8x64xf32, #tpu.memory_space<vmem>>, vector<8x1x32xf32>
    %379 = vector.shape_cast %378 : vector<8x1x32xf32> to vector<8x32xf32>
    %380 = vector.shape_cast %377 : vector<8x32xf32> to vector<8x1x32xf32>
    tpu.vector_store %arg16[%c0_124, %c7_125, %c0_126], %380 {strides = array<i32>} : memref<8x8x64xf32, #tpu.memory_space<vmem>>, vector<8x1x32xf32>,
    %c0_i32_127 = arith.constant 0 : i32
    %381 = vector.broadcast %c0_i32_127 : i32 to vector<8x1xi32>
    %382 = arith.cmpi sgt, %0, %381 : vector<8x1xi32>
    %383 = vector.extract_strided_slice %370 {offsets = [0, 32], sizes = [8, 32], strides = [1, 1]} : vector<8x64xf32> to vector<8x32xf32>
    %cst_128 = arith.constant 0.000000e+00 : f32
    %384 = vector.shape_cast %382 : vector<8x1xi1> to vector<8x1xi1>
    %385 = vector.broadcast %384 : vector<8x1xi1> to vector<8x32xi1>
    %386 = vector.broadcast %cst_128 : f32 to vector<8x32xf32>
    %387 = arith.select %385, %383, %386 : vector<8x32xi1>, vector<8x32xf32>
    %c0_129 = arith.constant 0 : index
    %c0_130 = arith.constant 0 : index
    %c32_131 = arith.constant 32 : index
    %388 = vector.load %arg16[%c0_129, %c0_130, %c32_131] : memref<8x8x64xf32, #tpu.memory_space<vmem>>, vector<8x1x32xf32>
    %389 = vector.shape_cast %388 : vector<8x1x32xf32> to vector<8x32xf32>
    %390 = vector.shape_cast %387 : vector<8x32xf32> to vector<8x1x32xf32>
    tpu.vector_store %arg16[%c0_129, %c0_130, %c32_131], %390 {strides = array<i32>} : memref<8x8x64xf32, #tpu.memory_space<vmem>>, vector<8x1x32xf32>,
    %c0_132 = arith.constant 0 : index
    %c0_133 = arith.constant 0 : index
    %391 = vector.load %arg4[%c0_132, %c0_133] : memref<8x1xi32, #tpu.memory_space<vmem>>, vector<8x1xi32>
    %c0_134 = arith.constant 0 : index
    %c0_135 = arith.constant 0 : index
    %392 = vector.load %arg2[%c0_134, %c0_135] : memref<32x64xbf16, #tpu.memory_space<vmem>>, vector<32x64xbf16>
    %c0_136 = arith.constant 0 : index
    %c0_137 = arith.constant 0 : index
    %393 = vector.load %arg8[%c0_136, %c0_137] : memref<64x256xbf16, #tpu.memory_space<vmem>>, vector<64x256xbf16>
    %cst_138 = arith.constant dense<0.000000e+00> : vector<32x256xf32>
    %394 = tpu.matmul %392, %393, %cst_138 {dimension_numbers = #tpu.dot_dimension_numbers<[1], [0], [0], [1], [0, 0, 1, 1], [], []>} : vector<32x64xbf16>, vector<64x256xbf16>, vector<32x256xf32> -> vector<32x256xf32>
    %c0_139 = arith.constant 0 : index
    %c0_140 = arith.constant 0 : index
    %395 = vector.load %arg10[%c0_139, %c0_140] : memref<1x256xf32, #tpu.memory_space<vmem>>, vector<1x256xf32>
    %396 = vector.broadcast %395 : vector<1x256xf32> to vector<32x256xf32>
    %397 = arith.addf %394, %396 : vector<32x256xf32>
    %398 = vector.shape_cast %397 : vector<32x256xf32> to vector<8x4x256xf32>
    %c0_141 = arith.constant 0 : index
    %c0_142 = arith.constant 0 : index
    %c0_143 = arith.constant 0 : index
    %399 = vector.load %arg15[%c0_141, %c0_142, %c0_143] : memref<8x4x256xf32, #tpu.memory_space<vmem>>, vector<8x4x256xf32>
    tpu.vector_store %arg15[%c0_141, %c0_142, %c0_143], %398 {strides = array<i32>} : memref<8x4x256xf32, #tpu.memory_space<vmem>>, vector<8x4x256xf32>,
    %c0_144 = arith.constant 0 : index
    %c0_145 = arith.constant 0 : index
    %400 = vector.load %arg9[%c0_144, %c0_145] : memref<64x256xf32, #tpu.memory_space<vmem>>, vector<64x256xf32>
    %401 = tpu.iota {dimensions = array<i32: 1>} : vector<1x64xi32>
    %c32_i32_146 = arith.constant 32 : i32
    %402 = vector.broadcast %c32_i32_146 : i32 to vector<1x64xi32>
    %403 = arith.cmpi slt, %401, %402 : vector<1x64xi32>
    %cst_147 = arith.constant 0.000000e+00 : f32
    %404 = vector.broadcast %cst_147 : f32 to vector<8x64xf32>
    %cst_148 = arith.constant 0.000000e+00 : f32
    %405 = vector.broadcast %cst_148 : f32 to vector<8x64xf32>
    %c0_149 = arith.constant 0 : index
    %c0_150 = arith.constant 0 : index
    %c0_151 = arith.constant 0 : index
    %406 = vector.load %arg15[%c0_149, %c0_150, %c0_151] : memref<8x4x256xf32, #tpu.memory_space<vmem>>, vector<8x1x256xf32>
    %407 = vector.shape_cast %406 : vector<8x1x256xf32> to vector<8x256xf32>
    %cst_152 = arith.constant dense<0.000000e+00> : vector<8x256xf32>
    %408 = tpu.matmul %404, %400, %cst_152 {dimension_numbers = #tpu.dot_dimension_numbers<[1], [0], [0], [1], [0, 0, 1, 1], [], []>} : vector<8x64xf32>, vector<64x256xf32>, vector<8x256xf32> -> vector<8x256xf32>
    %409 = arith.addf %407, %408 : vector<8x256xf32>
    %410 = vector.extract_strided_slice %409 {offsets = [0, 0], sizes = [8, 192], strides = [1, 1]} : vector<8x256xf32> to vector<8x192xf32>
    %411 = arith.negf %410 : vector<8x192xf32>
    %412 = math.exp %411 : vector<8x192xf32>
    %cst_153 = arith.constant 1.000000e+00 : f32
    %413 = vector.broadcast %cst_153 : f32 to vector<8x192xf32>
    %414 = arith.addf %413, %412 : vector<8x192xf32>
    %415 = arith.divf %413, %414 : vector<8x192xf32>
    %416 = vector.extract_strided_slice %409 {offsets = [0, 192], sizes = [8, 64], strides = [1, 1]} : vector<8x256xf32> to vector<8x64xf32>
    %417 = math.tanh %416 : vector<8x64xf32>
    %418 = vector.extract_strided_slice %415 {offsets = [0, 0], sizes = [8, 64], strides = [1, 1]} : vector<8x192xf32> to vector<8x64xf32>
    %419 = vector.extract_strided_slice %415 {offsets = [0, 64], sizes = [8, 64], strides = [1, 1]} : vector<8x192xf32> to vector<8x64xf32>
    %420 = vector.extract_strided_slice %415 {offsets = [0, 128], sizes = [8, 64], strides = [1, 1]} : vector<8x192xf32> to vector<8x64xf32>
    %421 = arith.mulf %419, %405 : vector<8x64xf32>
    %422 = arith.mulf %418, %417 : vector<8x64xf32>
    %423 = arith.addf %421, %422 : vector<8x64xf32>
    %424 = math.tanh %423 : vector<8x64xf32>
    %425 = arith.mulf %420, %424 : vector<8x64xf32>
    %c0_i32_154 = arith.constant 0 : i32
    %c3_i32_155 = arith.constant 3 : i32
    %426 = vector.broadcast %c0_i32_154 : i32 to vector<1x64xi32>
    %427 = vector.broadcast %c3_i32_155 : i32 to vector<1x64xi32>
    %428 = arith.select %403, %426, %427 : vector<1x64xi1>, vector<1x64xi32>
    %429 = vector.broadcast %391 : vector<8x1xi32> to vector<8x64xi32>
    %430 = vector.broadcast %428 : vector<1x64xi32> to vector<8x64xi32>
    %431 = arith.cmpi sgt, %429, %430 : vector<8x64xi32>
    %432 = arith.select %431, %423, %405 : vector<8x64xi1>, vector<8x64xf32>
    %433 = arith.select %431, %425, %404 : vector<8x64xi1>, vector<8x64xf32>
    %c0_i32_156 = arith.constant 0 : i32
    %434 = vector.broadcast %c0_i32_156 : i32 to vector<8x1xi32>
    %435 = arith.cmpi sgt, %391, %434 : vector<8x1xi32>
    %436 = vector.extract_strided_slice %425 {offsets = [0, 0], sizes = [8, 32], strides = [1, 1]} : vector<8x64xf32> to vector<8x32xf32>
    %cst_157 = arith.constant 0.000000e+00 : f32
    %437 = vector.shape_cast %435 : vector<8x1xi1> to vector<8x1xi1>
    %438 = vector.broadcast %437 : vector<8x1xi1> to vector<8x32xi1>
    %439 = vector.broadcast %cst_157 : f32 to vector<8x32xf32>
    %440 = arith.select %438, %436, %439 : vector<8x32xi1>, vector<8x32xf32>
    %c0_158 = arith.constant 0 : index
    %c0_159 = arith.constant 0 : index
    %c0_160 = arith.constant 0 : index
    %441 = vector.load %arg17[%c0_158, %c0_159, %c0_160] : memref<8x4x64xf32, #tpu.memory_space<vmem>>, vector<8x1x32xf32>
    %442 = vector.shape_cast %441 : vector<8x1x32xf32> to vector<8x32xf32>
    %443 = vector.shape_cast %440 : vector<8x32xf32> to vector<8x1x32xf32>
    tpu.vector_store %arg17[%c0_158, %c0_159, %c0_160], %443 {strides = array<i32>} : memref<8x4x64xf32, #tpu.memory_space<vmem>>, vector<8x1x32xf32>,
    %c3_i32_161 = arith.constant 3 : i32
    %444 = vector.broadcast %c3_i32_161 : i32 to vector<8x1xi32>
    %445 = arith.cmpi sgt, %391, %444 : vector<8x1xi32>
    %446 = vector.extract_strided_slice %425 {offsets = [0, 32], sizes = [8, 32], strides = [1, 1]} : vector<8x64xf32> to vector<8x32xf32>
    %cst_162 = arith.constant 0.000000e+00 : f32
    %447 = vector.shape_cast %445 : vector<8x1xi1> to vector<8x1xi1>
    %448 = vector.broadcast %447 : vector<8x1xi1> to vector<8x32xi1>
    %449 = vector.broadcast %cst_162 : f32 to vector<8x32xf32>
    %450 = arith.select %448, %446, %449 : vector<8x32xi1>, vector<8x32xf32>
    %c0_163 = arith.constant 0 : index
    %c3_164 = arith.constant 3 : index
    %c32_165 = arith.constant 32 : index
    %451 = vector.load %arg17[%c0_163, %c3_164, %c32_165] : memref<8x4x64xf32, #tpu.memory_space<vmem>>, vector<8x1x32xf32>
    %452 = vector.shape_cast %451 : vector<8x1x32xf32> to vector<8x32xf32>
    %453 = vector.shape_cast %450 : vector<8x32xf32> to vector<8x1x32xf32>
    tpu.vector_store %arg17[%c0_163, %c3_164, %c32_165], %453 {strides = array<i32>} : memref<8x4x64xf32, #tpu.memory_space<vmem>>, vector<8x1x32xf32>,
    %c0_166 = arith.constant 0 : index
    %c1_167 = arith.constant 1 : index
    %c0_168 = arith.constant 0 : index
    %454 = vector.load %arg15[%c0_166, %c1_167, %c0_168] : memref<8x4x256xf32, #tpu.memory_space<vmem>>, vector<8x1x256xf32>
    %455 = vector.shape_cast %454 : vector<8x1x256xf32> to vector<8x256xf32>
    %cst_169 = arith.constant dense<0.000000e+00> : vector<8x256xf32>
    %456 = tpu.matmul %433, %400, %cst_169 {dimension_numbers = #tpu.dot_dimension_numbers<[1], [0], [0], [1], [0, 0, 1, 1], [], []>} : vector<8x64xf32>, vector<64x256xf32>, vector<8x256xf32> -> vector<8x256xf32>
    %457 = arith.addf %455, %456 : vector<8x256xf32>
    %458 = vector.extract_strided_slice %457 {offsets = [0, 0], sizes = [8, 192], strides = [1, 1]} : vector<8x256xf32> to vector<8x192xf32>
    %459 = arith.negf %458 : vector<8x192xf32>
    %460 = math.exp %459 : vector<8x192xf32>
    %cst_170 = arith.constant 1.000000e+00 : f32
    %461 = vector.broadcast %cst_170 : f32 to vector<8x192xf32>
    %462 = arith.addf %461, %460 : vector<8x192xf32>
    %463 = arith.divf %461, %462 : vector<8x192xf32>
    %464 = vector.extract_strided_slice %457 {offsets = [0, 192], sizes = [8, 64], strides = [1, 1]} : vector<8x256xf32> to vector<8x64xf32>
    %465 = math.tanh %464 : vector<8x64xf32>
    %466 = vector.extract_strided_slice %463 {offsets = [0, 0], sizes = [8, 64], strides = [1, 1]} : vector<8x192xf32> to vector<8x64xf32>
    %467 = vector.extract_strided_slice %463 {offsets = [0, 64], sizes = [8, 64], strides = [1, 1]} : vector<8x192xf32> to vector<8x64xf32>
    %468 = vector.extract_strided_slice %463 {offsets = [0, 128], sizes = [8, 64], strides = [1, 1]} : vector<8x192xf32> to vector<8x64xf32>
    %469 = arith.mulf %467, %432 : vector<8x64xf32>
    %470 = arith.mulf %466, %465 : vector<8x64xf32>
    %471 = arith.addf %469, %470 : vector<8x64xf32>
    %472 = math.tanh %471 : vector<8x64xf32>
    %473 = arith.mulf %468, %472 : vector<8x64xf32>
    %c1_i32_171 = arith.constant 1 : i32
    %c2_i32_172 = arith.constant 2 : i32
    %474 = vector.broadcast %c1_i32_171 : i32 to vector<1x64xi32>
    %475 = vector.broadcast %c2_i32_172 : i32 to vector<1x64xi32>
    %476 = arith.select %403, %474, %475 : vector<1x64xi1>, vector<1x64xi32>
    %477 = vector.broadcast %391 : vector<8x1xi32> to vector<8x64xi32>
    %478 = vector.broadcast %476 : vector<1x64xi32> to vector<8x64xi32>
    %479 = arith.cmpi sgt, %477, %478 : vector<8x64xi32>
    %480 = arith.select %479, %471, %432 : vector<8x64xi1>, vector<8x64xf32>
    %481 = arith.select %479, %473, %433 : vector<8x64xi1>, vector<8x64xf32>
    %c1_i32_173 = arith.constant 1 : i32
    %482 = vector.broadcast %c1_i32_173 : i32 to vector<8x1xi32>
    %483 = arith.cmpi sgt, %391, %482 : vector<8x1xi32>
    %484 = vector.extract_strided_slice %473 {offsets = [0, 0], sizes = [8, 32], strides = [1, 1]} : vector<8x64xf32> to vector<8x32xf32>
    %cst_174 = arith.constant 0.000000e+00 : f32
    %485 = vector.shape_cast %483 : vector<8x1xi1> to vector<8x1xi1>
    %486 = vector.broadcast %485 : vector<8x1xi1> to vector<8x32xi1>
    %487 = vector.broadcast %cst_174 : f32 to vector<8x32xf32>
    %488 = arith.select %486, %484, %487 : vector<8x32xi1>, vector<8x32xf32>
    %c0_175 = arith.constant 0 : index
    %c1_176 = arith.constant 1 : index
    %c0_177 = arith.constant 0 : index
    %489 = vector.load %arg17[%c0_175, %c1_176, %c0_177] : memref<8x4x64xf32, #tpu.memory_space<vmem>>, vector<8x1x32xf32>
    %490 = vector.shape_cast %489 : vector<8x1x32xf32> to vector<8x32xf32>
    %491 = vector.shape_cast %488 : vector<8x32xf32> to vector<8x1x32xf32>
    tpu.vector_store %arg17[%c0_175, %c1_176, %c0_177], %491 {strides = array<i32>} : memref<8x4x64xf32, #tpu.memory_space<vmem>>, vector<8x1x32xf32>,
    %c2_i32_178 = arith.constant 2 : i32
    %492 = vector.broadcast %c2_i32_178 : i32 to vector<8x1xi32>
    %493 = arith.cmpi sgt, %391, %492 : vector<8x1xi32>
    %494 = vector.extract_strided_slice %473 {offsets = [0, 32], sizes = [8, 32], strides = [1, 1]} : vector<8x64xf32> to vector<8x32xf32>
    %cst_179 = arith.constant 0.000000e+00 : f32
    %495 = vector.shape_cast %493 : vector<8x1xi1> to vector<8x1xi1>
    %496 = vector.broadcast %495 : vector<8x1xi1> to vector<8x32xi1>
    %497 = vector.broadcast %cst_179 : f32 to vector<8x32xf32>
    %498 = arith.select %496, %494, %497 : vector<8x32xi1>, vector<8x32xf32>
    %c0_180 = arith.constant 0 : index
    %c2_181 = arith.constant 2 : index
    %c32_182 = arith.constant 32 : index
    %499 = vector.load %arg17[%c0_180, %c2_181, %c32_182] : memref<8x4x64xf32, #tpu.memory_space<vmem>>, vector<8x1x32xf32>
    %500 = vector.shape_cast %499 : vector<8x1x32xf32> to vector<8x32xf32>
    %501 = vector.shape_cast %498 : vector<8x32xf32> to vector<8x1x32xf32>
    tpu.vector_store %arg17[%c0_180, %c2_181, %c32_182], %501 {strides = array<i32>} : memref<8x4x64xf32, #tpu.memory_space<vmem>>, vector<8x1x32xf32>,
    %c0_183 = arith.constant 0 : index
    %c2_184 = arith.constant 2 : index
    %c0_185 = arith.constant 0 : index
    %502 = vector.load %arg15[%c0_183, %c2_184, %c0_185] : memref<8x4x256xf32, #tpu.memory_space<vmem>>, vector<8x1x256xf32>
    %503 = vector.shape_cast %502 : vector<8x1x256xf32> to vector<8x256xf32>
    %cst_186 = arith.constant dense<0.000000e+00> : vector<8x256xf32>
    %504 = tpu.matmul %481, %400, %cst_186 {dimension_numbers = #tpu.dot_dimension_numbers<[1], [0], [0], [1], [0, 0, 1, 1], [], []>} : vector<8x64xf32>, vector<64x256xf32>, vector<8x256xf32> -> vector<8x256xf32>
    %505 = arith.addf %503, %504 : vector<8x256xf32>
    %506 = vector.extract_strided_slice %505 {offsets = [0, 0], sizes = [8, 192], strides = [1, 1]} : vector<8x256xf32> to vector<8x192xf32>
    %507 = arith.negf %506 : vector<8x192xf32>
    %508 = math.exp %507 : vector<8x192xf32>
    %cst_187 = arith.constant 1.000000e+00 : f32
    %509 = vector.broadcast %cst_187 : f32 to vector<8x192xf32>
    %510 = arith.addf %509, %508 : vector<8x192xf32>
    %511 = arith.divf %509, %510 : vector<8x192xf32>
    %512 = vector.extract_strided_slice %505 {offsets = [0, 192], sizes = [8, 64], strides = [1, 1]} : vector<8x256xf32> to vector<8x64xf32>
    %513 = math.tanh %512 : vector<8x64xf32>
    %514 = vector.extract_strided_slice %511 {offsets = [0, 0], sizes = [8, 64], strides = [1, 1]} : vector<8x192xf32> to vector<8x64xf32>
    %515 = vector.extract_strided_slice %511 {offsets = [0, 64], sizes = [8, 64], strides = [1, 1]} : vector<8x192xf32> to vector<8x64xf32>
    %516 = vector.extract_strided_slice %511 {offsets = [0, 128], sizes = [8, 64], strides = [1, 1]} : vector<8x192xf32> to vector<8x64xf32>
    %517 = arith.mulf %515, %480 : vector<8x64xf32>
    %518 = arith.mulf %514, %513 : vector<8x64xf32>
    %519 = arith.addf %517, %518 : vector<8x64xf32>
    %520 = math.tanh %519 : vector<8x64xf32>
    %521 = arith.mulf %516, %520 : vector<8x64xf32>
    %c2_i32_188 = arith.constant 2 : i32
    %c1_i32_189 = arith.constant 1 : i32
    %522 = vector.broadcast %c2_i32_188 : i32 to vector<1x64xi32>
    %523 = vector.broadcast %c1_i32_189 : i32 to vector<1x64xi32>
    %524 = arith.select %403, %522, %523 : vector<1x64xi1>, vector<1x64xi32>
    %525 = vector.broadcast %391 : vector<8x1xi32> to vector<8x64xi32>
    %526 = vector.broadcast %524 : vector<1x64xi32> to vector<8x64xi32>
    %527 = arith.cmpi sgt, %525, %526 : vector<8x64xi32>
    %528 = arith.select %527, %519, %480 : vector<8x64xi1>, vector<8x64xf32>
    %529 = arith.select %527, %521, %481 : vector<8x64xi1>, vector<8x64xf32>
    %c2_i32_190 = arith.constant 2 : i32
    %530 = vector.broadcast %c2_i32_190 : i32 to vector<8x1xi32>
    %531 = arith.cmpi sgt, %391, %530 : vector<8x1xi32>
    %532 = vector.extract_strided_slice %521 {offsets = [0, 0], sizes = [8, 32], strides = [1, 1]} : vector<8x64xf32> to vector<8x32xf32>
    %cst_191 = arith.constant 0.000000e+00 : f32
    %533 = vector.shape_cast %531 : vector<8x1xi1> to vector<8x1xi1>
    %534 = vector.broadcast %533 : vector<8x1xi1> to vector<8x32xi1>
    %535 = vector.broadcast %cst_191 : f32 to vector<8x32xf32>
    %536 = arith.select %534, %532, %535 : vector<8x32xi1>, vector<8x32xf32>
    %c0_192 = arith.constant 0 : index
    %c2_193 = arith.constant 2 : index
    %c0_194 = arith.constant 0 : index
    %537 = vector.load %arg17[%c0_192, %c2_193, %c0_194] : memref<8x4x64xf32, #tpu.memory_space<vmem>>, vector<8x1x32xf32>
    %538 = vector.shape_cast %537 : vector<8x1x32xf32> to vector<8x32xf32>
    %539 = vector.shape_cast %536 : vector<8x32xf32> to vector<8x1x32xf32>
    tpu.vector_store %arg17[%c0_192, %c2_193, %c0_194], %539 {strides = array<i32>} : memref<8x4x64xf32, #tpu.memory_space<vmem>>, vector<8x1x32xf32>,
    %c1_i32_195 = arith.constant 1 : i32
    %540 = vector.broadcast %c1_i32_195 : i32 to vector<8x1xi32>
    %541 = arith.cmpi sgt, %391, %540 : vector<8x1xi32>
    %542 = vector.extract_strided_slice %521 {offsets = [0, 32], sizes = [8, 32], strides = [1, 1]} : vector<8x64xf32> to vector<8x32xf32>
    %cst_196 = arith.constant 0.000000e+00 : f32
    %543 = vector.shape_cast %541 : vector<8x1xi1> to vector<8x1xi1>
    %544 = vector.broadcast %543 : vector<8x1xi1> to vector<8x32xi1>
    %545 = vector.broadcast %cst_196 : f32 to vector<8x32xf32>
    %546 = arith.select %544, %542, %545 : vector<8x32xi1>, vector<8x32xf32>
    %c0_197 = arith.constant 0 : index
    %c1_198 = arith.constant 1 : index
    %c32_199 = arith.constant 32 : index
    %547 = vector.load %arg17[%c0_197, %c1_198, %c32_199] : memref<8x4x64xf32, #tpu.memory_space<vmem>>, vector<8x1x32xf32>
    %548 = vector.shape_cast %547 : vector<8x1x32xf32> to vector<8x32xf32>
    %549 = vector.shape_cast %546 : vector<8x32xf32> to vector<8x1x32xf32>
    tpu.vector_store %arg17[%c0_197, %c1_198, %c32_199], %549 {strides = array<i32>} : memref<8x4x64xf32, #tpu.memory_space<vmem>>, vector<8x1x32xf32>,
    %c0_200 = arith.constant 0 : index
    %c3_201 = arith.constant 3 : index
    %c0_202 = arith.constant 0 : index
    %550 = vector.load %arg15[%c0_200, %c3_201, %c0_202] : memref<8x4x256xf32, #tpu.memory_space<vmem>>, vector<8x1x256xf32>
    %551 = vector.shape_cast %550 : vector<8x1x256xf32> to vector<8x256xf32>
    %cst_203 = arith.constant dense<0.000000e+00> : vector<8x256xf32>
    %552 = tpu.matmul %529, %400, %cst_203 {dimension_numbers = #tpu.dot_dimension_numbers<[1], [0], [0], [1], [0, 0, 1, 1], [], []>} : vector<8x64xf32>, vector<64x256xf32>, vector<8x256xf32> -> vector<8x256xf32>
    %553 = arith.addf %551, %552 : vector<8x256xf32>
    %554 = vector.extract_strided_slice %553 {offsets = [0, 0], sizes = [8, 192], strides = [1, 1]} : vector<8x256xf32> to vector<8x192xf32>
    %555 = arith.negf %554 : vector<8x192xf32>
    %556 = math.exp %555 : vector<8x192xf32>
    %cst_204 = arith.constant 1.000000e+00 : f32
    %557 = vector.broadcast %cst_204 : f32 to vector<8x192xf32>
    %558 = arith.addf %557, %556 : vector<8x192xf32>
    %559 = arith.divf %557, %558 : vector<8x192xf32>
    %560 = vector.extract_strided_slice %553 {offsets = [0, 192], sizes = [8, 64], strides = [1, 1]} : vector<8x256xf32> to vector<8x64xf32>
    %561 = math.tanh %560 : vector<8x64xf32>
    %562 = vector.extract_strided_slice %559 {offsets = [0, 0], sizes = [8, 64], strides = [1, 1]} : vector<8x192xf32> to vector<8x64xf32>
    %563 = vector.extract_strided_slice %559 {offsets = [0, 64], sizes = [8, 64], strides = [1, 1]} : vector<8x192xf32> to vector<8x64xf32>
    %564 = vector.extract_strided_slice %559 {offsets = [0, 128], sizes = [8, 64], strides = [1, 1]} : vector<8x192xf32> to vector<8x64xf32>
    %565 = arith.mulf %563, %528 : vector<8x64xf32>
    %566 = arith.mulf %562, %561 : vector<8x64xf32>
    %567 = arith.addf %565, %566 : vector<8x64xf32>
    %568 = math.tanh %567 : vector<8x64xf32>
    %569 = arith.mulf %564, %568 : vector<8x64xf32>
    %c3_i32_205 = arith.constant 3 : i32
    %570 = vector.broadcast %c3_i32_205 : i32 to vector<8x1xi32>
    %571 = arith.cmpi sgt, %391, %570 : vector<8x1xi32>
    %572 = vector.extract_strided_slice %569 {offsets = [0, 0], sizes = [8, 32], strides = [1, 1]} : vector<8x64xf32> to vector<8x32xf32>
    %cst_206 = arith.constant 0.000000e+00 : f32
    %573 = vector.shape_cast %571 : vector<8x1xi1> to vector<8x1xi1>
    %574 = vector.broadcast %573 : vector<8x1xi1> to vector<8x32xi1>
    %575 = vector.broadcast %cst_206 : f32 to vector<8x32xf32>
    %576 = arith.select %574, %572, %575 : vector<8x32xi1>, vector<8x32xf32>
    %c0_207 = arith.constant 0 : index
    %c3_208 = arith.constant 3 : index
    %c0_209 = arith.constant 0 : index
    %577 = vector.load %arg17[%c0_207, %c3_208, %c0_209] : memref<8x4x64xf32, #tpu.memory_space<vmem>>, vector<8x1x32xf32>
    %578 = vector.shape_cast %577 : vector<8x1x32xf32> to vector<8x32xf32>
    %579 = vector.shape_cast %576 : vector<8x32xf32> to vector<8x1x32xf32>
    tpu.vector_store %arg17[%c0_207, %c3_208, %c0_209], %579 {strides = array<i32>} : memref<8x4x64xf32, #tpu.memory_space<vmem>>, vector<8x1x32xf32>,
    %c0_i32_210 = arith.constant 0 : i32
    %580 = vector.broadcast %c0_i32_210 : i32 to vector<8x1xi32>
    %581 = arith.cmpi sgt, %391, %580 : vector<8x1xi32>
    %582 = vector.extract_strided_slice %569 {offsets = [0, 32], sizes = [8, 32], strides = [1, 1]} : vector<8x64xf32> to vector<8x32xf32>
    %cst_211 = arith.constant 0.000000e+00 : f32
    %583 = vector.shape_cast %581 : vector<8x1xi1> to vector<8x1xi1>
    %584 = vector.broadcast %583 : vector<8x1xi1> to vector<8x32xi1>
    %585 = vector.broadcast %cst_211 : f32 to vector<8x32xf32>
    %586 = arith.select %584, %582, %585 : vector<8x32xi1>, vector<8x32xf32>
    %c0_212 = arith.constant 0 : index
    %c0_213 = arith.constant 0 : index
    %c32_214 = arith.constant 32 : index
    %587 = vector.load %arg17[%c0_212, %c0_213, %c32_214] : memref<8x4x64xf32, #tpu.memory_space<vmem>>, vector<8x1x32xf32>
    %588 = vector.shape_cast %587 : vector<8x1x32xf32> to vector<8x32xf32>
    %589 = vector.shape_cast %586 : vector<8x32xf32> to vector<8x1x32xf32>
    tpu.vector_store %arg17[%c0_212, %c0_213, %c32_214], %589 {strides = array<i32>} : memref<8x4x64xf32, #tpu.memory_space<vmem>>, vector<8x1x32xf32>,
    %c0_215 = arith.constant 0 : index
    %c0_216 = arith.constant 0 : index
    %c0_217 = arith.constant 0 : index
    %590 = vector.load %arg16[%c0_215, %c0_216, %c0_217] : memref<8x8x64xf32, #tpu.memory_space<vmem>>, vector<8x8x64xf32>
    %c0_218 = arith.constant 0 : index
    %c0_219 = arith.constant 0 : index
    %c0_220 = arith.constant 0 : index
    %591 = vector.load %arg17[%c0_218, %c0_219, %c0_220] : memref<8x4x64xf32, #tpu.memory_space<vmem>>, vector<8x4x64xf32>
    %cst_221 = arith.constant dense<0.000000e+00> : vector<8x64xf32>
    %592 = vector.multi_reduction <add>, %591, %cst_221 [1] : vector<8x4x64xf32> to vector<8x64xf32>
    %593 = vector.shape_cast %592 : vector<8x64xf32> to vector<8x1x64xf32>
    %594 = vector.broadcast %593 : vector<8x1x64xf32> to vector<8x8x64xf32>
    %595 = arith.mulf %590, %594 : vector<8x8x64xf32>
    %cst_222 = arith.constant dense<0.000000e+00> : vector<8x8xf32>
    %596 = vector.multi_reduction <add>, %595, %cst_222 [2] : vector<8x8x64xf32> to vector<8x8xf32>
    %597 = vector.shape_cast %596 : vector<8x8xf32> to vector<8x8x1xf32>
    %cst_223 = arith.constant dense<0xFF800000> : vector<8x1xf32>
    %598 = vector.multi_reduction <maximumf>, %597, %cst_223 [1] : vector<8x8x1xf32> to vector<8x1xf32>
    %599 = vector.shape_cast %598 : vector<8x1xf32> to vector<8x1x1xf32>
    %600 = vector.broadcast %599 : vector<8x1x1xf32> to vector<8x8x1xf32>
    %601 = arith.subf %597, %600 : vector<8x8x1xf32>
    %602 = math.exp %601 : vector<8x8x1xf32>
    %cst_224 = arith.constant dense<0.000000e+00> : vector<8x1xf32>
    %603 = vector.multi_reduction <add>, %602, %cst_224 [1] : vector<8x8x1xf32> to vector<8x1xf32>
    %604 = vector.shape_cast %603 : vector<8x1xf32> to vector<8x1x1xf32>
    %605 = vector.broadcast %604 : vector<8x1x1xf32> to vector<8x8x1xf32>
    %606 = arith.divf %602, %605 : vector<8x8x1xf32>
    %607 = vector.broadcast %606 : vector<8x8x1xf32> to vector<8x8x64xf32>
    %608 = arith.mulf %590, %607 : vector<8x8x64xf32>
    %cst_225 = arith.constant dense<0.000000e+00> : vector<8x64xf32>
    %609 = vector.multi_reduction <add>, %608, %cst_225 [1] : vector<8x8x64xf32> to vector<8x64xf32>
    %c0_226 = arith.constant 0 : index
    %c0_227 = arith.constant 0 : index
    %610 = vector.load %arg11[%c0_226, %c0_227] : memref<64x3xf32, #tpu.memory_space<vmem>>, vector<64x3xf32>
    %cst_228 = arith.constant dense<0.000000e+00> : vector<8x3xf32>
    %611 = tpu.matmul %609, %610, %cst_228 {dimension_numbers = #tpu.dot_dimension_numbers<[1], [0], [0], [1], [0, 0, 1, 1], [], []>} : vector<8x64xf32>, vector<64x3xf32>, vector<8x3xf32> -> vector<8x3xf32>
    %c0_229 = arith.constant 0 : index
    %c0_230 = arith.constant 0 : index
    %612 = vector.load %arg12[%c0_229, %c0_230] : memref<1x3xf32, #tpu.memory_space<vmem>>, vector<1x3xf32>
    %613 = vector.broadcast %612 : vector<1x3xf32> to vector<8x3xf32>
    %614 = arith.addf %611, %613 : vector<8x3xf32>
    %c0_231 = arith.constant 0 : index
    %c0_232 = arith.constant 0 : index
    %615 = vector.load %arg13[%c0_231, %c0_232] : memref<8x3xf32, #tpu.memory_space<vmem>>, vector<8x3xf32>
    tpu.vector_store %arg13[%c0_231, %c0_232], %614 {strides = array<i32>} : memref<8x3xf32, #tpu.memory_space<vmem>>, vector<8x3xf32>,
    return
  }
  func.func @transform_0(%arg0: i32) -> (i32, i32) {
    %c0_i32 = arith.constant 0 : i32
    %c0_i32_0 = arith.constant 0 : i32
    return %arg0, %c0_i32 : i32, i32
  }
  func.func @transform_1(%arg0: i32) -> (i32, i32) {
    %c0_i32 = arith.constant 0 : i32
    %c0_i32_0 = arith.constant 0 : i32
    return %arg0, %c0_i32 : i32, i32
  }
  func.func @transform_2(%arg0: i32) -> (i32, i32) {
    %c0_i32 = arith.constant 0 : i32
    %c0_i32_0 = arith.constant 0 : i32
    return %arg0, %c0_i32 : i32, i32
  }
  func.func @transform_3(%arg0: i32) -> (i32, i32) {
    %c0_i32 = arith.constant 0 : i32
    %c0_i32_0 = arith.constant 0 : i32
    return %arg0, %c0_i32 : i32, i32
  }
  func.func @transform_4(%arg0: i32) -> (i32, i32) {
    %c0_i32 = arith.constant 0 : i32
    %c0_i32_0 = arith.constant 0 : i32
    %c0_i32_1 = arith.constant 0 : i32
    return %c0_i32, %c0_i32_0 : i32, i32
  }
  func.func @transform_5(%arg0: i32) -> (i32, i32) {
    %c0_i32 = arith.constant 0 : i32
    %c0_i32_0 = arith.constant 0 : i32
    %c0_i32_1 = arith.constant 0 : i32
    return %c0_i32, %c0_i32_0 : i32, i32
  }
  func.func @transform_6(%arg0: i32) -> (i32, i32) {
    %c0_i32 = arith.constant 0 : i32
    %c0_i32_0 = arith.constant 0 : i32
    %c0_i32_1 = arith.constant 0 : i32
    return %c0_i32, %c0_i32_0 : i32, i32
  }
  func.func @transform_7(%arg0: i32) -> (i32, i32) {
    %c0_i32 = arith.constant 0 : i32
    %c0_i32_0 = arith.constant 0 : i32
    %c0_i32_1 = arith.constant 0 : i32
    return %c0_i32, %c0_i32_0 : i32, i32
  }
  func.func @transform_8(%arg0: i32) -> (i32, i32) {
    %c0_i32 = arith.constant 0 : i32
    %c0_i32_0 = arith.constant 0 : i32
    %c0_i32_1 = arith.constant 0 : i32
    return %c0_i32, %c0_i32_0 : i32, i32
  }
  func.func @transform_9(%arg0: i32) -> (i32, i32) {
    %c0_i32 = arith.constant 0 : i32
    %c0_i32_0 = arith.constant 0 : i32
    %c0_i32_1 = arith.constant 0 : i32
    return %c0_i32, %c0_i32_0 : i32, i32
  }
  func.func @transform_10(%arg0: i32) -> (i32, i32) {
    %c0_i32 = arith.constant 0 : i32
    %c0_i32_0 = arith.constant 0 : i32
    %c0_i32_1 = arith.constant 0 : i32
    return %c0_i32, %c0_i32_0 : i32, i32
  }
  func.func @transform_11(%arg0: i32) -> (i32, i32) {
    %c0_i32 = arith.constant 0 : i32
    %c0_i32_0 = arith.constant 0 : i32
    %c0_i32_1 = arith.constant 0 : i32
    return %c0_i32, %c0_i32_0 : i32, i32
  }
  func.func @transform_12(%arg0: i32) -> (i32, i32) {
    %c0_i32 = arith.constant 0 : i32
    %c0_i32_0 = arith.constant 0 : i32
    return %arg0, %c0_i32 : i32, i32
  }
}

</mosaic_0001>

<bundles_post_ra>
// kernel: tpu_custom_call.1
= control target key start
LH: loop header
LB: loop body
LE: loop exit
PB: predicated region body
PF: predicated region fallthrough
CT: control target
= control target key end

     0   :  { %17 = vsyncpa [#allocation7], 0  ;;  %s14700_s0 = inlined_call_operand.hbm [shape: bf16[64,64], index: 0, kind: input, shape index: {}]   ;;  %s14701_s1 = inlined_call_operand.hbm [shape: bf16[32,64], index: 1, kind: input, shape index: {}]   ;;  %s14702_s2 = inlined_call_operand.vmem [shape: s32[8,1], index: 2, kind: input, shape index: {}]   ;;  %s14703_s3 = inlined_call_operand.vmem [shape: s32[8,1], index: 3, kind: input, shape index: {}]   ;;  %s14704_s4 = inlined_call_operand.vmem [shape: bf16[64,256], index: 4, kind: input, shape index: {}]   ;;  %s14705_s5 = inlined_call_operand.hbm [shape: f32[64,256], index: 5, kind: input, shape index: {}]   ;;  %s14706_s6 = inlined_call_operand.vmem [shape: f32[1,256], index: 6, kind: input, shape index: {}]   ;;  %s14707_s7 = inlined_call_operand.hbm [shape: bf16[64,256], index: 7, kind: input, shape index: {}]   ;;  %s14708_s8 = inlined_call_operand.hbm [shape: f32[64,256], index: 8, kind: input, shape index: {}]   ;;  %s14709_s9 = inlined_call_operand.vmem [shape: f32[1,256], index: 9, kind: input, shape index: {}]   ;;  %s14710_s10 = inlined_call_operand.vmem [shape: f32[64,3], index: 10, kind: input, shape index: {}]   ;;  %s14711_s11 = inlined_call_operand.vmem [shape: f32[1,3], index: 11, kind: input, shape index: {}]   ;;  %s14712_s12 = inlined_call_operand.vmem [shape: f32[8,3], index: 12, kind: output, shape index: {}]  }
   0x1   :  { %18 = vsyncpa [#allocation9], 0 }
   0x2   :  { %19 = vsyncpa [#allocation12], 0  ;;  %s37_s23 = sshll.u32 %s14701_s1, 4  ;;  %s9511_s24 = smov [#allocation8]   ;;  %s38_s23 = int_to_ptr.hbm [resolvable:$true] %s37_s23 }
   0x3   :  { %s39_s25 = sshll.u32 %s9511_s24, 4  ;;  %s71_s28 = sshll.u32 %s14707_s7, 4  ;;  %s40_s25 = int_to_ptr.vmem [resolvable:$true] %s39_s25  ;;  %s72_s28 = int_to_ptr.hbm [resolvable:$true] %s71_s28 }
   0x4   :  { %s9512_s29 = smov 64   ;;  %s9513_s30 = smov 4  }
   0x5   :  { %45 = dma.hbm_to_vmem [thread:$0]  %s38_s23, 256, %s40_s25, [#allocation9], %s9512_s29, %s9512_s29, %s9513_s30  }
   0x6   :  { %s9514_s13 = smov [#allocation11]   ;;  %s9515_s15 = smov 128  }
   0x7   :  { %s73_s14 = sshll.u32 %s9514_s13, 4  ;;  %s9516_s16 = smov 8   ;;  %s74_s14 = int_to_ptr.vmem [resolvable:$true] %s73_s14 }
   0x8   :  { %79 = dma.hbm_to_vmem [thread:$0]  %s72_s28, 1024, %s74_s14, [#allocation12], %s9515_s15, %s9515_s15, %s9516_s16  }
   0x9   :  { %s24_s18 = sshll.u32 %s14700_s0, 4  ;;  %s9517_s19 = smov [#allocation6]   ;;  %s25_s18 = int_to_ptr.hbm [resolvable:$true] %s24_s18 }
   0xa   :  { %s26_s20 = sshll.u32 %s9517_s19, 4  ;;  %s56_s22 = sshll.u32 %s14705_s5, 4  ;;  %s27_s20 = int_to_ptr.vmem [resolvable:$true] %s26_s20  ;;  %s57_s22 = int_to_ptr.hbm [resolvable:$true] %s56_s22 }
   0xb   :  { %32 = dma.hbm_to_vmem [thread:$0]  %s25_s18, 512, %s27_s20, [#allocation7], %s9512_s29, %s9512_s29, %s9513_s30  }
   0xc   :  { %s9518_s23 = smov [#allocation10]   ;;  %s9519_s25 = smov 256  }
   0xd   :  { %s58_s24 = sshll.u32 %s9518_s23, 4  ;;  %s9520_s26 = smov 16   ;;  %s59_s24 = int_to_ptr.vmem [resolvable:$true] %s58_s24 }
   0xe   :  { %64 = dma.hbm_to_vmem [thread:$0]  %s57_s22, 2048, %s59_s24, [#allocation9], %s9519_s25, %s9519_s25, %s9520_s26  }
   0xf   :  { %s84_s28 = sshll.u32 %s14708_s8, 4  ;;  %s9521_s13 = smov [#allocation13]   ;;  %s85_s28 = int_to_ptr.hbm [resolvable:$true] %s84_s28 }
  0x10   :  { %s86_s14 = sshll.u32 %s9521_s13, 4  ;;  %s87_s14 = int_to_ptr.vmem [resolvable:$true] %s86_s14 }
  0x11   :  { %92 = dma.hbm_to_vmem [thread:$0]  %s85_s28, 2048, %s87_s14, [#allocation12], %s9519_s25, %s9519_s25, %s9520_s26  }
  0x12   :  { %9505 = dma.done.wait [#allocation7], 512  }
  0x13   :  { %9506 = vsyncadd [#allocation7], 4294966784 }
  0x14   :  { %9507 = dma.done.wait [#allocation9], 2304  }
  0x15   :  { %9508 = vsyncadd [#allocation9], 4294964992 }
  0x16   :  { %9509 = dma.done.wait [#allocation12], 3072  }
  0x17   :  { %9510 = vsyncadd [#allocation12], 4294964224  ;;  %v8328_v0 = vld [vmem:[%s14704_s4 + $0x30] sm:$0xf]  ;;  %v8514_v1 = vld [vmem:[%s14704_s4 + $0x34] sm:$0xf0] }
  0x18   :  { %v8513_v2 = vld [vmem:[%s14704_s4 + $0x34] sm:$0xf]  ;;  %v8329_v3 = vor.u32 %v8514_v1, %v8328_v0  ;;  %v8330_v4 = vld [vmem:[%s14704_s4 + $0x38] sm:$0xf0]  ;;  %v9631_v6 = vld [vmem:[#allocation10 + $0x70] sm:$0xff]  ;;  %vm203_vm0 = vcmask 523264  }
  0x19   :  { %v9629_v5 = vld [vmem:[#allocation10 + $0x78] sm:$0xff]  ;;  %v8333_v7 = vor.u32 %v8513_v2, %v8330_v4  ;;  %335 = vmatpush.msra.mxu2 %v9631_v6  ;;  %v9635_v8 = vld [vmem:[#allocation10 + $0x68] sm:$0xff]  ;;  %v8512_v10 = vld [vmem:[%s14704_s4 + $0x24] sm:$0xf0]  ;;  %v14719_v41 = vmov 0.0   ;;  %vm370_vm1 = vcmask 1040384  }
  0x1a   :  { %355 = vmatpush.msra.mxu3 %v9629_v5  ;;  %v8320_v9 = vld [vmem:[%s14704_s4 + $0x20] sm:$0xf]  ;;  %220 = vmatpush.bf16.msra.mxu0 %v8329_v3  ;;  %v8511_v12 = vld [vmem:[%s14704_s4 + $0x24] sm:$0xf]  ;;  %v8322_v13 = vld [vmem:[%s14704_s4 + $0x28] sm:$0xf0] }
  0x1b   :  { %v8321_v11 = vor.u32 %v8512_v10, %v8320_v9  ;;  %v9649_v14 = vld [vmem:[#allocation10 + $0x60] sm:$0xff]  ;;  %249 = vmatpush.bf16.msra.mxu1 %v8333_v7  ;;  %v8325_v15 = vor.u32 %v8511_v12, %v8322_v13  ;;  %v9652_v16 = vld [vmem:[#allocation10 + $0x58] sm:$0xff]  ;;  %v9654_v17 = vld [vmem:[#allocation10 + $0x50] sm:$0xff]  ;;  %vm14722_vm2 = vcmask 1041409   ;;  %vm375_vm3 = vcmask 1042434   ;;  %s9532_s27 = smov 32  }
  0x1c   :  { %356 = vmatpush.msra.mxu3 %v9635_v8  ;;  %v9656_v18 = vld [vmem:[#allocation10 + $0x48] sm:$0xff]  ;;  %336 = vmatpush.msra.mxu2 %v9649_v14  ;;  %v8312_v19 = vld [vmem:[%s14704_s4 + $0x10] sm:$0xf]  ;;  %v8510_v20 = vld [vmem:[%s14704_s4 + $0x14] sm:$0xf0]  ;;  %vm14721_vm4 = vcmask 1043459  }
  0x1d   :  { %v8509_v21 = vld [vmem:[%s14704_s4 + $0x14] sm:$0xf]  ;;  %v8314_v22 = vld [vmem:[%s14704_s4 + $0x18] sm:$0xf0]  ;;  %v8313_v24 = vor.u32 %v8510_v20, %v8312_v19  ;;  %v9678_v27 = vld [vmem:[#allocation10 + $0x30] sm:$0xff]  ;;  %vm14715_vm5 = vcmask 1044484  }
  0x1e   :  { %357 = vmatpush.msra.mxu3 %v9652_v16  ;;  %v9672_v23 = vld [vmem:[#allocation10 + $0x40] sm:$0xff]  ;;  %221 = vmatpush.bf16.msra.mxu0 %v8321_v11  ;;  %v9675_v25 = vld [vmem:[#allocation10 + $0x38] sm:$0xff]  ;;  %v8317_v26 = vor.u32 %v8509_v21, %v8314_v22  ;;  %v8304_v28 = vld [vmem:[%s14704_s4] sm:$0xf]  ;;  %vm14716_vm6 = vcmask 1045509   ;;  %vm14713_vm7 = vcmask 1046534  }
  0x1f   :  { %337 = vmatpush.msra.mxu2 %v9654_v17  ;;  %250 = vmatpush.bf16.msra.mxu1 %v8325_v15  ;;  %v8508_v29 = vld [vmem:[%s14704_s4 + $0x4] sm:$0xf0]  ;;  %v9687_v30 = vld [vmem:[#allocation10 + $0x28] sm:$0xff]  ;;  %v8306_v32 = vld [vmem:[%s14704_s4 + $0x8] sm:$0xf0]  ;;  %vm14714_vm8 = vcmask 1046528  }
  0x20   :  { %358 = vmatpush.msra.mxu3 %v9656_v18  ;;  %v8507_v31 = vld [vmem:[%s14704_s4 + $0x4] sm:$0xf]  ;;  %v9696_v33 = vld [vmem:[#allocation10 + $0x20] sm:$0xff]  ;;  %v8305_v34 = vor.u32 %v8508_v29, %v8304_v28  ;;  %v9699_v35 = vld [vmem:[#allocation10 + $0x18] sm:$0xff] }
  0x21   :  { %338 = vmatpush.msra.mxu2 %v9672_v23  ;;  %v8309_v36 = vor.u32 %v8507_v31, %v8306_v32  ;;  %v9702_v37 = vld [vmem:[#allocation10 + $0x10] sm:$0xff]  ;;  %v9705_v38 = vld [vmem:[#allocation10 + $0x8] sm:$0xff]  ;;  %v9708_v40 = vld [vmem:[#allocation10] sm:$0xff] }
  0x22   :  { %359 = vmatpush.msra.mxu3 %v9675_v25  ;;  %222 = vmatpush.bf16.msra.mxu0 %v8313_v24  ;;  %v8503_v39 = vld [vmem:[#allocation6] sm:$0xff]  ;;  %v8504_v42 = vld [vmem:[#allocation6 + $0x8] sm:$0xff]  ;;  %v8505_v43 = vld [vmem:[#allocation6 + $0x10] sm:$0xff] }
  0x23   :  { %339 = vmatpush.msra.mxu2 %v9678_v27  ;;  %251 = vmatpush.bf16.msra.mxu1 %v8317_v26  ;;  %v8506_v44 = vld [vmem:[#allocation6 + $0x18] sm:$0xff] }
  0x24   :  { %360 = vmatpush.msra.mxu3 %v9687_v30  ;;  %v137_v45 = vld [vmem:[%s14706_s6] sm:$0x3] }
  0x25   :  { %340 = vmatpush.msra.mxu2 %v9696_v33  ;;  %v9790_v46 = vperm.slane %v137_v45, 0  ;;  %v9792_v47 = vperm.slane %v137_v45, 1 }
  0x26   :  { %361 = vmatpush.msra.mxu3 %v9699_v35  ;;  %223 = vmatpush.bf16.msra.mxu0 %v8305_v34 }
  0x27   :  { %341 = vmatpush.msra.mxu2 %v9702_v37  ;;  %252 = vmatpush.bf16.msra.mxu1 %v8309_v36 }
  0x28   :  { %362 = vmatpush.msra.mxu3 %v9705_v38 }
  0x29   :  { %363 = vmatmul.f32.vlgmr.msra.gmra.mxu3 %v14719_v41  ;;  %342 = vmatpush.msra.mxu2 %v9708_v40 }
  0x2a   :  { %8334 = vmatmul.msk.bf16.vlgmr.msra.gmra.mxu0 %vm203_vm0, %v8503_v39  ;;  %343 = vmatmul.f32.vlgmr.msra.gmra.mxu2 %v14719_v41 }
  0x2b   :  { %8338 = vmatmul.msk.bf16.vlgmr.msra.gmra.mxu1 %vm203_vm0, %v8503_v39  ;;  %946 = vmatpush.msrb.mxu2 %v9631_v6 }
  0x2c   :  { %966 = vmatpush.msrb.mxu3 %v9629_v5  ;;  %2856 = vmatpush.msrb.mxu1 %v9629_v5 }
  0x2d   :  { %947 = vmatpush.msrb.mxu2 %v9649_v14  ;;  %2836 = vmatpush.msrb.mxu0 %v9631_v6 }
  0x2e   :  { %967 = vmatpush.msrb.mxu3 %v9635_v8  ;;  %2857 = vmatpush.msrb.mxu1 %v9635_v8 }
  0x2f   :  { %948 = vmatpush.msrb.mxu2 %v9654_v17  ;;  %2837 = vmatpush.msrb.mxu0 %v9649_v14 }
  0x30   :  { %968 = vmatpush.msrb.mxu3 %v9652_v16  ;;  %2858 = vmatpush.msrb.mxu1 %v9652_v16 }
  0x31   :  { %949 = vmatpush.msrb.mxu2 %v9672_v23  ;;  %2838 = vmatpush.msrb.mxu0 %v9654_v17 }
  0x32   :  { %969 = vmatpush.msrb.mxu3 %v9656_v18  ;;  %2859 = vmatpush.msrb.mxu1 %v9656_v18 }
  0x33   :  { %950 = vmatpush.msrb.mxu2 %v9678_v27  ;;  %2839 = vmatpush.msrb.mxu0 %v9672_v23 }
  0x34   :  { %970 = vmatpush.msrb.mxu3 %v9675_v25  ;;  %2860 = vmatpush.msrb.mxu1 %v9675_v25 }
  0x35   :  { %951 = vmatpush.msrb.mxu2 %v9696_v33  ;;  %2840 = vmatpush.msrb.mxu0 %v9678_v27 }
  0x36   :  { %971 = vmatpush.msrb.mxu3 %v9687_v30  ;;  %2861 = vmatpush.msrb.mxu1 %v9687_v30 }
  0x37   :  { %952 = vmatpush.msrb.mxu2 %v9702_v37  ;;  %2841 = vmatpush.msrb.mxu0 %v9696_v33 }
  0x38   :  { %972 = vmatpush.msrb.mxu3 %v9699_v35  ;;  %2862 = vmatpush.msrb.mxu1 %v9699_v35 }
  0x39   :  { %953 = vmatpush.msrb.mxu2 %v9708_v40  ;;  %2842 = vmatpush.msrb.mxu0 %v9702_v37 }
  0x3a   :  { %8335 = vmatmul.msk.bf16.gmra.mxu0 %vm203_vm0, %v8504_v42  ;;  %973 = vmatpush.msrb.mxu3 %v9705_v38 }
  0x3b   :  { %8339 = vmatmul.msk.bf16.gmra.mxu1 %vm203_vm0, %v8504_v42  ;;  %1576 = vmatpush.msra.mxu2 %v9631_v6 }
  0x3c   :  { %1596 = vmatpush.msra.mxu3 %v9629_v5  ;;  %2863 = vmatpush.msrb.mxu1 %v9705_v38 }
  0x3d   :  { %1577 = vmatpush.msra.mxu2 %v9649_v14  ;;  %2843 = vmatpush.msrb.mxu0 %v9708_v40 }
  0x3e   :  { %1597 = vmatpush.msra.mxu3 %v9635_v8  ;;  %4092 = vmatpush.msra.mxu1 %v9629_v5 }
  0x3f   :  { %4072 = vmatpush.msra.mxu0 %v9631_v6  ;;  %1578 = vmatpush.msra.mxu2 %v9654_v17 }
  0x40   :  { %1598 = vmatpush.msra.mxu3 %v9652_v16  ;;  %4093 = vmatpush.msra.mxu1 %v9635_v8 }
  0x41   :  { %4073 = vmatpush.msra.mxu0 %v9649_v14  ;;  %1579 = vmatpush.msra.mxu2 %v9672_v23 }
  0x42   :  { %1599 = vmatpush.msra.mxu3 %v9656_v18  ;;  %4094 = vmatpush.msra.mxu1 %v9652_v16 }
  0x43   :  { %4074 = vmatpush.msra.mxu0 %v9654_v17  ;;  %1580 = vmatpush.msra.mxu2 %v9678_v27 }
  0x44   :  { %1600 = vmatpush.msra.mxu3 %v9675_v25  ;;  %4095 = vmatpush.msra.mxu1 %v9656_v18 }
  0x45   :  { %4075 = vmatpush.msra.mxu0 %v9672_v23  ;;  %1581 = vmatpush.msra.mxu2 %v9696_v33 }
  0x46   :  { %1601 = vmatpush.msra.mxu3 %v9687_v30  ;;  %4096 = vmatpush.msra.mxu1 %v9675_v25 }
  0x47   :  { %4076 = vmatpush.msra.mxu0 %v9678_v27  ;;  %1582 = vmatpush.msra.mxu2 %v9702_v37 }
  0x48   :  { %1602 = vmatpush.msra.mxu3 %v9699_v35  ;;  %4097 = vmatpush.msra.mxu1 %v9687_v30 }
  0x49   :  { %4077 = vmatpush.msra.mxu0 %v9696_v33  ;;  %1583 = vmatpush.msra.mxu2 %v9708_v40 }
  0x4a   :  { %8336 = vmatmul.msk.bf16.gmra.mxu0 %vm203_vm0, %v8505_v43  ;;  %1603 = vmatpush.msra.mxu3 %v9705_v38 }
  0x4b   :  { %8340 = vmatmul.msk.bf16.gmra.mxu1 %vm203_vm0, %v8505_v43  ;;  %4078 = vmatpush.msra.mxu0 %v9702_v37 }
  0x4c   :  { %4098 = vmatpush.msra.mxu1 %v9699_v35 }
  0x4d   :  { %4079 = vmatpush.msra.mxu0 %v9708_v40 }
  0x4e   :  { %4099 = vmatpush.msra.mxu1 %v9705_v38 }
  0x5a   :  { %8337 = vmatmul.msk.bf16.gmra.mxu0 %vm203_vm0, %v8506_v44 }
  0x5b   :  { %8341 = vmatmul.msk.bf16.gmra.mxu1 %vm203_vm0, %v8506_v44 }
  0xa7   :  { %v225_v48 = vpop.f32.mrf.mxu0 }
  0xa8   :  { %v226_v49 = vadd.f32 %v225_v48, %v9790_v46  ;;  %v254_v50 = vpop.f32.mrf.mxu1 }
  0xa9   :  { %v255_v51 = vadd.f32 %v254_v50, %v9792_v47 }
  0xaa   :  { %274 = vst [vmem:[#allocation2] sm:$0xff] %v226_v49 }
  0xab   :  { %275 = vst [vmem:[#allocation2 + $0x8] sm:$0xff] %v255_v51 }
  0xac   :  { %v364_v52 = vpop.f32.mrf.mxu3 }
  0xad   :  { %v9796_v53 = vrot.slane %v364_v52, 7  ;;  %v9798_v54 = vpop.f32.mrf.mxu2 }
  0xaf   :  { %v227_v55 = vpop.f32.mrf.mxu0  ;;  %v371_v58 = vsel %vm370_vm1, %v9798_v54, %v9796_v53  ;;  %v373_v62 = vsel %vm14722_vm2, %v9798_v54, %v9796_v53  ;;  %v376_v6 = vsel %vm375_vm3, %v9798_v54, %v9796_v53  ;;  %v379_v14 = vsel %vm14721_vm4, %v9798_v54, %v9796_v53 }
  0xb0   :  { %v228_v56 = vadd.f32 %v227_v55, %v9790_v46  ;;  %v256_v57 = vpop.f32.mrf.mxu1  ;;  %v374_v0 = vrot.slane %v373_v62, 1  ;;  %v377_v8 = vrot.slane %v376_v6, 2  ;;  %v380_v16 = vrot.slane %v379_v14, 3 }
  0xb1   :  { %v257_v59 = vadd.f32 %v256_v57, %v9792_v47  ;;  %v382_v22 = vsel %vm14715_vm5, %v9798_v54, %v9796_v53  ;;  %v385_v30 = vsel %vm14716_vm6, %v9798_v54, %v9796_v53  ;;  %v388_v38 = vsel %vm14713_vm7, %v9798_v54, %v9796_v53 }
  0xb2   :  { %276 = vst [vmem:[#allocation2 + $0x10] sm:$0xff] %v228_v56  ;;  %v309_v60 = vld [vmem:[#allocation2] ss:$8 sm:$0x3]  ;;  %v383_v27 = vrot.slane %v382_v22, 4  ;;  %v386_v35 = vrot.slane %v385_v30, 5  ;;  %v391_v49 = vsel %vm14714_vm8, %v9796_v53, %v9798_v54 }
  0xb3   :  { %277 = vst [vmem:[#allocation2 + $0x18] sm:$0xff] %v257_v59  ;;  %v9805_v61 = vadd.f32 %v371_v58, %v309_v60  ;;  %v389_v44 = vrot.slane %v388_v38, 6  ;;  %v392_v50 = vrot.slane %v391_v49, 7 }
  0xb5   :  { %569 = vrot.lane.b32.xlu0 %v9805_v61, %s9512_s29 }
  0xb7   :  { %v230_v63 = vpop.f32.mrf.mxu0 }
  0xb8   :  { %v231_v1 = vadd.f32 %v230_v63, %v9790_v46  ;;  %v259_v2 = vpop.f32.mrf.mxu1 }
  0xb9   :  { %v260_v3 = vadd.f32 %v259_v2, %v9792_v47 }
  0xba   :  { %278 = vst [vmem:[#allocation2 + $0x20] sm:$0xff] %v231_v1  ;;  %v311_v4 = vld [vmem:[#allocation2 + $0x10] ss:$8 sm:$0x3] }
  0xbb   :  { %279 = vst [vmem:[#allocation2 + $0x28] sm:$0xff] %v260_v3  ;;  %v9814_v5 = vadd.f32 %v374_v0, %v311_v4 }
  0xbd   :  { %571 = vrot.lane.b32.xlu0 %v9814_v5, %s9512_s29  ;;  %v8343_v52 = vmul.f32 -1.442695, %v9814_v5 }
  0xbf   :  { %v232_v7 = vpop.f32.mrf.mxu0 }
  0xc0   :  { %v233_v9 = vadd.f32 %v232_v7, %v9790_v46  ;;  %v261_v10 = vpop.f32.mrf.mxu1 }
  0xc1   :  { %v262_v11 = vadd.f32 %v261_v10, %v9792_v47 }
  0xc2   :  { %280 = vst [vmem:[#allocation2 + $0x30] sm:$0xff] %v233_v9  ;;  %v313_v12 = vld [vmem:[#allocation2 + $0x20] ss:$8 sm:$0x3] }
  0xc3   :  { %281 = vst [vmem:[#allocation2 + $0x38] sm:$0xff] %v262_v11  ;;  %v403_v13 = vadd.f32 %v377_v8, %v313_v12 }
  0xc5   :  { %573 = vrot.lane.b32.xlu1 %v403_v13, %s9512_s29  ;;  %v8344_v57 = vmul.f32 -1.442695, %v403_v13 }
  0xc7   :  { %v235_v15 = vpop.f32.mrf.mxu0 }
  0xc8   :  { %v236_v17 = vadd.f32 %v235_v15, %v9790_v46  ;;  %v264_v18 = vpop.f32.mrf.mxu1 }
  0xc9   :  { %v265_v19 = vadd.f32 %v264_v18, %v9792_v47 }
  0xca   :  { %282 = vst [vmem:[#allocation2 + $0x40] sm:$0xff] %v236_v17  ;;  %v315_v20 = vld [vmem:[#allocation2 + $0x30] ss:$8 sm:$0x3] }
  0xcb   :  { %283 = vst [vmem:[#allocation2 + $0x48] sm:$0xff] %v265_v19  ;;  %v404_v21 = vadd.f32 %v380_v16, %v315_v20 }
  0xcd   :  { %575 = vrot.lane.b32.xlu1 %v404_v21, %s9512_s29  ;;  %v8345_v60 = vmul.f32 -1.442695, %v404_v21 }
  0xcf   :  { %v237_v23 = vpop.f32.mrf.mxu0 }
  0xd0   :  { %v238_v24 = vadd.f32 %v237_v23, %v9790_v46  ;;  %v266_v25 = vpop.f32.mrf.mxu1 }
  0xd1   :  { %v267_v26 = vadd.f32 %v266_v25, %v9792_v47 }
  0xd2   :  { %284 = vst [vmem:[#allocation2 + $0x50] sm:$0xff] %v238_v24  ;;  %v317_v28 = vld [vmem:[#allocation2 + $0x40] ss:$8 sm:$0x3] }
  0xd3   :  { %285 = vst [vmem:[#allocation2 + $0x58] sm:$0xff] %v267_v26  ;;  %v405_v29 = vadd.f32 %v383_v27, %v317_v28 }
  0xd5   :  { %577 = vrot.lane.b32.xlu2 %v405_v29, %s9512_s29  ;;  %v8346_v58 = vmul.f32 -1.442695, %v405_v29 }
  0xd7   :  { %v240_v31 = vpop.f32.mrf.mxu0 }
  0xd8   :  { %v241_v32 = vadd.f32 %v240_v31, %v9790_v46  ;;  %v269_v33 = vpop.f32.mrf.mxu1 }
  0xd9   :  { %v270_v34 = vadd.f32 %v269_v33, %v9792_v47 }
  0xda   :  { %286 = vst [vmem:[#allocation2 + $0x60] sm:$0xff] %v241_v32  ;;  %v319_v36 = vld [vmem:[#allocation2 + $0x50] ss:$8 sm:$0x3] }
  0xdb   :  { %287 = vst [vmem:[#allocation2 + $0x68] sm:$0xff] %v270_v34  ;;  %v406_v37 = vadd.f32 %v386_v35, %v319_v36 }
  0xdd   :  { %579 = vrot.lane.b32.xlu2 %v406_v37, %s9512_s29  ;;  %v8347_v62 = vmul.f32 -1.442695, %v406_v37 }
  0xdf   :  { %v242_v39 = vpop.f32.mrf.mxu0 }
  0xe0   :  { %v243_v40 = vadd.f32 %v242_v39, %v9790_v46  ;;  %v271_v42 = vpop.f32.mrf.mxu1 }
  0xe1   :  { %v272_v43 = vadd.f32 %v271_v42, %v9792_v47  ;;  %v8342_v47 = vmul.f32 -1.442695, %v9805_v61 }
  0xe2   :  { %288 = vst [vmem:[#allocation2 + $0x70] sm:$0xff] %v243_v40  ;;  %v321_v45 = vld [vmem:[#allocation2 + $0x60] ss:$8 sm:$0x3] }
  0xe3   :  { %289 = vst [vmem:[#allocation2 + $0x78] sm:$0xff] %v272_v43  ;;  %v9847_v48 = vadd.f32 %v389_v44, %v321_v45  ;;  %8551 = vpow2.f32 %v8342_v47 }
  0xe4   :  { %8553 = vpow2.f32 %v8343_v52 }
  0xe5   :  { %581 = vrot.lane.b32.xlu0 %v9847_v48, %s9512_s29  ;;  %v8348_v35 = vmul.f32 -1.442695, %v9847_v48 }
  0xe9   :  { %v8552_v55 = vpop.eup %8551 }
  0xea   :  { %v323_v51 = vld [vmem:[#allocation2 + $0x70] ss:$8 sm:$0x3]  ;;  %v433_v56 = vadd.f32 1.0, %v8552_v55  ;;  %v8554_v59 = vpop.eup %8553 }
  0xeb   :  { %v9854_v46 = vadd.f32 %v392_v50, %v323_v51  ;;  %v9860_v53 = vadd.f32 1.0, %v8554_v59 }
  0xec   :  { %8555 = vrcp.f32 %v433_v56  ;;  %v452_v15 = vand.u32 2147483648, %v433_v56  ;;  %vm446_vm10 = vweird.f32 %v433_v56  ;;  %v450_v18 = vand.u32 2147483647, %v433_v56 }
  0xed   :  { %583 = vrot.lane.b32.xlu1 %v9854_v46, %s9512_s29  ;;  %8557 = vpow2.f32 %v8344_v57  ;;  %v465_v36 = vand.u32 2147483647, %v9860_v53  ;;  %v467_v37 = vand.u32 2147483648, %v9860_v53  ;;  %vm461_vm14 = vweird.f32 %v9860_v53 }
  0xee   :  { %8559 = vpow2.f32 %v8346_v58  ;;  %v453_v21 = vor.u32 1.1754944e-38, %v452_v15  ;;  %vm451_vm12 = vcmp.eq.f32.partialorder %v450_v18, 8.507059e+37 }
  0xef   :  { %8561 = vrcp.f32 %v9860_v53  ;;  %v468_v49 = vor.u32 1.1754944e-38, %v467_v37 }
  0xf0   :  { %8563 = vpow2.f32 %v8345_v60  ;;  %v8349_v60 = vmul.f32 -1.442695, %v9854_v46 }
  0xf1   :  { %8565 = vpow2.f32 %v8347_v62 }
  0xf2   :  { %v8556_v54 = vpop.eup %8555 }
  0xf3   :  { %v8558_v63 = vpop.eup %8557  ;;  %v442_v61 = vmul.f32 %v8556_v54, %v433_v56  ;;  %vm447_vm9 = vweird.f32 %v8556_v54 }
  0xf4   :  { %v8560_v0 = vpop.eup %8559  ;;  %v9863_v1 = vadd.f32 1.0, %v8558_v63  ;;  %vm448_vm11 = vmor %vm446_vm10, %vm447_vm9  ;;  %vm466_vm9 = vcmp.eq.f32.partialorder %v465_v36, 8.507059e+37 }
  0xf5   :  { %v9865_v2 = vadd.f32 1.0, %v8560_v0  ;;  %v443_v3 = vsub.f32 1.0, %v442_v61  ;;  %v9867_v4 = vpop.eup %8561 }
  0xf6   :  { %8567 = vrcp.f32 %v9863_v1  ;;  %v8564_v5 = vpop.eup %8563  ;;  %v457_v8 = vmul.f32 %v9867_v4, %v9860_v53  ;;  %vm462_vm13 = vweird.f32 %v9867_v4  ;;  %v480_v51 = vand.u32 2147483647, %v9863_v1 }
  0xf7   :  { %8569 = vrcp.f32 %v9865_v2  ;;  %v444_v6 = vmul.f32 %v8556_v54, %v443_v3  ;;  %v8566_v7 = vpop.eup %8565  ;;  %v9873_v10 = vadd.f32 1.0, %v8564_v5  ;;  %vm9902_vm15 = vmor %vm461_vm14, %vm462_vm13  ;;  %v482_v47 = vand.u32 2147483648, %v9863_v1 }
  0xf8   :  { %v9875_v12 = vadd.f32 1.0, %v8566_v7  ;;  %v458_v16 = vsub.f32 1.0, %v457_v8  ;;  %v512_v62 = vand.u32 2147483648, %v9865_v2  ;;  %vm506_vm14 = vweird.f32 %v9865_v2 }
  0xf9   :  { %v445_v13 = vadd.f32 %v8556_v54, %v444_v6  ;;  %v510_v61 = vand.u32 2147483647, %v9865_v2  ;;  %v483_v5 = vor.u32 1.1754944e-38, %v482_v47 }
  0xfa   :  { %v459_v22 = vmul.f32 %v9867_v4, %v458_v16 }
  0xfb   :  { %v449_v19 = vsel %vm448_vm11, %v8556_v54, %v445_v13 }
  0xfc   :  { %v9877_v14 = vpop.eup %8567  ;;  %v9888_v28 = vsel %vm451_vm12, %v453_v21, %v449_v19  ;;  %v460_v32 = vadd.f32 %v9867_v4, %v459_v22  ;;  %vm476_vm12 = vweird.f32 %v9863_v1  ;;  %v527_v22 = vand.u32 2147483648, %v9875_v12 }
  0xfd   :  { %v9879_v17 = vpop.eup %8569  ;;  %v472_v20 = vmul.f32 %v9877_v14, %v9863_v1  ;;  %vm477_vm10 = vweird.f32 %v9877_v14  ;;  %v609_v1 = vmul.f32 0.0, %v9888_v28 }
  0xfe   :  { %v502_v23 = vmul.f32 %v9879_v17, %v9865_v2  ;;  %v464_v43 = vsel %vm9902_vm15, %v9867_v4, %v460_v32  ;;  %vm507_vm11 = vweird.f32 %v9879_v17  ;;  %vm9930_vm13 = vmor %vm476_vm12, %vm477_vm10 }
  0xff   :  { %v473_v30 = vsub.f32 1.0, %v472_v20  ;;  %v9918_v55 = vsel %vm466_vm9, %v468_v49, %v464_v43  ;;  %vm9939_vm15 = vmor %vm506_vm14, %vm507_vm11  ;;  %vm481_vm9 = vcmp.eq.f32.partialorder %v480_v51, 8.507059e+37  ;;  %vm511_vm11 = vcmp.eq.f32.partialorder %v510_v61, 8.507059e+37 }
 0x100   :  { %v503_v33 = vsub.f32 1.0, %v502_v23  ;;  %v495_v23 = vand.u32 2147483647, %v9873_v10  ;;  %vm521_vm14 = vweird.f32 %v9875_v12 }
 0x101   :  { %v474_v40 = vmul.f32 %v9877_v14, %v473_v30  ;;  %v528_v30 = vor.u32 1.1754944e-38, %v527_v22 }
 0x102   :  { %v504_v44 = vmul.f32 %v9879_v17, %v503_v33 }
 0x103   :  { %v475_v56 = vadd.f32 %v9877_v14, %v474_v40 }
 0x104   :  { %v505_v53 = vadd.f32 %v9879_v17, %v504_v44 }
 0x105   :  { %v479_v46 = vsel %vm9930_vm13, %v9877_v14, %v475_v56  ;;  %vm491_vm13 = vweird.f32 %v9873_v10 }
 0x106   :  { %v509_v6 = vsel %vm9939_vm15, %v9879_v17, %v505_v53  ;;  %v9950_v15 = vsel %vm481_vm9, %v483_v5, %v479_v46 }
 0x127   :  { %v570_v9 = vpop.permute.xlu0 %569 }
 0x128   :  { %v585_v11 = vrot.slane %v570_v9, 1  ;;  %v513_v9 = vor.u32 1.1754944e-38, %v512_v62 }
 0x12a   :  { %8571 = vtanh.f32 %v585_v11  ;;  %v497_v11 = vand.u32 2147483648, %v9873_v10  ;;  %v9952_v18 = vsel %vm511_vm11, %v513_v9, %v509_v6  ;;  %vm496_vm11 = vcmp.eq.f32.partialorder %v495_v23, 8.507059e+37 }
 0x12b   :  { %8573 = vrcp.f32 %v9873_v10  ;;  %v14717_v9 = vmov 0  }
 0x12c   :  { %8575 = vrcp.f32 %v9875_v12  ;;  %8547 = vset.pattern.permute.xlu0 %v14717_v9  ;;  %8548 = vset.pattern.permute.xlu2 %v14717_v9 }
 0x12d   :  { %8549 = vset.pattern.permute.xlu1 %v14717_v9 }
 0x12f   :  { %v572_v24 = vpop.permute.xlu0 %571  ;;  %v578_v26 = vpop.permute.xlu2 %577 }
 0x130   :  { %v8572_v25 = vpop.eup %8571  ;;  %v586_v27 = vrot.slane %v572_v24, 1  ;;  %v589_v38 = vrot.slane %v578_v26, 1  ;;  %v525_v24 = vand.u32 2147483647, %v9875_v12 }
 0x131   :  { %v617_v29 = vmul.f32 %v8572_v25, %v9888_v28  ;;  %v9891_v31 = vpop.eup %8573 }
 0x132   :  { %v9895_v34 = vpop.eup %8575  ;;  %8577 = vtanh.f32 %v586_v27  ;;  %v487_v42 = vmul.f32 %v9891_v31, %v9873_v10  ;;  %vm492_vm10 = vweird.f32 %v9891_v31  ;;  %v498_v27 = vor.u32 1.1754944e-38, %v497_v11 }
 0x133   :  { %633 = vrot.lane.b32.xlu2 %v617_v29, %s9512_s29  ;;  %v517_v45 = vmul.f32 %v9895_v34, %v9875_v12  ;;  %8579 = vpow2.f32 %v8348_v35  ;;  %vm522_vm12 = vweird.f32 %v9895_v34  ;;  %vm493_vm15 = vmor %vm491_vm13, %vm492_vm10  ;;  %vm526_vm7 = vcmp.eq.f32.partialorder %v525_v24, 8.507059e+37 }
 0x134   :  { %8581 = vtanh.f32 %v589_v38  ;;  %v488_v57 = vsub.f32 1.0, %v487_v42  ;;  %vm523_vm9 = vmor %vm521_vm14, %vm522_vm12  ;;  %v610_v11 = vmul.f32 0.0, %v9918_v55 }
 0x135   :  { %v518_v54 = vsub.f32 1.0, %v517_v45 }
 0x136   :  { %v489_v4 = vmul.f32 %v9891_v31, %v488_v57 }
 0x137   :  { %v574_v48 = vpop.permute.xlu1 %573  ;;  %v580_v58 = vpop.permute.xlu2 %579  ;;  %v519_v2 = vmul.f32 %v9895_v34, %v518_v54 }
 0x138   :  { %v587_v50 = vrot.slane %v574_v48, 1  ;;  %v8578_v52 = vpop.eup %8577  ;;  %v590_v3 = vrot.slane %v580_v58, 1  ;;  %v490_v17 = vadd.f32 %v9891_v31, %v489_v4 }
 0x139   :  { %v618_v59 = vmul.f32 %v8578_v52, %v9918_v55  ;;  %v8580_v0 = vpop.eup %8579  ;;  %v520_v21 = vadd.f32 %v9895_v34, %v519_v2 }
 0x13a   :  { %8583 = vtanh.f32 %v587_v50  ;;  %v8582_v7 = vpop.eup %8581  ;;  %v439_v13 = vadd.f32 1.0, %v8580_v0  ;;  %v494_v26 = vsel %vm493_vm15, %v9891_v31, %v490_v17  ;;  %v611_v17 = vmul.f32 0.0, %v9950_v15 }
 0x13b   :  { %635 = vrot.lane.b32.xlu0 %v618_v59, %s9512_s29  ;;  %8585 = vpow2.f32 %v8349_v60  ;;  %v621_v20 = vmul.f32 %v8582_v7, %v9952_v18  ;;  %v524_v10 = vsel %vm523_vm9, %v9895_v34, %v520_v21  ;;  %v9972_v35 = vsel %vm496_vm11, %v498_v27, %v494_v26 }
 0x13c   :  { %8587 = vtanh.f32 %v590_v3  ;;  %v9974_v12 = vsel %vm526_vm7, %v528_v30, %v524_v10  ;;  %v542_v49 = vand.u32 2147483648, %v439_v13  ;;  %vm536_vm10 = vweird.f32 %v439_v13 }
 0x13d   :  { %v540_v50 = vand.u32 2147483647, %v439_v13  ;;  %v612_v2 = vmul.f32 0.0, %v9972_v35  ;;  %v614_v26 = vmul.f32 0.0, %v9974_v12 }
 0x13e   :  { %v543_v52 = vor.u32 1.1754944e-38, %v542_v49 }
 0x13f   :  { %v576_v8 = vpop.permute.xlu1 %575  ;;  %vm541_vm13 = vcmp.eq.f32.partialorder %v540_v50, 8.507059e+37 }
 0x140   :  { %v588_v14 = vrot.slane %v576_v8, 1  ;;  %v8584_v16 = vpop.eup %8583 }
 0x141   :  { %v619_v19 = vmul.f32 %v8584_v16, %v9950_v15  ;;  %v8586_v25 = vpop.eup %8585 }
 0x142   :  { %8589 = vtanh.f32 %v588_v14  ;;  %v8588_v29 = vpop.eup %8587  ;;  %v440_v33 = vadd.f32 1.0, %v8586_v25 }
 0x143   :  { %8591 = vrcp.f32 %v439_v13  ;;  %637 = vrot.lane.b32.xlu1 %v619_v19, %s9512_s29  ;;  %641 = vrot.lane.b32.xlu0 %v621_v20, %s9512_s29  ;;  %v622_v38 = vmul.f32 %v8588_v29, %v9974_v12  ;;  %v613_v19 = vmul.f32 0.0, %v9952_v18 }
 0x144   :  { %8593 = vrcp.f32 %v440_v33  ;;  %v557_v60 = vand.u32 2147483648, %v440_v33  ;;  %vm551_vm15 = vweird.f32 %v440_v33  ;;  %v555_v62 = vand.u32 2147483647, %v440_v33 }
 0x146   :  { %v558_v61 = vor.u32 1.1754944e-38, %v557_v60  ;;  %vm556_vm11 = vcmp.eq.f32.partialorder %v555_v62, 8.507059e+37 }
 0x148   :  { %v8590_v32 = vpop.eup %8589 }
 0x149   :  { %v620_v36 = vmul.f32 %v8590_v32, %v9972_v35  ;;  %v8592_v37 = vpop.eup %8591 }
 0x14a   :  { %v532_v31 = vmul.f32 %v8592_v37, %v439_v13  ;;  %v8594_v39 = vpop.eup %8593  ;;  %vm537_vm7 = vweird.f32 %v8592_v37 }
 0x14b   :  { %639 = vrot.lane.b32.xlu2 %v620_v36, %s9512_s29  ;;  %643 = vrot.lane.b32.xlu1 %v622_v38, %s9512_s29  ;;  %v547_v42 = vmul.f32 %v8594_v39, %v440_v33  ;;  %vm538_vm12 = vmor %vm536_vm10, %vm537_vm7  ;;  %vm552_vm14 = vweird.f32 %v8594_v39  ;;  %v120_v38 = vld [vmem:[%s14702_s2] sm:$0xff] }
 0x14c   :  { %v533_v34 = vsub.f32 1.0, %v532_v31  ;;  %vm553_vm9 = vmor %vm551_vm15, %vm552_vm14 }
 0x14d   :  { %v548_v48 = vsub.f32 1.0, %v547_v42  ;;  %v681_v42 = vrot.slane %v9888_v28, 1  ;;  %v684_v28 = vrot.slane %v9972_v35, 1 }
 0x14e   :  { %v534_v40 = vmul.f32 %v8592_v37, %v533_v34 }
 0x14f   :  { %v549_v47 = vmul.f32 %v8594_v39, %v548_v48  ;;  %v682_v48 = vrot.slane %v9918_v55, 1  ;;  %v683_v55 = vrot.slane %v9950_v15, 1 }
 0x150   :  { %v535_v45 = vadd.f32 %v8592_v37, %v534_v40 }
 0x151   :  { %v550_v54 = vadd.f32 %v8594_v39, %v549_v47 }
 0x152   :  { %v539_v51 = vsel %vm538_vm12, %v8592_v37, %v535_v45  ;;  %vm14733_vm12 = vcmask 1046534  }
 0x153   :  { %v9980_v59 = vsel %vm541_vm13, %v543_v52, %v539_v51  ;;  %v554_v63 = vsel %vm553_vm9, %v8594_v39, %v550_v54  ;;  %v685_v51 = vrot.slane %v9952_v18, 1  ;;  %v686_v54 = vrot.slane %v9974_v12, 1 }
 0x154   :  { %v9984_v3 = vsel %vm556_vm11, %v558_v61, %v554_v63  ;;  %v615_v25 = vmul.f32 0.0, %v9980_v59  ;;  %v687_v18 = vrot.slane %v9980_v59, 1  ;;  %v306_v61 = vlaneseq }
 0x155   :  { %v616_v31 = vmul.f32 0.0, %v9984_v3 }
 0x156   :  { %v10040_v15 = vand.u32 127, %v306_v61 }
 0x157   :  { %v582_v43 = vpop.permute.xlu0 %581 }
 0x158   :  { %v591_v44 = vrot.slane %v582_v43, 1  ;;  %vm308_vm7 = vcmp.lt.s32.totalorder %v10040_v15, 32 }
 0x15a   :  { %8595 = vtanh.f32 %v591_v44 }
 0x15f   :  { %v584_v56 = vpop.permute.xlu1 %583 }
 0x160   :  { %v8596_v57 = vpop.eup %8595  ;;  %v592_v58 = vrot.slane %v584_v56, 1 }
 0x161   :  { %v623_v53 = vmul.f32 %v8596_v57, %v9980_v59  ;;  %v9524_v59 = vmov 7  }
 0x162   :  { %8597 = vtanh.f32 %v592_v58 }
 0x163   :  { %645 = vrot.lane.b32.xlu2 %v623_v53, %s9512_s29 }
 0x168   :  { %v8598_v0 = vpop.eup %8597 }
 0x169   :  { %v624_v46 = vmul.f32 %v8598_v0, %v9984_v3  ;;  %v688_v0 = vrot.slane %v9984_v3, 1 }
 0x16b   :  { %647 = vrot.lane.b32.xlu0 %v624_v46, %s9512_s29 }
 0x18d   :  { %v634_v4 = vpop.permute.xlu2 %633 }
 0x18e   :  { %v657_v5 = vadd.f32 %v634_v4, %v609_v1  ;;  %v10048_v4 = vsel %vm308_vm7, 0, %v9524_v59 }
 0x190   :  { %8599 = vtanh.f32 %v657_v5  ;;  %750 = vst [vmem:[#allocation1] ss:$9 sm:$0xff] %v657_v5 }
 0x196   :  { %v8600_v6 = vpop.eup %8599 }
 0x197   :  { %705 = vrot.lane.b32.xlu1 %v8600_v6, %s9512_s29  ;;  %v10064_v6 = vld [vmem:[#allocation10 + $0x70] sm:$0xff] }
 0x1a5   :  { %v640_v7 = vpop.permute.xlu2 %639 }
 0x1a6   :  { %v660_v8 = vadd.f32 %v640_v7, %v612_v2  ;;  %v10067_v2 = vld [vmem:[#allocation10 + $0x78] sm:$0xff]  ;;  %v10072_v7 = vld [vmem:[#allocation10 + $0x60] sm:$0xff] }
 0x1a8   :  { %8601 = vtanh.f32 %v660_v8  ;;  %756 = vst [vmem:[#allocation1 + $0x3] ss:$9 sm:$0xff] %v660_v8  ;;  %v10075_v8 = vld [vmem:[#allocation10 + $0x68] sm:$0xff] }
 0x1ad   :  { %v636_v14 = vpop.permute.xlu0 %635 }
 0x1ae   :  { %v8602_v13 = vpop.eup %8601  ;;  %v658_v16 = vadd.f32 %v636_v14, %v610_v11  ;;  %v10080_v11 = vld [vmem:[#allocation10 + $0x50] sm:$0xff]  ;;  %v10086_v14 = vld [vmem:[#allocation10 + $0x40] sm:$0xff] }
 0x1af   :  { %711 = vrot.lane.b32.xlu1 %v8602_v13, %s9512_s29  ;;  %v10083_v13 = vld [vmem:[#allocation10 + $0x58] sm:$0xff] }
 0x1b0   :  { %8603 = vtanh.f32 %v658_v16  ;;  %752 = vst [vmem:[#allocation1 + $0x1] ss:$9 sm:$0xff] %v658_v16  ;;  %v10089_v16 = vld [vmem:[#allocation10 + $0x48] sm:$0xff] }
 0x1b5   :  { %v638_v20 = vpop.permute.xlu1 %637  ;;  %v642_v21 = vpop.permute.xlu0 %641 }
 0x1b6   :  { %v8604_v22 = vpop.eup %8603  ;;  %v659_v23 = vadd.f32 %v638_v20, %v611_v17  ;;  %v661_v24 = vadd.f32 %v642_v21, %v613_v19  ;;  %v10092_v17 = vld [vmem:[#allocation10 + $0x30] sm:$0xff]  ;;  %v10095_v19 = vld [vmem:[#allocation10 + $0x38] sm:$0xff]  ;;  %v10098_v20 = vld [vmem:[#allocation10 + $0x20] sm:$0xff] }
 0x1b7   :  { %707 = vrot.lane.b32.xlu2 %v8604_v22, %s9512_s29  ;;  %v10101_v21 = vld [vmem:[#allocation10 + $0x28] sm:$0xff] }
 0x1b8   :  { %8605 = vtanh.f32 %v659_v23  ;;  %754 = vst [vmem:[#allocation1 + $0x2] ss:$9 sm:$0xff] %v659_v23  ;;  %v10106_v23 = vld [vmem:[#allocation10 + $0x10] sm:$0xff] }
 0x1b9   :  { %8607 = vtanh.f32 %v661_v24  ;;  %758 = vst [vmem:[#allocation1 + $0x4] ss:$9 sm:$0xff] %v661_v24  ;;  %v10109_v24 = vld [vmem:[#allocation10 + $0x18] sm:$0xff] }
 0x1bd   :  { %v646_v10 = vpop.permute.xlu2 %645  ;;  %v644_v27 = vpop.permute.xlu1 %643 }
 0x1be   :  { %v663_v29 = vadd.f32 %v646_v10, %v615_v25  ;;  %v8606_v30 = vpop.eup %8605  ;;  %v662_v32 = vadd.f32 %v644_v27, %v614_v26  ;;  %v10114_v25 = vld [vmem:[#allocation10] sm:$0xff]  ;;  %v10117_v26 = vld [vmem:[#allocation10 + $0x8] sm:$0xff] }
 0x1bf   :  { %v8608_v33 = vpop.eup %8607  ;;  %709 = vrot.lane.b32.xlu0 %v8606_v30, %s9512_s29  ;;  %v920_v30 = vld [vmem:[#allocation2 + $0x1] ss:$8 sm:$0x3] }
 0x1c0   :  { %8609 = vtanh.f32 %v663_v29  ;;  %762 = vst [vmem:[#allocation1 + $0x6] ss:$9 sm:$0xff] %v663_v29  ;;  %713 = vrot.lane.b32.xlu2 %v8608_v33, %s9512_s29 }
 0x1c1   :  { %8611 = vtanh.f32 %v662_v32  ;;  %760 = vst [vmem:[#allocation1 + $0x5] ss:$9 sm:$0xff] %v662_v32 }
 0x1c6   :  { %v8610_v36 = vpop.eup %8609 }
 0x1c7   :  { %v8612_v37 = vpop.eup %8611  ;;  %717 = vrot.lane.b32.xlu1 %v8610_v36, %s9512_s29 }
 0x1c8   :  { %715 = vrot.lane.b32.xlu0 %v8612_v37, %s9512_s29 }
 0x1d0   :  { %739 = vperm.xlu0 %8547, %v120_v38  }
 0x1dd   :  { %v648_v34 = vpop.permute.xlu0 %647 }
 0x1de   :  { %v664_v39 = vadd.f32 %v648_v34, %v616_v31  ;;  %v928_v34 = vld [vmem:[#allocation2 + $0x41] ss:$8 sm:$0x3] }
 0x1e0   :  { %8613 = vtanh.f32 %v664_v39  ;;  %764 = vst [vmem:[#allocation1 + $0x7] ss:$9 sm:$0xff] %v664_v39  ;;  %v922_v39 = vld [vmem:[#allocation2 + $0x11] ss:$8 sm:$0x3] }
 0x1e6   :  { %v8614_v40 = vpop.eup %8613 }
 0x1e7   :  { %719 = vrot.lane.b32.xlu2 %v8614_v40, %s9512_s29  ;;  %v10013_v45 = vld [vmem:[#allocation1] sm:$0xff] }
 0x209   :  { %v706_v43 = vpop.permute.xlu1 %705 }
 0x20a   :  { %v10011_v44 = vmul.f32 %v706_v43, %v681_v42 }
 0x20c   :  { %778 = vst [vmem:[#allocation1] ss:$9 sm:$0xff] %v10011_v44 }
 0x211   :  { %v708_v49 = vpop.permute.xlu2 %707 }
 0x212   :  { %v10017_v50 = vmul.f32 %v708_v49, %v682_v48 }
 0x214   :  { %780 = vst [vmem:[#allocation1 + $0x1] ss:$9 sm:$0xff] %v10017_v50 }
 0x21a   :  { %v714_v47 = vpop.permute.xlu2 %713 }
 0x21b   :  { %v10021_v52 = vmul.f32 %v714_v47, %v685_v51  ;;  %v924_v47 = vld [vmem:[#allocation2 + $0x21] ss:$8 sm:$0x3] }
 0x21d   :  { %786 = vst [vmem:[#allocation1 + $0x4] ss:$9 sm:$0xff] %v10021_v52 }
 0x221   :  { %v712_v56 = vpop.permute.xlu1 %711 }
 0x222   :  { %v10025_v57 = vmul.f32 %v712_v56, %v684_v28  ;;  %v934_v28 = vld [vmem:[#allocation2 + $0x71] ss:$8 sm:$0x3] }
 0x223   :  { %v926_v56 = vld [vmem:[#allocation2 + $0x31] ss:$8 sm:$0x3] }
 0x224   :  { %784 = vst [vmem:[#allocation1 + $0x3] ss:$9 sm:$0xff] %v10025_v57 }
 0x231   :  { %v710_v58 = vpop.permute.xlu0 %709 }
 0x232   :  { %v10029_v53 = vmul.f32 %v710_v58, %v683_v55 }
 0x234   :  { %782 = vst [vmem:[#allocation1 + $0x2] ss:$9 sm:$0xff] %v10029_v53 }
 0x239   :  { %v718_v60 = vpop.permute.xlu1 %717 }
 0x23a   :  { %v716_v62 = vpop.permute.xlu0 %715  ;;  %v10034_v63 = vmul.f32 %v718_v60, %v687_v18  ;;  %v930_v60 = vld [vmem:[#allocation2 + $0x51] ss:$8 sm:$0x3] }
 0x23b   :  { %v10036_v35 = vmul.f32 %v716_v62, %v686_v54 }
 0x23c   :  { %790 = vst [vmem:[#allocation1 + $0x6] ss:$9 sm:$0xff] %v10034_v63 }
 0x23d   :  { %788 = vst [vmem:[#allocation1 + $0x5] ss:$9 sm:$0xff] %v10036_v35 }
 0x241   :  { %v720_v46 = vpop.permute.xlu2 %719 }
 0x242   :  { %v736_v1 = vmul.f32 %v720_v46, %v688_v0  ;;  %v10044_v12 = vpop.permute.xlu0 %739 }
 0x243   :  { %vm741_vm10 = vcmp.gt.s32.totalorder %v10044_v12, %v10048_v4 }
 0x244   :  { %792 = vst [vmem:[#allocation1 + $0x7] ss:$9 sm:$0xff] %v736_v1 }
 0x24b   :  { %v793_v5 = vld [vmem:[#allocation1] sm:$0xff] }
 0x24c   :  { %802 = vst [vmem:[#allocation1] ss:$9 sm:$0xff] %v10011_v44  ;;  %v10056_v3 = vsel %vm741_vm10, %v793_v5, 0.0 }
 0x24d   :  { %804 = vst [vmem:[#allocation1 + $0x1] ss:$9 sm:$0xff] %v10017_v50  ;;  %8350 = vmatmul.msk.f32.vlgmr.msrb.gmra.mxu2 %vm203_vm0, %v10056_v3  ;;  %8351 = vmatmul.msk.f32.vlgmr.msrb.gmra.mxu3 %vm203_vm0, %v10056_v3 }
 0x24e   :  { %806 = vst [vmem:[#allocation1 + $0x2] ss:$9 sm:$0xff] %v10029_v53  ;;  %2206 = vmatpush.msrb.mxu2 %v10064_v6  ;;  %2226 = vmatpush.msrb.mxu3 %v10067_v2 }
 0x24f   :  { %808 = vst [vmem:[#allocation1 + $0x3] ss:$9 sm:$0xff] %v10025_v57 }
 0x250   :  { %810 = vst [vmem:[#allocation1 + $0x4] ss:$9 sm:$0xff] %v10021_v52  ;;  %2207 = vmatpush.msrb.mxu2 %v10072_v7  ;;  %2227 = vmatpush.msrb.mxu3 %v10075_v8 }
 0x251   :  { %812 = vst [vmem:[#allocation1 + $0x5] ss:$9 sm:$0xff] %v10036_v35 }
 0x252   :  { %814 = vst [vmem:[#allocation1 + $0x6] ss:$9 sm:$0xff] %v10034_v63  ;;  %2208 = vmatpush.msrb.mxu2 %v10080_v11  ;;  %2228 = vmatpush.msrb.mxu3 %v10083_v13 }
 0x253   :  { %816 = vst [vmem:[#allocation1 + $0x7] ss:$9 sm:$0xff] %v736_v1 }
 0x254   :  { %2209 = vmatpush.msrb.mxu2 %v10086_v14  ;;  %2229 = vmatpush.msrb.mxu3 %v10089_v16 }
 0x256   :  { %2210 = vmatpush.msrb.mxu2 %v10092_v17  ;;  %2230 = vmatpush.msrb.mxu3 %v10095_v19 }
 0x258   :  { %2211 = vmatpush.msrb.mxu2 %v10098_v20  ;;  %2231 = vmatpush.msrb.mxu3 %v10101_v21 }
 0x25a   :  { %v10104_v22 = vld [vmem:[#allocation1] sm:$0xff]  ;;  %2212 = vmatpush.msrb.mxu2 %v10106_v23  ;;  %2232 = vmatpush.msrb.mxu3 %v10109_v24 }
 0x25b   :  { %14732 = vst [vmem:[#allocation17_spill] sm:$0xff] %v10104_v22 }
 0x25c   :  { %850 = vst [vmem:[#allocation1] ss:$9 sm:$0xff] %v10011_v44  ;;  %2213 = vmatpush.msrb.mxu2 %v10114_v25  ;;  %2233 = vmatpush.msrb.mxu3 %v10117_v26 }
 0x25d   :  { %852 = vst [vmem:[#allocation1 + $0x1] ss:$9 sm:$0xff] %v10017_v50 }
 0x25e   :  { %854 = vst [vmem:[#allocation1 + $0x2] ss:$9 sm:$0xff] %v10029_v53 }
 0x25f   :  { %856 = vst [vmem:[#allocation1 + $0x3] ss:$9 sm:$0xff] %v10025_v57 }
 0x260   :  { %858 = vst [vmem:[#allocation1 + $0x4] ss:$9 sm:$0xff] %v10021_v52 }
 0x261   :  { %860 = vst [vmem:[#allocation1 + $0x5] ss:$9 sm:$0xff] %v10036_v35 }
 0x262   :  { %862 = vst [vmem:[#allocation1 + $0x6] ss:$9 sm:$0xff] %v10034_v63  ;;  %v932_v63 = vld [vmem:[#allocation2 + $0x61] ss:$8 sm:$0x3] }
 0x263   :  { %864 = vst [vmem:[#allocation1 + $0x7] ss:$9 sm:$0xff] %v736_v1 }
 0x2d0   :  { %v975_v10 = vpop.f32.mrf.mxu3  ;;  %v955_v29 = vpop.f32.mrf.mxu2 }
 0x2d1   :  { %v980_v27 = vrot.slane %v975_v10, 7 }
 0x2d3   :  { %v981_v32 = vsel %vm370_vm1, %v955_v29, %v980_v27  ;;  %v988_v33 = vsel %vm14715_vm5, %v955_v29, %v980_v27  ;;  %v982_v36 = vsel %vm14722_vm2, %v955_v29, %v980_v27  ;;  %v984_v40 = vsel %vm375_vm3, %v955_v29, %v980_v27 }
 0x2d4   :  { %v1004_v37 = vadd.f32 %v981_v32, %v920_v30  ;;  %v989_v38 = vrot.slane %v988_v33, 4  ;;  %v983_v31 = vrot.slane %v982_v36, 1  ;;  %v994_v44 = vsel %vm14714_vm8, %v980_v27, %v955_v29 }
 0x2d5   :  { %v986_v48 = vsel %vm14721_vm4, %v955_v29, %v980_v27  ;;  %v985_v49 = vrot.slane %v984_v40, 2  ;;  %v995_v50 = vrot.slane %v994_v44, 7  ;;  %v990_v57 = vsel %vm14716_vm6, %v955_v29, %v980_v27 }
 0x2d6   :  { %1172 = vrot.lane.b32.xlu1 %v1004_v37, %s9512_s29  ;;  %v1008_v42 = vadd.f32 %v989_v38, %v928_v34  ;;  %v1005_v43 = vadd.f32 %v983_v31, %v922_v39  ;;  %v987_v51 = vrot.slane %v986_v48, 3  ;;  %v992_v53 = vsel %vm14733_vm12, %v955_v29, %v980_v27 }
 0x2d7   :  { %v1006_v52 = vadd.f32 %v985_v49, %v924_v47  ;;  %v1011_v55 = vadd.f32 %v995_v50, %v934_v28  ;;  %v991_v18 = vrot.slane %v990_v57, 5  ;;  %v993_v54 = vrot.slane %v992_v53, 6 }
 0x2d8   :  { %1180 = vrot.lane.b32.xlu0 %v1008_v42, %s9512_s29  ;;  %1174 = vrot.lane.b32.xlu2 %v1005_v43, %s9512_s29  ;;  %v1007_v58 = vadd.f32 %v987_v51, %v926_v56  ;;  %v8352_v61 = vmul.f32 -1.442695, %v1004_v37  ;;  %v8353_v46 = vmul.f32 -1.442695, %v1005_v43  ;;  %v8356_v10 = vmul.f32 -1.442695, %v1008_v42 }
 0x2d9   :  { %v1009_v62 = vadd.f32 %v991_v18, %v930_v60  ;;  %v1010_v35 = vadd.f32 %v993_v54, %v932_v63  ;;  %v8354_v1 = vmul.f32 -1.442695, %v1006_v52  ;;  %v8359_v37 = vmul.f32 -1.442695, %v1011_v55 }
 0x2da   :  { %8615 = vpow2.f32 %v8352_v61  ;;  %v8355_v59 = vmul.f32 -1.442695, %v1007_v58 }
 0x2db   :  { %8617 = vpow2.f32 %v8353_v46  ;;  %v8357_v30 = vmul.f32 -1.442695, %v1009_v62 }
 0x2dc   :  { %8619 = vpow2.f32 %v8354_v1 }
 0x2dd   :  { %8621 = vpow2.f32 %v8355_v59 }
 0x2de   :  { %1176 = vrot.lane.b32.xlu1 %v1006_v52, %s9512_s29  ;;  %8623 = vpow2.f32 %v8356_v10 }
 0x2e0   :  { %1186 = vrot.lane.b32.xlu0 %v1011_v55, %s9512_s29  ;;  %1178 = vrot.lane.b32.xlu2 %v1007_v58, %s9512_s29  ;;  %v8616_v5 = vpop.eup %8615 }
 0x2e1   :  { %v10147_v29 = vadd.f32 1.0, %v8616_v5  ;;  %v8618_v32 = vpop.eup %8617 }
 0x2e2   :  { %v8620_v33 = vpop.eup %8619  ;;  %v10150_v38 = vadd.f32 1.0, %v8618_v32 }
 0x2e3   :  { %8625 = vrcp.f32 %v10147_v29  ;;  %v8622_v36 = vpop.eup %8621  ;;  %v10152_v34 = vadd.f32 1.0, %v8620_v33  ;;  %v1055_v60 = vand.u32 2147483648, %v10147_v29  ;;  %v1053_v4 = vand.u32 2147483647, %v10147_v29 }
 0x2e4   :  { %8627 = vpow2.f32 %v8357_v30  ;;  %v8624_v31 = vpop.eup %8623  ;;  %v10156_v40 = vadd.f32 1.0, %v8622_v36  ;;  %vm1049_vm13 = vweird.f32 %v10147_v29  ;;  %v1070_v30 = vand.u32 2147483648, %v10150_v38 }
 0x2e5   :  { %v10160_v43 = vadd.f32 1.0, %v8624_v31  ;;  %v1056_v10 = vor.u32 1.1754944e-38, %v1055_v60  ;;  %vm10211_vm14 = vcmp.eq.f32.partialorder %v1053_v4, 8.507059e+37  ;;  %v1068_v36 = vand.u32 2147483647, %v10150_v38 }
 0x2e6   :  { %1182 = vrot.lane.b32.xlu1 %v1009_v62, %s9512_s29  ;;  %vm1064_vm9 = vweird.f32 %v10150_v38  ;;  %vm1079_vm11 = vweird.f32 %v10152_v34  ;;  %v1085_v60 = vand.u32 2147483648, %v10152_v34 }
 0x2e7   :  { %vm10256_vm8 = vcmp.eq.f32.partialorder %v1068_v36, 8.507059e+37 }
 0x2e8   :  { %1184 = vrot.lane.b32.xlu2 %v1010_v35, %s9512_s29 }
 0x2e9   :  { %v10158_v42 = vpop.eup %8625 }
 0x2ea   :  { %v8628_v44 = vpop.eup %8627  ;;  %v1045_v50 = vmul.f32 %v10158_v42, %v10147_v29  ;;  %vm1050_vm15 = vweird.f32 %v10158_v42 }
 0x2eb   :  { %v10170_v47 = vadd.f32 1.0, %v8628_v44  ;;  %vm10243_vm12 = vmor %vm1049_vm13, %vm1050_vm15  ;;  %vm1109_vm13 = vweird.f32 %v10160_v43 }
 0x2ec   :  { %v1046_v18 = vsub.f32 1.0, %v1045_v50 }
 0x2ee   :  { %766 = vrot.lane.b32.xlu1 %v10013_v45, %s9512_s29  ;;  %v8358_v45 = vmul.f32 -1.442695, %v1010_v35  ;;  %v1047_v1 = vmul.f32 %v10158_v42, %v1046_v18  ;;  %v1083_v18 = vand.u32 2147483647, %v10152_v34 }
 0x2f0   :  { %8629 = vpow2.f32 %v8358_v45  ;;  %v1048_v50 = vadd.f32 %v10158_v42, %v1047_v1  ;;  %vm10270_vm6 = vcmp.eq.f32.partialorder %v1083_v18, 8.507059e+37 }
 0x2f1   :  { %8631 = vpow2.f32 %v8359_v37 }
 0x2f2   :  { %8633 = vrcp.f32 %v10150_v38 }
 0x2f3   :  { %8635 = vrcp.f32 %v10152_v34 }
 0x2f4   :  { %8637 = vrcp.f32 %v10156_v40 }
 0x2f5   :  { %8639 = vrcp.f32 %v10160_v43 }
 0x2f6   :  { %v8630_v49 = vpop.eup %8629  ;;  %8641 = vrcp.f32 %v10170_v47 }
 0x2f7   :  { %v8632_v51 = vpop.eup %8631  ;;  %v10174_v56 = vadd.f32 1.0, %v8630_v49 }
 0x2f8   :  { %v10172_v28 = vpop.eup %8633  ;;  %v10190_v62 = vadd.f32 1.0, %v8632_v51 }
 0x2f9   :  { %v10181_v55 = vpop.eup %8635  ;;  %v1060_v63 = vmul.f32 %v10172_v28, %v10150_v38  ;;  %8643 = vrcp.f32 %v10174_v56  ;;  %vm1065_vm15 = vweird.f32 %v10172_v28 }
 0x2fa   :  { %v10187_v54 = vpop.eup %8637  ;;  %v1075_v46 = vmul.f32 %v10181_v55, %v10152_v34  ;;  %8645 = vrcp.f32 %v10190_v62  ;;  %vm1080_vm5 = vweird.f32 %v10181_v55  ;;  %vm10288_vm4 = vmor %vm1064_vm9, %vm1065_vm15 }
 0x2fb   :  { %v10198_v35 = vpop.eup %8639  ;;  %v1090_v59 = vmul.f32 %v10187_v54, %v10156_v40  ;;  %v1061_v45 = vsub.f32 1.0, %v1060_v63  ;;  %vm10306_vm9 = vmor %vm1079_vm11, %vm1080_vm5  ;;  %vm1124_vm11 = vweird.f32 %v10170_v47 }
 0x2fc   :  { %v1105_v33 = vmul.f32 %v10198_v35, %v10160_v43  ;;  %v1076_v37 = vsub.f32 1.0, %v1075_v46  ;;  %v10219_v31 = vpop.eup %8641  ;;  %vm1110_vm2 = vweird.f32 %v10198_v35 }
 0x2fd   :  { %v1091_v51 = vsub.f32 1.0, %v1090_v59  ;;  %v1062_v63 = vmul.f32 %v10172_v28, %v1061_v45  ;;  %v1098_v59 = vand.u32 2147483647, %v10156_v40  ;;  %vm10341_vm5 = vmor %vm1109_vm13, %vm1110_vm2 }
 0x2fe   :  { %v1077_v1 = vmul.f32 %v10181_v55, %v1076_v37 }
 0x2ff   :  { %v1092_v45 = vmul.f32 %v10187_v54, %v1091_v51  ;;  %v1063_v36 = vadd.f32 %v10172_v28, %v1062_v63 }
 0x300   :  { %v1078_v46 = vadd.f32 %v10181_v55, %v1077_v1 }
 0x301   :  { %v1093_v63 = vadd.f32 %v10187_v54, %v1092_v45  ;;  %v1067_v38 = vsel %vm10288_vm4, %v10172_v28, %v1063_v36  ;;  %v1115_v45 = vand.u32 2147483648, %v10160_v43 }
 0x332   :  { %v10165_v48 = vpop.permute.xlu2 %1174 }
 0x33a   :  { %v1179_v5 = vpop.permute.xlu2 %1178 }
 0x33b   :  { %v1191_v4 = vrot.slane %v1179_v5, 1  ;;  %v1120_v5 = vmul.f32 %v10219_v31, %v10170_v47 }
 0x33d   :  { %v1121_v9 = vsub.f32 1.0, %v1120_v5 }
 0x342   :  { %v1185_v51 = vpop.permute.xlu2 %1184 }
 0x348   :  { %v10143_v0 = vpop.permute.xlu1 %1172 }
 0x349   :  { %v1188_v61 = vrot.slane %v10143_v0, 1  ;;  %v1086_v0 = vor.u32 1.1754944e-38, %v1085_v60 }
 0x34b   :  { %8647 = vtanh.f32 %v1188_v61  ;;  %v1106_v61 = vsub.f32 1.0, %v1105_v33  ;;  %v1100_v33 = vand.u32 2147483648, %v10156_v40 }
 0x34d   :  { %v1101_v34 = vor.u32 1.1754944e-38, %v1100_v33 }
 0x350   :  { %v10145_v27 = vpop.permute.xlu1 %1176 }
 0x358   :  { %v10154_v39 = vpop.permute.xlu1 %1182 }
 0x360   :  { %v767_v52 = vpop.permute.xlu1 %766 }
 0x361   :  { %v10179_v57 = vsel %vm741_vm10, %v767_v52, 0.0  ;;  %v10226_v52 = vpop.eup %8643  ;;  %vm1094_vm10 = vweird.f32 %v10156_v40  ;;  %v1122_v40 = vmul.f32 %v10219_v31, %v1121_v9 }
 0x362   :  { %1220 = vrot.lane.b32.xlu2 %v10179_v57, %s9512_s29  ;;  %v1214_v58 = vrot.slane %v10179_v57, 2  ;;  %v1213_v53 = vrot.slane %v10179_v57, 1  ;;  %v1215_v32 = vrot.slane %v10179_v57, 3  ;;  %v1217_v44 = vrot.slane %v10179_v57, 5 }
 0x363   :  { %v1216_v49 = vrot.slane %v10179_v57, 4  ;;  %v1135_v37 = vmul.f32 %v10226_v52, %v10174_v56  ;;  %vm1140_vm2 = vweird.f32 %v10226_v52 }
 0x364   :  { %1224 = vrot.lane.b32.xlu1 %v1214_v58, %s9512_s29  ;;  %1222 = vrot.lane.b32.xlu0 %v1213_v53, %s9512_s29  ;;  %v1189_v58 = vrot.slane %v10165_v48, 1  ;;  %v10229_v53 = vor.u32 1.1754944e-38, %v1070_v30  ;;  %v1190_v48 = vrot.slane %v10145_v27, 1  ;;  %v10251_v30 = vpop.eup %8645  ;;  %v1052_v27 = vsel %vm10243_vm12, %v10158_v42, %v1048_v50 }
 0x365   :  { %vm1095_vm12 = vweird.f32 %v10187_v54  ;;  %v1218_v42 = vrot.slane %v10179_v57, 6  ;;  %v1107_v50 = vmul.f32 %v10198_v35, %v1106_v61  ;;  %v1136_v41 = vsub.f32 1.0, %v1135_v37 }
 0x366   :  { %8649 = vtanh.f32 %v1189_v58  ;;  %v10277_v58 = vsel %vm10211_vm14, %v1056_v10, %v1052_v27  ;;  %vm10292_vm14 = vcmp.eq.f32.partialorder %v1098_v59, 8.507059e+37  ;;  %v1150_v59 = vmul.f32 %v10251_v30, %v10190_v62  ;;  %vm10318_vm4 = vmor %vm1094_vm10, %vm1095_vm12 }
 0x367   :  { %8651 = vtanh.f32 %v1191_v4  ;;  %v1219_v4 = vrot.slane %v10179_v57, 7  ;;  %v1108_v1 = vadd.f32 %v10198_v35, %v1107_v50  ;;  %v1113_v27 = vand.u32 2147483647, %v10160_v43 }
 0x368   :  { %8653 = vtanh.f32 %v1190_v48  ;;  %v1194_v48 = vrot.slane %v1185_v51, 1  ;;  %v10335_v33 = vsel %vm10256_vm8, %v10229_v53, %v1067_v38  ;;  %vm1125_vm10 = vweird.f32 %v10219_v31 }
 0x369   :  { %vm1139_vm8 = vweird.f32 %v10174_v56  ;;  %vm1114_vm13 = vcmp.eq.f32.partialorder %v1113_v27, 8.507059e+37 }
 0x36a   :  { %1226 = vrot.lane.b32.xlu2 %v1215_v32, %s9512_s29  ;;  %v1181_v32 = vpop.permute.xlu0 %1180  ;;  %vm10383_vm15 = vmor %vm1139_vm8, %vm1140_vm2  ;;  %vm14756_vm2 = vcmask 1041409   ;;  %vm14758_vm8 = vcmask 1045509  }
 0x36b   :  { %v1192_v22 = vrot.slane %v1181_v32, 1  ;;  %v1193_v32 = vrot.slane %v10154_v39, 1  ;;  %v1097_v39 = vsel %vm10318_vm4, %v10187_v54, %v1093_v63  ;;  %v1151_v54 = vsub.f32 1.0, %v1150_v59 }
 0x36c   :  { %1230 = vrot.lane.b32.xlu1 %v1217_v44, %s9512_s29  ;;  %1228 = vrot.lane.b32.xlu0 %v1216_v49, %s9512_s29  ;;  %v8648_v44 = vpop.eup %8647  ;;  %v10357_v53 = vsel %vm10292_vm14, %v1101_v34, %v1097_v39  ;;  %v1128_v49 = vand.u32 2147483647, %v10170_v47  ;;  %v1116_v63 = vor.u32 1.1754944e-38, %v1115_v45  ;;  %vm1154_vm4 = vweird.f32 %v10190_v62 }
 0x36d   :  { %v1252_v18 = vmul.f32 %v8648_v44, %v10277_v58  ;;  %v8650_v5 = vpop.eup %8649  ;;  %v1082_v44 = vsel %vm10306_vm9, %v10181_v55, %v1078_v46  ;;  %8655 = vtanh.f32 %v1192_v22  ;;  %v1112_v22 = vsel %vm10341_vm5, %v10198_v35, %v1108_v1 }
 0x36e   :  { %v8652_v37 = vpop.eup %8651  ;;  %8657 = vtanh.f32 %v1194_v48  ;;  %v1253_v9 = vmul.f32 %v8650_v5, %v10335_v33  ;;  %v10353_v43 = vsel %vm10270_vm6, %v1086_v0, %v1082_v44  ;;  %v1123_v35 = vadd.f32 %v10219_v31, %v1122_v40  ;;  %vm10374_vm6 = vmor %vm1124_vm11, %vm1125_vm10 }
 0x36f   :  { %v8654_v36 = vpop.eup %8653  ;;  %8659 = vtanh.f32 %v1193_v32  ;;  %v1255_v50 = vmul.f32 %v8652_v37, %v10357_v53  ;;  %v1143_v0 = vand.u32 2147483647, %v10174_v56  ;;  %v1152_v61 = vmul.f32 %v10251_v30, %v1151_v54 }
 0x370   :  { %v1254_v29 = vmul.f32 %v8654_v36, %v10353_v43  ;;  %v1127_v1 = vsel %vm10374_vm6, %v10219_v31, %v1123_v35  ;;  %vm1129_vm12 = vcmp.eq.f32.partialorder %v1128_v49, 8.507059e+37  ;;  %vm1155_vm9 = vweird.f32 %v10251_v30 }
 0x371   :  { %vm1144_vm14 = vcmp.eq.f32.partialorder %v1143_v0, 8.507059e+37  ;;  %v1153_v34 = vadd.f32 %v10251_v30, %v1152_v61  ;;  %v1160_v31 = vand.u32 2147483648, %v10190_v62  ;;  %v1158_v44 = vand.u32 2147483647, %v10190_v62  ;;  %vm1156_vm5 = vmor %vm1154_vm4, %vm1155_vm9 }
 0x372   :  { %1232 = vrot.lane.b32.xlu2 %v1218_v42, %s9512_s29  ;;  %v1137_v42 = vmul.f32 %v10226_v52, %v1136_v41  ;;  %v1187_v41 = vpop.permute.xlu0 %1186  ;;  %vm14757_vm6 = vcmask 1043459  }
 0x373   :  { %v1195_v46 = vrot.slane %v1187_v41, 1  ;;  %v8656_v48 = vpop.eup %8655  ;;  %v1157_v39 = vsel %vm1156_vm5, %v10251_v30, %v1153_v34  ;;  %vm1159_vm11 = vcmp.eq.f32.partialorder %v1158_v44, 8.507059e+37 }
 0x374   :  { %1234 = vrot.lane.b32.xlu0 %v1219_v4, %s9512_s29  ;;  %1268 = vrot.lane.b32.xlu1 %v1252_v18, %s9512_s29  ;;  %v1138_v51 = vadd.f32 %v10226_v52, %v1137_v42  ;;  %v1130_v4 = vand.u32 2147483648, %v10170_v47  ;;  %v1145_v18 = vand.u32 2147483648, %v10174_v56  ;;  %v8658_v60 = vpop.eup %8657  ;;  %v10387_v47 = vsel %vm1114_vm13, %v1116_v63, %v1112_v22 }
 0x375   :  { %v8660_v59 = vpop.eup %8659  ;;  %8661 = vtanh.f32 %v1195_v46  ;;  %v1256_v28 = vmul.f32 %v8656_v48, %v10387_v47  ;;  %v1161_v42 = vor.u32 1.1754944e-38, %v1160_v31  ;;  %vm14759_vm13 = vcmask 1044484  }
 0x376   :  { %v1142_v56 = vsel %vm10383_vm15, %v10226_v52, %v1138_v51  ;;  %v1131_v5 = vor.u32 1.1754944e-38, %v1130_v4  ;;  %v1146_v32 = vor.u32 1.1754944e-38, %v1145_v18  ;;  %v10416_v51 = vld [vmem:[#allocation1] sm:$0xff]  ;;  %vm14760_vm15 = vcmask 1046534  }
 0x377   :  { %v10411_v36 = vsel %vm1159_vm11, %v1161_v42, %v1157_v39 }
 0x378   :  { %v10398_v27 = vsel %vm1129_vm12, %v1131_v5, %v1127_v1  ;;  %v10400_v45 = vsel %vm1144_vm14, %v1146_v32, %v1142_v56  ;;  %vm14761_vm12 = vcmask 1046528  }
 0x379   :  { %v1257_v52 = vmul.f32 %v8660_v59, %v10398_v27  ;;  %v1258_v37 = vmul.f32 %v8658_v60, %v10400_v45 }
 0x37a   :  { %1270 = vrot.lane.b32.xlu2 %v1253_v9, %s9512_s29 }
 0x37b   :  { %v8662_v40 = vpop.eup %8661 }
 0x37c   :  { %1272 = vrot.lane.b32.xlu0 %v1254_v29, %s9512_s29  ;;  %1274 = vrot.lane.b32.xlu1 %v1255_v50, %s9512_s29  ;;  %v1259_v55 = vmul.f32 %v8662_v40, %v10411_v36 }
 0x382   :  { %1276 = vrot.lane.b32.xlu2 %v1256_v28, %s9512_s29 }
 0x384   :  { %1278 = vrot.lane.b32.xlu0 %v1257_v52, %s9512_s29  ;;  %1280 = vrot.lane.b32.xlu1 %v1258_v37, %s9512_s29 }
 0x38a   :  { %1282 = vrot.lane.b32.xlu2 %v1259_v55, %s9512_s29 }
 0x3bc   :  { %v1221_v41 = vpop.permute.xlu2 %1220 }
 0x3bd   :  { %v1244_v10 = vmul.f32 %v1221_v41, %v10277_v58 }
 0x3c4   :  { %v1227_v9 = vpop.permute.xlu2 %1226 }
 0x3c5   :  { %v1247_v59 = vmul.f32 %v1227_v9, %v10357_v53 }
 0x3cc   :  { %v1233_v22 = vpop.permute.xlu2 %1232 }
 0x3cd   :  { %v1250_v44 = vmul.f32 %v1233_v22, %v10400_v45  ;;  %v1318_v22 = vrot.slane %v10353_v43, 1 }
 0x3d4   :  { %v1271_v62 = vpop.permute.xlu2 %1270 }
 0x3d6   :  { %v1225_v54 = vpop.permute.xlu1 %1224  ;;  %v1223_v29 = vpop.permute.xlu0 %1222 }
 0x3d7   :  { %v1245_v50 = vmul.f32 %v1223_v29, %v10335_v33  ;;  %v1246_v5 = vmul.f32 %v1225_v54, %v10353_v43 }
 0x3d9   :  { %v1293_v35 = vadd.f32 %v1271_v62, %v1245_v50 }
 0x3db   :  { %8663 = vtanh.f32 %v1293_v35  ;;  %1384 = vst [vmem:[#allocation1 + $0x1] ss:$9 sm:$0xff] %v1293_v35 }
 0x3dc   :  { %v1277_v30 = vpop.permute.xlu2 %1276 }
 0x3de   :  { %v1231_v46 = vpop.permute.xlu1 %1230  ;;  %v1229_v49 = vpop.permute.xlu0 %1228 }
 0x3df   :  { %v1248_v4 = vmul.f32 %v1229_v49, %v10387_v47  ;;  %v1249_v39 = vmul.f32 %v1231_v46, %v10398_v27 }
 0x3e1   :  { %v8664_v18 = vpop.eup %8663  ;;  %v1296_v63 = vadd.f32 %v1277_v30, %v1248_v4  ;;  %v1317_v30 = vrot.slane %v10335_v33, 1 }
 0x3e2   :  { %1342 = vrot.lane.b32.xlu1 %v8664_v18, %s9512_s29  ;;  %v1321_v18 = vrot.slane %v10398_v27, 1  ;;  %v1319_v27 = vrot.slane %v10357_v53, 1 }
 0x3e3   :  { %8665 = vtanh.f32 %v1296_v63  ;;  %1390 = vst [vmem:[#allocation1 + $0x4] ss:$9 sm:$0xff] %v1296_v63 }
 0x3e4   :  { %v1283_v60 = vpop.permute.xlu2 %1282 }
 0x3e6   :  { %v1235_v0 = vpop.permute.xlu0 %1234  ;;  %v1269_v61 = vpop.permute.xlu1 %1268 }
 0x3e7   :  { %v1251_v48 = vmul.f32 %v1235_v0, %v10411_v36  ;;  %v1292_v38 = vadd.f32 %v1269_v61, %v1244_v10  ;;  %v1320_v0 = vrot.slane %v10387_v47, 1  ;;  %v1322_v47 = vrot.slane %v10400_v45, 1 }
 0x3e9   :  { %v8666_v1 = vpop.eup %8665  ;;  %v1299_v56 = vadd.f32 %v1283_v60, %v1251_v48  ;;  %8667 = vtanh.f32 %v1292_v38  ;;  %1382 = vst [vmem:[#allocation1] ss:$9 sm:$0xff] %v1292_v38  ;;  %v1316_v48 = vrot.slane %v10277_v58, 1  ;;  %v1323_v60 = vrot.slane %v10411_v36, 1 }
 0x3ea   :  { %1348 = vrot.lane.b32.xlu1 %v8666_v1, %s9512_s29 }
 0x3eb   :  { %8669 = vtanh.f32 %v1299_v56  ;;  %1396 = vst [vmem:[#allocation1 + $0x7] ss:$9 sm:$0xff] %v1299_v56 }
 0x3ee   :  { %v1273_v32 = vpop.permute.xlu0 %1272  ;;  %v1275_v28 = vpop.permute.xlu1 %1274 }
 0x3ef   :  { %v8668_v34 = vpop.eup %8667  ;;  %v1294_v31 = vadd.f32 %v1273_v32, %v1246_v5  ;;  %v1295_v52 = vadd.f32 %v1275_v28, %v1247_v59 }
 0x3f0   :  { %1340 = vrot.lane.b32.xlu0 %v8668_v34, %s9512_s29  ;;  %v9525_v34 = vmov 6  }
 0x3f1   :  { %v8670_v37 = vpop.eup %8669  ;;  %8671 = vtanh.f32 %v1294_v31  ;;  %1386 = vst [vmem:[#allocation1 + $0x2] ss:$9 sm:$0xff] %v1294_v31  ;;  %v10448_v58 = vsel %vm308_vm7, 1, %v9525_v34 }
 0x3f2   :  { %8673 = vtanh.f32 %v1295_v52  ;;  %1388 = vst [vmem:[#allocation1 + $0x3] ss:$9 sm:$0xff] %v1295_v52  ;;  %1354 = vrot.lane.b32.xlu1 %v8670_v37, %s9512_s29  ;;  %vm1373_vm10 = vcmp.gt.s32.totalorder %v10044_v12, %v10448_v58 }
 0x3f6   :  { %v1279_v40 = vpop.permute.xlu0 %1278  ;;  %v1281_v42 = vpop.permute.xlu1 %1280 }
 0x3f7   :  { %v8672_v55 = vpop.eup %8671  ;;  %v1297_v41 = vadd.f32 %v1279_v40, %v1249_v39  ;;  %v1298_v9 = vadd.f32 %v1281_v42, %v1250_v44  ;;  %v1556_v44 = vld [vmem:[#allocation2 + $0x32] ss:$8 sm:$0x3]  ;;  %v1558_v42 = vld [vmem:[#allocation2 + $0x42] ss:$8 sm:$0x3] }
 0x3f8   :  { %v8674_v62 = vpop.eup %8673  ;;  %1344 = vrot.lane.b32.xlu2 %v8672_v55, %s9512_s29  ;;  %v1560_v40 = vld [vmem:[#allocation2 + $0x52] ss:$8 sm:$0x3] }
 0x3f9   :  { %8675 = vtanh.f32 %v1297_v41  ;;  %1392 = vst [vmem:[#allocation1 + $0x5] ss:$9 sm:$0xff] %v1297_v41  ;;  %1346 = vrot.lane.b32.xlu0 %v8674_v62, %s9512_s29 }
 0x3fa   :  { %8677 = vtanh.f32 %v1298_v9  ;;  %1394 = vst [vmem:[#allocation1 + $0x6] ss:$9 sm:$0xff] %v1298_v9 }
 0x3ff   :  { %v8676_v54 = vpop.eup %8675 }
 0x400   :  { %v8678_v29 = vpop.eup %8677  ;;  %1350 = vrot.lane.b32.xlu2 %v8676_v54, %s9512_s29 }
 0x401   :  { %1352 = vrot.lane.b32.xlu0 %v8678_v29, %s9512_s29  ;;  %v10437_v46 = vld [vmem:[#allocation1] sm:$0xff] }
 0x452   :  { %v1345_v50 = vpop.permute.xlu2 %1344 }
 0x453   :  { %v10434_v35 = vmul.f32 %v1345_v50, %v1318_v22  ;;  %v1562_v22 = vld [vmem:[#allocation2 + $0x62] ss:$8 sm:$0x3] }
 0x454   :  { %v1343_v49 = vpop.permute.xlu1 %1342 }
 0x455   :  { %1414 = vst [vmem:[#allocation1 + $0x2] ss:$9 sm:$0xff] %v10434_v35  ;;  %v1365_v4 = vmul.f32 %v1343_v49, %v1317_v30 }
 0x457   :  { %1412 = vst [vmem:[#allocation1 + $0x1] ss:$9 sm:$0xff] %v1365_v4 }
 0x45a   :  { %v1351_v63 = vpop.permute.xlu2 %1350 }
 0x45b   :  { %v1369_v10 = vmul.f32 %v1351_v63, %v1321_v18 }
 0x45c   :  { %v1349_v61 = vpop.permute.xlu1 %1348 }
 0x45d   :  { %1420 = vst [vmem:[#allocation1 + $0x5] ss:$9 sm:$0xff] %v1369_v10  ;;  %v1368_v43 = vmul.f32 %v1349_v61, %v1320_v0 }
 0x45f   :  { %1418 = vst [vmem:[#allocation1 + $0x4] ss:$9 sm:$0xff] %v1368_v43 }
 0x462   :  { %v1341_v33 = vpop.permute.xlu0 %1340 }
 0x463   :  { %v1364_v38 = vmul.f32 %v1341_v33, %v1316_v48 }
 0x464   :  { %v1355_v1 = vpop.permute.xlu1 %1354 }
 0x465   :  { %1410 = vst [vmem:[#allocation1] ss:$9 sm:$0xff] %v1364_v38  ;;  %v1371_v56 = vmul.f32 %v1355_v1, %v1323_v60 }
 0x467   :  { %1424 = vst [vmem:[#allocation1 + $0x7] ss:$9 sm:$0xff] %v1371_v56 }
 0x46b   :  { %v1347_v59 = vpop.permute.xlu0 %1346 }
 0x46c   :  { %v1367_v5 = vmul.f32 %v1347_v59, %v1319_v27 }
 0x46e   :  { %1416 = vst [vmem:[#allocation1 + $0x3] ss:$9 sm:$0xff] %v1367_v5 }
 0x473   :  { %v1353_v32 = vpop.permute.xlu0 %1352 }
 0x474   :  { %v1370_v28 = vmul.f32 %v1353_v32, %v1322_v47 }
 0x476   :  { %1422 = vst [vmem:[#allocation1 + $0x6] ss:$9 sm:$0xff] %v1370_v28 }
 0x47d   :  { %v1425_v36 = vld [vmem:[#allocation1] sm:$0xff] }
 0x47e   :  { %1434 = vst [vmem:[#allocation1] ss:$9 sm:$0xff] %v1364_v38  ;;  %v10456_v53 = vsel %vm1373_vm10, %v1425_v36, %v10056_v3 }
 0x47f   :  { %1436 = vst [vmem:[#allocation1 + $0x1] ss:$9 sm:$0xff] %v1365_v4  ;;  %8360 = vmatmul.msk.f32.vlgmr.msra.gmra.mxu2 %vm203_vm0, %v10456_v53  ;;  %8361 = vmatmul.msk.f32.vlgmr.msra.gmra.mxu3 %vm203_vm0, %v10456_v53 }
 0x480   :  { %1438 = vst [vmem:[#allocation1 + $0x2] ss:$9 sm:$0xff] %v10434_v35  ;;  %3454 = vmatpush.msra.mxu2 %v10064_v6  ;;  %3474 = vmatpush.msra.mxu3 %v10067_v2 }
 0x481   :  { %1440 = vst [vmem:[#allocation1 + $0x3] ss:$9 sm:$0xff] %v1367_v5 }
 0x482   :  { %1442 = vst [vmem:[#allocation1 + $0x4] ss:$9 sm:$0xff] %v1368_v43  ;;  %3455 = vmatpush.msra.mxu2 %v10072_v7  ;;  %3475 = vmatpush.msra.mxu3 %v10075_v8  ;;  %v1550_v8 = vld [vmem:[#allocation2 + $0x2] ss:$8 sm:$0x3] }
 0x483   :  { %1444 = vst [vmem:[#allocation1 + $0x5] ss:$9 sm:$0xff] %v1369_v10 }
 0x484   :  { %1446 = vst [vmem:[#allocation1 + $0x6] ss:$9 sm:$0xff] %v1370_v28  ;;  %3456 = vmatpush.msra.mxu2 %v10080_v11  ;;  %3476 = vmatpush.msra.mxu3 %v10083_v13 }
 0x485   :  { %1448 = vst [vmem:[#allocation1 + $0x7] ss:$9 sm:$0xff] %v1371_v56 }
 0x486   :  { %3457 = vmatpush.msra.mxu2 %v10086_v14  ;;  %3477 = vmatpush.msra.mxu3 %v10089_v16 }
 0x488   :  { %3458 = vmatpush.msra.mxu2 %v10092_v17  ;;  %3478 = vmatpush.msra.mxu3 %v10095_v19 }
 0x48a   :  { %3459 = vmatpush.msra.mxu2 %v10098_v20  ;;  %3479 = vmatpush.msra.mxu3 %v10101_v21  ;;  %v1554_v20 = vld [vmem:[#allocation2 + $0x22] ss:$8 sm:$0x3]  ;;  %v1552_v21 = vld [vmem:[#allocation2 + $0x12] ss:$8 sm:$0x3] }
 0x48c   :  { %v10475_v3 = vld [vmem:[#allocation1] sm:$0xff]  ;;  %3460 = vmatpush.msra.mxu2 %v10106_v23  ;;  %3480 = vmatpush.msra.mxu3 %v10109_v24 }
 0x48d   :  { %1481 = vst [vmem:[#allocation1] ss:$9 sm:$0xff] %v1364_v38 }
 0x48e   :  { %1483 = vst [vmem:[#allocation1 + $0x1] ss:$9 sm:$0xff] %v1365_v4  ;;  %3461 = vmatpush.msra.mxu2 %v10114_v25  ;;  %3481 = vmatpush.msra.mxu3 %v10117_v26 }
 0x48f   :  { %1485 = vst [vmem:[#allocation1 + $0x2] ss:$9 sm:$0xff] %v10434_v35  ;;  %v1564_v35 = vld [vmem:[#allocation2 + $0x72] ss:$8 sm:$0x3] }
 0x490   :  { %1487 = vst [vmem:[#allocation1 + $0x3] ss:$9 sm:$0xff] %v1367_v5 }
 0x491   :  { %1489 = vst [vmem:[#allocation1 + $0x4] ss:$9 sm:$0xff] %v1368_v43 }
 0x492   :  { %1491 = vst [vmem:[#allocation1 + $0x5] ss:$9 sm:$0xff] %v1369_v10 }
 0x493   :  { %1493 = vst [vmem:[#allocation1 + $0x6] ss:$9 sm:$0xff] %v1370_v28 }
 0x494   :  { %1495 = vst [vmem:[#allocation1 + $0x7] ss:$9 sm:$0xff] %v1371_v56 }
 0x502   :  { %v1605_v6 = vpop.f32.mrf.mxu3  ;;  %v1585_v7 = vpop.f32.mrf.mxu2 }
 0x503   :  { %v1610_v2 = vrot.slane %v1605_v6, 7 }
 0x505   :  { %v1611_v11 = vsel %vm370_vm1, %v1585_v7, %v1610_v2  ;;  %v1614_v13 = vsel %vm375_vm3, %v1585_v7, %v1610_v2  ;;  %v1612_v14 = vsel %vm14756_vm2, %v1585_v7, %v1610_v2  ;;  %v1616_v23 = vsel %vm14757_vm6, %v1585_v7, %v1610_v2 }
 0x506   :  { %v1634_v16 = vadd.f32 %v1611_v11, %v1550_v8  ;;  %v1615_v17 = vrot.slane %v1614_v13, 2  ;;  %v1613_v19 = vrot.slane %v1612_v14, 1  ;;  %v1620_v26 = vsel %vm14758_vm8, %v1585_v7, %v1610_v2 }
 0x507   :  { %v1618_v45 = vsel %vm14759_vm13, %v1585_v7, %v1610_v2  ;;  %v1617_v31 = vrot.slane %v1616_v23, 3  ;;  %v1621_v52 = vrot.slane %v1620_v26, 5  ;;  %v1622_v55 = vsel %vm14760_vm15, %v1585_v7, %v1610_v2 }
 0x508   :  { %1802 = vrot.lane.b32.xlu2 %v1634_v16, %s9512_s29  ;;  %v1636_v24 = vadd.f32 %v1615_v17, %v1554_v20  ;;  %v1635_v25 = vadd.f32 %v1613_v19, %v1552_v21  ;;  %v1619_v37 = vrot.slane %v1618_v45, 4  ;;  %v1624_v62 = vsel %vm14761_vm12, %v1610_v2, %v1585_v7 }
 0x509   :  { %v1637_v39 = vadd.f32 %v1617_v31, %v1556_v44  ;;  %v1639_v41 = vadd.f32 %v1621_v52, %v1560_v40  ;;  %v1623_v54 = vrot.slane %v1622_v55, 6  ;;  %v1625_v29 = vrot.slane %v1624_v62, 7 }
 0x50a   :  { %1806 = vrot.lane.b32.xlu1 %v1636_v24, %s9512_s29  ;;  %1804 = vrot.lane.b32.xlu0 %v1635_v25, %s9512_s29  ;;  %v1638_v9 = vadd.f32 %v1619_v37, %v1558_v42  ;;  %v8362_v49 = vmul.f32 -1.442695, %v1634_v16  ;;  %v8364_v4 = vmul.f32 -1.442695, %v1636_v24  ;;  %v8363_v18 = vmul.f32 -1.442695, %v1635_v25 }
 0x50b   :  { %v1640_v50 = vadd.f32 %v1623_v54, %v1562_v22  ;;  %v1641_v30 = vadd.f32 %v1625_v29, %v1564_v35  ;;  %v8365_v63 = vmul.f32 -1.442695, %v1637_v39  ;;  %v8367_v33 = vmul.f32 -1.442695, %v1639_v41 }
 0x50c   :  { %8679 = vpow2.f32 %v8362_v49  ;;  %v8366_v43 = vmul.f32 -1.442695, %v1638_v9 }
 0x50d   :  { %8681 = vpow2.f32 %v8364_v4  ;;  %v8369_v5 = vmul.f32 -1.442695, %v1641_v30 }
 0x50e   :  { %8683 = vpow2.f32 %v8363_v18 }
 0x50f   :  { %8685 = vpow2.f32 %v8365_v63 }
 0x510   :  { %1808 = vrot.lane.b32.xlu2 %v1637_v39, %s9512_s29 }
 0x512   :  { %1812 = vrot.lane.b32.xlu1 %v1639_v41, %s9512_s29  ;;  %1810 = vrot.lane.b32.xlu0 %v1638_v9, %s9512_s29  ;;  %v8680_v10 = vpop.eup %8679 }
 0x513   :  { %v10502_v61 = vadd.f32 1.0, %v8680_v10  ;;  %v8682_v48 = vpop.eup %8681 }
 0x514   :  { %v8684_v38 = vpop.eup %8683  ;;  %v10505_v1 = vadd.f32 1.0, %v8682_v48 }
 0x515   :  { %v8686_v60 = vpop.eup %8685  ;;  %8687 = vrcp.f32 %v10502_v61  ;;  %v10507_v56 = vadd.f32 1.0, %v8684_v38  ;;  %v1683_v58 = vand.u32 2147483647, %v10502_v61  ;;  %v1685_v25 = vand.u32 2147483648, %v10502_v61 }
 0x516   :  { %8689 = vpow2.f32 %v8366_v43  ;;  %v10509_v27 = vadd.f32 1.0, %v8686_v60  ;;  %vm1679_vm14 = vweird.f32 %v10502_v61  ;;  %v1715_v62 = vand.u32 2147483648, %v10505_v1 }
 0x517   :  { %8691 = vpow2.f32 %v8367_v33  ;;  %v1700_v39 = vand.u32 2147483648, %v10507_v56  ;;  %vm10561_vm9 = vcmp.eq.f32.partialorder %v1683_v58, 8.507059e+37  ;;  %v1686_v41 = vor.u32 1.1754944e-38, %v1685_v25 }
 0x518   :  { %1814 = vrot.lane.b32.xlu2 %v1640_v50, %s9512_s29  ;;  %v1698_v29 = vand.u32 2147483647, %v10507_v56  ;;  %vm1709_vm4 = vweird.f32 %v10505_v1  ;;  %v1713_v22 = vand.u32 2147483647, %v10505_v1  ;;  %vm1694_vm11 = vweird.f32 %v10507_v56 }
 0x519   :  { %v10582_v10 = vor.u32 1.1754944e-38, %v1700_v39  ;;  %v1716_v38 = vor.u32 1.1754944e-38, %v1715_v62  ;;  %vm1724_vm2 = vweird.f32 %v10509_v27 }
 0x51a   :  { %1398 = vrot.lane.b32.xlu1 %v10437_v46, %s9512_s29  ;;  %1816 = vrot.lane.b32.xlu0 %v1641_v30, %s9512_s29  ;;  %v8368_v46 = vmul.f32 -1.442695, %v1640_v50  ;;  %vm10603_vm6 = vcmp.eq.f32.partialorder %v1698_v29, 8.507059e+37  ;;  %vm10608_vm13 = vcmp.eq.f32.partialorder %v1713_v22, 8.507059e+37 }
 0x51b   :  { %v10514_v47 = vpop.eup %8687 }
 0x51c   :  { %8693 = vpow2.f32 %v8368_v46  ;;  %v8690_v32 = vpop.eup %8689  ;;  %v1675_v6 = vmul.f32 %v10514_v47, %v10502_v61  ;;  %vm1680_vm5 = vweird.f32 %v10514_v47 }
 0x51d   :  { %8695 = vrcp.f32 %v10505_v1  ;;  %v8692_v28 = vpop.eup %8691  ;;  %v10520_v2 = vadd.f32 1.0, %v8690_v32 }
 0x51e   :  { %8697 = vrcp.f32 %v10507_v56  ;;  %v10524_v8 = vadd.f32 1.0, %v8692_v28  ;;  %v1676_v21 = vsub.f32 1.0, %v1675_v6  ;;  %v1728_v28 = vand.u32 2147483647, %v10509_v27 }
 0x51f   :  { %8699 = vrcp.f32 %v10509_v27 }
 0x520   :  { %8701 = vpow2.f32 %v8369_v5  ;;  %v1677_v52 = vmul.f32 %v10514_v47, %v1676_v21 }
 0x521   :  { %8703 = vrcp.f32 %v10520_v2 }
 0x522   :  { %v8694_v36 = vpop.eup %8693  ;;  %8705 = vrcp.f32 %v10524_v8  ;;  %v1678_v4 = vadd.f32 %v10514_v47, %v1677_v52 }
 0x523   :  { %v10522_v7 = vpop.eup %8695  ;;  %v10528_v14 = vadd.f32 1.0, %v8694_v36 }
 0x524   :  { %v10526_v13 = vpop.eup %8697  ;;  %v1705_v23 = vmul.f32 %v10522_v7, %v10505_v1  ;;  %vm1710_vm8 = vweird.f32 %v10522_v7 }
 0x525   :  { %v10536_v17 = vpop.eup %8699  ;;  %v1690_v26 = vmul.f32 %v10526_v13, %v10507_v56  ;;  %8707 = vrcp.f32 %v10528_v14  ;;  %vm1695_vm15 = vweird.f32 %v10526_v13 }
 0x526   :  { %v8702_v24 = vpop.eup %8701  ;;  %v1720_v31 = vmul.f32 %v10536_v17, %v10509_v27  ;;  %v1706_v40 = vsub.f32 1.0, %v1705_v23  ;;  %vm1725_vm12 = vweird.f32 %v10536_v17 }
 0x527   :  { %v10556_v37 = vadd.f32 1.0, %v8702_v24  ;;  %v1691_v9 = vsub.f32 1.0, %v1690_v26  ;;  %v10566_v54 = vpop.eup %8703 }
 0x528   :  { %v1721_v50 = vsub.f32 1.0, %v1720_v31  ;;  %v10571_v35 = vpop.eup %8705  ;;  %v1707_v43 = vmul.f32 %v10522_v7, %v1706_v40  ;;  %v1735_v46 = vmul.f32 %v10566_v54, %v10520_v2 }
 0x529   :  { %v1692_v33 = vmul.f32 %v10526_v13, %v1691_v9  ;;  %v1750_v61 = vmul.f32 %v10571_v35, %v10524_v8 }
 0x52a   :  { %v1722_v32 = vmul.f32 %v10536_v17, %v1721_v50  ;;  %v1736_v24 = vsub.f32 1.0, %v1735_v46 }
 0x52b   :  { %v10579_v18 = vpop.eup %8707  ;;  %v1693_v23 = vadd.f32 %v10526_v13, %v1692_v33 }
 0x52c   :  { %v1723_v26 = vadd.f32 %v10536_v17, %v1722_v32  ;;  %v1737_v9 = vmul.f32 %v10566_v54, %v1736_v24 }
 0x52e   :  { %v1738_v46 = vadd.f32 %v10566_v54, %v1737_v9 }
 0x562   :  { %v1803_v34 = vpop.permute.xlu2 %1802 }
 0x563   :  { %v1818_v45 = vrot.slane %v1803_v34, 1 }
 0x565   :  { %8709 = vtanh.f32 %v1818_v45 }
 0x566   :  { %8711 = vrcp.f32 %v10556_v37 }
 0x56a   :  { %v1809_v44 = vpop.permute.xlu2 %1808 }
 0x56b   :  { %v1821_v48 = vrot.slane %v1809_v44, 1  ;;  %v1751_v44 = vsub.f32 1.0, %v1750_v61  ;;  %v1775_v61 = vand.u32 2147483648, %v10528_v14 }
 0x572   :  { %v1815_v58 = vpop.permute.xlu2 %1814 }
 0x57c   :  { %v10500_v0 = vpop.permute.xlu1 %1806 }
 0x57d   :  { %v1820_v60 = vrot.slane %v10500_v0, 1  ;;  %v1760_v0 = vand.u32 2147483648, %v10524_v8 }
 0x584   :  { %v10511_v59 = vpop.permute.xlu1 %1812 }
 0x585   :  { %v1823_v29 = vrot.slane %v10511_v59, 1  ;;  %v1752_v59 = vmul.f32 %v10571_v35, %v1751_v44 }
 0x58c   :  { %v1399_v11 = vpop.permute.xlu1 %1398 }
 0x58d   :  { %v10534_v16 = vsel %vm1373_vm10, %v1399_v11, %v10179_v57  ;;  %v1805_v57 = vpop.permute.xlu0 %1804  ;;  %vm10593_vm10 = vmor %vm1679_vm14, %vm1680_vm5  ;;  %v1765_v11 = vmul.f32 %v10579_v18, %v10528_v14  ;;  %vm10651_vm5 = vcmp.eq.f32.partialorder %v1728_v28, 8.507059e+37  ;;  %v1753_v28 = vadd.f32 %v10571_v35, %v1752_v59 }
 0x58e   :  { %1850 = vrot.lane.b32.xlu2 %v10534_v16, %s9512_s29  ;;  %v1844_v19 = vrot.slane %v10534_v16, 2  ;;  %v1843_v20 = vrot.slane %v10534_v16, 1  ;;  %v1845_v42 = vrot.slane %v10534_v16, 3  ;;  %v1847_v30 = vrot.slane %v10534_v16, 5  ;;  %vm10636_vm14 = vmor %vm1709_vm4, %vm1710_vm8 }
 0x58f   :  { %v1846_v49 = vrot.slane %v10534_v16, 4  ;;  %v1819_v63 = vrot.slane %v1805_v57, 1  ;;  %v1682_v36 = vsel %vm10593_vm10, %v10514_v47, %v1678_v4  ;;  %v1708_v47 = vadd.f32 %v10522_v7, %v1707_v43 }
 0x590   :  { %1854 = vrot.lane.b32.xlu1 %v1844_v19, %s9512_s29  ;;  %1852 = vrot.lane.b32.xlu0 %v1843_v20, %s9512_s29  ;;  %v8710_v19 = vpop.eup %8709  ;;  %v1730_v20 = vand.u32 2147483648, %v10509_v27  ;;  %v1848_v21 = vrot.slane %v10534_v16, 6  ;;  %v10625_v25 = vsel %vm10561_vm9, %v1686_v41, %v1682_v36  ;;  %v1849_v45 = vrot.slane %v10534_v16, 7  ;;  %vm10644_vm9 = vmor %vm1694_vm11, %vm1695_vm15 }
 0x591   :  { %8713 = vtanh.f32 %v1819_v63  ;;  %v10621_v57 = vpop.eup %8711  ;;  %v1882_v31 = vmul.f32 %v8710_v19, %v10625_v25  ;;  %v1766_v39 = vsub.f32 1.0, %v1765_v11  ;;  %v1712_v55 = vsel %vm10636_vm14, %v10522_v7, %v1708_v47  ;;  %vm10669_vm11 = vmor %vm1724_vm2, %vm1725_vm12 }
 0x592   :  { %8715 = vtanh.f32 %v1821_v48  ;;  %vm1739_vm4 = vweird.f32 %v10520_v2  ;;  %v1824_v41 = vrot.slane %v1815_v58, 1  ;;  %v1697_v56 = vsel %vm10644_vm9, %v10526_v13, %v1693_v23 }
 0x593   :  { %8717 = vtanh.f32 %v1820_v60  ;;  %v1780_v7 = vmul.f32 %v10621_v57, %v10556_v37  ;;  %v1731_v50 = vor.u32 1.1754944e-38, %v1730_v20  ;;  %v1745_v13 = vand.u32 2147483648, %v10520_v2 }
 0x594   :  { %v1727_v4 = vsel %vm10669_vm11, %v10536_v17, %v1723_v26  ;;  %vm1740_vm10 = vweird.f32 %v10566_v54  ;;  %v1767_v27 = vmul.f32 %v10579_v18, %v1766_v39  ;;  %v10684_v43 = vsel %vm10603_vm6, %v10582_v10, %v1697_v56 }
 0x595   :  { %v1811_v34 = vpop.permute.xlu0 %1810  ;;  %v10688_v48 = vsel %vm10608_vm13, %v1716_v38, %v1712_v55  ;;  %vm1755_vm2 = vweird.f32 %v10571_v35  ;;  %v1781_v60 = vsub.f32 1.0, %v1780_v7  ;;  %v10695_v5 = vsel %vm10651_vm5, %v1731_v50, %v1727_v4  ;;  %vm10708_vm8 = vmor %vm1739_vm4, %vm1740_vm10 }
 0x596   :  { %1856 = vrot.lane.b32.xlu2 %v1845_v42, %s9512_s29  ;;  %v1822_v40 = vrot.slane %v1811_v34, 1  ;;  %v1758_v10 = vand.u32 2147483647, %v10524_v8  ;;  %vm1770_vm6 = vweird.f32 %v10579_v18  ;;  %v1768_v34 = vadd.f32 %v10579_v18, %v1767_v27 }
 0x597   :  { %v8714_v62 = vpop.eup %8713  ;;  %vm1754_vm13 = vweird.f32 %v10524_v8  ;;  %v1742_v11 = vsel %vm10708_vm8, %v10566_v54, %v1738_v46  ;;  %vm1769_vm12 = vweird.f32 %v10528_v14  ;;  %v1773_v8 = vand.u32 2147483647, %v10528_v14 }
 0x598   :  { %1860 = vrot.lane.b32.xlu1 %v1847_v30, %s9512_s29  ;;  %1858 = vrot.lane.b32.xlu0 %v1846_v49, %s9512_s29  ;;  %v1743_v30 = vand.u32 2147483647, %v10520_v2  ;;  %v8716_v49 = vpop.eup %8715  ;;  %8719 = vtanh.f32 %v1822_v40  ;;  %v1883_v33 = vmul.f32 %v8714_v62, %v10684_v43  ;;  %vm10722_vm15 = vmor %vm1754_vm13, %vm1755_vm2  ;;  %v1782_v19 = vmul.f32 %v10621_v57, %v1781_v60 }
 0x599   :  { %v8718_v63 = vpop.eup %8717  ;;  %8721 = vtanh.f32 %v1824_v41  ;;  %v1885_v32 = vmul.f32 %v8716_v49, %v10695_v5  ;;  %v1746_v20 = vor.u32 1.1754944e-38, %v1745_v13  ;;  %vm10731_vm14 = vmor %vm1769_vm12, %vm1770_vm6  ;;  %v1757_v23 = vsel %vm10722_vm15, %v10571_v35, %v1753_v28  ;;  %v10764_v49 = vld [vmem:[#allocation1] sm:$0xff] }
 0x59a   :  { %8723 = vtanh.f32 %v1823_v29  ;;  %v1884_v38 = vmul.f32 %v8718_v63, %v10688_v48  ;;  %vm1744_vm9 = vcmp.eq.f32.partialorder %v1743_v30, 8.507059e+37  ;;  %vm1759_vm5 = vcmp.eq.f32.partialorder %v1758_v10, 8.507059e+37 }
 0x59b   :  { %v1772_v14 = vsel %vm10731_vm14, %v10579_v18, %v1768_v34  ;;  %v10741_v58 = vsel %vm1744_vm9, %v1746_v20, %v1742_v11  ;;  %v1761_v26 = vor.u32 1.1754944e-38, %v1760_v0  ;;  %vm1774_vm4 = vcmp.eq.f32.partialorder %v1773_v8, 8.507059e+37 }
 0x59c   :  { %v1783_v52 = vadd.f32 %v10621_v57, %v1782_v19  ;;  %vm1785_vm11 = vweird.f32 %v10621_v57  ;;  %v1790_v39 = vand.u32 2147483648, %v10556_v37  ;;  %vm1784_vm10 = vweird.f32 %v10556_v37 }
 0x59d   :  { %v1817_v17 = vpop.permute.xlu0 %1816  ;;  %v10746_v44 = vsel %vm1759_vm5, %v1761_v26, %v1757_v23  ;;  %v1788_v42 = vand.u32 2147483647, %v10556_v37  ;;  %vm1786_vm2 = vmor %vm1784_vm10, %vm1785_vm11  ;;  %vm14784_vm13 = vcmask 1041409   ;;  %vm14785_vm15 = vcmask 1043459  }
 0x59e   :  { %1862 = vrot.lane.b32.xlu2 %v1848_v21, %s9512_s29  ;;  %v1825_v36 = vrot.slane %v1817_v17, 1  ;;  %v8720_v47 = vpop.eup %8719  ;;  %v1787_v55 = vsel %vm1786_vm2, %v10621_v57, %v1783_v52  ;;  %v1791_v41 = vor.u32 1.1754944e-38, %v1790_v39  ;;  %v1948_v52 = vrot.slane %v10688_v48, 1 }
 0x59f   :  { %v8722_v54 = vpop.eup %8721  ;;  %vm1789_vm6 = vcmp.eq.f32.partialorder %v1788_v42, 8.507059e+37  ;;  %vm14786_vm12 = vcmask 1045509   ;;  %vm14787_vm14 = vcmask 1044484   ;;  %vm14788_vm9 = vcmask 1046534  }
 0x5a0   :  { %1864 = vrot.lane.b32.xlu0 %v1849_v45, %s9512_s29  ;;  %1898 = vrot.lane.b32.xlu1 %v1882_v31, %s9512_s29  ;;  %v8724_v24 = vpop.eup %8723  ;;  %8725 = vtanh.f32 %v1825_v36  ;;  %v1776_v45 = vor.u32 1.1754944e-38, %v1775_v61  ;;  %v1886_v31 = vmul.f32 %v8720_v47, %v10741_v58  ;;  %v10759_v56 = vsel %vm1789_vm6, %v1791_v41, %v1787_v55 }
 0x5a1   :  { %v1887_v18 = vmul.f32 %v8724_v24, %v10746_v44  ;;  %v1951_v41 = vrot.slane %v10746_v44, 1  ;;  %vm14789_vm5 = vcmask 1046528  }
 0x5a2   :  { %v10748_v35 = vsel %vm1774_vm4, %v1776_v45, %v1772_v14 }
 0x5a3   :  { %v1888_v40 = vmul.f32 %v8722_v54, %v10748_v35 }
 0x5a6   :  { %1900 = vrot.lane.b32.xlu2 %v1883_v33, %s9512_s29  ;;  %v8726_v1 = vpop.eup %8725 }
 0x5a7   :  { %v1889_v9 = vmul.f32 %v8726_v1, %v10759_v56 }
 0x5a8   :  { %1902 = vrot.lane.b32.xlu0 %v1884_v38, %s9512_s29  ;;  %1904 = vrot.lane.b32.xlu1 %v1885_v32, %s9512_s29 }
 0x5ae   :  { %1906 = vrot.lane.b32.xlu2 %v1886_v31, %s9512_s29 }
 0x5b0   :  { %1908 = vrot.lane.b32.xlu0 %v1887_v18, %s9512_s29  ;;  %1910 = vrot.lane.b32.xlu1 %v1888_v40, %s9512_s29  ;;  %v1947_v40 = vrot.slane %v10684_v43, 1 }
 0x5b6   :  { %1912 = vrot.lane.b32.xlu2 %v1889_v9, %s9512_s29 }
 0x5e8   :  { %v1851_v7 = vpop.permute.xlu2 %1850 }
 0x5e9   :  { %v1874_v33 = vmul.f32 %v1851_v7, %v10625_v25 }
 0x5f0   :  { %v1857_v62 = vpop.permute.xlu2 %1856 }
 0x5f1   :  { %v1877_v36 = vmul.f32 %v1857_v62, %v10695_v5 }
 0x5f8   :  { %v1863_v29 = vpop.permute.xlu2 %1862 }
 0x5f9   :  { %v1880_v47 = vmul.f32 %v1863_v29, %v10748_v35  ;;  %v1946_v29 = vrot.slane %v10625_v25, 1  ;;  %v9526_v25 = vmov 5  }
 0x600   :  { %v1901_v37 = vpop.permute.xlu2 %1900 }
 0x602   :  { %v1855_v22 = vpop.permute.xlu1 %1854  ;;  %v1853_v50 = vpop.permute.xlu0 %1852 }
 0x603   :  { %v1875_v30 = vmul.f32 %v1853_v50, %v10684_v43  ;;  %v1876_v6 = vmul.f32 %v1855_v22, %v10688_v48  ;;  %v1950_v48 = vrot.slane %v10741_v58, 1  ;;  %v1953_v50 = vrot.slane %v10759_v56, 1 }
 0x605   :  { %v1923_v13 = vadd.f32 %v1901_v37, %v1875_v30 }
 0x607   :  { %8727 = vtanh.f32 %v1923_v13  ;;  %2014 = vst [vmem:[#allocation1 + $0x1] ss:$9 sm:$0xff] %v1923_v13 }
 0x608   :  { %v1907_v57 = vpop.permute.xlu2 %1906 }
 0x60a   :  { %v1861_v4 = vpop.permute.xlu1 %1860  ;;  %v1859_v59 = vpop.permute.xlu0 %1858 }
 0x60b   :  { %v1878_v27 = vmul.f32 %v1859_v59, %v10741_v58  ;;  %v1879_v20 = vmul.f32 %v1861_v4, %v10746_v44  ;;  %v1949_v58 = vrot.slane %v10695_v5, 1  ;;  %v1952_v4 = vrot.slane %v10748_v35, 1  ;;  %v9367_v35 = vld [vmem:[#allocation10 + $0x78] sm:$0xff] }
 0x60d   :  { %v8728_v63 = vpop.eup %8727  ;;  %v1926_v17 = vadd.f32 %v1907_v57, %v1878_v27 }
 0x60e   :  { %1972 = vrot.lane.b32.xlu1 %v8728_v63, %s9512_s29 }
 0x60f   :  { %8729 = vtanh.f32 %v1926_v17  ;;  %2020 = vst [vmem:[#allocation1 + $0x4] ss:$9 sm:$0xff] %v1926_v17  ;;  %v9368_v17 = vld [vmem:[#allocation10 + $0x70] sm:$0xff] }
 0x610   :  { %v1913_v32 = vpop.permute.xlu2 %1912 }
 0x612   :  { %v1865_v46 = vpop.permute.xlu0 %1864  ;;  %v1899_v60 = vpop.permute.xlu1 %1898 }
 0x613   :  { %v1881_v10 = vmul.f32 %v1865_v46, %v10759_v56  ;;  %v1922_v38 = vadd.f32 %v1899_v60, %v1874_v33  ;;  %v10808_v56 = vsel %vm308_vm7, 2, %v9526_v25  ;;  %v9369_v33 = vld [vmem:[#allocation10 + $0x68] sm:$0xff]  ;;  %v9371_v46 = vld [vmem:[#allocation10 + $0x58] sm:$0xff]  ;;  %v9372_v60 = vld [vmem:[#allocation10 + $0x50] sm:$0xff] }
 0x614   :  { %vm2003_vm8 = vcmp.gt.s32.totalorder %v10044_v12, %v10808_v56 }
 0x615   :  { %v8730_v28 = vpop.eup %8729  ;;  %v1929_v34 = vadd.f32 %v1913_v32, %v1881_v10  ;;  %8731 = vtanh.f32 %v1922_v38  ;;  %2012 = vst [vmem:[#allocation1] ss:$9 sm:$0xff] %v1922_v38  ;;  %v9373_v10 = vld [vmem:[#allocation10 + $0x48] sm:$0xff]  ;;  %v9374_v38 = vld [vmem:[#allocation10 + $0x40] sm:$0xff]  ;;  %v9375_v32 = vld [vmem:[#allocation10 + $0x38] sm:$0xff] }
 0x616   :  { %1978 = vrot.lane.b32.xlu1 %v8730_v28, %s9512_s29  ;;  %v9376_v28 = vld [vmem:[#allocation10 + $0x30] sm:$0xff] }
 0x617   :  { %8733 = vtanh.f32 %v1929_v34  ;;  %2026 = vst [vmem:[#allocation1 + $0x7] ss:$9 sm:$0xff] %v1929_v34  ;;  %v9377_v34 = vld [vmem:[#allocation10 + $0x28] sm:$0xff] }
 0x61a   :  { %v1903_v0 = vpop.permute.xlu0 %1902  ;;  %v1905_v61 = vpop.permute.xlu1 %1904 }
 0x61b   :  { %v8732_v11 = vpop.eup %8731  ;;  %v1924_v2 = vadd.f32 %v1903_v0, %v1876_v6  ;;  %v1925_v8 = vadd.f32 %v1905_v61, %v1877_v36  ;;  %v9378_v36 = vld [vmem:[#allocation10 + $0x20] sm:$0xff]  ;;  %v9379_v0 = vld [vmem:[#allocation10 + $0x18] sm:$0xff]  ;;  %v9380_v61 = vld [vmem:[#allocation10 + $0x10] sm:$0xff] }
 0x61c   :  { %1970 = vrot.lane.b32.xlu0 %v8732_v11, %s9512_s29  ;;  %v9381_v11 = vld [vmem:[#allocation10 + $0x8] sm:$0xff] }
 0x61d   :  { %v8734_v19 = vpop.eup %8733  ;;  %8735 = vtanh.f32 %v1924_v2  ;;  %2016 = vst [vmem:[#allocation1 + $0x2] ss:$9 sm:$0xff] %v1924_v2  ;;  %v9382_v2 = vld [vmem:[#allocation10] sm:$0xff] }
 0x61e   :  { %8737 = vtanh.f32 %v1925_v8  ;;  %2018 = vst [vmem:[#allocation1 + $0x3] ss:$9 sm:$0xff] %v1925_v8  ;;  %1984 = vrot.lane.b32.xlu1 %v8734_v19, %s9512_s29 }
 0x622   :  { %v1909_v21 = vpop.permute.xlu0 %1908  ;;  %v1911_v54 = vpop.permute.xlu1 %1910 }
 0x623   :  { %v8736_v23 = vpop.eup %8735  ;;  %v1927_v14 = vadd.f32 %v1909_v21, %v1879_v20  ;;  %v1928_v24 = vadd.f32 %v1911_v54, %v1880_v47  ;;  %v2180_v20 = vld [vmem:[#allocation2 + $0x3] ss:$8 sm:$0x3] }
 0x624   :  { %v8738_v26 = vpop.eup %8737  ;;  %1974 = vrot.lane.b32.xlu2 %v8736_v23, %s9512_s29 }
 0x625   :  { %8739 = vtanh.f32 %v1927_v14  ;;  %2022 = vst [vmem:[#allocation1 + $0x5] ss:$9 sm:$0xff] %v1927_v14  ;;  %1976 = vrot.lane.b32.xlu0 %v8738_v26, %s9512_s29 }
 0x626   :  { %8741 = vtanh.f32 %v1928_v24  ;;  %2024 = vst [vmem:[#allocation1 + $0x6] ss:$9 sm:$0xff] %v1928_v24 }
 0x62b   :  { %v8740_v45 = vpop.eup %8739 }
 0x62c   :  { %v8742_v31 = vpop.eup %8741  ;;  %1980 = vrot.lane.b32.xlu2 %v8740_v45, %s9512_s29  ;;  %v2184_v45 = vld [vmem:[#allocation2 + $0x23] ss:$8 sm:$0x3] }
 0x62d   :  { %1982 = vrot.lane.b32.xlu0 %v8742_v31, %s9512_s29  ;;  %v10785_v42 = vld [vmem:[#allocation1] sm:$0xff] }
 0x62e   :  { %v2182_v31 = vld [vmem:[#allocation2 + $0x13] ss:$8 sm:$0x3] }
 0x67e   :  { %v1975_v39 = vpop.permute.xlu2 %1974 }
 0x67f   :  { %v10782_v18 = vmul.f32 %v1975_v39, %v1948_v52 }
 0x680   :  { %v1973_v55 = vpop.permute.xlu1 %1972 }
 0x681   :  { %2044 = vst [vmem:[#allocation1 + $0x2] ss:$9 sm:$0xff] %v10782_v18  ;;  %v10788_v1 = vmul.f32 %v1973_v55, %v1947_v40 }
 0x683   :  { %2042 = vst [vmem:[#allocation1 + $0x1] ss:$9 sm:$0xff] %v10788_v1 }
 0x686   :  { %v1981_v9 = vpop.permute.xlu2 %1980 }
 0x687   :  { %v10792_v7 = vmul.f32 %v1981_v9, %v1951_v41 }
 0x688   :  { %v1979_v62 = vpop.permute.xlu1 %1978 }
 0x689   :  { %2050 = vst [vmem:[#allocation1 + $0x5] ss:$9 sm:$0xff] %v10792_v7  ;;  %v10796_v43 = vmul.f32 %v1979_v62, %v1950_v48  ;;  %v2190_v62 = vld [vmem:[#allocation2 + $0x53] ss:$8 sm:$0x3] }
 0x68b   :  { %2048 = vst [vmem:[#allocation1 + $0x4] ss:$9 sm:$0xff] %v10796_v43 }
 0x68e   :  { %v1971_v37 = vpop.permute.xlu0 %1970 }
 0x68f   :  { %v1994_v22 = vmul.f32 %v1971_v37, %v1946_v29 }
 0x690   :  { %v1985_v30 = vpop.permute.xlu1 %1984 }
 0x691   :  { %2040 = vst [vmem:[#allocation1] ss:$9 sm:$0xff] %v1994_v22  ;;  %v10801_v44 = vmul.f32 %v1985_v30, %v1953_v50 }
 0x693   :  { %2054 = vst [vmem:[#allocation1 + $0x7] ss:$9 sm:$0xff] %v10801_v44 }
 0x697   :  { %v1977_v13 = vpop.permute.xlu0 %1976 }
 0x698   :  { %v1997_v57 = vmul.f32 %v1977_v13, %v1949_v58  ;;  %v2192_v58 = vld [vmem:[#allocation2 + $0x63] ss:$8 sm:$0x3] }
 0x69a   :  { %2046 = vst [vmem:[#allocation1 + $0x3] ss:$9 sm:$0xff] %v1997_v57 }
 0x69f   :  { %v1983_v59 = vpop.permute.xlu0 %1982 }
 0x6a0   :  { %v2000_v27 = vmul.f32 %v1983_v59, %v1952_v4 }
 0x6a2   :  { %2052 = vst [vmem:[#allocation1 + $0x6] ss:$9 sm:$0xff] %v2000_v27 }
 0x6a9   :  { %v2055_v63 = vld [vmem:[#allocation1] sm:$0xff] }
 0x6aa   :  { %2064 = vst [vmem:[#allocation1] ss:$9 sm:$0xff] %v1994_v22  ;;  %v10816_v5 = vsel %vm2003_vm8, %v2055_v63, %v10456_v53  ;;  %v9370_v53 = vld [vmem:[#allocation10 + $0x60] sm:$0xff] }
 0x6ab   :  { %2066 = vst [vmem:[#allocation1 + $0x1] ss:$9 sm:$0xff] %v10788_v1  ;;  %8370 = vmatmul.msk.f32.vlgmr.msrb.gmra.mxu2 %vm203_vm0, %v10816_v5  ;;  %8371 = vmatmul.msk.f32.vlgmr.msrb.gmra.mxu3 %vm203_vm0, %v10816_v5 }
 0x6ac   :  { %2068 = vst [vmem:[#allocation1 + $0x2] ss:$9 sm:$0xff] %v10782_v18  ;;  %4710 = vmatpush.msrb.mxu3 %v9367_v35  ;;  %4690 = vmatpush.msrb.mxu2 %v9368_v17 }
 0x6ad   :  { %2070 = vst [vmem:[#allocation1 + $0x3] ss:$9 sm:$0xff] %v1997_v57 }
 0x6ae   :  { %2072 = vst [vmem:[#allocation1 + $0x4] ss:$9 sm:$0xff] %v10796_v43  ;;  %4711 = vmatpush.msrb.mxu3 %v9369_v33  ;;  %4691 = vmatpush.msrb.mxu2 %v9370_v53 }
 0x6af   :  { %2074 = vst [vmem:[#allocation1 + $0x5] ss:$9 sm:$0xff] %v10792_v7 }
 0x6b0   :  { %2076 = vst [vmem:[#allocation1 + $0x6] ss:$9 sm:$0xff] %v2000_v27  ;;  %4712 = vmatpush.msrb.mxu3 %v9371_v46  ;;  %4692 = vmatpush.msrb.mxu2 %v9372_v60 }
 0x6b1   :  { %2078 = vst [vmem:[#allocation1 + $0x7] ss:$9 sm:$0xff] %v10801_v44 }
 0x6b2   :  { %4713 = vmatpush.msrb.mxu3 %v9373_v10  ;;  %4693 = vmatpush.msrb.mxu2 %v9374_v38 }
 0x6b4   :  { %4714 = vmatpush.msrb.mxu3 %v9375_v32  ;;  %4694 = vmatpush.msrb.mxu2 %v9376_v28 }
 0x6b6   :  { %4715 = vmatpush.msrb.mxu3 %v9377_v34  ;;  %4695 = vmatpush.msrb.mxu2 %v9378_v36 }
 0x6b8   :  { %v10827_v6 = vld [vmem:[#allocation1] sm:$0xff]  ;;  %4716 = vmatpush.msrb.mxu3 %v9379_v0  ;;  %4696 = vmatpush.msrb.mxu2 %v9380_v61 }
 0x6b9   :  { %2111 = vst [vmem:[#allocation1] ss:$9 sm:$0xff] %v1994_v22 }
 0x6ba   :  { %2113 = vst [vmem:[#allocation1 + $0x1] ss:$9 sm:$0xff] %v10788_v1  ;;  %4717 = vmatpush.msrb.mxu3 %v9381_v11  ;;  %4697 = vmatpush.msrb.mxu2 %v9382_v2 }
 0x6bb   :  { %2115 = vst [vmem:[#allocation1 + $0x2] ss:$9 sm:$0xff] %v10782_v18 }
 0x6bc   :  { %2117 = vst [vmem:[#allocation1 + $0x3] ss:$9 sm:$0xff] %v1997_v57  ;;  %v2194_v57 = vld [vmem:[#allocation2 + $0x73] ss:$8 sm:$0x3] }
 0x6bd   :  { %2119 = vst [vmem:[#allocation1 + $0x4] ss:$9 sm:$0xff] %v10796_v43  ;;  %v2188_v43 = vld [vmem:[#allocation2 + $0x43] ss:$8 sm:$0x3] }
 0x6be   :  { %2121 = vst [vmem:[#allocation1 + $0x5] ss:$9 sm:$0xff] %v10792_v7  ;;  %v2186_v7 = vld [vmem:[#allocation2 + $0x33] ss:$8 sm:$0x3] }
 0x6bf   :  { %2123 = vst [vmem:[#allocation1 + $0x6] ss:$9 sm:$0xff] %v2000_v27 }
 0x6c0   :  { %2125 = vst [vmem:[#allocation1 + $0x7] ss:$9 sm:$0xff] %v10801_v44 }
 0x72e   :  { %v2235_v8 = vpop.f32.mrf.mxu3  ;;  %v2215_v47 = vpop.f32.mrf.mxu2 }
 0x72f   :  { %v2240_v19 = vrot.slane %v2235_v8, 7 }
 0x731   :  { %v2241_v21 = vsel %vm370_vm1, %v2215_v47, %v2240_v19  ;;  %v2244_v54 = vsel %vm375_vm3, %v2215_v47, %v2240_v19  ;;  %v2242_v23 = vsel %vm14784_vm13, %v2215_v47, %v2240_v19  ;;  %v2246_v52 = vsel %vm14785_vm15, %v2215_v47, %v2240_v19 }
 0x732   :  { %v2264_v14 = vadd.f32 %v2241_v21, %v2180_v20  ;;  %v2245_v24 = vrot.slane %v2244_v54, 2  ;;  %v2243_v26 = vrot.slane %v2242_v23, 1  ;;  %v2250_v40 = vsel %vm14786_vm12, %v2215_v47, %v2240_v19 }
 0x733   :  { %v2248_v55 = vsel %vm14787_vm14, %v2215_v47, %v2240_v19  ;;  %v2247_v1 = vrot.slane %v2246_v52, 3  ;;  %v2251_v41 = vrot.slane %v2250_v40, 5  ;;  %v2252_v29 = vsel %vm14788_vm9, %v2215_v47, %v2240_v19 }
 0x734   :  { %2432 = vrot.lane.b32.xlu2 %v2264_v14, %s9512_s29  ;;  %v2266_v39 = vadd.f32 %v2245_v24, %v2184_v45  ;;  %v2265_v18 = vadd.f32 %v2243_v26, %v2182_v31  ;;  %v2249_v9 = vrot.slane %v2248_v55, 4  ;;  %v2254_v50 = vsel %vm14789_vm5, %v2240_v19, %v2215_v47 }
 0x735   :  { %v2267_v48 = vadd.f32 %v2247_v1, %v2186_v7  ;;  %v2269_v37 = vadd.f32 %v2251_v41, %v2190_v62  ;;  %v2253_v30 = vrot.slane %v2252_v29, 6  ;;  %v2255_v44 = vrot.slane %v2254_v50, 7 }
 0x736   :  { %2436 = vrot.lane.b32.xlu1 %v2266_v39, %s9512_s29  ;;  %2434 = vrot.lane.b32.xlu0 %v2265_v18, %s9512_s29  ;;  %v2268_v22 = vadd.f32 %v2249_v9, %v2188_v43  ;;  %v8372_v59 = vmul.f32 -1.442695, %v2264_v14  ;;  %v8374_v27 = vmul.f32 -1.442695, %v2266_v39  ;;  %v8373_v25 = vmul.f32 -1.442695, %v2265_v18 }
 0x737   :  { %v2270_v13 = vadd.f32 %v2253_v30, %v2192_v58  ;;  %v2271_v4 = vadd.f32 %v2255_v44, %v2194_v57  ;;  %v8375_v63 = vmul.f32 -1.442695, %v2267_v48  ;;  %v8377_v60 = vmul.f32 -1.442695, %v2269_v37 }
 0x738   :  { %8743 = vpow2.f32 %v8372_v59  ;;  %v8376_v53 = vmul.f32 -1.442695, %v2268_v22 }
 0x739   :  { %8745 = vpow2.f32 %v8374_v27  ;;  %v8379_v0 = vmul.f32 -1.442695, %v2271_v4 }
 0x73a   :  { %8747 = vpow2.f32 %v8373_v25 }
 0x73b   :  { %8749 = vpow2.f32 %v8375_v63 }
 0x73c   :  { %2438 = vrot.lane.b32.xlu2 %v2267_v48, %s9512_s29 }
 0x73e   :  { %2442 = vrot.lane.b32.xlu1 %v2269_v37, %s9512_s29  ;;  %2440 = vrot.lane.b32.xlu0 %v2268_v22, %s9512_s29  ;;  %v8744_v35 = vpop.eup %8743 }
 0x73f   :  { %v10854_v33 = vadd.f32 1.0, %v8744_v35  ;;  %v8746_v46 = vpop.eup %8745 }
 0x740   :  { %v8748_v10 = vpop.eup %8747  ;;  %v10857_v32 = vadd.f32 1.0, %v8746_v46 }
 0x741   :  { %v8750_v38 = vpop.eup %8749  ;;  %8751 = vrcp.f32 %v10854_v33  ;;  %v10859_v28 = vadd.f32 1.0, %v8748_v10  ;;  %v2313_v56 = vand.u32 2147483647, %v10854_v33  ;;  %v2315_v55 = vand.u32 2147483648, %v10854_v33 }
 0x742   :  { %8753 = vpow2.f32 %v8376_v53  ;;  %v10861_v34 = vadd.f32 1.0, %v8750_v38  ;;  %vm2309_vm4 = vweird.f32 %v10854_v33  ;;  %v2345_v44 = vand.u32 2147483648, %v10857_v32 }
 0x743   :  { %8755 = vpow2.f32 %v8377_v60  ;;  %v2330_v43 = vand.u32 2147483648, %v10859_v28  ;;  %vm10913_vm11 = vcmp.eq.f32.partialorder %v2313_v56, 8.507059e+37  ;;  %v2316_v50 = vor.u32 1.1754944e-38, %v2315_v55 }
 0x744   :  { %2444 = vrot.lane.b32.xlu2 %v2270_v13, %s9512_s29  ;;  %vm2339_vm10 = vweird.f32 %v10857_v32  ;;  %v2343_v57 = vand.u32 2147483647, %v10857_v32  ;;  %vm2324_vm6 = vweird.f32 %v10859_v28  ;;  %v2346_v38 = vor.u32 1.1754944e-38, %v2345_v44 }
 0x745   :  { %v10934_v46 = vor.u32 1.1754944e-38, %v2330_v43  ;;  %vm2354_vm13 = vweird.f32 %v10861_v34 }
 0x746   :  { %2028 = vrot.lane.b32.xlu1 %v10785_v42, %s9512_s29  ;;  %2446 = vrot.lane.b32.xlu0 %v2271_v4, %s9512_s29  ;;  %v8378_v42 = vmul.f32 -1.442695, %v2270_v13  ;;  %v2328_v13 = vand.u32 2147483647, %v10859_v28  ;;  %vm10960_vm14 = vcmp.eq.f32.partialorder %v2343_v57, 8.507059e+37 }
 0x747   :  { %v10866_v61 = vpop.eup %8751 }
 0x748   :  { %8757 = vpow2.f32 %v8378_v42  ;;  %v8754_v11 = vpop.eup %8753  ;;  %v2305_v47 = vmul.f32 %v10866_v61, %v10854_v33  ;;  %vm2310_vm2 = vweird.f32 %v10866_v61  ;;  %vm10955_vm15 = vcmp.eq.f32.partialorder %v2328_v13, 8.507059e+37 }
 0x749   :  { %8759 = vrcp.f32 %v10857_v32  ;;  %v8756_v2 = vpop.eup %8755  ;;  %v10872_v20 = vadd.f32 1.0, %v8754_v11 }
 0x74a   :  { %8761 = vrcp.f32 %v10859_v28  ;;  %v10876_v54 = vadd.f32 1.0, %v8756_v2  ;;  %v2306_v39 = vsub.f32 1.0, %v2305_v47 }
 0x74b   :  { %8763 = vrcp.f32 %v10861_v34 }
 0x74c   :  { %8765 = vpow2.f32 %v8379_v0  ;;  %v2307_v7 = vmul.f32 %v10866_v61, %v2306_v39 }
 0x74d   :  { %8767 = vrcp.f32 %v10872_v20 }
 0x74e   :  { %v8758_v19 = vpop.eup %8757  ;;  %8769 = vrcp.f32 %v10876_v54  ;;  %v2308_v63 = vadd.f32 %v10866_v61, %v2307_v7 }
 0x74f   :  { %v10874_v21 = vpop.eup %8759  ;;  %v10880_v24 = vadd.f32 1.0, %v8758_v19  ;;  %v2358_v19 = vand.u32 2147483647, %v10861_v34 }
 0x750   :  { %v10878_v14 = vpop.eup %8761  ;;  %v2335_v18 = vmul.f32 %v10874_v21, %v10857_v32  ;;  %vm2340_vm12 = vweird.f32 %v10874_v21 }
 0x751   :  { %v10888_v45 = vpop.eup %8763  ;;  %v2320_v1 = vmul.f32 %v10878_v14, %v10859_v28  ;;  %8771 = vrcp.f32 %v10880_v24  ;;  %vm2325_vm9 = vweird.f32 %v10878_v14 }
 0x752   :  { %v8766_v40 = vpop.eup %8765  ;;  %v2350_v9 = vmul.f32 %v10888_v45, %v10861_v34  ;;  %v2336_v29 = vsub.f32 1.0, %v2335_v18  ;;  %v2360_v18 = vand.u32 2147483648, %v10861_v34  ;;  %vm2355_vm5 = vweird.f32 %v10888_v45 }
 0x753   :  { %v10908_v48 = vadd.f32 1.0, %v8766_v40  ;;  %v2321_v30 = vsub.f32 1.0, %v2320_v1  ;;  %v10918_v58 = vpop.eup %8767 }
 0x754   :  { %v2351_v4 = vsub.f32 1.0, %v2350_v9  ;;  %v10923_v59 = vpop.eup %8769  ;;  %v2337_v60 = vmul.f32 %v10874_v21, %v2336_v29  ;;  %v2365_v0 = vmul.f32 %v10918_v58, %v10872_v20 }
 0x755   :  { %v2322_v42 = vmul.f32 %v10878_v14, %v2321_v30  ;;  %v2380_v33 = vmul.f32 %v10923_v59, %v10876_v54  ;;  %v2418_v32 = vand.u32 2147483647, %v10908_v48 }
 0x756   :  { %v2366_v56 = vsub.f32 1.0, %v2365_v0 }
 0x757   :  { %v10931_v35 = vpop.eup %8771  ;;  %v2381_v29 = vsub.f32 1.0, %v2380_v33 }
 0x758   :  { %v2367_v13 = vmul.f32 %v10918_v58, %v2366_v56 }
 0x75a   :  { %v2368_v2 = vadd.f32 %v10918_v58, %v2367_v13 }
 0x78e   :  { %v2433_v8 = vpop.permute.xlu2 %2432 }
 0x78f   :  { %v2448_v41 = vrot.slane %v2433_v8, 1  ;;  %v2352_v8 = vmul.f32 %v10888_v45, %v2351_v4 }
 0x791   :  { %8773 = vtanh.f32 %v2448_v41  ;;  %v2353_v9 = vadd.f32 %v10888_v45, %v2352_v8 }
 0x792   :  { %8775 = vrcp.f32 %v10908_v48 }
 0x796   :  { %v2439_v62 = vpop.permute.xlu2 %2438 }
 0x797   :  { %v2451_v10 = vrot.slane %v2439_v62, 1  ;;  %v8774_v39 = vpop.eup %8773 }
 0x798   :  { %v10973_v55 = vpop.eup %8775 }
 0x79e   :  { %v2445_v1 = vpop.permute.xlu2 %2444 }
 0x79f   :  { %v2454_v44 = vrot.slane %v2445_v1, 1 }
 0x7a8   :  { %v10852_v17 = vpop.permute.xlu1 %2436 }
 0x7a9   :  { %v2450_v11 = vrot.slane %v10852_v17, 1 }
 0x7b0   :  { %v10863_v36 = vpop.permute.xlu1 %2442 }
 0x7b1   :  { %v2453_v4 = vrot.slane %v10863_v36, 1  ;;  %v2382_v36 = vmul.f32 %v10923_v59, %v2381_v29 }
 0x7b8   :  { %v2029_v23 = vpop.permute.xlu1 %2028 }
 0x7b9   :  { %v10886_v26 = vsel %vm2003_vm8, %v2029_v23, %v10534_v16  ;;  %v2435_v16 = vpop.permute.xlu0 %2434  ;;  %vm10945_vm8 = vmor %vm2309_vm4, %vm2310_vm2  ;;  %vm11003_vm2 = vcmp.eq.f32.partialorder %v2358_v19, 8.507059e+37 }
 0x7ba   :  { %2480 = vrot.lane.b32.xlu2 %v10886_v26, %s9512_s29  ;;  %v2474_v31 = vrot.slane %v10886_v26, 2  ;;  %v2473_v52 = vrot.slane %v10886_v26, 1  ;;  %v2475_v37 = vrot.slane %v10886_v26, 3  ;;  %v2477_v27 = vrot.slane %v10886_v26, 5  ;;  %vm10988_vm4 = vmor %vm2339_vm10, %vm2340_vm12 }
 0x7bb   :  { %v2476_v25 = vrot.slane %v10886_v26, 4  ;;  %v2449_v53 = vrot.slane %v2435_v16, 1  ;;  %v2312_v23 = vsel %vm10945_vm8, %v10866_v61, %v2308_v63  ;;  %v2338_v61 = vadd.f32 %v10874_v21, %v2337_v60 }
 0x7bc   :  { %2484 = vrot.lane.b32.xlu1 %v2474_v31, %s9512_s29  ;;  %2482 = vrot.lane.b32.xlu0 %v2473_v52, %s9512_s29  ;;  %v2395_v52 = vmul.f32 %v10931_v35, %v10880_v24  ;;  %v2478_v40 = vrot.slane %v10886_v26, 6  ;;  %v2323_v16 = vadd.f32 %v10878_v14, %v2322_v42  ;;  %v10977_v41 = vsel %vm10913_vm11, %v2316_v50, %v2312_v23  ;;  %vm10996_vm11 = vmor %vm2324_vm6, %vm2325_vm9 }
 0x7bd   :  { %8777 = vtanh.f32 %v2449_v53  ;;  %v2479_v7 = vrot.slane %v10886_v26, 7  ;;  %v2512_v62 = vmul.f32 %v8774_v39, %v10977_v41  ;;  %v2342_v30 = vsel %vm10988_vm4, %v10874_v21, %v2338_v61  ;;  %vm11021_vm6 = vmor %vm2354_vm13, %vm2355_vm5 }
 0x7be   :  { %8779 = vtanh.f32 %v2451_v10  ;;  %vm2369_vm10 = vweird.f32 %v10872_v20  ;;  %v2327_v28 = vsel %vm10996_vm11, %v10878_v14, %v2323_v16  ;;  %v2410_v21 = vmul.f32 %v10973_v55, %v10908_v48 }
 0x7bf   :  { %8781 = vtanh.f32 %v2450_v11  ;;  %v2373_v63 = vand.u32 2147483647, %v10872_v20  ;;  %v2375_v14 = vand.u32 2147483648, %v10872_v20  ;;  %v2357_v60 = vsel %vm11021_vm6, %v10888_v45, %v2353_v9 }
 0x7c0   :  { %vm2370_vm8 = vweird.f32 %v10918_v58  ;;  %v11036_v42 = vsel %vm10955_vm15, %v10934_v46, %v2327_v28  ;;  %v11040_v0 = vsel %vm10960_vm14, %v2346_v38, %v2342_v30  ;;  %vm2385_vm13 = vweird.f32 %v10923_v59 }
 0x7c1   :  { %v2441_v47 = vpop.permute.xlu0 %2440  ;;  %v2411_v8 = vsub.f32 1.0, %v2410_v21  ;;  %v2388_v46 = vand.u32 2147483647, %v10876_v54  ;;  %vm2400_vm15 = vweird.f32 %v10931_v35  ;;  %v2383_v23 = vadd.f32 %v10923_v59, %v2382_v36  ;;  %vm11060_vm12 = vmor %vm2369_vm10, %vm2370_vm8  ;;  %v11116_v36 = vld [vmem:[#allocation1] sm:$0xff] }
 0x7c2   :  { %2486 = vrot.lane.b32.xlu2 %v2475_v37, %s9512_s29  ;;  %v2396_v37 = vsub.f32 1.0, %v2395_v52  ;;  %v2452_v22 = vrot.slane %v2441_v47, 1  ;;  %vm2384_vm14 = vweird.f32 %v10876_v54  ;;  %v2390_v52 = vand.u32 2147483648, %v10876_v54 }
 0x7c3   :  { %v8778_v57 = vpop.eup %8777  ;;  %v2405_v39 = vand.u32 2147483648, %v10880_v24  ;;  %v2372_v61 = vsel %vm11060_vm12, %v10918_v58, %v2368_v2  ;;  %vm11074_vm9 = vmor %vm2384_vm14, %vm2385_vm13  ;;  %vm2399_vm5 = vweird.f32 %v10880_v24  ;;  %v2403_v54 = vand.u32 2147483647, %v10880_v24 }
 0x7c4   :  { %2490 = vrot.lane.b32.xlu1 %v2477_v27, %s9512_s29  ;;  %2488 = vrot.lane.b32.xlu0 %v2476_v25, %s9512_s29  ;;  %v2361_v25 = vor.u32 1.1754944e-38, %v2360_v18  ;;  %v8780_v53 = vpop.eup %8779  ;;  %v2397_v34 = vmul.f32 %v10931_v35, %v2396_v37  ;;  %8783 = vtanh.f32 %v2452_v22  ;;  %v2513_v11 = vmul.f32 %v8778_v57, %v11036_v42  ;;  %vm11083_vm4 = vmor %vm2399_vm5, %vm2400_vm15 }
 0x7c5   :  { %v8782_v10 = vpop.eup %8781  ;;  %8785 = vtanh.f32 %v2454_v44  ;;  %v2412_v18 = vmul.f32 %v10973_v55, %v2411_v8  ;;  %v2376_v16 = vor.u32 1.1754944e-38, %v2375_v14  ;;  %vm2374_vm11 = vcmp.eq.f32.partialorder %v2373_v63, 8.507059e+37 }
 0x7c6   :  { %8787 = vtanh.f32 %v2453_v4  ;;  %v11047_v19 = vsel %vm11003_vm2, %v2361_v25, %v2357_v60  ;;  %v2514_v38 = vmul.f32 %v8782_v10, %v11040_v0  ;;  %v2398_v31 = vadd.f32 %v10931_v35, %v2397_v34 }
 0x7c7   :  { %v2515_v47 = vmul.f32 %v8780_v53, %v11047_v19  ;;  %v2387_v1 = vsel %vm11074_vm9, %v10923_v59, %v2383_v23  ;;  %vm2389_vm2 = vcmp.eq.f32.partialorder %v2388_v46, 8.507059e+37  ;;  %v2406_v43 = vor.u32 1.1754944e-38, %v2405_v39 }
 0x7c8   :  { %v2402_v24 = vsel %vm11083_vm4, %v10931_v35, %v2398_v31  ;;  %vm2404_vm10 = vcmp.eq.f32.partialorder %v2403_v54, 8.507059e+37  ;;  %v2413_v37 = vadd.f32 %v10973_v55, %v2412_v18  ;;  %vm2415_vm6 = vweird.f32 %v10973_v55 }
 0x7c9   :  { %v2447_v45 = vpop.permute.xlu0 %2446  ;;  %v11100_v59 = vsel %vm2404_vm10, %v2406_v43, %v2402_v24  ;;  %v2420_v50 = vand.u32 2147483648, %v10908_v48  ;;  %vm2414_vm8 = vweird.f32 %v10908_v48  ;;  %vm2419_vm15 = vcmp.eq.f32.partialorder %v2418_v32, 8.507059e+37 }
 0x7ca   :  { %2492 = vrot.lane.b32.xlu2 %v2478_v40, %s9512_s29  ;;  %v2455_v17 = vrot.slane %v2447_v45, 1  ;;  %v8784_v40 = vpop.eup %8783  ;;  %vm2416_vm13 = vmor %vm2414_vm8, %vm2415_vm6  ;;  %vm14812_vm14 = vcmask 1041409   ;;  %vm14813_vm9 = vcmask 1043459   ;;  %vm14814_vm5 = vcmask 1045509  }
 0x7cb   :  { %v8786_v58 = vpop.eup %8785  ;;  %v2417_v44 = vsel %vm2416_vm13, %v10973_v55, %v2413_v37  ;;  %v2421_v13 = vor.u32 1.1754944e-38, %v2420_v50  ;;  %vm14815_vm4 = vcmask 1044484  }
 0x7cc   :  { %2494 = vrot.lane.b32.xlu0 %v2479_v7, %s9512_s29  ;;  %2528 = vrot.lane.b32.xlu1 %v2512_v62, %s9512_s29  ;;  %v8788_v9 = vpop.eup %8787  ;;  %8789 = vtanh.f32 %v2455_v17  ;;  %v11093_v7 = vsel %vm2374_vm11, %v2376_v16, %v2372_v61  ;;  %v2391_v62 = vor.u32 1.1754944e-38, %v2390_v52  ;;  %v2518_v30 = vmul.f32 %v8786_v58, %v11100_v59 }
 0x7cd   :  { %v2516_v29 = vmul.f32 %v8784_v40, %v11093_v7  ;;  %v11111_v21 = vsel %vm2419_vm15, %v2421_v13, %v2417_v44  ;;  %v2577_v44 = vrot.slane %v11036_v42, 1  ;;  %vm14816_vm11 = vcmask 1046534  }
 0x7ce   :  { %v11098_v22 = vsel %vm2389_vm2, %v2391_v62, %v2387_v1  ;;  %vm14817_vm2 = vcmask 1046528  }
 0x7cf   :  { %v2517_v35 = vmul.f32 %v8788_v9, %v11098_v22 }
 0x7d2   :  { %2530 = vrot.lane.b32.xlu2 %v2513_v11, %s9512_s29  ;;  %v8790_v28 = vpop.eup %8789 }
 0x7d3   :  { %v2519_v57 = vmul.f32 %v8790_v28, %v11111_v21 }
 0x7d4   :  { %2532 = vrot.lane.b32.xlu0 %v2514_v38, %s9512_s29  ;;  %2534 = vrot.lane.b32.xlu1 %v2515_v47, %s9512_s29 }
 0x7da   :  { %2536 = vrot.lane.b32.xlu2 %v2516_v29, %s9512_s29 }
 0x7dc   :  { %2538 = vrot.lane.b32.xlu0 %v2517_v35, %s9512_s29  ;;  %2540 = vrot.lane.b32.xlu1 %v2518_v30, %s9512_s29  ;;  %v2578_v35 = vrot.slane %v11040_v0, 1 }
 0x7e2   :  { %2542 = vrot.lane.b32.xlu2 %v2519_v57, %s9512_s29 }
 0x814   :  { %v2481_v4 = vpop.permute.xlu2 %2480 }
 0x815   :  { %v2504_v8 = vmul.f32 %v2481_v4, %v10977_v41  ;;  %v2581_v4 = vrot.slane %v11098_v22, 1 }
 0x81c   :  { %v2487_v27 = vpop.permute.xlu2 %2486 }
 0x81d   :  { %v2507_v52 = vmul.f32 %v2487_v27, %v11047_v19 }
 0x824   :  { %v2493_v25 = vpop.permute.xlu2 %2492 }
 0x825   :  { %v2510_v56 = vmul.f32 %v2493_v25, %v11100_v59 }
 0x82c   :  { %v2531_v48 = vpop.permute.xlu2 %2530 }
 0x82e   :  { %v2485_v63 = vpop.permute.xlu1 %2484  ;;  %v2483_v14 = vpop.permute.xlu0 %2482 }
 0x82f   :  { %v2505_v53 = vmul.f32 %v2483_v14, %v11036_v42  ;;  %v2506_v39 = vmul.f32 %v2485_v63, %v11040_v0  ;;  %v2576_v0 = vrot.slane %v10977_v41, 1 }
 0x831   :  { %v2553_v60 = vadd.f32 %v2531_v48, %v2505_v53  ;;  %v2580_v48 = vrot.slane %v11093_v7, 1 }
 0x833   :  { %8791 = vtanh.f32 %v2553_v60  ;;  %2644 = vst [vmem:[#allocation1 + $0x1] ss:$9 sm:$0xff] %v2553_v60  ;;  %v2583_v60 = vrot.slane %v11111_v21, 1 }
 0x834   :  { %v2537_v55 = vpop.permute.xlu2 %2536 }
 0x836   :  { %v2491_v34 = vpop.permute.xlu1 %2490  ;;  %v2489_v10 = vpop.permute.xlu0 %2488 }
 0x837   :  { %v2508_v45 = vmul.f32 %v2489_v10, %v11093_v7  ;;  %v2509_v58 = vmul.f32 %v2491_v34, %v11098_v22  ;;  %v2579_v22 = vrot.slane %v11047_v19, 1  ;;  %v2582_v7 = vrot.slane %v11100_v59, 1 }
 0x839   :  { %v8792_v11 = vpop.eup %8791  ;;  %v2556_v2 = vadd.f32 %v2537_v55, %v2508_v45 }
 0x83a   :  { %2602 = vrot.lane.b32.xlu1 %v8792_v11, %s9512_s29 }
 0x83b   :  { %8793 = vtanh.f32 %v2556_v2  ;;  %2650 = vst [vmem:[#allocation1 + $0x4] ss:$9 sm:$0xff] %v2556_v2 }
 0x83c   :  { %v2543_v31 = vpop.permute.xlu2 %2542 }
 0x83e   :  { %v2495_v46 = vpop.permute.xlu0 %2494  ;;  %v2529_v38 = vpop.permute.xlu1 %2528 }
 0x83f   :  { %v2511_v47 = vmul.f32 %v2495_v46, %v11111_v21  ;;  %v2552_v23 = vadd.f32 %v2529_v38, %v2504_v8  ;;  %v9527_v8 = vmov 4  }
 0x840   :  { %v11145_v41 = vsel %vm308_vm7, 3, %v9527_v8 }
 0x841   :  { %v8794_v17 = vpop.eup %8793  ;;  %v2559_v33 = vadd.f32 %v2543_v31, %v2511_v47  ;;  %8795 = vtanh.f32 %v2552_v23  ;;  %2642 = vst [vmem:[#allocation1] ss:$9 sm:$0xff] %v2552_v23  ;;  %vm2633_vm12 = vcmp.gt.s32.totalorder %v10044_v12, %v11145_v41  ;;  %v2810_v47 = vld [vmem:[#allocation2 + $0x4] ss:$8 sm:$0x3] }
 0x842   :  { %2608 = vrot.lane.b32.xlu1 %v8794_v17, %s9512_s29 }
 0x843   :  { %8797 = vtanh.f32 %v2559_v33  ;;  %2656 = vst [vmem:[#allocation1 + $0x7] ss:$9 sm:$0xff] %v2559_v33 }
 0x846   :  { %v2533_v61 = vpop.permute.xlu0 %2532  ;;  %v2535_v20 = vpop.permute.xlu1 %2534 }
 0x847   :  { %v8796_v54 = vpop.eup %8795  ;;  %v2554_v18 = vadd.f32 %v2533_v61, %v2506_v39  ;;  %v2555_v40 = vadd.f32 %v2535_v20, %v2507_v52  ;;  %v2814_v61 = vld [vmem:[#allocation2 + $0x24] ss:$8 sm:$0x3]  ;;  %v2812_v20 = vld [vmem:[#allocation2 + $0x14] ss:$8 sm:$0x3] }
 0x848   :  { %2600 = vrot.lane.b32.xlu0 %v8796_v54, %s9512_s29 }
 0x849   :  { %v8798_v16 = vpop.eup %8797  ;;  %8799 = vtanh.f32 %v2554_v18  ;;  %2646 = vst [vmem:[#allocation1 + $0x2] ss:$9 sm:$0xff] %v2554_v18 }
 0x84a   :  { %8801 = vtanh.f32 %v2555_v40  ;;  %2648 = vst [vmem:[#allocation1 + $0x3] ss:$9 sm:$0xff] %v2555_v40  ;;  %2614 = vrot.lane.b32.xlu1 %v8798_v16, %s9512_s29 }
 0x84e   :  { %v2539_v1 = vpop.permute.xlu0 %2538  ;;  %v2541_v24 = vpop.permute.xlu1 %2540 }
 0x84f   :  { %v8800_v9 = vpop.eup %8799  ;;  %v2557_v62 = vadd.f32 %v2539_v1, %v2509_v58  ;;  %v2558_v43 = vadd.f32 %v2541_v24, %v2510_v56 }
 0x850   :  { %v8802_v29 = vpop.eup %8801  ;;  %2604 = vrot.lane.b32.xlu2 %v8800_v9, %s9512_s29  ;;  %v2816_v9 = vld [vmem:[#allocation2 + $0x34] ss:$8 sm:$0x3] }
 0x851   :  { %8803 = vtanh.f32 %v2557_v62  ;;  %2652 = vst [vmem:[#allocation1 + $0x5] ss:$9 sm:$0xff] %v2557_v62  ;;  %2606 = vrot.lane.b32.xlu0 %v8802_v29, %s9512_s29  ;;  %v2818_v29 = vld [vmem:[#allocation2 + $0x44] ss:$8 sm:$0x3] }
 0x852   :  { %8805 = vtanh.f32 %v2558_v43  ;;  %2654 = vst [vmem:[#allocation1 + $0x6] ss:$9 sm:$0xff] %v2558_v43  ;;  %v2820_v43 = vld [vmem:[#allocation2 + $0x54] ss:$8 sm:$0x3] }
 0x857   :  { %v8804_v37 = vpop.eup %8803 }
 0x858   :  { %v8806_v50 = vpop.eup %8805  ;;  %2610 = vrot.lane.b32.xlu2 %v8804_v37, %s9512_s29 }
 0x859   :  { %2612 = vrot.lane.b32.xlu0 %v8806_v50, %s9512_s29  ;;  %v11135_v28 = vld [vmem:[#allocation1] sm:$0xff] }
 0x8aa   :  { %v2605_v30 = vpop.permute.xlu2 %2604 }
 0x8ab   :  { %v2626_v32 = vmul.f32 %v2605_v30, %v2578_v35 }
 0x8ac   :  { %v2603_v13 = vpop.permute.xlu1 %2602 }
 0x8ad   :  { %2674 = vst [vmem:[#allocation1 + $0x2] ss:$9 sm:$0xff] %v2626_v32  ;;  %v2625_v57 = vmul.f32 %v2603_v13, %v2577_v44  ;;  %v2822_v13 = vld [vmem:[#allocation2 + $0x64] ss:$8 sm:$0x3] }
 0x8af   :  { %2672 = vst [vmem:[#allocation1 + $0x1] ss:$9 sm:$0xff] %v2625_v57 }
 0x8b2   :  { %v2611_v27 = vpop.permute.xlu2 %2610 }
 0x8b3   :  { %v2629_v25 = vmul.f32 %v2611_v27, %v2581_v4  ;;  %v2824_v4 = vld [vmem:[#allocation2 + $0x74] ss:$8 sm:$0x3] }
 0x8b4   :  { %v2609_v63 = vpop.permute.xlu1 %2608 }
 0x8b5   :  { %2680 = vst [vmem:[#allocation1 + $0x5] ss:$9 sm:$0xff] %v2629_v25  ;;  %v2628_v14 = vmul.f32 %v2609_v63, %v2580_v48 }
 0x8b7   :  { %2678 = vst [vmem:[#allocation1 + $0x4] ss:$9 sm:$0xff] %v2628_v14 }
 0x8ba   :  { %v2601_v53 = vpop.permute.xlu0 %2600 }
 0x8bb   :  { %v2624_v42 = vmul.f32 %v2601_v53, %v2576_v0 }
 0x8bc   :  { %v2615_v55 = vpop.permute.xlu1 %2614 }
 0x8bd   :  { %2670 = vst [vmem:[#allocation1] ss:$9 sm:$0xff] %v2624_v42  ;;  %v2631_v34 = vmul.f32 %v2615_v55, %v2583_v60 }
 0x8bf   :  { %2684 = vst [vmem:[#allocation1 + $0x7] ss:$9 sm:$0xff] %v2631_v34 }
 0x8c3   :  { %v2607_v10 = vpop.permute.xlu0 %2606 }
 0x8c4   :  { %v2627_v45 = vmul.f32 %v2607_v10, %v2579_v22 }
 0x8c6   :  { %2676 = vst [vmem:[#allocation1 + $0x3] ss:$9 sm:$0xff] %v2627_v45 }
 0x8cb   :  { %v2613_v11 = vpop.permute.xlu0 %2612 }
 0x8cc   :  { %v2630_v2 = vmul.f32 %v2613_v11, %v2582_v7 }
 0x8ce   :  { %2682 = vst [vmem:[#allocation1 + $0x6] ss:$9 sm:$0xff] %v2630_v2 }
 0x8d5   :  { %v2685_v21 = vld [vmem:[#allocation1] sm:$0xff] }
 0x8d6   :  { %2694 = vst [vmem:[#allocation1] ss:$9 sm:$0xff] %v2624_v42  ;;  %v11153_v19 = vsel %vm2633_vm12, %v2685_v21, %v10816_v5 }
 0x8d7   :  { %2696 = vst [vmem:[#allocation1 + $0x1] ss:$9 sm:$0xff] %v2625_v57  ;;  %8380 = vmatmul.msk.f32.vlgmr.msrb.gmra.mxu0 %vm203_vm0, %v11153_v19  ;;  %8381 = vmatmul.msk.f32.vlgmr.msrb.gmra.mxu1 %vm203_vm0, %v11153_v19 }
 0x8d8   :  { %2698 = vst [vmem:[#allocation1 + $0x2] ss:$9 sm:$0xff] %v2626_v32 }
 0x8d9   :  { %2700 = vst [vmem:[#allocation1 + $0x3] ss:$9 sm:$0xff] %v2627_v45 }
 0x8da   :  { %2702 = vst [vmem:[#allocation1 + $0x4] ss:$9 sm:$0xff] %v2628_v14 }
 0x8db   :  { %2704 = vst [vmem:[#allocation1 + $0x5] ss:$9 sm:$0xff] %v2629_v25 }
 0x8dc   :  { %2706 = vst [vmem:[#allocation1 + $0x6] ss:$9 sm:$0xff] %v2630_v2 }
 0x8dd   :  { %2708 = vst [vmem:[#allocation1 + $0x7] ss:$9 sm:$0xff] %v2631_v34 }
 0x8e4   :  { %v11159_v59 = vld [vmem:[#allocation1] sm:$0xff] }
 0x8e5   :  { %2741 = vst [vmem:[#allocation1] ss:$9 sm:$0xff] %v2624_v42 }
 0x8e6   :  { %2743 = vst [vmem:[#allocation1 + $0x1] ss:$9 sm:$0xff] %v2625_v57 }
 0x8e7   :  { %2745 = vst [vmem:[#allocation1 + $0x2] ss:$9 sm:$0xff] %v2626_v32 }
 0x8e8   :  { %2747 = vst [vmem:[#allocation1 + $0x3] ss:$9 sm:$0xff] %v2627_v45 }
 0x8e9   :  { %2749 = vst [vmem:[#allocation1 + $0x4] ss:$9 sm:$0xff] %v2628_v14 }
 0x8ea   :  { %2751 = vst [vmem:[#allocation1 + $0x5] ss:$9 sm:$0xff] %v2629_v25 }
 0x8eb   :  { %2753 = vst [vmem:[#allocation1 + $0x6] ss:$9 sm:$0xff] %v2630_v2 }
 0x8ec   :  { %2755 = vst [vmem:[#allocation1 + $0x7] ss:$9 sm:$0xff] %v2631_v34 }
 0x954   :  { %v2865_v5 = vpop.f32.mrf.mxu1  ;;  %v2845_v38 = vpop.f32.mrf.mxu0 }
 0x955   :  { %v2870_v46 = vrot.slane %v2865_v5, 7 }
 0x957   :  { %v2871_v23 = vsel %vm370_vm1, %v2845_v38, %v2870_v46  ;;  %v2874_v31 = vsel %vm375_vm3, %v2845_v38, %v2870_v46  ;;  %v2872_v17 = vsel %vm14812_vm14, %v2845_v38, %v2870_v46  ;;  %v2876_v54 = vsel %vm14813_vm9, %v2845_v38, %v2870_v46 }
 0x958   :  { %v2894_v33 = vadd.f32 %v2871_v23, %v2810_v47  ;;  %v2875_v52 = vrot.slane %v2874_v31, 2  ;;  %v2873_v39 = vrot.slane %v2872_v17, 1  ;;  %v2880_v16 = vsel %vm14814_vm5, %v2845_v38, %v2870_v46 }
 0x959   :  { %v2878_v56 = vsel %vm14815_vm4, %v2845_v38, %v2870_v46  ;;  %v2877_v58 = vrot.slane %v2876_v54, 3  ;;  %v2881_v1 = vrot.slane %v2880_v16, 5  ;;  %v2882_v37 = vsel %vm14816_vm11, %v2845_v38, %v2870_v46 }
 0x95a   :  { %3062 = vrot.lane.b32.xlu2 %v2894_v33, %s9512_s29  ;;  %v2896_v18 = vadd.f32 %v2875_v52, %v2814_v61  ;;  %v2895_v40 = vadd.f32 %v2873_v39, %v2812_v20  ;;  %v2879_v24 = vrot.slane %v2878_v56, 4  ;;  %v2884_v30 = vsel %vm14817_vm2, %v2870_v46, %v2845_v38 }
 0x95b   :  { %v2897_v62 = vadd.f32 %v2877_v58, %v2816_v9  ;;  %v2899_v50 = vadd.f32 %v2881_v1, %v2820_v43  ;;  %v2883_v32 = vrot.slane %v2882_v37, 6  ;;  %v2885_v44 = vrot.slane %v2884_v30, 7 }
 0x95c   :  { %3066 = vrot.lane.b32.xlu1 %v2896_v18, %s9512_s29  ;;  %3064 = vrot.lane.b32.xlu0 %v2895_v40, %s9512_s29  ;;  %v2898_v35 = vadd.f32 %v2879_v24, %v2818_v29  ;;  %v8382_v25 = vmul.f32 -1.442695, %v2894_v33  ;;  %v8384_v48 = vmul.f32 -1.442695, %v2896_v18  ;;  %v8383_v63 = vmul.f32 -1.442695, %v2895_v40 }
 0x95d   :  { %v2900_v57 = vadd.f32 %v2883_v32, %v2822_v13  ;;  %v2901_v27 = vadd.f32 %v2885_v44, %v2824_v4  ;;  %v8385_v14 = vmul.f32 -1.442695, %v2897_v62  ;;  %v8387_v34 = vmul.f32 -1.442695, %v2899_v50 }
 0x95e   :  { %8807 = vpow2.f32 %v8382_v25  ;;  %v8386_v60 = vmul.f32 -1.442695, %v2898_v35 }
 0x95f   :  { %8809 = vpow2.f32 %v8384_v48  ;;  %v8389_v8 = vmul.f32 -1.442695, %v2901_v27 }
 0x960   :  { %8811 = vpow2.f32 %v8383_v63 }
 0x961   :  { %8813 = vpow2.f32 %v8385_v14 }
 0x962   :  { %3068 = vrot.lane.b32.xlu2 %v2897_v62, %s9512_s29 }
 0x964   :  { %3072 = vrot.lane.b32.xlu1 %v2899_v50, %s9512_s29  ;;  %3070 = vrot.lane.b32.xlu0 %v2898_v35, %s9512_s29  ;;  %v8808_v0 = vpop.eup %8807 }
 0x965   :  { %v11181_v42 = vadd.f32 1.0, %v8808_v0  ;;  %v8810_v55 = vpop.eup %8809 }
 0x966   :  { %v8812_v22 = vpop.eup %8811  ;;  %v11184_v45 = vadd.f32 1.0, %v8810_v55 }
 0x967   :  { %v8814_v10 = vpop.eup %8813  ;;  %8815 = vrcp.f32 %v11181_v42  ;;  %v11186_v7 = vadd.f32 1.0, %v8812_v22  ;;  %v2943_v41 = vand.u32 2147483647, %v11181_v42  ;;  %v2945_v1 = vand.u32 2147483648, %v11181_v42 }
 0x968   :  { %8817 = vpow2.f32 %v8386_v60  ;;  %v11188_v11 = vadd.f32 1.0, %v8814_v10  ;;  %vm2939_vm10 = vweird.f32 %v11181_v42  ;;  %vm2969_vm8 = vweird.f32 %v11184_v45 }
 0x969   :  { %8819 = vpow2.f32 %v8387_v34  ;;  %v2960_v50 = vand.u32 2147483648, %v11186_v7  ;;  %vm11240_vm6 = vcmp.eq.f32.partialorder %v2943_v41, 8.507059e+37  ;;  %v2946_v44 = vor.u32 1.1754944e-38, %v2945_v1 }
 0x96a   :  { %3074 = vrot.lane.b32.xlu2 %v2900_v57, %s9512_s29  ;;  %v2973_v25 = vand.u32 2147483647, %v11184_v45  ;;  %vm2954_vm15 = vweird.f32 %v11186_v7  ;;  %vm2984_vm14 = vweird.f32 %v11188_v11 }
 0x96b   :  { %v11261_v22 = vor.u32 1.1754944e-38, %v2960_v50 }
 0x96c   :  { %2658 = vrot.lane.b32.xlu1 %v11135_v28, %s9512_s29  ;;  %3076 = vrot.lane.b32.xlu0 %v2901_v27, %s9512_s29  ;;  %v8388_v28 = vmul.f32 -1.442695, %v2900_v57  ;;  %v2975_v57 = vand.u32 2147483648, %v11184_v45  ;;  %v2958_v27 = vand.u32 2147483647, %v11186_v7  ;;  %vm11287_vm4 = vcmp.eq.f32.partialorder %v2973_v25, 8.507059e+37 }
 0x96d   :  { %v11193_v21 = vpop.eup %8815 }
 0x96e   :  { %8821 = vpow2.f32 %v8388_v28  ;;  %v8818_v5 = vpop.eup %8817  ;;  %v2935_v23 = vmul.f32 %v11193_v21, %v11181_v42  ;;  %vm2940_vm13 = vweird.f32 %v11193_v21  ;;  %vm11282_vm9 = vcmp.eq.f32.partialorder %v2958_v27, 8.507059e+37 }
 0x96f   :  { %8823 = vrcp.f32 %v11184_v45  ;;  %v8820_v46 = vpop.eup %8819  ;;  %v11199_v31 = vadd.f32 1.0, %v8818_v5  ;;  %v2976_v5 = vor.u32 1.1754944e-38, %v2975_v57 }
 0x970   :  { %8825 = vrcp.f32 %v11186_v7  ;;  %v11203_v33 = vadd.f32 1.0, %v8820_v46  ;;  %v2936_v16 = vsub.f32 1.0, %v2935_v23 }
 0x971   :  { %8827 = vrcp.f32 %v11188_v11 }
 0x972   :  { %8829 = vpow2.f32 %v8389_v8  ;;  %v2937_v43 = vmul.f32 %v11193_v21, %v2936_v16 }
 0x973   :  { %8831 = vrcp.f32 %v11199_v31 }
 0x974   :  { %v8822_v47 = vpop.eup %8821  ;;  %8833 = vrcp.f32 %v11203_v33  ;;  %v2938_v60 = vadd.f32 %v11193_v21, %v2937_v43 }
 0x975   :  { %v11201_v17 = vpop.eup %8823  ;;  %v11207_v61 = vadd.f32 1.0, %v8822_v47 }
 0x976   :  { %v11205_v39 = vpop.eup %8825  ;;  %v2965_v56 = vmul.f32 %v11201_v17, %v11184_v45  ;;  %vm2970_vm5 = vweird.f32 %v11201_v17 }
 0x977   :  { %v11215_v54 = vpop.eup %8827  ;;  %v2950_v24 = vmul.f32 %v11205_v39, %v11186_v7  ;;  %8835 = vrcp.f32 %v11207_v61  ;;  %vm2955_vm11 = vweird.f32 %v11205_v39 }
 0x978   :  { %v8830_v58 = vpop.eup %8829  ;;  %v2980_v62 = vmul.f32 %v11215_v54, %v11188_v11  ;;  %v2966_v35 = vsub.f32 1.0, %v2965_v56  ;;  %vm2985_vm2 = vweird.f32 %v11215_v54 }
 0x979   :  { %v11235_v29 = vadd.f32 1.0, %v8830_v58  ;;  %v2951_v13 = vsub.f32 1.0, %v2950_v24  ;;  %v11245_v4 = vpop.eup %8831 }
 0x97a   :  { %v2981_v48 = vsub.f32 1.0, %v2980_v62  ;;  %v11250_v63 = vpop.eup %8833  ;;  %v2967_v28 = vmul.f32 %v11201_v17, %v2966_v35  ;;  %v2995_v46 = vmul.f32 %v11245_v4, %v11199_v31 }
 0x97b   :  { %v2952_v8 = vmul.f32 %v11205_v39, %v2951_v13  ;;  %v3010_v42 = vmul.f32 %v11250_v63, %v11203_v33  ;;  %v3050_v45 = vand.u32 2147483648, %v11235_v29 }
 0x97c   :  { %v2982_v23 = vmul.f32 %v11215_v54, %v2981_v48  ;;  %v2996_v24 = vsub.f32 1.0, %v2995_v46 }
 0x97d   :  { %v11258_v55 = vpop.eup %8835  ;;  %v2953_v1 = vadd.f32 %v11205_v39, %v2952_v8  ;;  %v3011_v32 = vsub.f32 1.0, %v3010_v42 }
 0x97e   :  { %v3025_v56 = vmul.f32 %v11258_v55, %v11207_v61  ;;  %v2997_v48 = vmul.f32 %v11245_v4, %v2996_v24 }
 0x9b4   :  { %v3063_v38 = vpop.permute.xlu2 %3062 }
 0x9b5   :  { %v3078_v9 = vrot.slane %v3063_v38, 1 }
 0x9b7   :  { %8837 = vtanh.f32 %v3078_v9 }
 0x9b8   :  { %8839 = vrcp.f32 %v11235_v29 }
 0x9bc   :  { %v3069_v37 = vpop.permute.xlu2 %3068 }
 0x9bd   :  { %v3081_v10 = vrot.slane %v3069_v37, 1  ;;  %v8838_v58 = vpop.eup %8837  ;;  %v2983_v37 = vadd.f32 %v11215_v54, %v2982_v23 }
 0x9be   :  { %v11300_v9 = vpop.eup %8839 }
 0x9c4   :  { %v3075_v62 = vpop.permute.xlu2 %3074 }
 0x9c5   :  { %v3084_v25 = vrot.slane %v3075_v62, 1 }
 0x9ce   :  { %v11179_v53 = vpop.permute.xlu1 %3066 }
 0x9cf   :  { %v3080_v38 = vrot.slane %v11179_v53, 1 }
 0x9d6   :  { %v11190_v2 = vpop.permute.xlu1 %3072 }
 0x9de   :  { %v2659_v52 = vpop.permute.xlu1 %2658 }
 0x9df   :  { %v11213_v20 = vsel %vm2633_vm12, %v2659_v52, %v10886_v26  ;;  %v3065_v26 = vpop.permute.xlu0 %3064  ;;  %vm11272_vm12 = vmor %vm2939_vm10, %vm2940_vm13  ;;  %v2988_v52 = vand.u32 2147483647, %v11188_v11 }
 0x9e0   :  { %3110 = vrot.lane.b32.xlu2 %v11213_v20, %s9512_s29  ;;  %v3104_v18 = vrot.slane %v11213_v20, 2  ;;  %v3103_v40 = vrot.slane %v11213_v20, 1  ;;  %v3105_v30 = vrot.slane %v11213_v20, 3  ;;  %v3107_v14 = vrot.slane %v11213_v20, 5  ;;  %vm11315_vm10 = vmor %vm2969_vm8, %vm2970_vm5 }
 0x9e1   :  { %v3106_v0 = vrot.slane %v11213_v20, 4  ;;  %v3079_v34 = vrot.slane %v3065_v26, 1  ;;  %v2990_v26 = vand.u32 2147483648, %v11188_v11  ;;  %v3108_v41 = vrot.slane %v11213_v20, 6 }
 0x9e2   :  { %3114 = vrot.lane.b32.xlu1 %v3104_v18, %s9512_s29  ;;  %3112 = vrot.lane.b32.xlu0 %v3103_v40, %s9512_s29  ;;  %v2942_v40 = vsel %vm11272_vm12, %v11193_v21, %v2938_v60  ;;  %v2968_v21 = vadd.f32 %v11201_v17, %v2967_v28  ;;  %v3109_v50 = vrot.slane %v11213_v20, 7  ;;  %vm11330_vm13 = vcmp.eq.f32.partialorder %v2988_v52, 8.507059e+37 }
 0x9e3   :  { %8841 = vtanh.f32 %v3079_v34  ;;  %v11304_v43 = vsel %vm11240_vm6, %v2946_v44, %v2942_v40  ;;  %v3026_v44 = vsub.f32 1.0, %v3025_v56  ;;  %vm11323_vm6 = vmor %vm2954_vm15, %vm2955_vm11  ;;  %vm2999_vm8 = vweird.f32 %v11199_v31 }
 0x9e4   :  { %8843 = vtanh.f32 %v3081_v10  ;;  %v3142_v35 = vmul.f32 %v8838_v58, %v11304_v43  ;;  %v2972_v27 = vsel %vm11315_vm10, %v11201_v17, %v2968_v21  ;;  %v2957_v7 = vsel %vm11323_vm6, %v11205_v39, %v2953_v1  ;;  %vm11348_vm15 = vmor %vm2984_vm14, %vm2985_vm2 }
 0x9e5   :  { %8845 = vtanh.f32 %v3080_v38  ;;  %v3040_v17 = vmul.f32 %v11300_v9, %v11235_v29  ;;  %v2991_v34 = vor.u32 1.1754944e-38, %v2990_v26  ;;  %v3003_v28 = vand.u32 2147483647, %v11199_v31 }
 0x9e6   :  { %v3005_v39 = vand.u32 2147483648, %v11199_v31  ;;  %v2987_v8 = vsel %vm11348_vm15, %v11215_v54, %v2983_v37  ;;  %vm3000_vm12 = vweird.f32 %v11245_v4  ;;  %v3027_v11 = vmul.f32 %v11258_v55, %v3026_v44 }
 0x9e7   :  { %v3071_v18 = vpop.permute.xlu0 %3070  ;;  %v11363_v38 = vsel %vm11282_vm9, %v11261_v22, %v2957_v7  ;;  %v11367_v47 = vsel %vm11287_vm4, %v2976_v5, %v2972_v27  ;;  %vm3015_vm14 = vweird.f32 %v11250_v63  ;;  %v2998_v52 = vadd.f32 %v11245_v4, %v2997_v48  ;;  %vm11387_vm5 = vmor %vm2999_vm8, %vm3000_vm12 }
 0x9e8   :  { %3116 = vrot.lane.b32.xlu2 %v3105_v30, %s9512_s29  ;;  %v3082_v13 = vrot.slane %v3071_v18, 1  ;;  %v3041_v18 = vsub.f32 1.0, %v3040_v17  ;;  %v11374_v40 = vsel %vm11330_vm13, %v2991_v34, %v2987_v8  ;;  %v3018_v22 = vand.u32 2147483647, %v11203_v33 }
 0x9e9   :  { %vm3030_vm9 = vweird.f32 %v11258_v55  ;;  %v3028_v42 = vadd.f32 %v11258_v55, %v3027_v11  ;;  %vm3014_vm4 = vweird.f32 %v11203_v33  ;;  %v3020_v21 = vand.u32 2147483648, %v11203_v33 }
 0x9ea   :  { %3120 = vrot.lane.b32.xlu1 %v3107_v14, %s9512_s29  ;;  %3118 = vrot.lane.b32.xlu0 %v3106_v0, %s9512_s29  ;;  %v8842_v14 = vpop.eup %8841  ;;  %v3083_v0 = vrot.slane %v11190_v2, 1  ;;  %v3012_v2 = vmul.f32 %v11250_v63, %v3011_v32  ;;  %8847 = vtanh.f32 %v3082_v13  ;;  %v3035_v26 = vand.u32 2147483648, %v11207_v61  ;;  %vm11401_vm11 = vmor %vm3014_vm4, %vm3015_vm14 }
 0x9eb   :  { %v8844_v10 = vpop.eup %8843  ;;  %8849 = vtanh.f32 %v3084_v25  ;;  %v3143_v23 = vmul.f32 %v8842_v14, %v11363_v38  ;;  %vm3029_vm2 = vweird.f32 %v11207_v61  ;;  %v3033_v33 = vand.u32 2147483647, %v11207_v61 }
 0x9ec   :  { %v8846_v46 = vpop.eup %8845  ;;  %8851 = vtanh.f32 %v3083_v0  ;;  %v3145_v16 = vmul.f32 %v8844_v10, %v11374_v40  ;;  %v3013_v53 = vadd.f32 %v11250_v63, %v3012_v2  ;;  %v3042_v1 = vmul.f32 %v11300_v9, %v3041_v18  ;;  %vm11410_vm10 = vmor %vm3029_vm2, %vm3030_vm9 }
 0x9ed   :  { %v3144_v5 = vmul.f32 %v8846_v46, %v11367_v47  ;;  %v3006_v62 = vor.u32 1.1754944e-38, %v3005_v39  ;;  %vm3004_vm6 = vcmp.eq.f32.partialorder %v3003_v28, 8.507059e+37  ;;  %vm3019_vm13 = vcmp.eq.f32.partialorder %v3018_v22, 8.507059e+37  ;;  %v11443_v46 = vld [vmem:[#allocation1] sm:$0xff] }
 0x9ee   :  { %v3032_v61 = vsel %vm11410_vm10, %v11258_v55, %v3028_v42  ;;  %v3021_v32 = vor.u32 1.1754944e-38, %v3020_v21  ;;  %v3036_v44 = vor.u32 1.1754944e-38, %v3035_v26  ;;  %vm3034_vm8 = vcmp.eq.f32.partialorder %v3033_v33, 8.507059e+37 }
 0x9ef   :  { %v3077_v54 = vpop.permute.xlu0 %3076  ;;  %v3043_v57 = vadd.f32 %v11300_v9, %v3042_v1  ;;  %vm3045_vm15 = vweird.f32 %v11300_v9  ;;  %vm3044_vm12 = vweird.f32 %v11235_v29  ;;  %v3048_v7 = vand.u32 2147483647, %v11235_v29 }
 0x9f0   :  { %3122 = vrot.lane.b32.xlu2 %v3108_v41, %s9512_s29  ;;  %v3085_v56 = vrot.slane %v3077_v54, 1  ;;  %v3002_v41 = vsel %vm11387_vm5, %v11245_v4, %v2998_v52  ;;  %v8848_v24 = vpop.eup %8847  ;;  %vm3046_vm14 = vmor %vm3044_vm12, %vm3045_vm15  ;;  %v3051_v14 = vor.u32 1.1754944e-38, %v3050_v45  ;;  %vm14840_vm4 = vcmask 1041409  }
 0x9f1   :  { %v8850_v4 = vpop.eup %8849  ;;  %v11420_v30 = vsel %vm3004_vm6, %v3006_v62, %v3002_v41  ;;  %v3047_v48 = vsel %vm3046_vm14, %v11300_v9, %v3043_v57  ;;  %vm3049_vm9 = vcmp.eq.f32.partialorder %v3048_v7, 8.507059e+37  ;;  %v3208_v7 = vrot.slane %v11367_v47, 1 }
 0x9f2   :  { %3124 = vrot.lane.b32.xlu0 %v3109_v50, %s9512_s29  ;;  %3158 = vrot.lane.b32.xlu1 %v3142_v35, %s9512_s29  ;;  %v3017_v50 = vsel %vm11401_vm11, %v11250_v63, %v3013_v53  ;;  %v8852_v35 = vpop.eup %8851  ;;  %8853 = vtanh.f32 %v3085_v56  ;;  %v3146_v13 = vmul.f32 %v8848_v24, %v11420_v30  ;;  %v11427_v63 = vsel %vm3034_vm8, %v3036_v44, %v3032_v61 }
 0x9f3   :  { %v11425_v27 = vsel %vm3019_vm13, %v3021_v32, %v3017_v50  ;;  %v3148_v25 = vmul.f32 %v8850_v4, %v11427_v63  ;;  %v11438_v0 = vsel %vm3049_vm9, %v3051_v14, %v3047_v48  ;;  %v3207_v14 = vrot.slane %v11363_v38, 1 }
 0x9f4   :  { %v3147_v55 = vmul.f32 %v8852_v35, %v11425_v27  ;;  %vm14841_vm11 = vcmask 1043459   ;;  %vm14842_vm2 = vcmask 1045509   ;;  %vm14843_vm10 = vcmask 1044484  }
 0x9f5   :  { %vm14844_vm6 = vcmask 1046534   ;;  %vm14845_vm13 = vcmask 1046528  }
 0x9f8   :  { %3160 = vrot.lane.b32.xlu2 %v3143_v23, %s9512_s29  ;;  %v8854_v17 = vpop.eup %8853 }
 0x9f9   :  { %v3149_v60 = vmul.f32 %v8854_v17, %v11438_v0 }
 0x9fa   :  { %3162 = vrot.lane.b32.xlu0 %v3144_v5, %s9512_s29  ;;  %3164 = vrot.lane.b32.xlu1 %v3145_v16, %s9512_s29 }
 0xa00   :  { %3166 = vrot.lane.b32.xlu2 %v3146_v13, %s9512_s29 }
 0xa02   :  { %3168 = vrot.lane.b32.xlu0 %v3147_v55, %s9512_s29  ;;  %3170 = vrot.lane.b32.xlu1 %v3148_v25, %s9512_s29 }
 0xa08   :  { %3172 = vrot.lane.b32.xlu2 %v3149_v60, %s9512_s29 }
 0xa3a   :  { %v3111_v34 = vpop.permute.xlu2 %3110 }
 0xa3b   :  { %v3134_v5 = vmul.f32 %v3111_v34, %v11304_v43 }
 0xa42   :  { %v3117_v28 = vpop.permute.xlu2 %3116 }
 0xa43   :  { %v3137_v41 = vmul.f32 %v3117_v28, %v11374_v40 }
 0xa4a   :  { %v3123_v39 = vpop.permute.xlu2 %3122 }
 0xa4b   :  { %v3140_v50 = vmul.f32 %v3123_v39, %v11427_v63  ;;  %v3211_v39 = vrot.slane %v11425_v27, 1 }
 0xa52   :  { %v3161_v29 = vpop.permute.xlu2 %3160 }
 0xa54   :  { %v3115_v10 = vpop.permute.xlu1 %3114  ;;  %v3113_v8 = vpop.permute.xlu0 %3112 }
 0xa55   :  { %v3135_v2 = vmul.f32 %v3113_v8, %v11363_v38  ;;  %v3136_v31 = vmul.f32 %v3115_v10, %v11367_v47  ;;  %v3210_v8 = vrot.slane %v11420_v30, 1  ;;  %v3206_v47 = vrot.slane %v11304_v43, 1 }
 0xa57   :  { %v3183_v11 = vadd.f32 %v3161_v29, %v3135_v2 }
 0xa59   :  { %8855 = vtanh.f32 %v3183_v11  ;;  %3274 = vst [vmem:[#allocation1 + $0x1] ss:$9 sm:$0xff] %v3183_v11 }
 0xa5a   :  { %v3167_v9 = vpop.permute.xlu2 %3166 }
 0xa5c   :  { %v3121_v54 = vpop.permute.xlu1 %3120  ;;  %v3119_v23 = vpop.permute.xlu0 %3118 }
 0xa5d   :  { %v3138_v52 = vmul.f32 %v3119_v23, %v11420_v30  ;;  %v3139_v61 = vmul.f32 %v3121_v54, %v11425_v27  ;;  %v3213_v54 = vrot.slane %v11438_v0, 1  ;;  %v3209_v27 = vrot.slane %v11374_v40, 1 }
 0xa5e   :  { %v3212_v30 = vrot.slane %v11427_v63, 1 }
 0xa5f   :  { %v8856_v18 = vpop.eup %8855  ;;  %v3186_v22 = vadd.f32 %v3167_v9, %v3138_v52 }
 0xa60   :  { %3232 = vrot.lane.b32.xlu1 %v8856_v18, %s9512_s29 }
 0xa61   :  { %8857 = vtanh.f32 %v3186_v22  ;;  %3280 = vst [vmem:[#allocation1 + $0x4] ss:$9 sm:$0xff] %v3186_v22 }
 0xa62   :  { %v3173_v58 = vpop.permute.xlu2 %3172 }
 0xa64   :  { %v3125_v16 = vpop.permute.xlu0 %3124  ;;  %v3159_v53 = vpop.permute.xlu1 %3158 }
 0xa65   :  { %v3141_v42 = vmul.f32 %v3125_v16, %v11438_v0  ;;  %v3182_v56 = vadd.f32 %v3159_v53, %v3134_v5  ;;  %v14725_v53 = vmov 3  }
 0xa66   :  { %v11473_v43 = vsel %vm308_vm7, 4, %v14725_v53 }
 0xa67   :  { %v8858_v21 = vpop.eup %8857  ;;  %v3189_v26 = vadd.f32 %v3173_v58, %v3141_v42  ;;  %8859 = vtanh.f32 %v3182_v56  ;;  %3272 = vst [vmem:[#allocation1] ss:$9 sm:$0xff] %v3182_v56  ;;  %vm3263_vm5 = vcmp.gt.s32.totalorder %v10044_v12, %v11473_v43  ;;  %v3428_v58 = vld [vmem:[#allocation2 + $0x5] ss:$8 sm:$0x3] }
 0xa68   :  { %3238 = vrot.lane.b32.xlu1 %v8858_v21, %s9512_s29 }
 0xa69   :  { %8861 = vtanh.f32 %v3189_v26  ;;  %3286 = vst [vmem:[#allocation1 + $0x7] ss:$9 sm:$0xff] %v3189_v26 }
 0xa6c   :  { %v3163_v33 = vpop.permute.xlu0 %3162  ;;  %v3165_v1 = vpop.permute.xlu1 %3164 }
 0xa6d   :  { %v8860_v24 = vpop.eup %8859  ;;  %v3184_v62 = vadd.f32 %v3163_v33, %v3136_v31  ;;  %v3185_v37 = vadd.f32 %v3165_v1, %v3137_v41 }
 0xa6e   :  { %3230 = vrot.lane.b32.xlu0 %v8860_v24, %s9512_s29  ;;  %v3432_v24 = vld [vmem:[#allocation2 + $0x25] ss:$8 sm:$0x3] }
 0xa6f   :  { %v8862_v4 = vpop.eup %8861  ;;  %8863 = vtanh.f32 %v3184_v62  ;;  %3276 = vst [vmem:[#allocation1 + $0x2] ss:$9 sm:$0xff] %v3184_v62  ;;  %v3430_v62 = vld [vmem:[#allocation2 + $0x15] ss:$8 sm:$0x3] }
 0xa70   :  { %8865 = vtanh.f32 %v3185_v37  ;;  %3278 = vst [vmem:[#allocation1 + $0x3] ss:$9 sm:$0xff] %v3185_v37  ;;  %3244 = vrot.lane.b32.xlu1 %v8862_v4, %s9512_s29 }
 0xa74   :  { %v3169_v35 = vpop.permute.xlu0 %3168  ;;  %v3171_v32 = vpop.permute.xlu1 %3170 }
 0xa75   :  { %v8864_v44 = vpop.eup %8863  ;;  %v3187_v13 = vadd.f32 %v3169_v35, %v3139_v61  ;;  %v3188_v57 = vadd.f32 %v3171_v32, %v3140_v50 }
 0xa76   :  { %v8866_v45 = vpop.eup %8865  ;;  %3234 = vrot.lane.b32.xlu2 %v8864_v44, %s9512_s29 }
 0xa77   :  { %8867 = vtanh.f32 %v3187_v13  ;;  %3282 = vst [vmem:[#allocation1 + $0x5] ss:$9 sm:$0xff] %v3187_v13  ;;  %3236 = vrot.lane.b32.xlu0 %v8866_v45, %s9512_s29 }
 0xa78   :  { %8869 = vtanh.f32 %v3188_v57  ;;  %3284 = vst [vmem:[#allocation1 + $0x6] ss:$9 sm:$0xff] %v3188_v57  ;;  %v3434_v57 = vld [vmem:[#allocation2 + $0x35] ss:$8 sm:$0x3] }
 0xa7d   :  { %v8868_v55 = vpop.eup %8867 }
 0xa7e   :  { %v8870_v25 = vpop.eup %8869  ;;  %3240 = vrot.lane.b32.xlu2 %v8868_v55, %s9512_s29  ;;  %v3438_v55 = vld [vmem:[#allocation2 + $0x55] ss:$8 sm:$0x3] }
 0xa7f   :  { %3242 = vrot.lane.b32.xlu0 %v8870_v25, %s9512_s29  ;;  %v11462_v60 = vld [vmem:[#allocation1] sm:$0xff]  ;;  %v3436_v25 = vld [vmem:[#allocation2 + $0x45] ss:$8 sm:$0x3] }
 0xad0   :  { %v3235_v48 = vpop.permute.xlu2 %3234 }
 0xad1   :  { %v3256_v17 = vmul.f32 %v3235_v48, %v3208_v7 }
 0xad2   :  { %v3233_v34 = vpop.permute.xlu1 %3232 }
 0xad3   :  { %3304 = vst [vmem:[#allocation1 + $0x2] ss:$9 sm:$0xff] %v3256_v17  ;;  %v3255_v28 = vmul.f32 %v3233_v34, %v3207_v14 }
 0xad5   :  { %3302 = vst [vmem:[#allocation1 + $0x1] ss:$9 sm:$0xff] %v3255_v28 }
 0xad8   :  { %v3241_v29 = vpop.permute.xlu2 %3240 }
 0xad9   :  { %v3259_v10 = vmul.f32 %v3241_v29, %v3211_v39  ;;  %v3440_v39 = vld [vmem:[#allocation2 + $0x65] ss:$8 sm:$0x3] }
 0xada   :  { %v3239_v2 = vpop.permute.xlu1 %3238 }
 0xadb   :  { %3310 = vst [vmem:[#allocation1 + $0x5] ss:$9 sm:$0xff] %v3259_v10  ;;  %v3258_v11 = vmul.f32 %v3239_v2, %v3210_v8 }
 0xadd   :  { %3308 = vst [vmem:[#allocation1 + $0x4] ss:$9 sm:$0xff] %v3258_v11 }
 0xae0   :  { %v3231_v9 = vpop.permute.xlu0 %3230 }
 0xae1   :  { %v3254_v38 = vmul.f32 %v3231_v9, %v3206_v47 }
 0xae2   :  { %v3245_v23 = vpop.permute.xlu1 %3244 }
 0xae3   :  { %3300 = vst [vmem:[#allocation1] ss:$9 sm:$0xff] %v3254_v38  ;;  %v3261_v52 = vmul.f32 %v3245_v23, %v3213_v54 }
 0xae5   :  { %3314 = vst [vmem:[#allocation1 + $0x7] ss:$9 sm:$0xff] %v3261_v52 }
 0xae9   :  { %v3237_v18 = vpop.permute.xlu0 %3236 }
 0xaea   :  { %v3257_v22 = vmul.f32 %v3237_v18, %v3209_v27 }
 0xaec   :  { %3306 = vst [vmem:[#allocation1 + $0x3] ss:$9 sm:$0xff] %v3257_v22 }
 0xaf1   :  { %v3243_v5 = vpop.permute.xlu0 %3242 }
 0xaf2   :  { %v3260_v16 = vmul.f32 %v3243_v5, %v3212_v30 }
 0xaf4   :  { %3312 = vst [vmem:[#allocation1 + $0x6] ss:$9 sm:$0xff] %v3260_v16 }
 0xafb   :  { %v3315_v0 = vld [vmem:[#allocation1] sm:$0xff] }
 0xafc   :  { %3318 = vst [vmem:[#allocation1] ss:$9 sm:$0xff] %v3254_v38  ;;  %v11481_v40 = vsel %vm3263_vm5, %v3315_v0, %v11153_v19 }
 0xafd   :  { %3320 = vst [vmem:[#allocation1 + $0x1] ss:$9 sm:$0xff] %v3255_v28  ;;  %8390 = vmatmul.msk.f32.vlgmr.msra.gmra.mxu2 %vm203_vm0, %v11481_v40  ;;  %8391 = vmatmul.msk.f32.vlgmr.msra.gmra.mxu3 %vm203_vm0, %v11481_v40 }
 0xafe   :  { %3322 = vst [vmem:[#allocation1 + $0x2] ss:$9 sm:$0xff] %v3256_v17 }
 0xaff   :  { %3324 = vst [vmem:[#allocation1 + $0x3] ss:$9 sm:$0xff] %v3257_v22 }
 0xb00   :  { %3326 = vst [vmem:[#allocation1 + $0x4] ss:$9 sm:$0xff] %v3258_v11 }
 0xb01   :  { %3328 = vst [vmem:[#allocation1 + $0x5] ss:$9 sm:$0xff] %v3259_v10 }
 0xb02   :  { %3330 = vst [vmem:[#allocation1 + $0x6] ss:$9 sm:$0xff] %v3260_v16 }
 0xb03   :  { %3332 = vst [vmem:[#allocation1 + $0x7] ss:$9 sm:$0xff] %v3261_v52 }
 0xb0a   :  { %v11487_v63 = vld [vmem:[#allocation1] sm:$0xff] }
 0xb0b   :  { %3359 = vst [vmem:[#allocation1] ss:$9 sm:$0xff] %v3254_v38 }
 0xb0c   :  { %3361 = vst [vmem:[#allocation1 + $0x1] ss:$9 sm:$0xff] %v3255_v28 }
 0xb0d   :  { %3363 = vst [vmem:[#allocation1 + $0x2] ss:$9 sm:$0xff] %v3256_v17 }
 0xb0e   :  { %3365 = vst [vmem:[#allocation1 + $0x3] ss:$9 sm:$0xff] %v3257_v22 }
 0xb0f   :  { %3367 = vst [vmem:[#allocation1 + $0x4] ss:$9 sm:$0xff] %v3258_v11 }
 0xb10   :  { %3369 = vst [vmem:[#allocation1 + $0x5] ss:$9 sm:$0xff] %v3259_v10  ;;  %v3442_v10 = vld [vmem:[#allocation2 + $0x75] ss:$8 sm:$0x3] }
 0xb11   :  { %3371 = vst [vmem:[#allocation1 + $0x6] ss:$9 sm:$0xff] %v3260_v16 }
 0xb12   :  { %3373 = vst [vmem:[#allocation1 + $0x7] ss:$9 sm:$0xff] %v3261_v52 }
 0xb80   :  { %v3483_v19 = vpop.f32.mrf.mxu3  ;;  %v3463_v56 = vpop.f32.mrf.mxu2 }
 0xb81   :  { %v3488_v42 = vrot.slane %v3483_v19, 7 }
 0xb83   :  { %v3489_v21 = vsel %vm370_vm1, %v3463_v56, %v3488_v42  ;;  %v3492_v26 = vsel %vm375_vm3, %v3463_v56, %v3488_v42  ;;  %v3490_v41 = vsel %vm14840_vm4, %v3463_v56, %v3488_v42  ;;  %v3494_v37 = vsel %vm14841_vm11, %v3463_v56, %v3488_v42 }
 0xb84   :  { %v3512_v31 = vadd.f32 %v3489_v21, %v3428_v58  ;;  %v3493_v33 = vrot.slane %v3492_v26, 2  ;;  %v3491_v1 = vrot.slane %v3490_v41, 1  ;;  %v3498_v61 = vsel %vm14842_vm2, %v3463_v56, %v3488_v42 }
 0xb85   :  { %v3496_v35 = vsel %vm14843_vm10, %v3463_v56, %v3488_v42  ;;  %v3495_v32 = vrot.slane %v3494_v37, 3  ;;  %v3499_v44 = vrot.slane %v3498_v61, 5  ;;  %v3500_v7 = vsel %vm14844_vm6, %v3463_v56, %v3488_v42 }
 0xb86   :  { %3680 = vrot.lane.b32.xlu2 %v3512_v31, %s9512_s29  ;;  %v3514_v4 = vadd.f32 %v3493_v33, %v3432_v24  ;;  %v3513_v50 = vadd.f32 %v3491_v1, %v3430_v62  ;;  %v3497_v13 = vrot.slane %v3496_v35, 4  ;;  %v3502_v14 = vsel %vm14845_vm13, %v3488_v42, %v3463_v56 }
 0xb87   :  { %v3515_v45 = vadd.f32 %v3495_v32, %v3434_v57  ;;  %v3517_v48 = vadd.f32 %v3499_v44, %v3438_v55  ;;  %v3501_v34 = vrot.slane %v3500_v7, 6  ;;  %v3503_v28 = vrot.slane %v3502_v14, 7 }
 0xb88   :  { %3684 = vrot.lane.b32.xlu1 %v3514_v4, %s9512_s29  ;;  %3682 = vrot.lane.b32.xlu0 %v3513_v50, %s9512_s29  ;;  %v3516_v17 = vadd.f32 %v3497_v13, %v3436_v25  ;;  %v8392_v2 = vmul.f32 -1.442695, %v3512_v31  ;;  %v8394_v11 = vmul.f32 -1.442695, %v3514_v4  ;;  %v8393_v47 = vmul.f32 -1.442695, %v3513_v50 }
 0xb89   :  { %v3518_v29 = vadd.f32 %v3501_v34, %v3440_v39  ;;  %v3519_v8 = vadd.f32 %v3503_v28, %v3442_v10  ;;  %v8395_v9 = vmul.f32 -1.442695, %v3515_v45  ;;  %v8397_v18 = vmul.f32 -1.442695, %v3517_v48 }
 0xb8a   :  { %8871 = vpow2.f32 %v8392_v2  ;;  %v8396_v52 = vmul.f32 -1.442695, %v3516_v17 }
 0xb8b   :  { %8873 = vpow2.f32 %v8394_v11  ;;  %v8399_v42 = vmul.f32 -1.442695, %v3519_v8 }
 0xb8c   :  { %8875 = vpow2.f32 %v8393_v47 }
 0xb8d   :  { %8877 = vpow2.f32 %v8395_v9 }
 0xb8e   :  { %3686 = vrot.lane.b32.xlu2 %v3515_v45, %s9512_s29 }
 0xb90   :  { %3690 = vrot.lane.b32.xlu1 %v3517_v48, %s9512_s29  ;;  %3688 = vrot.lane.b32.xlu0 %v3516_v17, %s9512_s29  ;;  %v8872_v38 = vpop.eup %8871 }
 0xb91   :  { %v11509_v23 = vadd.f32 1.0, %v8872_v38  ;;  %v8874_v27 = vpop.eup %8873 }
 0xb92   :  { %v8876_v22 = vpop.eup %8875  ;;  %v11512_v5 = vadd.f32 1.0, %v8874_v27 }
 0xb93   :  { %v8878_v30 = vpop.eup %8877  ;;  %8879 = vrcp.f32 %v11509_v23  ;;  %v11514_v16 = vadd.f32 1.0, %v8876_v22  ;;  %v3561_v43 = vand.u32 2147483647, %v11509_v23  ;;  %v3563_v45 = vand.u32 2147483648, %v11509_v23 }
 0xb94   :  { %8881 = vpow2.f32 %v8396_v52  ;;  %v11516_v0 = vadd.f32 1.0, %v8878_v30  ;;  %vm3557_vm8 = vweird.f32 %v11509_v23  ;;  %v3593_v2 = vand.u32 2147483648, %v11512_v5 }
 0xb95   :  { %8883 = vpow2.f32 %v8397_v18  ;;  %v3578_v34 = vand.u32 2147483648, %v11514_v16  ;;  %vm11568_vm15 = vcmp.eq.f32.partialorder %v3561_v43, 8.507059e+37  ;;  %v3564_v10 = vor.u32 1.1754944e-38, %v3563_v45 }
 0xb96   :  { %3692 = vrot.lane.b32.xlu2 %v3518_v29, %s9512_s29  ;;  %v3576_v47 = vand.u32 2147483647, %v11514_v16  ;;  %vm3587_vm12 = vweird.f32 %v11512_v5  ;;  %v3591_v9 = vand.u32 2147483647, %v11512_v5  ;;  %vm3572_vm9 = vweird.f32 %v11514_v16 }
 0xb97   :  { %vm3602_vm4 = vweird.f32 %v11516_v0 }
 0xb98   :  { %3288 = vrot.lane.b32.xlu1 %v11462_v60, %s9512_s29  ;;  %3694 = vrot.lane.b32.xlu0 %v3519_v8, %s9512_s29  ;;  %v8398_v60 = vmul.f32 -1.442695, %v3518_v29  ;;  %vm11610_vm11 = vcmp.eq.f32.partialorder %v3576_v47, 8.507059e+37  ;;  %vm11615_vm10 = vcmp.eq.f32.partialorder %v3591_v9, 8.507059e+37 }
 0xb99   :  { %v11521_v56 = vpop.eup %8879 }
 0xb9a   :  { %8885 = vpow2.f32 %v8398_v60  ;;  %v8882_v58 = vpop.eup %8881  ;;  %v3553_v31 = vmul.f32 %v11521_v56, %v11509_v23  ;;  %vm3558_vm14 = vweird.f32 %v11521_v56 }
 0xb9b   :  { %8887 = vrcp.f32 %v11512_v5  ;;  %v8884_v21 = vpop.eup %8883  ;;  %v11527_v33 = vadd.f32 1.0, %v8882_v58 }
 0xb9c   :  { %8889 = vrcp.f32 %v11514_v16  ;;  %v11531_v24 = vadd.f32 1.0, %v8884_v21  ;;  %v3554_v44 = vsub.f32 1.0, %v3553_v31 }
 0xb9d   :  { %8891 = vrcp.f32 %v11516_v0 }
 0xb9e   :  { %8893 = vpow2.f32 %v8399_v42  ;;  %v3555_v48 = vmul.f32 %v11521_v56, %v3554_v44  ;;  %v11589_v42 = vor.u32 1.1754944e-38, %v3578_v34  ;;  %v3606_v44 = vand.u32 2147483647, %v11516_v0 }
 0xb9f   :  { %8895 = vrcp.f32 %v11527_v33 }
 0xba0   :  { %v8886_v41 = vpop.eup %8885  ;;  %8897 = vrcp.f32 %v11531_v24  ;;  %v3556_v22 = vadd.f32 %v11521_v56, %v3555_v48 }
 0xba1   :  { %v11529_v1 = vpop.eup %8887  ;;  %v11535_v4 = vadd.f32 1.0, %v8886_v41  ;;  %v3594_v41 = vor.u32 1.1754944e-38, %v3593_v2 }
 0xba2   :  { %v11533_v37 = vpop.eup %8889  ;;  %v3583_v13 = vmul.f32 %v11529_v1, %v11512_v5  ;;  %vm3588_vm2 = vweird.f32 %v11529_v1 }
 0xba3   :  { %v11543_v61 = vpop.eup %8891  ;;  %v3568_v55 = vmul.f32 %v11533_v37, %v11514_v16  ;;  %8899 = vrcp.f32 %v11535_v4  ;;  %vm3573_vm6 = vweird.f32 %v11533_v37 }
 0xba4   :  { %v8894_v57 = vpop.eup %8893  ;;  %v3598_v7 = vmul.f32 %v11543_v61, %v11516_v0  ;;  %v3584_v28 = vsub.f32 1.0, %v3583_v13  ;;  %vm3603_vm13 = vweird.f32 %v11543_v61 }
 0xba5   :  { %v11563_v17 = vadd.f32 1.0, %v8894_v57  ;;  %v3569_v8 = vsub.f32 1.0, %v3568_v55  ;;  %v11573_v11 = vpop.eup %8895  ;;  %v3608_v55 = vand.u32 2147483648, %v11516_v0 }
 0xba6   :  { %v3599_v38 = vsub.f32 1.0, %v3598_v7  ;;  %v11578_v52 = vpop.eup %8897  ;;  %v3585_v58 = vmul.f32 %v11529_v1, %v3584_v28  ;;  %v3613_v31 = vmul.f32 %v11573_v11, %v11527_v33 }
 0xba7   :  { %v3628_v23 = vmul.f32 %v11578_v52, %v11531_v24 }
 0xba8   :  { %v3614_v48 = vsub.f32 1.0, %v3613_v31  ;;  %v3621_v31 = vand.u32 2147483647, %v11527_v33 }
 0xba9   :  { %v11586_v60 = vpop.eup %8899  ;;  %v3629_v29 = vsub.f32 1.0, %v3628_v23 }
 0xbaa   :  { %v3643_v43 = vmul.f32 %v11586_v60, %v11535_v4 }
 0xbe0   :  { %v3681_v26 = vpop.permute.xlu2 %3680 }
 0xbe1   :  { %v3696_v25 = vrot.slane %v3681_v26, 1  ;;  %v3570_v26 = vmul.f32 %v11533_v37, %v3569_v8 }
 0xbe3   :  { %8901 = vtanh.f32 %v3696_v25  ;;  %v3571_v7 = vadd.f32 %v11533_v37, %v3570_v26  ;;  %v3609_v26 = vor.u32 1.1754944e-38, %v3608_v55 }
 0xbe4   :  { %8903 = vrcp.f32 %v11563_v17 }
 0xbe8   :  { %v3687_v14 = vpop.permute.xlu2 %3686 }
 0xbe9   :  { %v3699_v21 = vrot.slane %v3687_v14, 1  ;;  %v8902_v45 = vpop.eup %8901 }
 0xbea   :  { %v11628_v14 = vpop.eup %8903 }
 0xbf0   :  { %v3693_v34 = vpop.permute.xlu2 %3692 }
 0xbfa   :  { %v11507_v54 = vpop.permute.xlu1 %3684 }
 0xc02   :  { %v11518_v19 = vpop.permute.xlu1 %3690 }
 0xc0a   :  { %v3289_v62 = vpop.permute.xlu1 %3288 }
 0xc0b   :  { %v11541_v50 = vsel %vm3263_vm5, %v3289_v62, %v11213_v20  ;;  %v3683_v20 = vpop.permute.xlu0 %3682  ;;  %v3698_v62 = vrot.slane %v11507_v54, 1  ;;  %vm11600_vm5 = vmor %vm3557_vm8, %vm3558_vm14  ;;  %vm11658_vm14 = vcmp.eq.f32.partialorder %v3606_v44, 8.507059e+37 }
 0xc0c   :  { %3728 = vrot.lane.b32.xlu2 %v11541_v50, %s9512_s29  ;;  %v3722_v35 = vrot.slane %v11541_v50, 2  ;;  %v3721_v32 = vrot.slane %v11541_v50, 1  ;;  %v3723_v39 = vrot.slane %v11541_v50, 3  ;;  %v3725_v27 = vrot.slane %v11541_v50, 5  ;;  %vm11643_vm8 = vmor %vm3587_vm12, %vm3588_vm2 }
 0xc0d   :  { %v3724_v18 = vrot.slane %v11541_v50, 4  ;;  %v3697_v30 = vrot.slane %v3683_v20, 1  ;;  %v3560_v57 = vsel %vm11600_vm5, %v11521_v56, %v3556_v22  ;;  %v3586_v56 = vadd.f32 %v11529_v1, %v3585_v58 }
 0xc0e   :  { %3732 = vrot.lane.b32.xlu1 %v3722_v35, %s9512_s29  ;;  %3730 = vrot.lane.b32.xlu0 %v3721_v32, %s9512_s29  ;;  %v3600_v32 = vmul.f32 %v11543_v61, %v3599_v38  ;;  %v3726_v25 = vrot.slane %v11541_v50, 6  ;;  %v11632_v28 = vsel %vm11568_vm15, %v3564_v10, %v3560_v57  ;;  %v3727_v8 = vrot.slane %v11541_v50, 7  ;;  %vm11651_vm15 = vmor %vm3572_vm9, %vm3573_vm6 }
 0xc0f   :  { %8905 = vtanh.f32 %v3697_v30  ;;  %v3760_v2 = vmul.f32 %v8902_v45, %v11632_v28  ;;  %v3644_v10 = vsub.f32 1.0, %v3643_v43  ;;  %vm3617_vm12 = vweird.f32 %v11527_v33  ;;  %vm11676_vm9 = vmor %vm3602_vm4, %vm3603_vm13 }
 0xc10   :  { %8907 = vtanh.f32 %v3699_v21  ;;  %v3575_v16 = vsel %vm11651_vm15, %v11533_v37, %v3571_v7  ;;  %v3615_v22 = vmul.f32 %v11573_v11, %v3614_v48  ;;  %v3701_v58 = vrot.slane %v11518_v19, 1 }
 0xc11   :  { %8909 = vtanh.f32 %v3698_v62  ;;  %v3623_v37 = vand.u32 2147483648, %v11527_v33  ;;  %vm3618_vm5 = vweird.f32 %v11573_v11  ;;  %v3630_v19 = vmul.f32 %v11578_v52, %v3629_v29 }
 0xc12   :  { %v3645_v0 = vmul.f32 %v11586_v60, %v3644_v10  ;;  %v11691_v44 = vsel %vm11610_vm11, %v11589_v42, %v3575_v16  ;;  %vm3633_vm4 = vweird.f32 %v11578_v52  ;;  %v3616_v23 = vadd.f32 %v11573_v11, %v3615_v22  ;;  %vm11715_vm2 = vmor %vm3617_vm12, %vm3618_vm5 }
 0xc13   :  { %v3689_v13 = vpop.permute.xlu0 %3688  ;;  %v3636_v42 = vand.u32 2147483647, %v11531_v24  ;;  %vm3648_vm11 = vweird.f32 %v11586_v60  ;;  %v3631_v54 = vadd.f32 %v11578_v52, %v3630_v19  ;;  %v3638_v7 = vand.u32 2147483648, %v11531_v24 }
 0xc14   :  { %3734 = vrot.lane.b32.xlu2 %v3723_v39, %s9512_s29  ;;  %v3601_v39 = vadd.f32 %v11543_v61, %v3600_v32  ;;  %v3700_v9 = vrot.slane %v3689_v13, 1  ;;  %v3653_v48 = vand.u32 2147483648, %v11535_v4  ;;  %vm3647_vm13 = vweird.f32 %v11535_v4 }
 0xc15   :  { %v8906_v30 = vpop.eup %8905  ;;  %vm3622_vm15 = vcmp.eq.f32.partialorder %v3621_v31, 8.507059e+37  ;;  %v3639_v38 = vor.u32 1.1754944e-38, %v3638_v7  ;;  %v3668_v22 = vand.u32 2147483648, %v11563_v17  ;;  %vm3662_vm5 = vweird.f32 %v11563_v17 }
 0xc16   :  { %3738 = vrot.lane.b32.xlu1 %v3725_v27, %s9512_s29  ;;  %3736 = vrot.lane.b32.xlu0 %v3724_v18, %s9512_s29  ;;  %v3590_v27 = vsel %vm11643_vm8, %v11529_v1, %v3586_v56  ;;  %v3702_v18 = vrot.slane %v3693_v34, 1  ;;  %v3658_v1 = vmul.f32 %v11628_v14, %v11563_v17  ;;  %v8908_v62 = vpop.eup %8907  ;;  %v3605_v35 = vsel %vm11676_vm9, %v11543_v61, %v3601_v39  ;;  %vm11738_vm8 = vmor %vm3647_vm13, %vm3648_vm11 }
 0xc17   :  { %v8910_v32 = vpop.eup %8909  ;;  %8911 = vtanh.f32 %v3700_v9  ;;  %v11695_v13 = vsel %vm11615_vm10, %v3594_v41, %v3590_v27  ;;  %v3761_v57 = vmul.f32 %v8906_v30, %v11691_v44  ;;  %v11702_v45 = vsel %vm11658_vm14, %v3609_v26, %v3605_v35 }
 0xc18   :  { %8913 = vtanh.f32 %v3702_v18  ;;  %v3659_v43 = vsub.f32 1.0, %v3658_v1  ;;  %v3762_v41 = vmul.f32 %v8910_v32, %v11695_v13  ;;  %v3763_v20 = vmul.f32 %v8908_v62, %v11702_v45 }
 0xc19   :  { %8915 = vtanh.f32 %v3701_v58  ;;  %v3646_v56 = vadd.f32 %v11586_v60, %v3645_v0  ;;  %vm3632_vm10 = vweird.f32 %v11531_v24  ;;  %v3620_v34 = vsel %vm11715_vm2, %v11573_v11, %v3616_v23  ;;  %v11771_v23 = vld [vmem:[#allocation1] sm:$0xff] }
 0xc1a   :  { %vm11729_vm6 = vmor %vm3632_vm10, %vm3633_vm4  ;;  %v3651_v24 = vand.u32 2147483647, %v11535_v4  ;;  %v3660_v39 = vmul.f32 %v11628_v14, %v3659_v43  ;;  %vm3637_vm14 = vcmp.eq.f32.partialorder %v3636_v42, 8.507059e+37  ;;  %v3654_v27 = vor.u32 1.1754944e-38, %v3653_v48 }
 0xc1b   :  { %v3695_v61 = vpop.permute.xlu0 %3694  ;;  %v3635_v29 = vsel %vm11729_vm6, %v11578_v52, %v3631_v54  ;;  %v3650_v4 = vsel %vm11738_vm8, %v11586_v60, %v3646_v56  ;;  %vm3663_vm9 = vweird.f32 %v11628_v14  ;;  %v3666_v30 = vand.u32 2147483647, %v11563_v17 }
 0xc1c   :  { %3740 = vrot.lane.b32.xlu2 %v3726_v25, %s9512_s29  ;;  %v3703_v55 = vrot.slane %v3695_v61, 1  ;;  %vm3652_vm12 = vcmp.eq.f32.partialorder %v3651_v24, 8.507059e+37  ;;  %v3661_v18 = vadd.f32 %v11628_v14, %v3660_v39  ;;  %v11753_v16 = vsel %vm3637_vm14, %v3639_v38, %v3635_v29  ;;  %vm3664_vm4 = vmor %vm3662_vm5, %vm3663_vm9 }
 0xc1d   :  { %v11755_v52 = vsel %vm3652_vm12, %v3654_v27, %v3650_v4  ;;  %v3669_v26 = vor.u32 1.1754944e-38, %v3668_v22  ;;  %vm3667_vm11 = vcmp.eq.f32.partialorder %v3666_v30, 8.507059e+37  ;;  %vm14869_vm10 = vcmask 1041409  }
 0xc1e   :  { %3742 = vrot.lane.b32.xlu0 %v3727_v8, %s9512_s29  ;;  %3776 = vrot.lane.b32.xlu1 %v3760_v2, %s9512_s29  ;;  %v8912_v8 = vpop.eup %8911  ;;  %v3624_v2 = vor.u32 1.1754944e-38, %v3623_v37  ;;  %8917 = vtanh.f32 %v3703_v55  ;;  %v3665_v58 = vsel %vm3664_vm4, %v11628_v14, %v3661_v18  ;;  %vm14870_vm6 = vcmask 1043459  }
 0xc1f   :  { %v8914_v11 = vpop.eup %8913  ;;  %v11766_v31 = vsel %vm3667_vm11, %v3669_v26, %v3665_v58  ;;  %v3826_v26 = vrot.slane %v11695_v13, 1  ;;  %vm14871_vm13 = vcmask 1045509   ;;  %vm14872_vm8 = vcmask 1044484  }
 0xc20   :  { %v8916_v10 = vpop.eup %8915  ;;  %v11748_v9 = vsel %vm3622_vm15, %v3624_v2, %v3620_v34  ;;  %v3766_v1 = vmul.f32 %v8914_v11, %v11755_v52  ;;  %vm14873_vm15 = vcmask 1046534   ;;  %vm14874_vm14 = vcmask 1046528  }
 0xc21   :  { %v3764_v5 = vmul.f32 %v8912_v8, %v11748_v9  ;;  %v3765_v60 = vmul.f32 %v8916_v10, %v11753_v16 }
 0xc24   :  { %3778 = vrot.lane.b32.xlu2 %v3761_v57, %s9512_s29  ;;  %v8918_v21 = vpop.eup %8917 }
 0xc25   :  { %v3767_v37 = vmul.f32 %v8918_v21, %v11766_v31 }
 0xc26   :  { %3780 = vrot.lane.b32.xlu0 %v3762_v41, %s9512_s29  ;;  %3782 = vrot.lane.b32.xlu1 %v3763_v20, %s9512_s29 }
 0xc2c   :  { %3784 = vrot.lane.b32.xlu2 %v3764_v5, %s9512_s29 }
 0xc2e   :  { %3786 = vrot.lane.b32.xlu0 %v3765_v60, %s9512_s29  ;;  %3788 = vrot.lane.b32.xlu1 %v3766_v1, %s9512_s29 }
 0xc34   :  { %3790 = vrot.lane.b32.xlu2 %v3767_v37, %s9512_s29 }
 0xc66   :  { %v3729_v62 = vpop.permute.xlu2 %3728 }
 0xc67   :  { %v3752_v56 = vmul.f32 %v3729_v62, %v11632_v28 }
 0xc6e   :  { %v3735_v35 = vpop.permute.xlu2 %3734 }
 0xc6f   :  { %v3755_v39 = vmul.f32 %v3735_v35, %v11702_v45  ;;  %v3825_v35 = vrot.slane %v11691_v44, 1 }
 0xc76   :  { %v3741_v19 = vpop.permute.xlu2 %3740 }
 0xc77   :  { %v3758_v38 = vmul.f32 %v3741_v19, %v11755_v52 }
 0xc7e   :  { %v3779_v17 = vpop.permute.xlu2 %3778 }
 0xc80   :  { %v3733_v0 = vpop.permute.xlu1 %3732  ;;  %v3731_v32 = vpop.permute.xlu0 %3730 }
 0xc81   :  { %v3753_v61 = vmul.f32 %v3731_v32, %v11691_v44  ;;  %v3754_v8 = vmul.f32 %v3733_v0, %v11695_v13  ;;  %v3829_v32 = vrot.slane %v11753_v16, 1  ;;  %v3824_v13 = vrot.slane %v11632_v28, 1 }
 0xc83   :  { %v3801_v57 = vadd.f32 %v3779_v17, %v3753_v61 }
 0xc85   :  { %8919 = vtanh.f32 %v3801_v57  ;;  %3892 = vst [vmem:[#allocation1 + $0x1] ss:$9 sm:$0xff] %v3801_v57 }
 0xc86   :  { %v3785_v14 = vpop.permute.xlu2 %3784 }
 0xc88   :  { %v3739_v43 = vpop.permute.xlu1 %3738  ;;  %v3737_v42 = vpop.permute.xlu0 %3736 }
 0xc89   :  { %v3756_v41 = vmul.f32 %v3737_v42, %v11748_v9  ;;  %v3757_v27 = vmul.f32 %v3739_v43, %v11753_v16  ;;  %v3827_v16 = vrot.slane %v11702_v45, 1 }
 0xc8b   :  { %v8920_v20 = vpop.eup %8919  ;;  %v3804_v54 = vadd.f32 %v3785_v14, %v3756_v41  ;;  %v3828_v14 = vrot.slane %v11748_v9, 1  ;;  %v3830_v9 = vrot.slane %v11755_v52, 1 }
 0xc8c   :  { %3850 = vrot.lane.b32.xlu1 %v8920_v20, %s9512_s29  ;;  %v3831_v20 = vrot.slane %v11766_v31, 1 }
 0xc8d   :  { %8921 = vtanh.f32 %v3804_v54  ;;  %3898 = vst [vmem:[#allocation1 + $0x4] ss:$9 sm:$0xff] %v3804_v54 }
 0xc8e   :  { %v3791_v34 = vpop.permute.xlu2 %3790 }
 0xc90   :  { %v3743_v55 = vpop.permute.xlu0 %3742  ;;  %v3777_v25 = vpop.permute.xlu1 %3776 }
 0xc91   :  { %v3759_v7 = vmul.f32 %v3743_v55, %v11766_v31  ;;  %v3800_v48 = vadd.f32 %v3777_v25, %v3752_v56 }
 0xc93   :  { %v8922_v33 = vpop.eup %8921  ;;  %v3807_v24 = vadd.f32 %v3791_v34, %v3759_v7  ;;  %8923 = vtanh.f32 %v3800_v48  ;;  %3890 = vst [vmem:[#allocation1] ss:$9 sm:$0xff] %v3800_v48  ;;  %v14724_v34 = vmov 2  }
 0xc94   :  { %3856 = vrot.lane.b32.xlu1 %v8922_v33, %s9512_s29  ;;  %v11801_v28 = vsel %vm308_vm7, 5, %v14724_v34 }
 0xc95   :  { %8925 = vtanh.f32 %v3807_v24  ;;  %3904 = vst [vmem:[#allocation1 + $0x7] ss:$9 sm:$0xff] %v3807_v24  ;;  %vm3881_vm2 = vcmp.gt.s32.totalorder %v10044_v12, %v11801_v28 }
 0xc98   :  { %v3781_v2 = vpop.permute.xlu0 %3780  ;;  %v3783_v47 = vpop.permute.xlu1 %3782 }
 0xc99   :  { %v8924_v11 = vpop.eup %8923  ;;  %v3802_v29 = vadd.f32 %v3781_v2, %v3754_v8  ;;  %v3803_v4 = vadd.f32 %v3783_v47, %v3755_v39  ;;  %v4046_v39 = vld [vmem:[#allocation2 + $0x6] ss:$8 sm:$0x3] }
 0xc9a   :  { %3848 = vrot.lane.b32.xlu0 %v8924_v11, %s9512_s29 }
 0xc9b   :  { %v8926_v10 = vpop.eup %8925  ;;  %8927 = vtanh.f32 %v3802_v29  ;;  %3894 = vst [vmem:[#allocation1 + $0x2] ss:$9 sm:$0xff] %v3802_v29 }
 0xc9c   :  { %8929 = vtanh.f32 %v3803_v4  ;;  %3896 = vst [vmem:[#allocation1 + $0x3] ss:$9 sm:$0xff] %v3803_v4  ;;  %3862 = vrot.lane.b32.xlu1 %v8926_v10, %s9512_s29  ;;  %v4050_v10 = vld [vmem:[#allocation2 + $0x26] ss:$8 sm:$0x3] }
 0xca0   :  { %v3787_v5 = vpop.permute.xlu0 %3786  ;;  %v3789_v18 = vpop.permute.xlu1 %3788 }
 0xca1   :  { %v8928_v22 = vpop.eup %8927  ;;  %v3805_v60 = vadd.f32 %v3787_v5, %v3757_v27  ;;  %v3806_v1 = vadd.f32 %v3789_v18, %v3758_v38  ;;  %v4048_v38 = vld [vmem:[#allocation2 + $0x16] ss:$8 sm:$0x3] }
 0xca2   :  { %v8930_v30 = vpop.eup %8929  ;;  %3852 = vrot.lane.b32.xlu2 %v8928_v22, %s9512_s29 }
 0xca3   :  { %8931 = vtanh.f32 %v3805_v60  ;;  %3900 = vst [vmem:[#allocation1 + $0x5] ss:$9 sm:$0xff] %v3805_v60  ;;  %3854 = vrot.lane.b32.xlu0 %v8930_v30, %s9512_s29 }
 0xca4   :  { %8933 = vtanh.f32 %v3806_v1  ;;  %3902 = vst [vmem:[#allocation1 + $0x6] ss:$9 sm:$0xff] %v3806_v1 }
 0xca9   :  { %v8932_v58 = vpop.eup %8931 }
 0xcaa   :  { %v8934_v21 = vpop.eup %8933  ;;  %3858 = vrot.lane.b32.xlu2 %v8932_v58, %s9512_s29 }
 0xcab   :  { %3860 = vrot.lane.b32.xlu0 %v8934_v21, %s9512_s29  ;;  %v11790_v19 = vld [vmem:[#allocation1] sm:$0xff] }
 0xcac   :  { %v4052_v21 = vld [vmem:[#allocation2 + $0x36] ss:$8 sm:$0x3] }
 0xcfc   :  { %v3853_v37 = vpop.permute.xlu2 %3852 }
 0xcfd   :  { %v3874_v62 = vmul.f32 %v3853_v37, %v3826_v26  ;;  %v4056_v37 = vld [vmem:[#allocation2 + $0x56] ss:$8 sm:$0x3] }
 0xcfe   :  { %v3851_v17 = vpop.permute.xlu1 %3850 }
 0xcff   :  { %3922 = vst [vmem:[#allocation1 + $0x2] ss:$9 sm:$0xff] %v3874_v62  ;;  %v3873_v0 = vmul.f32 %v3851_v17, %v3825_v35 }
 0xd01   :  { %3920 = vst [vmem:[#allocation1 + $0x1] ss:$9 sm:$0xff] %v3873_v0 }
 0xd04   :  { %v3859_v61 = vpop.permute.xlu2 %3858 }
 0xd05   :  { %v3877_v57 = vmul.f32 %v3859_v61, %v3829_v32 }
 0xd06   :  { %v3857_v43 = vpop.permute.xlu1 %3856 }
 0xd07   :  { %3928 = vst [vmem:[#allocation1 + $0x5] ss:$9 sm:$0xff] %v3877_v57  ;;  %v3876_v42 = vmul.f32 %v3857_v43, %v3828_v14  ;;  %v4058_v14 = vld [vmem:[#allocation2 + $0x66] ss:$8 sm:$0x3] }
 0xd09   :  { %3926 = vst [vmem:[#allocation1 + $0x4] ss:$9 sm:$0xff] %v3876_v42 }
 0xd0c   :  { %v3849_v41 = vpop.permute.xlu0 %3848 }
 0xd0d   :  { %v3872_v44 = vmul.f32 %v3849_v41, %v3824_v13 }
 0xd0e   :  { %v3863_v54 = vpop.permute.xlu1 %3862 }
 0xd0f   :  { %3918 = vst [vmem:[#allocation1] ss:$9 sm:$0xff] %v3872_v44  ;;  %v3879_v56 = vmul.f32 %v3863_v54, %v3831_v20 }
 0xd11   :  { %3932 = vst [vmem:[#allocation1 + $0x7] ss:$9 sm:$0xff] %v3879_v56 }
 0xd15   :  { %v3855_v55 = vpop.permute.xlu0 %3854 }
 0xd16   :  { %v3875_v25 = vmul.f32 %v3855_v55, %v3827_v16 }
 0xd18   :  { %3924 = vst [vmem:[#allocation1 + $0x3] ss:$9 sm:$0xff] %v3875_v25 }
 0xd1d   :  { %v3861_v7 = vpop.permute.xlu0 %3860 }
 0xd1e   :  { %v3878_v48 = vmul.f32 %v3861_v7, %v3830_v9 }
 0xd20   :  { %3930 = vst [vmem:[#allocation1 + $0x6] ss:$9 sm:$0xff] %v3878_v48 }
 0xd27   :  { %v3933_v31 = vld [vmem:[#allocation1] sm:$0xff] }
 0xd28   :  { %3936 = vst [vmem:[#allocation1] ss:$9 sm:$0xff] %v3872_v44  ;;  %v11809_v45 = vsel %vm3881_vm2, %v3933_v31, %v11481_v40 }
 0xd29   :  { %3938 = vst [vmem:[#allocation1 + $0x1] ss:$9 sm:$0xff] %v3873_v0  ;;  %8400 = vmatmul.msk.f32.vlgmr.msra.gmra.mxu0 %vm203_vm0, %v11809_v45  ;;  %8401 = vmatmul.msk.f32.vlgmr.msra.gmra.mxu1 %vm203_vm0, %v11809_v45 }
 0xd2a   :  { %3940 = vst [vmem:[#allocation1 + $0x2] ss:$9 sm:$0xff] %v3874_v62 }
 0xd2b   :  { %3942 = vst [vmem:[#allocation1 + $0x3] ss:$9 sm:$0xff] %v3875_v25 }
 0xd2c   :  { %3944 = vst [vmem:[#allocation1 + $0x4] ss:$9 sm:$0xff] %v3876_v42 }
 0xd2d   :  { %3946 = vst [vmem:[#allocation1 + $0x5] ss:$9 sm:$0xff] %v3877_v57 }
 0xd2e   :  { %3948 = vst [vmem:[#allocation1 + $0x6] ss:$9 sm:$0xff] %v3878_v48 }
 0xd2f   :  { %3950 = vst [vmem:[#allocation1 + $0x7] ss:$9 sm:$0xff] %v3879_v56 }
 0xd36   :  { %v11815_v52 = vld [vmem:[#allocation1] sm:$0xff] }
 0xd37   :  { %14868 = vst [vmem:[#allocation18_spill] sm:$0xff] %v11815_v52 }
 0xd38   :  { %3977 = vst [vmem:[#allocation1] ss:$9 sm:$0xff] %v3872_v44 }
 0xd39   :  { %3979 = vst [vmem:[#allocation1 + $0x1] ss:$9 sm:$0xff] %v3873_v0 }
 0xd3a   :  { %3981 = vst [vmem:[#allocation1 + $0x2] ss:$9 sm:$0xff] %v3874_v62  ;;  %v4054_v62 = vld [vmem:[#allocation2 + $0x46] ss:$8 sm:$0x3] }
 0xd3b   :  { %3983 = vst [vmem:[#allocation1 + $0x3] ss:$9 sm:$0xff] %v3875_v25 }
 0xd3c   :  { %3985 = vst [vmem:[#allocation1 + $0x4] ss:$9 sm:$0xff] %v3876_v42  ;;  %v4060_v42 = vld [vmem:[#allocation2 + $0x76] ss:$8 sm:$0x3] }
 0xd3d   :  { %3987 = vst [vmem:[#allocation1 + $0x5] ss:$9 sm:$0xff] %v3877_v57 }
 0xd3e   :  { %3989 = vst [vmem:[#allocation1 + $0x6] ss:$9 sm:$0xff] %v3878_v48 }
 0xd3f   :  { %3991 = vst [vmem:[#allocation1 + $0x7] ss:$9 sm:$0xff] %v3879_v56 }
 0xda6   :  { %v4101_v40 = vpop.f32.mrf.mxu1  ;;  %v4081_v24 = vpop.f32.mrf.mxu0 }
 0xda7   :  { %v4106_v33 = vrot.slane %v4101_v40, 7 }
 0xda9   :  { %v4107_v8 = vsel %vm370_vm1, %v4081_v24, %v4106_v33  ;;  %v4110_v2 = vsel %vm375_vm3, %v4081_v24, %v4106_v33  ;;  %v4108_v47 = vsel %vm14869_vm10, %v4081_v24, %v4106_v33  ;;  %v4112_v27 = vsel %vm14870_vm6, %v4081_v24, %v4106_v33 }
 0xdaa   :  { %v4130_v11 = vadd.f32 %v4107_v8, %v4046_v39  ;;  %v4111_v29 = vrot.slane %v4110_v2, 2  ;;  %v4109_v4 = vrot.slane %v4108_v47, 1  ;;  %v4116_v22 = vsel %vm14871_vm13, %v4081_v24, %v4106_v33 }
 0xdab   :  { %v4114_v60 = vsel %vm14872_vm8, %v4081_v24, %v4106_v33  ;;  %v4113_v1 = vrot.slane %v4112_v27, 3  ;;  %v4117_v30 = vrot.slane %v4116_v22, 5  ;;  %v4118_v35 = vsel %vm14873_vm15, %v4081_v24, %v4106_v33 }
 0xdac   :  { %4298 = vrot.lane.b32.xlu2 %v4130_v11, %s9512_s29  ;;  %v4132_v5 = vadd.f32 %v4111_v29, %v4050_v10  ;;  %v4131_v18 = vadd.f32 %v4109_v4, %v4048_v38  ;;  %v4115_v58 = vrot.slane %v4114_v60, 4  ;;  %v4120_v32 = vsel %vm14874_vm14, %v4106_v33, %v4081_v24 }
 0xdad   :  { %v4133_v26 = vadd.f32 %v4113_v1, %v4052_v21  ;;  %v4135_v17 = vadd.f32 %v4117_v30, %v4056_v37  ;;  %v4119_v61 = vrot.slane %v4118_v35, 6  ;;  %v4121_v57 = vrot.slane %v4120_v32, 7 }
 0xdae   :  { %4302 = vrot.lane.b32.xlu1 %v4132_v5, %s9512_s29  ;;  %4300 = vrot.lane.b32.xlu0 %v4131_v18, %s9512_s29  ;;  %v4134_v0 = vadd.f32 %v4115_v58, %v4054_v62  ;;  %v8402_v41 = vmul.f32 -1.442695, %v4130_v11  ;;  %v8404_v44 = vmul.f32 -1.442695, %v4132_v5  ;;  %v8403_v20 = vmul.f32 -1.442695, %v4131_v18 }
 0xdaf   :  { %v4136_v43 = vadd.f32 %v4119_v61, %v4058_v14  ;;  %v4137_v13 = vadd.f32 %v4121_v57, %v4060_v42  ;;  %v8405_v54 = vmul.f32 -1.442695, %v4133_v26  ;;  %v8407_v7 = vmul.f32 -1.442695, %v4135_v17 }
 0xdb0   :  { %8935 = vpow2.f32 %v8402_v41  ;;  %v8406_v25 = vmul.f32 -1.442695, %v4134_v0 }
 0xdb1   :  { %8937 = vpow2.f32 %v8404_v44  ;;  %v8409_v8 = vmul.f32 -1.442695, %v4137_v13 }
 0xdb2   :  { %8939 = vpow2.f32 %v8403_v20 }
 0xdb3   :  { %8941 = vpow2.f32 %v8405_v54 }
 0xdb4   :  { %4304 = vrot.lane.b32.xlu2 %v4133_v26, %s9512_s29 }
 0xdb6   :  { %4308 = vrot.lane.b32.xlu1 %v4135_v17, %s9512_s29  ;;  %4306 = vrot.lane.b32.xlu0 %v4134_v0, %s9512_s29  ;;  %v8936_v56 = vpop.eup %8935 }
 0xdb7   :  { %v11837_v55 = vadd.f32 1.0, %v8936_v56  ;;  %v8938_v9 = vpop.eup %8937 }
 0xdb8   :  { %v8940_v48 = vpop.eup %8939  ;;  %v11840_v40 = vadd.f32 1.0, %v8938_v9 }
 0xdb9   :  { %v8942_v31 = vpop.eup %8941  ;;  %8943 = vrcp.f32 %v11837_v55  ;;  %v11842_v33 = vadd.f32 1.0, %v8940_v48  ;;  %v4179_v28 = vand.u32 2147483647, %v11837_v55  ;;  %v4181_v35 = vand.u32 2147483648, %v11837_v55 }
 0xdba   :  { %8945 = vpow2.f32 %v8406_v25  ;;  %v11844_v24 = vadd.f32 1.0, %v8942_v31  ;;  %vm4175_vm12 = vweird.f32 %v11837_v55  ;;  %v4211_v54 = vand.u32 2147483648, %v11840_v40 }
 0xdbb   :  { %8947 = vpow2.f32 %v8407_v7  ;;  %vm11896_vm9 = vcmp.eq.f32.partialorder %v4179_v28, 8.507059e+37  ;;  %v4182_v44 = vor.u32 1.1754944e-38, %v4181_v35  ;;  %v4194_v25 = vand.u32 2147483647, %v11842_v33 }
 0xdbc   :  { %4310 = vrot.lane.b32.xlu2 %v4136_v43, %s9512_s29  ;;  %vm4205_vm5 = vweird.f32 %v11840_v40  ;;  %v4209_v9 = vand.u32 2147483647, %v11840_v40  ;;  %vm4190_vm11 = vweird.f32 %v11842_v33  ;;  %vm4220_vm10 = vweird.f32 %v11844_v24 }
 0xdbd   :  { %vm11938_vm6 = vcmp.eq.f32.partialorder %v4194_v25, 8.507059e+37 }
 0xdbe   :  { %3906 = vrot.lane.b32.xlu1 %v11790_v19, %s9512_s29  ;;  %4312 = vrot.lane.b32.xlu0 %v4137_v13, %s9512_s29  ;;  %v8408_v19 = vmul.f32 -1.442695, %v4136_v43  ;;  %v4196_v43 = vand.u32 2147483648, %v11842_v33  ;;  %vm11943_vm8 = vcmp.eq.f32.partialorder %v4209_v9, 8.507059e+37 }
 0xdbf   :  { %v11849_v2 = vpop.eup %8943 }
 0xdc0   :  { %8949 = vpow2.f32 %v8408_v19  ;;  %v8946_v47 = vpop.eup %8945  ;;  %v4171_v10 = vmul.f32 %v11849_v2, %v11837_v55  ;;  %vm4176_vm4 = vweird.f32 %v11849_v2 }
 0xdc1   :  { %8951 = vrcp.f32 %v11840_v40  ;;  %v8948_v11 = vpop.eup %8947  ;;  %v11855_v38 = vadd.f32 1.0, %v8946_v47 }
 0xdc2   :  { %8953 = vrcp.f32 %v11842_v33  ;;  %v11859_v5 = vadd.f32 1.0, %v8948_v11  ;;  %v4172_v26 = vsub.f32 1.0, %v4171_v10 }
 0xdc3   :  { %8955 = vrcp.f32 %v11844_v24 }
 0xdc4   :  { %8957 = vpow2.f32 %v8409_v8  ;;  %v4173_v61 = vmul.f32 %v11849_v2, %v4172_v26 }
 0xdc5   :  { %8959 = vrcp.f32 %v11855_v38 }
 0xdc6   :  { %v8950_v4 = vpop.eup %8949  ;;  %8961 = vrcp.f32 %v11859_v5  ;;  %v4174_v8 = vadd.f32 %v11849_v2, %v4173_v61  ;;  %v4226_v61 = vand.u32 2147483648, %v11844_v24 }
 0xdc7   :  { %v11857_v27 = vpop.eup %8951  ;;  %v11863_v60 = vadd.f32 1.0, %v8950_v4 }
 0xdc8   :  { %v11861_v22 = vpop.eup %8953  ;;  %v4201_v37 = vmul.f32 %v11857_v27, %v11840_v40  ;;  %vm4206_vm13 = vweird.f32 %v11857_v27 }
 0xdc9   :  { %v11871_v30 = vpop.eup %8955  ;;  %v4186_v17 = vmul.f32 %v11861_v22, %v11842_v33  ;;  %8963 = vrcp.f32 %v11863_v60  ;;  %vm4191_vm15 = vweird.f32 %v11861_v22 }
 0xdca   :  { %v8958_v62 = vpop.eup %8957  ;;  %v4216_v32 = vmul.f32 %v11871_v30, %v11844_v24  ;;  %v4202_v42 = vsub.f32 1.0, %v4201_v37  ;;  %vm4221_vm14 = vweird.f32 %v11871_v30  ;;  %v4227_v37 = vor.u32 1.1754944e-38, %v4226_v61 }
 0xdcb   :  { %v11891_v57 = vadd.f32 1.0, %v8958_v62  ;;  %v4187_v20 = vsub.f32 1.0, %v4186_v17  ;;  %v11901_v56 = vpop.eup %8959 }
 0xdcc   :  { %v4217_v7 = vsub.f32 1.0, %v4216_v32  ;;  %v11906_v48 = vpop.eup %8961  ;;  %v4203_v4 = vmul.f32 %v11857_v27, %v4202_v42 }
 0xdcd   :  { %v4246_v55 = vmul.f32 %v11906_v48, %v11859_v5 }
 0xdce   :  { %v4218_v62 = vmul.f32 %v11871_v30, %v4217_v7 }
 0xdcf   :  { %v11914_v47 = vpop.eup %8963  ;;  %v4247_v41 = vsub.f32 1.0, %v4246_v55 }
 0xdd0   :  { %v4219_v25 = vadd.f32 %v11871_v30, %v4218_v62  ;;  %v4239_v62 = vand.u32 2147483647, %v11855_v38 }
 0xe06   :  { %v4299_v29 = vpop.permute.xlu2 %4298 }
 0xe07   :  { %v4314_v0 = vrot.slane %v4299_v29, 1  ;;  %v11917_v29 = vor.u32 1.1754944e-38, %v4196_v43 }
 0xe09   :  { %8965 = vtanh.f32 %v4314_v0  ;;  %v4261_v0 = vmul.f32 %v11914_v47, %v11863_v60 }
 0xe0a   :  { %8967 = vrcp.f32 %v11891_v57 }
 0xe0e   :  { %v4305_v14 = vpop.permute.xlu2 %4304 }
 0xe0f   :  { %v4317_v10 = vrot.slane %v4305_v14, 1  ;;  %v8966_v32 = vpop.eup %8965 }
 0xe20   :  { %v11835_v16 = vpop.permute.xlu1 %4302 }
 0xe21   :  { %v4316_v26 = vrot.slane %v11835_v16, 1 }
 0xe28   :  { %v11846_v39 = vpop.permute.xlu1 %4308 }
 0xe30   :  { %v3907_v18 = vpop.permute.xlu1 %3906 }
 0xe31   :  { %v11869_v1 = vsel %vm3881_vm2, %v3907_v18, %v11541_v50  ;;  %v4301_v50 = vpop.permute.xlu0 %4300  ;;  %v4188_v18 = vmul.f32 %v11861_v22, %v4187_v20  ;;  %vm11928_vm2 = vmor %vm4175_vm12, %vm4176_vm4  ;;  %v4311_v20 = vpop.permute.xlu2 %4310 }
 0xe32   :  { %4346 = vrot.lane.b32.xlu2 %v11869_v1, %s9512_s29  ;;  %v4340_v58 = vrot.slane %v11869_v1, 2  ;;  %v4339_v21 = vrot.slane %v11869_v1, 1  ;;  %v4341_v13 = vrot.slane %v11869_v1, 3  ;;  %v4343_v19 = vrot.slane %v11869_v1, 5  ;;  %vm11971_vm12 = vmor %vm4205_vm5, %vm4206_vm13 }
 0xe33   :  { %v4342_v31 = vrot.slane %v11869_v1, 4  ;;  %v4315_v11 = vrot.slane %v4301_v50, 1  ;;  %v4224_v50 = vand.u32 2147483647, %v11844_v24  ;;  %v4178_v35 = vsel %vm11928_vm2, %v11849_v2, %v4174_v8 }
 0xe34   :  { %4350 = vrot.lane.b32.xlu1 %v4340_v58, %s9512_s29  ;;  %4348 = vrot.lane.b32.xlu0 %v4339_v21, %s9512_s29  ;;  %v4212_v58 = vor.u32 1.1754944e-38, %v4211_v54  ;;  %v4231_v21 = vmul.f32 %v11901_v56, %v11855_v38  ;;  %v4204_v2 = vadd.f32 %v11857_v27, %v4203_v4  ;;  %v4344_v14 = vrot.slane %v11869_v1, 6 }
 0xe35   :  { %8969 = vtanh.f32 %v4315_v11  ;;  %v4189_v43 = vadd.f32 %v11861_v22, %v4188_v18  ;;  %v11960_v54 = vsel %vm11896_vm9, %v4182_v44, %v4178_v35  ;;  %v4345_v9 = vrot.slane %v11869_v1, 7  ;;  %vm11979_vm9 = vmor %vm4190_vm11, %vm4191_vm15 }
 0xe36   :  { %8971 = vtanh.f32 %v4317_v10  ;;  %v4232_v42 = vsub.f32 1.0, %v4231_v21  ;;  %v4378_v7 = vmul.f32 %v8966_v32, %v11960_v54  ;;  %v4262_v44 = vsub.f32 1.0, %v4261_v0  ;;  %vm12004_vm11 = vmor %vm4220_vm10, %vm4221_vm14 }
 0xe37   :  { %8973 = vtanh.f32 %v4316_v26  ;;  %v4208_v11 = vsel %vm11971_vm12, %v11857_v27, %v4204_v2  ;;  %vm11986_vm4 = vcmp.eq.f32.partialorder %v4224_v50, 8.507059e+37  ;;  %vm4235_vm5 = vweird.f32 %v11855_v38 }
 0xe38   :  { %v4320_v4 = vrot.slane %v4311_v20, 1  ;;  %v4193_v33 = vsel %vm11979_vm9, %v11861_v22, %v4189_v43  ;;  %v4233_v10 = vmul.f32 %v11901_v56, %v4232_v42  ;;  %v4319_v21 = vrot.slane %v11846_v39, 1 }
 0xe39   :  { %v4307_v28 = vpop.permute.xlu0 %4306  ;;  %v4241_v22 = vand.u32 2147483648, %v11855_v38  ;;  %vm4236_vm2 = vweird.f32 %v11901_v56  ;;  %v4248_v39 = vmul.f32 %v11906_v48, %v4247_v41  ;;  %v4263_v24 = vmul.f32 %v11914_v47, %v4262_v44 }
 0xe3a   :  { %4352 = vrot.lane.b32.xlu2 %v4341_v13, %s9512_s29  ;;  %v11956_v13 = vpop.eup %8967  ;;  %v12019_v55 = vsel %vm11938_vm6, %v11917_v29, %v4193_v33  ;;  %v12023_v0 = vsel %vm11943_vm8, %v4212_v58, %v4208_v11  ;;  %vm4251_vm10 = vweird.f32 %v11906_v48  ;;  %v4234_v2 = vadd.f32 %v11901_v56, %v4233_v10  ;;  %vm12043_vm13 = vmor %vm4235_vm5, %vm4236_vm2 }
 0xe3b   :  { %v4276_v27 = vmul.f32 %v11956_v13, %v11891_v57  ;;  %v8970_v18 = vpop.eup %8969  ;;  %v4254_v29 = vand.u32 2147483647, %v11859_v5  ;;  %vm4266_vm6 = vweird.f32 %v11914_v47  ;;  %v4249_v16 = vadd.f32 %v11906_v48, %v4248_v39 }
 0xe3c   :  { %4356 = vrot.lane.b32.xlu1 %v4343_v19, %s9512_s29  ;;  %4354 = vrot.lane.b32.xlu0 %v4342_v31, %s9512_s29  ;;  %v4318_v31 = vrot.slane %v4307_v28, 1  ;;  %v8972_v50 = vpop.eup %8971  ;;  %v4223_v28 = vsel %vm12004_vm11, %v11871_v30, %v4219_v25  ;;  %v4379_v32 = vmul.f32 %v8970_v18, %v12019_v55  ;;  %v4264_v43 = vadd.f32 %v11914_v47, %v4263_v24 }
 0xe3d   :  { %v8974_v35 = vpop.eup %8973  ;;  %v4277_v61 = vsub.f32 1.0, %v4276_v27  ;;  %vm4250_vm8 = vweird.f32 %v11859_v5  ;;  %v4256_v25 = vand.u32 2147483648, %v11859_v5  ;;  %vm4265_vm14 = vweird.f32 %v11863_v60 }
 0xe3e   :  { %8975 = vtanh.f32 %v4318_v31  ;;  %v4380_v58 = vmul.f32 %v8974_v35, %v12023_v0  ;;  %vm12057_vm15 = vmor %vm4250_vm8, %vm4251_vm10  ;;  %v4269_v5 = vand.u32 2147483647, %v11863_v60  ;;  %v4242_v44 = vor.u32 1.1754944e-38, %v4241_v22 }
 0xe3f   :  { %8977 = vtanh.f32 %v4320_v4  ;;  %v4278_v19 = vmul.f32 %v11956_v13, %v4277_v61  ;;  %vm12066_vm12 = vmor %vm4265_vm14, %vm4266_vm6  ;;  %vm4240_vm9 = vcmp.eq.f32.partialorder %v4239_v62, 8.507059e+37  ;;  %v4253_v8 = vsel %vm12057_vm15, %v11906_v48, %v4249_v16 }
 0xe40   :  { %8979 = vtanh.f32 %v4319_v21  ;;  %v4257_v4 = vor.u32 1.1754944e-38, %v4256_v25  ;;  %vm4270_vm5 = vcmp.eq.f32.partialorder %v4269_v5, 8.507059e+37  ;;  %vm4281_vm11 = vweird.f32 %v11956_v13 }
 0xe41   :  { %v4313_v30 = vpop.permute.xlu0 %4312  ;;  %v4279_v27 = vadd.f32 %v11956_v13, %v4278_v19  ;;  %v4286_v21 = vand.u32 2147483648, %v11891_v57  ;;  %vm4280_vm2 = vweird.f32 %v11891_v57  ;;  %vm5358_vm8 = vcmask 1043456  }
 0xe42   :  { %4358 = vrot.lane.b32.xlu2 %v4344_v14, %s9512_s29  ;;  %v12030_v14 = vsel %vm11986_vm4, %v4227_v37, %v4223_v28  ;;  %v4321_v42 = vrot.slane %v4313_v30, 1  ;;  %vm4255_vm4 = vcmp.eq.f32.partialorder %v4254_v29, 8.507059e+37  ;;  %v4284_v37 = vand.u32 2147483647, %v11891_v57  ;;  %vm4282_vm10 = vmor %vm4280_vm2, %vm4281_vm11 }
 0xe43   :  { %v4381_v17 = vmul.f32 %v8972_v50, %v12030_v14  ;;  %v12081_v18 = vsel %vm4255_vm4, %v4257_v4, %v4253_v8  ;;  %v4283_v62 = vsel %vm4282_vm10, %v11956_v13, %v4279_v27  ;;  %v4287_v50 = vor.u32 1.1754944e-38, %v4286_v21 }
 0xe44   :  { %4360 = vrot.lane.b32.xlu0 %v4345_v9, %s9512_s29  ;;  %4394 = vrot.lane.b32.xlu1 %v4378_v7, %s9512_s29  ;;  %v4271_v9 = vand.u32 2147483648, %v11863_v60  ;;  %v4238_v7 = vsel %vm12043_vm13, %v11901_v56, %v4234_v2  ;;  %v8976_v41 = vpop.eup %8975  ;;  %v4268_v60 = vsel %vm12066_vm12, %v11914_v47, %v4264_v43  ;;  %8981 = vtanh.f32 %v4321_v42 }
 0xe45   :  { %v8978_v56 = vpop.eup %8977  ;;  %v12076_v40 = vsel %vm4240_vm9, %v4242_v44, %v4238_v7  ;;  %vm4285_vm6 = vcmp.eq.f32.partialorder %v4284_v37, 8.507059e+37  ;;  %vm14898_vm15 = vcmask 1041409   ;;  %vm14899_vm14 = vcmask 1043459  }
 0xe46   :  { %v8980_v11 = vpop.eup %8979  ;;  %v4272_v33 = vor.u32 1.1754944e-38, %v4271_v9  ;;  %v4382_v10 = vmul.f32 %v8976_v41, %v12076_v40  ;;  %v12094_v28 = vsel %vm4285_vm6, %v4287_v50, %v4283_v62  ;;  %vm14900_vm12 = vcmask 1045509   ;;  %vm14904_vm11 = vmmov %vm14898_vm15 }
 0xe47   :  { %v4383_v47 = vmul.f32 %v8980_v11, %v12081_v18  ;;  %vm14901_vm9 = vcmask 1044484   ;;  %vm14902_vm4 = vcmask 1046534   ;;  %vm14905_vm2 = vmmov %vm14899_vm14 }
 0xe48   :  { %v12083_v48 = vsel %vm4270_vm5, %v4272_v33, %v4268_v60  ;;  %vm14903_vm5 = vcmask 1046528   ;;  %vm14906_vm10 = vmmov %vm14900_vm12 }
 0xe49   :  { %v4384_v26 = vmul.f32 %v8978_v56, %v12083_v48  ;;  %vm14907_vm6 = vmmov %vm14901_vm9 }
 0xe4a   :  { %4396 = vrot.lane.b32.xlu2 %v4379_v32, %s9512_s29  ;;  %v8982_v22 = vpop.eup %8981 }
 0xe4b   :  { %v4385_v39 = vmul.f32 %v8982_v22, %v12094_v28 }
 0xe4c   :  { %4398 = vrot.lane.b32.xlu0 %v4380_v58, %s9512_s29  ;;  %4400 = vrot.lane.b32.xlu1 %v4381_v17, %s9512_s29  ;;  %v12099_v58 = vld [vmem:[#allocation1] sm:$0xff] }
 0xe52   :  { %4402 = vrot.lane.b32.xlu2 %v4382_v10, %s9512_s29 }
 0xe54   :  { %4404 = vrot.lane.b32.xlu0 %v4383_v47, %s9512_s29  ;;  %4406 = vrot.lane.b32.xlu1 %v4384_v26, %s9512_s29 }
 0xe5a   :  { %4408 = vrot.lane.b32.xlu2 %v4385_v39, %s9512_s29 }
 0xe8c   :  { %v4347_v24 = vpop.permute.xlu2 %4346 }
 0xe8d   :  { %v4370_v25 = vmul.f32 %v4347_v24, %v11960_v54 }
 0xe94   :  { %v4353_v35 = vpop.permute.xlu2 %4352 }
 0xe95   :  { %v4373_v31 = vmul.f32 %v4353_v35, %v12030_v14 }
 0xe9c   :  { %v4359_v30 = vpop.permute.xlu2 %4358 }
 0xe9d   :  { %v4376_v27 = vmul.f32 %v4359_v30, %v12083_v48  ;;  %v8523_v30 = vld [vmem:[#allocation11 + $0x34] sm:$0xf] }
 0xea4   :  { %v4397_v57 = vpop.permute.xlu2 %4396 }
 0xea6   :  { %v4351_v32 = vpop.permute.xlu1 %4350  ;;  %v4349_v2 = vpop.permute.xlu0 %4348 }
 0xea7   :  { %v4371_v61 = vmul.f32 %v4349_v2, %v12019_v55  ;;  %v4372_v56 = vmul.f32 %v4351_v32, %v12023_v0  ;;  %v8454_v32 = vld [vmem:[#allocation11 + $0x30] sm:$0xf] }
 0xea9   :  { %v4419_v29 = vadd.f32 %v4397_v57, %v4371_v61  ;;  %v8456_v57 = vld [vmem:[#allocation11 + $0x38] sm:$0xf0]  ;;  %v8524_v61 = vld [vmem:[#allocation11 + $0x34] sm:$0xf0] }
 0xeaa   :  { %v8459_v2 = vor.u32 %v8523_v30, %v8456_v57 }
 0xeab   :  { %8983 = vtanh.f32 %v4419_v29  ;;  %4510 = vst [vmem:[#allocation1 + $0x1] ss:$9 sm:$0xff] %v4419_v29  ;;  %v8521_v29 = vld [vmem:[#allocation11 + $0x24] sm:$0xf] }
 0xeac   :  { %v4403_v13 = vpop.permute.xlu2 %4402  ;;  %5331 = vmatpush.bf16.msrb.mxu1 %v8459_v2  ;;  %v12146_v2 = vld [vmem:[#allocation13 + $0x78] sm:$0xff] }
 0xead   :  { %5446 = vmatpush.msra.mxu3 %v12146_v2 }
 0xeae   :  { %v4357_v17 = vpop.permute.xlu1 %4356  ;;  %v4355_v16 = vpop.permute.xlu0 %4354 }
 0xeaf   :  { %v4374_v43 = vmul.f32 %v4355_v16, %v12076_v40  ;;  %v4375_v21 = vmul.f32 %v4357_v17, %v12081_v18  ;;  %v8455_v17 = vor.u32 %v8524_v61, %v8454_v32 }
 0xeb1   :  { %v8984_v42 = vpop.eup %8983  ;;  %v4422_v20 = vadd.f32 %v4403_v13, %v4374_v43  ;;  %v8448_v13 = vld [vmem:[#allocation11 + $0x28] sm:$0xf0]  ;;  %5312 = vmatpush.bf16.msrb.mxu0 %v8455_v17  ;;  %v8446_v43 = vld [vmem:[#allocation11 + $0x20] sm:$0xf]  ;;  %v4448_v17 = vrot.slane %v12083_v48, 1 }
 0xeb2   :  { %4468 = vrot.lane.b32.xlu1 %v8984_v42, %s9512_s29  ;;  %v8451_v16 = vor.u32 %v8521_v29, %v8448_v13  ;;  %v8522_v42 = vld [vmem:[#allocation11 + $0x24] sm:$0xf0]  ;;  %v12160_v29 = vld [vmem:[#allocation13 + $0x60] sm:$0xff]  ;;  %v12162_v13 = vld [vmem:[#allocation13 + $0x58] sm:$0xff] }
 0xeb3   :  { %8985 = vtanh.f32 %v4422_v20  ;;  %4516 = vst [vmem:[#allocation1 + $0x4] ss:$9 sm:$0xff] %v4422_v20  ;;  %v8447_v20 = vor.u32 %v8522_v42, %v8446_v43  ;;  %v12169_v42 = vld [vmem:[#allocation13 + $0x50] sm:$0xff] }
 0xeb4   :  { %v4409_v19 = vpop.permute.xlu2 %4408  ;;  %5332 = vmatpush.bf16.msrb.mxu1 %v8451_v16  ;;  %v8516_v16 = vld [vmem:[#allocation8 + $0x8] sm:$0xff] }
 0xeb5   :  { %5313 = vmatpush.bf16.msrb.mxu0 %v8447_v20  ;;  %v12171_v20 = vld [vmem:[#allocation13 + $0x48] sm:$0xff] }
 0xeb6   :  { %v4361_v9 = vpop.permute.xlu0 %4360  ;;  %v4395_v7 = vpop.permute.xlu1 %4394 }
 0xeb7   :  { %v4377_v38 = vmul.f32 %v4361_v9, %v12094_v28  ;;  %v4418_v5 = vadd.f32 %v4395_v7, %v4370_v25  ;;  %v8519_v25 = vld [vmem:[#allocation11 + $0x14] sm:$0xf]  ;;  %v8440_v9 = vld [vmem:[#allocation11 + $0x18] sm:$0xf0]  ;;  %v8438_v7 = vld [vmem:[#allocation11 + $0x10] sm:$0xf] }
 0xeb9   :  { %v8986_v41 = vpop.eup %8985  ;;  %v4425_v44 = vadd.f32 %v4409_v19, %v4377_v38  ;;  %8987 = vtanh.f32 %v4418_v5  ;;  %4508 = vst [vmem:[#allocation1] ss:$9 sm:$0xff] %v4418_v5  ;;  %v8443_v38 = vor.u32 %v8519_v25, %v8440_v9  ;;  %v8520_v5 = vld [vmem:[#allocation11 + $0x14] sm:$0xf0]  ;;  %v8517_v19 = vld [vmem:[#allocation11 + $0x4] sm:$0xf] }
 0xeba   :  { %4474 = vrot.lane.b32.xlu1 %v8986_v41, %s9512_s29  ;;  %v8432_v41 = vld [vmem:[#allocation11 + $0x8] sm:$0xf0] }
 0xebb   :  { %8989 = vtanh.f32 %v4425_v44  ;;  %4522 = vst [vmem:[#allocation1 + $0x7] ss:$9 sm:$0xff] %v4425_v44  ;;  %v8439_v44 = vor.u32 %v8520_v5, %v8438_v7  ;;  %5333 = vmatpush.bf16.msrb.mxu1 %v8443_v38  ;;  %v12187_v7 = vld [vmem:[#allocation13 + $0x40] sm:$0xff]  ;;  %v12189_v38 = vld [vmem:[#allocation13 + $0x38] sm:$0xff] }
 0xebd   :  { %5314 = vmatpush.bf16.msrb.mxu0 %v8439_v44  ;;  %v12207_v44 = vld [vmem:[#allocation13 + $0x20] sm:$0xff] }
 0xebe   :  { %v4399_v8 = vpop.permute.xlu0 %4398  ;;  %v4401_v60 = vpop.permute.xlu1 %4400 }
 0xebf   :  { %v8988_v11 = vpop.eup %8987  ;;  %v4420_v4 = vadd.f32 %v4399_v8, %v4372_v56  ;;  %v4421_v33 = vadd.f32 %v4401_v60, %v4373_v31  ;;  %v8435_v31 = vor.u32 %v8517_v19, %v8432_v41  ;;  %v8430_v56 = vld [vmem:[#allocation11] sm:$0xf]  ;;  %v8518_v8 = vld [vmem:[#allocation11 + $0x4] sm:$0xf0]  ;;  %v8515_v60 = vld [vmem:[#allocation8] sm:$0xff] }
 0xec0   :  { %4466 = vrot.lane.b32.xlu0 %v8988_v11, %s9512_s29  ;;  %v8431_v11 = vor.u32 %v8518_v8, %v8430_v56  ;;  %v12200_v41 = vld [vmem:[#allocation13 + $0x28] sm:$0xff]  ;;  %v12215_v56 = vld [vmem:[#allocation13 + $0x10] sm:$0xff] }
 0xec1   :  { %v8990_v10 = vpop.eup %8989  ;;  %8991 = vtanh.f32 %v4420_v4  ;;  %4512 = vst [vmem:[#allocation1 + $0x2] ss:$9 sm:$0xff] %v4420_v4  ;;  %5334 = vmatpush.bf16.msrb.mxu1 %v8435_v31  ;;  %v4444_v4 = vrot.slane %v12023_v0, 1  ;;  %v12209_v31 = vld [vmem:[#allocation13 + $0x18] sm:$0xff]  ;;  %v12217_v8 = vld [vmem:[#allocation13 + $0x8] sm:$0xff] }
 0xec2   :  { %8993 = vtanh.f32 %v4421_v33  ;;  %4514 = vst [vmem:[#allocation1 + $0x3] ss:$9 sm:$0xff] %v4421_v33  ;;  %4480 = vrot.lane.b32.xlu1 %v8990_v10, %s9512_s29  ;;  %5315 = vmatpush.bf16.msrb.mxu0 %v8431_v11  ;;  %v5387_v11 = vld [vmem:[#allocation13] sm:$0xff] }
 0xec4   :  { %8462 = vmatmul.msk.bf16.vlgmr.msrb.gmra.mxu1 %vm203_vm0, %v8515_v60 }
 0xec5   :  { %8460 = vmatmul.msk.bf16.vlgmr.msrb.gmra.mxu0 %vm203_vm0, %v8515_v60  ;;  %6677 = vmatpush.msra.mxu1 %v12146_v2 }
 0xec6   :  { %v4405_v47 = vpop.permute.xlu0 %4404  ;;  %v4407_v26 = vpop.permute.xlu1 %4406 }
 0xec7   :  { %v8992_v37 = vpop.eup %8991  ;;  %v4423_v62 = vadd.f32 %v4405_v47, %v4375_v21  ;;  %v4424_v22 = vadd.f32 %v4407_v26, %v4376_v27  ;;  %v4443_v27 = vrot.slane %v12019_v55, 1  ;;  %v4447_v26 = vrot.slane %v12081_v18, 1 }
 0xec8   :  { %v8994_v50 = vpop.eup %8993  ;;  %4470 = vrot.lane.b32.xlu2 %v8992_v37, %s9512_s29 }
 0xec9   :  { %8995 = vtanh.f32 %v4423_v62  ;;  %4518 = vst [vmem:[#allocation1 + $0x5] ss:$9 sm:$0xff] %v4423_v62  ;;  %4472 = vrot.lane.b32.xlu0 %v8994_v50, %s9512_s29  ;;  %v4446_v62 = vrot.slane %v12076_v40, 1  ;;  %v4442_v50 = vrot.slane %v11960_v54, 1  ;;  %v4445_v40 = vrot.slane %v12030_v14, 1  ;;  %v12151_v54 = vld [vmem:[#allocation13 + $0x70] sm:$0xff] }
 0xeca   :  { %8997 = vtanh.f32 %v4424_v22  ;;  %4520 = vst [vmem:[#allocation1 + $0x6] ss:$9 sm:$0xff] %v4424_v22  ;;  %5426 = vmatpush.msra.mxu2 %v12151_v54  ;;  %v14723_v14 = vmov 1   ;;  %6657 = vmatpush.msra.mxu0 %v12151_v54 }
 0xecb   :  { %v4498_v61 = vsel %vm308_vm7, 6, %v14723_v14 }
 0xecc   :  { %5427 = vmatpush.msra.mxu2 %v12160_v29  ;;  %6658 = vmatpush.msra.mxu0 %v12160_v29  ;;  %vm4499_vm13 = vcmp.gt.s32.totalorder %v10044_v12, %v4498_v61  ;;  %v14897_v12 = vmov 0.0  }
 0xece   :  { %5428 = vmatpush.msra.mxu2 %v12169_v42  ;;  %6659 = vmatpush.msra.mxu0 %v12169_v42 }
 0xecf   :  { %v8996_v39 = vpop.eup %8995 }
 0xed0   :  { %v8998_v24 = vpop.eup %8997  ;;  %4476 = vrot.lane.b32.xlu2 %v8996_v39, %s9512_s29  ;;  %5429 = vmatpush.msra.mxu2 %v12187_v7 }
 0xed1   :  { %v4523_v35 = vld [vmem:[#allocation1] sm:$0xff]  ;;  %4478 = vrot.lane.b32.xlu0 %v8998_v24, %s9512_s29  ;;  %6660 = vmatpush.msra.mxu0 %v12187_v7 }
 0xed2   :  { %4524 = vrot.lane.b32.xlu1 %v4523_v35, %s9512_s29  ;;  %v4449_v35 = vrot.slane %v12094_v28, 1  ;;  %v12153_v28 = vld [vmem:[#allocation13 + $0x68] sm:$0xff] }
 0xed3   :  { %5447 = vmatpush.msra.mxu3 %v12153_v28  ;;  %6678 = vmatpush.msra.mxu1 %v12153_v28 }
 0xed4   :  { %8463 = vmatmul.msk.bf16.gmra.mxu1 %vm203_vm0, %v8516_v16 }
 0xed5   :  { %5448 = vmatpush.msra.mxu3 %v12162_v13  ;;  %6679 = vmatpush.msra.mxu1 %v12162_v13 }
 0xed6   :  { %8461 = vmatmul.msk.bf16.gmra.mxu0 %vm203_vm0, %v8516_v16 }
 0xed7   :  { %5449 = vmatpush.msra.mxu3 %v12171_v20  ;;  %6680 = vmatpush.msra.mxu1 %v12171_v20 }
 0xed9   :  { %5450 = vmatpush.msra.mxu3 %v12189_v38  ;;  %6681 = vmatpush.msra.mxu1 %v12189_v38 }
 0xedb   :  { %5451 = vmatpush.msra.mxu3 %v12200_v41  ;;  %6682 = vmatpush.msra.mxu1 %v12200_v41 }
 0xedd   :  { %5452 = vmatpush.msra.mxu3 %v12209_v31  ;;  %6683 = vmatpush.msra.mxu1 %v12209_v31 }
 0xedf   :  { %5453 = vmatpush.msra.mxu3 %v12217_v8  ;;  %6684 = vmatpush.msra.mxu1 %v12217_v8 }
 0xf22   :  { %v4471_v33 = vpop.permute.xlu2 %4470 }
 0xf23   :  { %v12119_v10 = vmul.f32 %v4471_v33, %v4444_v4  ;;  %v5246_v33 = vld [vmem:[%s14709_s9] sm:$0x3] }
 0xf24   :  { %v4469_v21 = vpop.permute.xlu1 %4468 }
 0xf25   :  { %4540 = vst [vmem:[#allocation1 + $0x2] ss:$9 sm:$0xff] %v12119_v10  ;;  %v12124_v47 = vmul.f32 %v4469_v21, %v4443_v27  ;;  %v5248_v21 = vperm.slane %v5246_v33, 0 }
 0xf27   :  { %4538 = vst [vmem:[#allocation1 + $0x1] ss:$9 sm:$0xff] %v12124_v47 }
 0xf2a   :  { %v4477_v0 = vpop.permute.xlu2 %4476 }
 0xf2b   :  { %v12128_v37 = vmul.f32 %v4477_v0, %v4447_v26 }
 0xf2c   :  { %v4475_v22 = vpop.permute.xlu1 %4474 }
 0xf2d   :  { %4546 = vst [vmem:[#allocation1 + $0x5] ss:$9 sm:$0xff] %v12128_v37  ;;  %v12132_v55 = vmul.f32 %v4475_v22, %v4446_v62 }
 0xf2f   :  { %4544 = vst [vmem:[#allocation1 + $0x4] ss:$9 sm:$0xff] %v12132_v55 }
 0xf32   :  { %v4467_v39 = vpop.permute.xlu0 %4466 }
 0xf33   :  { %v12136_v24 = vmul.f32 %v4467_v39, %v4442_v50 }
 0xf34   :  { %v4481_v18 = vpop.permute.xlu1 %4480 }
 0xf35   :  { %4536 = vst [vmem:[#allocation1] ss:$9 sm:$0xff] %v12136_v24  ;;  %v12140_v30 = vmul.f32 %v4481_v18, %v4449_v35 }
 0xf37   :  { %4550 = vst [vmem:[#allocation1 + $0x7] ss:$9 sm:$0xff] %v12140_v30 }
 0xf3b   :  { %v4473_v57 = vpop.permute.xlu0 %4472 }
 0xf3c   :  { %v12144_v32 = vmul.f32 %v4473_v57, %v4445_v40 }
 0xf3e   :  { %4542 = vst [vmem:[#allocation1 + $0x3] ss:$9 sm:$0xff] %v12144_v32 }
 0xf41   :  { %v5336_v27 = vpop.f32.mrf.mxu1 }
 0xf42   :  { %v5317_v0 = vpop.f32.mrf.mxu0 }
 0xf43   :  { %v4479_v43 = vpop.permute.xlu0 %4478 }
 0xf44   :  { %v12175_v25 = vmul.f32 %v4479_v43, %v4448_v17  ;;  %v4525_v9 = vpop.permute.xlu1 %4524 }
 0xf45   :  { %v12183_v48 = vsel %vm4499_vm13, %v4525_v9, %v11869_v1  ;;  %v12198_v1 = vld [vmem:[#allocation13 + $0x30] sm:$0xff] }
 0xf46   :  { %4548 = vst [vmem:[#allocation1 + $0x6] ss:$9 sm:$0xff] %v12175_v25  ;;  %4964 = vrot.lane.b32.xlu1 %v12183_v48, %s9512_s29  ;;  %v4957_v5 = vrot.slane %v12183_v48, 1  ;;  %v4958_v19 = vrot.slane %v12183_v48, 2  ;;  %5430 = vmatpush.msra.mxu2 %v12198_v1 }
 0xf47   :  { %6661 = vmatpush.msra.mxu0 %v12198_v1 }
 0xf48   :  { %4966 = vrot.lane.b32.xlu2 %v4957_v5, %s9512_s29  ;;  %4968 = vrot.lane.b32.xlu0 %v4958_v19, %s9512_s29 }
 0xf49   :  { %5431 = vmatpush.msra.mxu2 %v12207_v44  ;;  %6662 = vmatpush.msra.mxu0 %v12207_v44  ;;  %v5338_v50 = vpop.f32.mrf.mxu1 }
 0xf4a   :  { %v5319_v35 = vpop.f32.mrf.mxu0 }
 0xf4b   :  { %5432 = vmatpush.msra.mxu2 %v12215_v56  ;;  %6663 = vmatpush.msra.mxu0 %v12215_v56  ;;  %v5320_v18 = vadd.f32 %v5319_v35, %v5248_v21 }
 0xf4d   :  { %v4551_v60 = vld [vmem:[#allocation1] sm:$0xff]  ;;  %5433 = vmatpush.msra.mxu2 %v5387_v11  ;;  %6664 = vmatpush.msra.mxu0 %v5387_v11 }
 0xf4e   :  { %4554 = vst [vmem:[#allocation1] ss:$9 sm:$0xff] %v12136_v24  ;;  %v4553_v4 = vsel %vm4499_vm13, %v4551_v60, %v11809_v45  ;;  %vm14908_vm13 = vmmov %vm14902_vm4 }
 0xf4f   :  { %4556 = vst [vmem:[#allocation1 + $0x1] ss:$9 sm:$0xff] %v12124_v47  ;;  %8410 = vmatmul.msk.f32.vlgmr.msrb.gmra.mxu2 %vm203_vm0, %v4553_v4  ;;  %8411 = vmatmul.msk.f32.vlgmr.msrb.gmra.mxu3 %vm203_vm0, %v4553_v4  ;;  %v4668_v4 = vld [vmem:[#allocation2 + $0x27] ss:$8 sm:$0x3] }
 0xf50   :  { %4558 = vst [vmem:[#allocation1 + $0x2] ss:$9 sm:$0xff] %v12119_v10  ;;  %6047 = vmatpush.msrb.mxu3 %v12146_v2  ;;  %6027 = vmatpush.msrb.mxu2 %v12151_v54 }
 0xf51   :  { %4560 = vst [vmem:[#allocation1 + $0x3] ss:$9 sm:$0xff] %v12144_v32 }
 0xf52   :  { %4562 = vst [vmem:[#allocation1 + $0x4] ss:$9 sm:$0xff] %v12132_v55  ;;  %6048 = vmatpush.msrb.mxu3 %v12153_v28  ;;  %6028 = vmatpush.msrb.mxu2 %v12160_v29 }
 0xf53   :  { %4564 = vst [vmem:[#allocation1 + $0x5] ss:$9 sm:$0xff] %v12128_v37 }
 0xf54   :  { %4566 = vst [vmem:[#allocation1 + $0x6] ss:$9 sm:$0xff] %v12175_v25  ;;  %6049 = vmatpush.msrb.mxu3 %v12162_v13  ;;  %6029 = vmatpush.msrb.mxu2 %v12169_v42 }
 0xf55   :  { %4568 = vst [vmem:[#allocation1 + $0x7] ss:$9 sm:$0xff] %v12140_v30 }
 0xf56   :  { %6050 = vmatpush.msrb.mxu3 %v12171_v20  ;;  %6030 = vmatpush.msrb.mxu2 %v12187_v7 }
 0xf57   :  { %5454 = vmatmul.f32.vlgmr.msra.gmra.mxu3 %v14897_v12  ;;  %5434 = vmatmul.f32.vlgmr.msra.gmra.mxu2 %v14897_v12  ;;  %v4666_v12 = vld [vmem:[#allocation2 + $0x17] ss:$8 sm:$0x3] }
 0xf58   :  { %6051 = vmatpush.msrb.mxu3 %v12189_v38  ;;  %6031 = vmatpush.msrb.mxu2 %v12198_v1 }
 0xf5a   :  { %6052 = vmatpush.msrb.mxu3 %v12200_v41  ;;  %6032 = vmatpush.msrb.mxu2 %v12207_v44 }
 0xf5c   :  { %v12254_v45 = vld [vmem:[#allocation1] sm:$0xff]  ;;  %6053 = vmatpush.msrb.mxu3 %v12209_v31  ;;  %6033 = vmatpush.msrb.mxu2 %v12215_v56 }
 0xf5d   :  { %4595 = vst [vmem:[#allocation1] ss:$9 sm:$0xff] %v12136_v24 }
 0xf5e   :  { %4597 = vst [vmem:[#allocation1 + $0x1] ss:$9 sm:$0xff] %v12124_v47  ;;  %6054 = vmatpush.msrb.mxu3 %v12217_v8  ;;  %6034 = vmatpush.msrb.mxu2 %v5387_v11 }
 0xf5f   :  { %4599 = vst [vmem:[#allocation1 + $0x2] ss:$9 sm:$0xff] %v12119_v10  ;;  %v5249_v10 = vperm.slane %v5246_v33, 1 }
 0xf60   :  { %7295 = vmatpush.msra.mxu3 %v12146_v2  ;;  %4601 = vst [vmem:[#allocation1 + $0x3] ss:$9 sm:$0xff] %v12144_v32  ;;  %7275 = vmatpush.msra.mxu2 %v12151_v54  ;;  %v5341_v32 = vpop.f32.mrf.mxu1  ;;  %v5322_v54 = vpop.f32.mrf.mxu0 }
 0xf61   :  { %4603 = vst [vmem:[#allocation1 + $0x4] ss:$9 sm:$0xff] %v12132_v55  ;;  %v5337_v47 = vadd.f32 %v5336_v27, %v5249_v10  ;;  %v5339_v39 = vadd.f32 %v5338_v50, %v5249_v10  ;;  %v5342_v2 = vadd.f32 %v5341_v32, %v5249_v10  ;;  %v4672_v50 = vld [vmem:[#allocation2 + $0x47] ss:$8 sm:$0x3] }
 0xf62   :  { %7296 = vmatpush.msra.mxu3 %v12153_v28  ;;  %4605 = vst [vmem:[#allocation1 + $0x5] ss:$9 sm:$0xff] %v12128_v37  ;;  %7276 = vmatpush.msra.mxu2 %v12160_v29  ;;  %v5318_v37 = vadd.f32 %v5317_v0, %v5248_v21  ;;  %v5323_v28 = vadd.f32 %v5322_v54, %v5248_v21 }
 0xf63   :  { %4607 = vst [vmem:[#allocation1 + $0x6] ss:$9 sm:$0xff] %v12175_v25  ;;  %v5354_v26 = vrot.slane %v5337_v47, 4  ;;  %v5355_v24 = vrot.slane %v5339_v39, 4  ;;  %v5356_v61 = vrot.slane %v5342_v2, 4 }
 0xf64   :  { %7297 = vmatpush.msra.mxu3 %v12162_v13  ;;  %4609 = vst [vmem:[#allocation1 + $0x7] ss:$9 sm:$0xff] %v12140_v30  ;;  %7277 = vmatpush.msra.mxu2 %v12169_v42  ;;  %v4676_v2 = vld [vmem:[#allocation2 + $0x67] ss:$8 sm:$0x3] }
 0xf65   :  { %v5359_v62 = vsel %vm5358_vm8, %v5318_v37, %v5354_v26  ;;  %v5360_v22 = vsel %vm5358_vm8, %v5354_v26, %v5318_v37  ;;  %v5362_v30 = vsel %vm5358_vm8, %v5320_v18, %v5355_v24  ;;  %v5363_v40 = vsel %vm5358_vm8, %v5355_v24, %v5320_v18 }
 0xf66   :  { %7298 = vmatpush.msra.mxu3 %v12171_v20  ;;  %7278 = vmatpush.msra.mxu2 %v12187_v7  ;;  %v5361_v55 = vrot.slane %v5360_v22, 4  ;;  %5379 = vst [vmem:[#allocation3] sm:$0xff] %v5359_v62  ;;  %v5364_v57 = vrot.slane %v5363_v40, 4  ;;  %v5365_v29 = vsel %vm5358_vm8, %v5323_v28, %v5356_v61  ;;  %v5366_v13 = vsel %vm5358_vm8, %v5356_v61, %v5323_v28  ;;  %v4670_v62 = vld [vmem:[#allocation2 + $0x37] ss:$8 sm:$0x3] }
 0xf67   :  { %5381 = vst [vmem:[#allocation3 + $0x10] sm:$0xff] %v5362_v30  ;;  %v5367_v17 = vrot.slane %v5366_v13, 4  ;;  %v4678_v61 = vld [vmem:[#allocation2 + $0x77] ss:$8 sm:$0x3] }
 0xf68   :  { %7299 = vmatpush.msra.mxu3 %v12189_v38  ;;  %7279 = vmatpush.msra.mxu2 %v12198_v1  ;;  %5380 = vst [vmem:[#allocation3 + $0x8] sm:$0xff] %v5361_v55  ;;  %v5343_v16 = vpop.f32.mrf.mxu1  ;;  %v5324_v42 = vpop.f32.mrf.mxu0  ;;  %v4674_v55 = vld [vmem:[#allocation2 + $0x57] ss:$8 sm:$0x3] }
 0xf69   :  { %5382 = vst [vmem:[#allocation3 + $0x18] sm:$0xff] %v5364_v57  ;;  %v5344_v43 = vadd.f32 %v5343_v16, %v5249_v10  ;;  %v5325_v20 = vadd.f32 %v5324_v42, %v5248_v21 }
 0xf6a   :  { %7300 = vmatpush.msra.mxu3 %v12200_v41  ;;  %7280 = vmatpush.msra.mxu2 %v12207_v44  ;;  %5383 = vst [vmem:[#allocation3 + $0x20] sm:$0xff] %v5365_v29  ;;  %v4664_v41 = vld [vmem:[#allocation2 + $0x7] ss:$8 sm:$0x3]  ;;  %v4959_v29 = vrot.slane %v12183_v48, 3 }
 0xf6b   :  { %5384 = vst [vmem:[#allocation3 + $0x28] sm:$0xff] %v5367_v17  ;;  %v5357_v25 = vrot.slane %v5344_v43, 4 }
 0xf6c   :  { %7301 = vmatpush.msra.mxu3 %v12209_v31  ;;  %7281 = vmatpush.msra.mxu2 %v12215_v56 }
 0xf6d   :  { %v5368_v9 = vsel %vm5358_vm8, %v5325_v20, %v5357_v25  ;;  %v5369_v7 = vsel %vm5358_vm8, %v5357_v25, %v5325_v20  ;;  %v5403_v43 = vld [vmem:[#allocation3] ss:$4 sm:$0x3]  ;;  %vm14909_vm8 = vmmov %vm14903_vm5 }
 0xf6e   :  { %7302 = vmatpush.msra.mxu3 %v12217_v8  ;;  %7282 = vmatpush.msra.mxu2 %v5387_v11  ;;  %v5370_v38 = vrot.slane %v5369_v7, 4  ;;  %5385 = vst [vmem:[#allocation3 + $0x30] sm:$0xff] %v5368_v9  ;;  %v5407_v9 = vld [vmem:[#allocation3 + $0x10] ss:$4 sm:$0x3] }
 0xf6f   :  { %v5405_v7 = vld [vmem:[#allocation3 + $0x8] ss:$4 sm:$0x3] }
 0xf70   :  { %5386 = vst [vmem:[#allocation3 + $0x38] sm:$0xff] %v5370_v38 }
 0xfd2   :  { %v4719_v5 = vpop.f32.mrf.mxu3  ;;  %v4699_v1 = vpop.f32.mrf.mxu2 }
 0xfd3   :  { %v4724_v19 = vrot.slane %v4719_v5, 7 }
 0xfd5   :  { %v4725_v44 = vsel %vm370_vm1, %v4699_v1, %v4724_v19  ;;  %v4728_v31 = vsel %vm375_vm3, %v4699_v1, %v4724_v19  ;;  %v4726_v56 = vsel %vm14898_vm15, %v4699_v1, %v4724_v19  ;;  %v4730_v33 = vsel %vm14899_vm14, %v4699_v1, %v4724_v19 }
 0xfd6   :  { %v12297_v8 = vadd.f32 %v4725_v44, %v4664_v41  ;;  %v4729_v60 = vrot.slane %v4728_v31, 2  ;;  %v4727_v11 = vrot.slane %v4726_v56, 1  ;;  %v4734_v21 = vsel %vm14900_vm12, %v4699_v1, %v4724_v19  ;;  %v5409_v56 = vld [vmem:[#allocation3 + $0x18] ss:$4 sm:$0x3] }
 0xfd7   :  { %v4732_v47 = vsel %vm14901_vm9, %v4699_v1, %v4724_v19  ;;  %v4731_v26 = vrot.slane %v4730_v33, 3  ;;  %v4735_v0 = vrot.slane %v4734_v21, 5  ;;  %v4736_v39 = vsel %vm14902_vm4, %v4699_v1, %v4724_v19 }
 0xfd8   :  { %4916 = vrot.lane.b32.xlu2 %v12297_v8, %s9512_s29  ;;  %v12302_v10 = vadd.f32 %v4729_v60, %v4668_v4  ;;  %v12304_v27 = vadd.f32 %v4727_v11, %v4666_v12  ;;  %v4733_v37 = vrot.slane %v4732_v47, 4  ;;  %v4738_v18 = vsel %vm14903_vm5, %v4724_v19, %v4699_v1  ;;  %v5413_v4 = vld [vmem:[#allocation3 + $0x28] ss:$4 sm:$0x3] }
 0xfd9   :  { %v12312_v22 = vadd.f32 %v4731_v26, %v4670_v62  ;;  %v12317_v24 = vadd.f32 %v4735_v0, %v4674_v55  ;;  %v4737_v40 = vrot.slane %v4736_v39, 6  ;;  %v4739_v57 = vrot.slane %v4738_v18, 7  ;;  %v5411_v12 = vld [vmem:[#allocation3 + $0x20] ss:$4 sm:$0x3] }
 0xfda   :  { %4920 = vrot.lane.b32.xlu1 %v12302_v10, %s9512_s29  ;;  %4918 = vrot.lane.b32.xlu0 %v12304_v27, %s9512_s29  ;;  %v12319_v35 = vadd.f32 %v4733_v37, %v4672_v50  ;;  %v5455_v30 = vpop.f32.mrf.mxu3  ;;  %v5435_v54 = vpop.f32.mrf.mxu2  ;;  %v5415_v62 = vld [vmem:[#allocation3 + $0x30] ss:$4 sm:$0x3]  ;;  %v5417_v50 = vld [vmem:[#allocation3 + $0x38] ss:$4 sm:$0x3] }
 0xfdb   :  { %v5460_v32 = vrot.slane %v5455_v30, 7  ;;  %v4754_v28 = vadd.f32 %v4737_v40, %v4676_v2  ;;  %v12328_v13 = vadd.f32 %v4739_v57, %v4678_v61  ;;  %v4962_v18 = vrot.slane %v12183_v48, 6 }
 0xfdc   :  { %v4960_v40 = vrot.slane %v12183_v48, 4  ;;  %v4961_v57 = vrot.slane %v12183_v48, 5  ;;  %v4963_v2 = vrot.slane %v12183_v48, 7  ;;  %v8417_v48 = vmul.f32 -1.442695, %v12317_v24 }
 0xfdd   :  { %v5464_v17 = vsel %vm375_vm3, %v5435_v54, %v5460_v32  ;;  %v5462_v16 = vsel %vm14904_vm11, %v5435_v54, %v5460_v32  ;;  %v5461_v42 = vsel %vm370_vm1, %v5435_v54, %v5460_v32  ;;  %v5466_v5 = vsel %vm14905_vm2, %v5435_v54, %v5460_v32 }
 0xfde   :  { %v5465_v20 = vrot.slane %v5464_v17, 2  ;;  %v5463_v25 = vrot.slane %v5462_v16, 1  ;;  %v12336_v38 = vadd.f32 %v5461_v42, %v5403_v43  ;;  %v5470_v41 = vsel %vm14906_vm10, %v5435_v54, %v5460_v32 }
 0xfdf   :  { %v5468_v44 = vsel %vm14907_vm6, %v5435_v54, %v5460_v32  ;;  %v5467_v31 = vrot.slane %v5466_v5, 3  ;;  %v5471_v60 = vrot.slane %v5470_v41, 5  ;;  %v5472_v21 = vsel %vm14908_vm13, %v5435_v54, %v5460_v32 }
 0xfe0   :  { %4922 = vrot.lane.b32.xlu2 %v12312_v22, %s9512_s29  ;;  %v12341_v19 = vadd.f32 %v5465_v20, %v5407_v9  ;;  %v12343_v1 = vadd.f32 %v5463_v25, %v5405_v7  ;;  %v5469_v11 = vrot.slane %v5468_v44, 4  ;;  %v5474_v0 = vsel %vm14909_vm8, %v5460_v32, %v5435_v54  ;;  %v12400_v7 = vpop.permute.xlu2 %4966 }
 0xfe1   :  { %v12351_v33 = vadd.f32 %v5467_v31, %v5409_v56  ;;  %v12356_v47 = vadd.f32 %v5471_v60, %v5413_v4  ;;  %v5473_v37 = vrot.slane %v5472_v21, 6  ;;  %v5475_v55 = vrot.slane %v5474_v0, 7 }
 0xfe2   :  { %4926 = vrot.lane.b32.xlu1 %v12317_v24, %s9512_s29  ;;  %4924 = vrot.lane.b32.xlu0 %v12319_v35, %s9512_s29  ;;  %v12358_v26 = vadd.f32 %v5469_v11, %v5411_v12  ;;  %v8412_v32 = vmul.f32 -1.442695, %v12297_v8  ;;  %v8415_v54 = vmul.f32 -1.442695, %v12312_v22  ;;  %v8418_v17 = vmul.f32 -1.442695, %v4754_v28 }
 0xfe3   :  { %v12365_v39 = vadd.f32 %v5473_v37, %v5415_v62  ;;  %v12370_v30 = vadd.f32 %v5475_v55, %v5417_v50  ;;  %v8414_v16 = vmul.f32 -1.442695, %v12302_v10  ;;  %v8413_v42 = vmul.f32 -1.442695, %v12304_v27 }
 0xfe4   :  { %8999 = vpow2.f32 %v8412_v32  ;;  %v8416_v20 = vmul.f32 -1.442695, %v12319_v35  ;;  %v8419_v25 = vmul.f32 -1.442695, %v12328_v13  ;;  %v8464_v41 = vmul.f32 -1.442695, %v12336_v38 }
 0xfe5   :  { %9001 = vpow2.f32 %v8415_v54  ;;  %v8466_v11 = vmul.f32 -1.442695, %v12341_v19  ;;  %v8467_v55 = vmul.f32 -1.442695, %v12351_v33 }
 0xfe8   :  { %4928 = vrot.lane.b32.xlu2 %v4754_v28, %s9512_s29 }
 0xfea   :  { %4970 = vrot.lane.b32.xlu1 %v4959_v29, %s9512_s29  ;;  %4930 = vrot.lane.b32.xlu0 %v12328_v13, %s9512_s29  ;;  %v9000_v61 = vpop.eup %8999 }
 0xfeb   :  { %v12383_v29 = vadd.f32 1.0, %v9000_v61  ;;  %v9002_v43 = vpop.eup %9001 }
 0xfec   :  { %v12389_v8 = vadd.f32 1.0, %v9002_v43 }
 0xfed   :  { %9003 = vrcp.f32 %v12383_v29  ;;  %v4797_v32 = vand.u32 2147483647, %v12383_v29  ;;  %vm4793_vm14 = vweird.f32 %v12383_v29 }
 0xfee   :  { %9005 = vpow2.f32 %v8418_v17  ;;  %vm4838_vm5 = vweird.f32 %v12389_v8 }
 0xfef   :  { %9007 = vpow2.f32 %v8414_v16  ;;  %vm4798_vm9 = vcmp.eq.f32.partialorder %v4797_v32, 8.507059e+37 }
 0xff0   :  { %5652 = vrot.lane.b32.xlu2 %v12336_v38, %s9512_s29  ;;  %9009 = vpow2.f32 %v8413_v42  ;;  %v8465_v38 = vmul.f32 -1.442695, %v12343_v1 }
 0xff1   :  { %9011 = vpow2.f32 %v8417_v48 }
 0xff2   :  { %5656 = vrot.lane.b32.xlu1 %v12341_v19, %s9512_s29  ;;  %5654 = vrot.lane.b32.xlu0 %v12343_v1, %s9512_s29  ;;  %9013 = vrcp.f32 %v12389_v8 }
 0xff3   :  { %v12391_v22 = vpop.eup %9003  ;;  %9015 = vpow2.f32 %v8416_v20 }
 0xff4   :  { %v9006_v28 = vpop.eup %9005  ;;  %v4789_v10 = vmul.f32 %v12391_v22, %v12383_v29  ;;  %9017 = vpow2.f32 %v8419_v25  ;;  %vm4794_vm15 = vweird.f32 %v12391_v22 }
 0xff5   :  { %v9008_v27 = vpop.eup %9007  ;;  %v12398_v24 = vadd.f32 1.0, %v9006_v28  ;;  %vm12444_vm12 = vmor %vm4793_vm14, %vm4794_vm15 }
 0xff6   :  { %v9010_v9 = vpop.eup %9009  ;;  %v12403_v35 = vadd.f32 1.0, %v9008_v27  ;;  %v4790_v44 = vsub.f32 1.0, %v4789_v10 }
 0xff7   :  { %v9012_v5 = vpop.eup %9011  ;;  %v12407_v31 = vadd.f32 1.0, %v9010_v9  ;;  %9019 = vrcp.f32 %v12398_v24  ;;  %vm4883_vm10 = vweird.f32 %v12398_v24 }
 0xff8   :  { %5658 = vrot.lane.b32.xlu2 %v12351_v33, %s9512_s29  ;;  %v12405_v13 = vpop.eup %9013  ;;  %v12410_v56 = vadd.f32 1.0, %v9012_v5  ;;  %9021 = vpow2.f32 %v8464_v41  ;;  %v4791_v12 = vmul.f32 %v12391_v22, %v4790_v44  ;;  %v8468_v33 = vmul.f32 -1.442695, %v12358_v26 }
 0xff9   :  { %v9016_v60 = vpop.eup %9015  ;;  %9023 = vrcp.f32 %v12403_v35  ;;  %v4834_v21 = vmul.f32 %v12405_v13, %v12389_v8  ;;  %vm4839_vm4 = vweird.f32 %v12405_v13  ;;  %v4842_v5 = vand.u32 2147483647, %v12389_v8 }
 0xffa   :  { %5662 = vrot.lane.b32.xlu1 %v12356_v47, %s9512_s29  ;;  %5660 = vrot.lane.b32.xlu0 %v12358_v26, %s9512_s29  ;;  %v9018_v4 = vpop.eup %9017  ;;  %9025 = vrcp.f32 %v12407_v31  ;;  %v12420_v0 = vadd.f32 1.0, %v9016_v60  ;;  %v4792_v50 = vadd.f32 %v12391_v22, %v4791_v12  ;;  %v8471_v26 = vmul.f32 -1.442695, %v12370_v30  ;;  %vm12481_vm11 = vmor %vm4838_vm5, %vm4839_vm4 }
 0xffb   :  { %9027 = vrcp.f32 %v12410_v56  ;;  %v12424_v19 = vadd.f32 1.0, %v9018_v4  ;;  %vm12485_vm2 = vcmp.eq.f32.partialorder %v4842_v5, 8.507059e+37  ;;  %vm4823_vm14 = vweird.f32 %v12403_v35 }
 0xffc   :  { %9029 = vpow2.f32 %v8466_v11  ;;  %v4844_v11 = vand.u32 2147483648, %v12389_v8 }
 0xffd   :  { %v12422_v62 = vpop.eup %9019  ;;  %9031 = vpow2.f32 %v8465_v38 }
 0xffe   :  { %v4879_v61 = vmul.f32 %v12422_v62, %v12398_v24  ;;  %v4845_v32 = vor.u32 1.1754944e-38, %v4844_v11  ;;  %vm4884_vm6 = vweird.f32 %v12422_v62 }
 0xfff   :  { %vm12530_vm13 = vmor %vm4883_vm10, %vm4884_vm6 }
0x1000   :  { %5664 = vrot.lane.b32.xlu2 %v12365_v39, %s9512_s29  ;;  %v4880_v10 = vsub.f32 1.0, %v4879_v61  ;;  %v4887_v61 = vand.u32 2147483647, %v12398_v24 }
0x1002   :  { %4976 = vrot.lane.b32.xlu1 %v4962_v18, %s9512_s29  ;;  %5666 = vrot.lane.b32.xlu0 %v12370_v30, %s9512_s29  ;;  %v4835_v18 = vsub.f32 1.0, %v4834_v21  ;;  %vm12534_vm8 = vcmp.eq.f32.partialorder %v4887_v61, 8.507059e+37 }
0x1004   :  { %v4836_v42 = vmul.f32 %v12405_v13, %v4835_v18  ;;  %v4827_v18 = vand.u32 2147483647, %v12403_v35 }
0x1006   :  { %v4837_v60 = vadd.f32 %v12405_v13, %v4836_v42  ;;  %vm4828_vm5 = vcmp.eq.f32.partialorder %v4827_v18, 8.507059e+37 }
0x1008   :  { %4972 = vrot.lane.b32.xlu2 %v4960_v40, %s9512_s29  ;;  %v9022_v40 = vpop.eup %9021 }
0x1009   :  { %v12432_v54 = vpop.eup %9023 }
0x100a   :  { %4974 = vrot.lane.b32.xlu0 %v4961_v57, %s9512_s29  ;;  %v8469_v57 = vmul.f32 -1.442695, %v12356_v47  ;;  %v12439_v17 = vpop.eup %9025  ;;  %v8470_v47 = vmul.f32 -1.442695, %v12365_v39  ;;  %v12456_v39 = vadd.f32 1.0, %v9022_v40  ;;  %v4819_v30 = vmul.f32 %v12432_v54, %v12403_v35 }
0x100b   :  { %v12448_v43 = vpop.eup %9027  ;;  %vm4824_vm15 = vweird.f32 %v12432_v54  ;;  %vm4809_vm4 = vweird.f32 %v12439_v17 }
0x100c   :  { %v9030_v48 = vpop.eup %9029  ;;  %vm4869_vm6 = vweird.f32 %v12448_v43 }
0x100d   :  { %v9032_v28 = vpop.eup %9031  ;;  %v12469_v38 = vadd.f32 1.0, %v9030_v48 }
0x100e   :  { %v12473_v21 = vadd.f32 1.0, %v9032_v28 }
0x1010   :  { %4978 = vrot.lane.b32.xlu2 %v4963_v2, %s9512_s29  ;;  %v4799_v2 = vand.u32 2147483648, %v12383_v29  ;;  %v4796_v29 = vsel %vm12444_vm12, %v12391_v22, %v4792_v50  ;;  %vm12562_vm12 = vmor %vm4823_vm14, %vm4824_vm15 }
0x1012   :  { %v4800_v20 = vor.u32 1.1754944e-38, %v4799_v2  ;;  %v4804_v2 = vmul.f32 %v12439_v17, %v12407_v31 }
0x1014   :  { %v12461_v9 = vsel %vm4798_vm9, %v4800_v20, %v4796_v29  ;;  %vm4808_vm9 = vweird.f32 %v12407_v31 }
0x1015   :  { %vm12604_vm10 = vmor %vm4808_vm9, %vm4809_vm4  ;;  %vm5529_vm9 = vweird.f32 %v12456_v39 }
0x1032   :  { %v4917_v37 = vpop.permute.xlu2 %4916 }
0x1033   :  { %v4932_v1 = vrot.slane %v4917_v37, 1  ;;  %v4881_v37 = vmul.f32 %v12422_v62, %v4880_v10  ;;  %v4864_v10 = vmul.f32 %v12448_v43, %v12410_v56 }
0x1035   :  { %9033 = vtanh.f32 %v4932_v1 }
0x1036   :  { %9035 = vrcp.f32 %v12420_v0 }
0x1037   :  { %9037 = vpow2.f32 %v8467_v55  ;;  %v4820_v55 = vsub.f32 1.0, %v4819_v30  ;;  %v12514_v30 = vpop.permute.xlu1 %4964 }
0x1038   :  { %9039 = vrcp.f32 %v12424_v19 }
0x1039   :  { %9041 = vpow2.f32 %v8469_v57  ;;  %v4841_v57 = vsel %vm12481_vm11, %v12405_v13, %v4837_v60  ;;  %v4882_v13 = vadd.f32 %v12422_v62, %v4881_v37  ;;  %v4821_v42 = vmul.f32 %v12432_v54, %v4820_v55 }
0x103a   :  { %9043 = vpow2.f32 %v8468_v33  ;;  %v4923_v25 = vpop.permute.xlu2 %4922  ;;  %vm4868_vm11 = vweird.f32 %v12410_v56 }
0x103b   :  { %v9034_v27 = vpop.eup %9033  ;;  %9045 = vpow2.f32 %v8470_v47  ;;  %v4935_v22 = vrot.slane %v4923_v25, 1  ;;  %v4889_v47 = vand.u32 2147483648, %v12398_v24  ;;  %v12510_v25 = vsel %vm12485_vm2, %v4845_v32, %v4841_v57  ;;  %vm12621_vm15 = vmor %vm4868_vm11, %vm4869_vm6 }
0x103c   :  { %v12464_v41 = vpop.eup %9035  ;;  %9047 = vpow2.f32 %v8471_v26  ;;  %v4996_v44 = vmul.f32 %v9034_v27, %v12461_v9  ;;  %v12516_v27 = vpop.permute.xlu0 %4968  ;;  %v4822_v50 = vadd.f32 %v12432_v54, %v4821_v42  ;;  %v4865_v57 = vsub.f32 1.0, %v4864_v10 }
0x103d   :  { %v9038_v4 = vpop.eup %9037  ;;  %9049 = vtanh.f32 %v4935_v22  ;;  %v4890_v55 = vor.u32 1.1754944e-38, %v4889_v47 }
0x103e   :  { %v12471_v12 = vpop.eup %9039  ;;  %5012 = vrot.lane.b32.xlu0 %v4996_v44, %s9512_s29  ;;  %9051 = vrcp.f32 %v12456_v39  ;;  %v12490_v8 = vadd.f32 1.0, %v9038_v4  ;;  %v4805_v44 = vsub.f32 1.0, %v4804_v2  ;;  %v4849_v2 = vmul.f32 %v12464_v41, %v12420_v0 }
0x103f   :  { %v9042_v1 = vpop.eup %9041  ;;  %9053 = vrcp.f32 %v12469_v38  ;;  %vm4899_vm6 = vweird.f32 %v12471_v12 }
0x1040   :  { %v9044_v40 = vpop.eup %9043  ;;  %9055 = vrcp.f32 %v12473_v21  ;;  %v12502_v26 = vadd.f32 1.0, %v9042_v1  ;;  %v4886_v1 = vsel %vm12530_vm13, %v12422_v62, %v4882_v13  ;;  %v4806_v62 = vmul.f32 %v12439_v17, %v4805_v44 }
0x1041   :  { %v9046_v33 = vpop.eup %9045  ;;  %v12506_v20 = vadd.f32 1.0, %v9044_v40  ;;  %9057 = vrcp.f32 %v12490_v8  ;;  %v4829_v40 = vand.u32 2147483648, %v12403_v35  ;;  %v4826_v35 = vsel %vm12562_vm12, %v12432_v54, %v4822_v50 }
0x1042   :  { %v9048_v16 = vpop.eup %9047  ;;  %v4929_v29 = vpop.permute.xlu2 %4928  ;;  %v12519_v22 = vadd.f32 1.0, %v9046_v33  ;;  %v12560_v33 = vsel %vm12534_vm8, %v4890_v55, %v4886_v1  ;;  %v4807_v54 = vadd.f32 %v12439_v17, %v4806_v62  ;;  %v4850_v37 = vsub.f32 1.0, %v4849_v2 }
0x1043   :  { %v9050_v48 = vpop.eup %9049  ;;  %v4938_v28 = vrot.slane %v4929_v29, 1  ;;  %v12524_v11 = vadd.f32 1.0, %v9048_v16  ;;  %v4812_v29 = vand.u32 2147483647, %v12407_v31  ;;  %v4830_v42 = vor.u32 1.1754944e-38, %v4829_v40 }
0x1044   :  { %v4999_v5 = vmul.f32 %v9050_v48, %v12510_v25  ;;  %v12522_v60 = vpop.eup %9051  ;;  %v4814_v48 = vand.u32 2147483648, %v12407_v31  ;;  %v4872_v62 = vand.u32 2147483647, %v12410_v56  ;;  %v4894_v2 = vmul.f32 %v12471_v12, %v12424_v19 }
0x1045   :  { %9059 = vtanh.f32 %v4938_v28  ;;  %v12545_v24 = vpop.eup %9053  ;;  %v5525_v47 = vmul.f32 %v12522_v60, %v12456_v39  ;;  %v4866_v28 = vmul.f32 %v12448_v43, %v4865_v57  ;;  %v12585_v18 = vsel %vm4828_vm5, %v4830_v42, %v4826_v35 }
0x1046   :  { %9061 = vrcp.f32 %v12502_v26  ;;  %5018 = vrot.lane.b32.xlu0 %v4999_v5, %s9512_s29  ;;  %v12550_v32 = vpop.eup %9055  ;;  %vm12590_vm2 = vcmp.eq.f32.partialorder %v4812_v29, 8.507059e+37  ;;  %v4857_v29 = vand.u32 2147483647, %v12420_v0  ;;  %v4811_v42 = vsel %vm12604_vm10, %v12439_v17, %v4807_v54 }
0x1047   :  { %9063 = vrcp.f32 %v12506_v20  ;;  %v12568_v16 = vpop.eup %9057  ;;  %v5526_v40 = vsub.f32 1.0, %v5525_v47  ;;  %v4867_v35 = vadd.f32 %v12448_v43, %v4866_v28  ;;  %vm4853_vm13 = vweird.f32 %v12420_v0 }
0x1048   :  { %9065 = vrcp.f32 %v12519_v22  ;;  %vm4854_vm8 = vweird.f32 %v12464_v41  ;;  %vm12625_vm14 = vcmp.eq.f32.partialorder %v4872_v62, 8.507059e+37  ;;  %vm12638_vm12 = vcmp.eq.f32.partialorder %v4857_v29, 8.507059e+37 }
0x1049   :  { %9067 = vrcp.f32 %v12524_v11  ;;  %v5527_v28 = vmul.f32 %v12522_v60, %v5526_v40  ;;  %vm5530_vm4 = vweird.f32 %v12522_v60  ;;  %v5533_v57 = vand.u32 2147483647, %v12456_v39  ;;  %vm12659_vm5 = vmor %vm4853_vm13, %vm4854_vm8 }
0x104a   :  { %v5653_v31 = vpop.permute.xlu2 %5652  ;;  %v5555_v17 = vmul.f32 %v12545_v24, %v12469_v38  ;;  %vm12674_vm11 = vmor %vm5529_vm9, %vm5530_vm4  ;;  %vm4898_vm10 = vweird.f32 %v12424_v19  ;;  %vm5574_vm8 = vweird.f32 %v12490_v8  ;;  %vm5560_vm9 = vweird.f32 %v12545_v24 }
0x104b   :  { %v9060_v13 = vpop.eup %9059 }
0x104c   :  { %v12578_v10 = vpop.eup %9061  ;;  %v4921_v5 = vpop.permute.xlu1 %4920  ;;  %v5002_v4 = vmul.f32 %v9060_v13, %v12560_v33  ;;  %v4874_v13 = vand.u32 2147483648, %v12410_v56  ;;  %v4871_v56 = vsel %vm12621_vm15, %v12448_v43, %v4867_v35  ;;  %v5528_v43 = vadd.f32 %v12522_v60, %v5527_v28 }
0x104d   :  { %v4919_v44 = vpop.permute.xlu0 %4918  ;;  %v12583_v55 = vpop.eup %9063  ;;  %v4934_v1 = vrot.slane %v4921_v5, 1  ;;  %v5535_v35 = vand.u32 2147483648, %v12456_v39  ;;  %vm5575_vm15 = vweird.f32 %v12568_v16 }
0x104e   :  { %v4933_v50 = vrot.slane %v4919_v44, 1  ;;  %v12587_v61 = vpop.eup %9065  ;;  %5024 = vrot.lane.b32.xlu0 %v5002_v4, %s9512_s29  ;;  %v4851_v44 = vmul.f32 %v12464_v41, %v4850_v37  ;;  %v4859_v4 = vand.u32 2147483648, %v12420_v0  ;;  %v4875_v54 = vor.u32 1.1754944e-38, %v4874_v13 }
0x104f   :  { %v12598_v5 = vpop.eup %9067  ;;  %9069 = vtanh.f32 %v4934_v1  ;;  %v4815_v1 = vor.u32 1.1754944e-38, %v4814_v48  ;;  %v4895_v37 = vsub.f32 1.0, %v4894_v2  ;;  %v5570_v48 = vmul.f32 %v12568_v16, %v12490_v8 }
0x1050   :  { %9071 = vtanh.f32 %v4933_v50  ;;  %v4852_v2 = vadd.f32 %v12464_v41, %v4851_v44  ;;  %v4860_v14 = vor.u32 1.1754944e-38, %v4859_v4  ;;  %v12651_v53 = vsel %vm12625_vm14, %v4875_v54, %v4871_v56  ;;  %vm12707_vm14 = vmor %vm4898_vm10, %vm4899_vm6 }
0x1051   :  { %v12633_v47 = vsel %vm12590_vm2, %v4815_v1, %v4811_v42  ;;  %v4896_v44 = vmul.f32 %v12471_v12, %v4895_v37  ;;  %v5571_v4 = vsub.f32 1.0, %v5570_v48  ;;  %v4904_v37 = vand.u32 2147483648, %v12424_v19 }
0x1052   :  { %v4856_v54 = vsel %vm12659_vm5, %v12464_v41, %v4852_v2  ;;  %v5540_v48 = vmul.f32 %v12550_v32, %v12473_v21  ;;  %v5532_v41 = vsel %vm12674_vm11, %v12522_v60, %v5528_v43  ;;  %vm5534_vm2 = vcmp.eq.f32.partialorder %v5533_v57, 8.507059e+37  ;;  %v5659_v2 = vpop.permute.xlu2 %5658  ;;  %vm12743_vm5 = vmor %vm5574_vm8, %vm5575_vm15 }
0x1053   :  { %v5536_v39 = vor.u32 1.1754944e-38, %v5535_v35  ;;  %v4897_v56 = vadd.f32 %v12471_v12, %v4896_v44  ;;  %v5556_v60 = vsub.f32 1.0, %v5555_v17  ;;  %v4905_v43 = vor.u32 1.1754944e-38, %v4904_v37 }
0x1054   :  { %v4927_v62 = vpop.permute.xlu1 %4926  ;;  %v5541_v35 = vsub.f32 1.0, %v5540_v48  ;;  %v5580_v44 = vand.u32 2147483648, %v12490_v8  ;;  %v5615_v37 = vmul.f32 %v12587_v61, %v12519_v22  ;;  %vm5545_vm10 = vweird.f32 %v12550_v32 }
0x1055   :  { %v4925_v13 = vpop.permute.xlu0 %4924  ;;  %v9070_v42 = vpop.eup %9069  ;;  %v4937_v1 = vrot.slane %v4927_v62, 1  ;;  %v4902_v62 = vand.u32 2147483647, %v12424_v19  ;;  %v5557_v0 = vmul.f32 %v12545_v24, %v5556_v60  ;;  %v5548_v60 = vand.u32 2147483647, %v12473_v21 }
0x1056   :  { %v4936_v34 = vrot.slane %v4925_v13, 1  ;;  %v9072_v29 = vpop.eup %9071  ;;  %v4998_v50 = vmul.f32 %v9070_v42, %v12585_v18  ;;  %v5572_v13 = vmul.f32 %v12568_v16, %v5571_v4  ;;  %v5542_v48 = vmul.f32 %v12550_v32, %v5541_v35 }
0x1057   :  { %9073 = vtanh.f32 %v4937_v1  ;;  %v4997_v52 = vmul.f32 %v9072_v29, %v12633_v47  ;;  %vm12693_vm13 = vcmp.eq.f32.partialorder %v4902_v62, 8.507059e+37  ;;  %v12700_v1 = vsel %vm5534_vm2, %v5536_v39, %v5532_v41 }
0x1058   :  { %9075 = vtanh.f32 %v4936_v34  ;;  %5016 = vrot.lane.b32.xlu2 %v4998_v50, %s9512_s29  ;;  %v5668_v34 = vrot.slane %v5653_v31, 1  ;;  %v12691_v31 = vsel %vm12638_vm12, %v4860_v14, %v4856_v54  ;;  %v5578_v50 = vand.u32 2147483647, %v12490_v8 }
0x1059   :  { %5014 = vrot.lane.b32.xlu1 %v4997_v52, %s9512_s29  ;;  %v4901_v62 = vsel %vm12707_vm14, %v12471_v12, %v4897_v56  ;;  %v5573_v17 = vadd.f32 %v12568_v16, %v5572_v13  ;;  %v5563_v54 = vand.u32 2147483647, %v12469_v38  ;;  %vm5559_vm12 = vweird.f32 %v12469_v38 }
0x105a   :  { %9077 = vtanh.f32 %v5668_v34  ;;  %v5565_v12 = vand.u32 2147483648, %v12469_v38  ;;  %v5671_v34 = vrot.slane %v5659_v2, 1  ;;  %v12731_v41 = vsel %vm12693_vm13, %v4905_v43, %v4901_v62  ;;  %vm12772_vm6 = vmor %vm5559_vm12, %vm5560_vm9 }
0x105b   :  { %vm12733_vm4 = vcmp.eq.f32.partialorder %v5578_v50, 8.507059e+37  ;;  %v5600_v56 = vmul.f32 %v12578_v10, %v12502_v26  ;;  %v5581_v2 = vor.u32 1.1754944e-38, %v5580_v44  ;;  %vm12747_vm11 = vcmp.eq.f32.partialorder %v5563_v54, 8.507059e+37 }
0x105c   :  { %v12698_v57 = vpop.permute.xlu1 %4970  ;;  %vm5544_vm2 = vweird.f32 %v12473_v21  ;;  %v5577_v43 = vsel %vm12743_vm5, %v12568_v16, %v5573_v17  ;;  %v5558_v8 = vadd.f32 %v12545_v24, %v5557_v0  ;;  %v5616_v35 = vsub.f32 1.0, %v5615_v37  ;;  %v5665_v17 = vpop.permute.xlu2 %5664 }
0x105d   :  { %v4931_v42 = vpop.permute.xlu0 %4930  ;;  %v9074_v29 = vpop.eup %9073  ;;  %v5566_v50 = vor.u32 1.1754944e-38, %v5565_v12  ;;  %v5543_v44 = vadd.f32 %v12550_v32, %v5542_v48  ;;  %v5601_v16 = vsub.f32 1.0, %v5600_v56  ;;  %v12766_v37 = vsel %vm12733_vm4, %v5581_v2, %v5577_v43  ;;  %vm12789_vm8 = vmor %vm5544_vm2, %vm5545_vm10 }
0x105e   :  { %v4939_v14 = vrot.slane %v4931_v42, 1  ;;  %v9076_v4 = vpop.eup %9075  ;;  %v5001_v28 = vmul.f32 %v9074_v29, %v12651_v53  ;;  %v5585_v29 = vmul.f32 %v12583_v55, %v12506_v20  ;;  %vm12776_vm13 = vcmp.eq.f32.partialorder %v5548_v60, 8.507059e+37 }
0x105f   :  { %v5000_v19 = vmul.f32 %v9076_v4, %v12691_v31  ;;  %v5550_v4 = vand.u32 2147483648, %v12473_v21  ;;  %v5617_v39 = vmul.f32 %v12587_v61, %v5616_v35  ;;  %vm5619_vm15 = vweird.f32 %v12519_v22 }
0x1060   :  { %9079 = vtanh.f32 %v4939_v14  ;;  %5022 = vrot.lane.b32.xlu2 %v5001_v28, %s9512_s29  ;;  %v9078_v42 = vpop.eup %9077  ;;  %v5586_v56 = vsub.f32 1.0, %v5585_v29  ;;  %vm5620_vm14 = vweird.f32 %v12587_v61  ;;  %v5547_v2 = vsel %vm12789_vm8, %v12550_v32, %v5543_v44 }
0x1061   :  { %5020 = vrot.lane.b32.xlu1 %v5000_v19, %s9512_s29  ;;  %9081 = vtanh.f32 %v5671_v34  ;;  %v5700_v19 = vmul.f32 %v9078_v42, %v12700_v1  ;;  %v5562_v34 = vsel %vm12772_vm6, %v12545_v24, %v5558_v8  ;;  %v5551_v13 = vor.u32 1.1754944e-38, %v5550_v4 }
0x1062   :  { %v5674_v24 = vrot.slane %v5665_v17, 1  ;;  %v5623_v60 = vand.u32 2147483647, %v12519_v22  ;;  %v5602_v21 = vmul.f32 %v12578_v10, %v5601_v16  ;;  %v12803_v42 = vsel %vm12747_vm11, %v5566_v50, %v5562_v34  ;;  %vm12827_vm11 = vmor %vm5619_vm15, %vm5620_vm14 }
0x1063   :  { %v5625_v43 = vand.u32 2147483648, %v12519_v22  ;;  %vm5604_vm12 = vweird.f32 %v12502_v26  ;;  %v5630_v8 = vmul.f32 %v12598_v5, %v12524_v11  ;;  %v5618_v29 = vadd.f32 %v12587_v61, %v5617_v39 }
0x1064   :  { %v5657_v14 = vpop.permute.xlu1 %5656  ;;  %vm5605_vm9 = vweird.f32 %v12578_v10  ;;  %v5608_v32 = vand.u32 2147483647, %v12502_v26  ;;  %v12815_v50 = vsel %vm12776_vm13, %v5551_v13, %v5547_v2  ;;  %v5610_v44 = vand.u32 2147483648, %v12502_v26 }
0x1065   :  { %v5655_v40 = vpop.permute.xlu0 %5654  ;;  %v5670_v62 = vrot.slane %v5657_v14, 1  ;;  %v5587_v14 = vmul.f32 %v12583_v55, %v5586_v56  ;;  %vm5589_vm4 = vweird.f32 %v12506_v20  ;;  %vm5590_vm5 = vweird.f32 %v12583_v55  ;;  %vm12837_vm2 = vmor %vm5604_vm12, %vm5605_vm9 }
0x1066   :  { %v9080_v28 = vpop.eup %9079  ;;  %v5669_v54 = vrot.slane %v5655_v40, 1  ;;  %v5595_v12 = vand.u32 2147483648, %v12506_v20  ;;  %v5631_v48 = vsub.f32 1.0, %v5630_v8  ;;  %v5593_v56 = vand.u32 2147483647, %v12506_v20  ;;  %vm12848_vm10 = vmor %vm5589_vm4, %vm5590_vm5 }
0x1067   :  { %v5003_v0 = vmul.f32 %v9080_v28, %v12731_v41  ;;  %9083 = vtanh.f32 %v5670_v62  ;;  %v9082_v35 = vpop.eup %9081  ;;  %v5588_v22 = vadd.f32 %v12583_v55, %v5587_v14  ;;  %v5626_v38 = vor.u32 1.1754944e-38, %v5625_v43 }
0x1068   :  { %9085 = vtanh.f32 %v5669_v54  ;;  %5716 = vrot.lane.b32.xlu2 %v5700_v19, %s9512_s29  ;;  %v5603_v54 = vadd.f32 %v12578_v10, %v5602_v21  ;;  %v5703_v17 = vmul.f32 %v9082_v35, %v12766_v37  ;;  %v5622_v26 = vsel %vm12827_vm11, %v12587_v61, %v5618_v29 }
0x1069   :  { %5026 = vrot.lane.b32.xlu1 %v5003_v0, %s9512_s29  ;;  %9087 = vtanh.f32 %v5674_v24  ;;  %vm5624_vm6 = vcmp.eq.f32.partialorder %v5623_v60, 8.507059e+37  ;;  %v5611_v24 = vor.u32 1.1754944e-38, %v5610_v44  ;;  %vm5609_vm13 = vcmp.eq.f32.partialorder %v5608_v32, 8.507059e+37 }
0x106a   :  { %v5607_v2 = vsel %vm12837_vm2, %v12578_v10, %v5603_v54  ;;  %v5596_v20 = vor.u32 1.1754944e-38, %v5595_v12  ;;  %v5632_v21 = vmul.f32 %v12598_v5, %v5631_v48  ;;  %v5592_v8 = vsel %vm12848_vm10, %v12583_v55, %v5588_v22 }
0x106b   :  { %vm5594_vm8 = vcmp.eq.f32.partialorder %v5593_v56, 8.507059e+37  ;;  %v12864_v14 = vsel %vm5624_vm6, %v5626_v38, %v5622_v26  ;;  %vm5634_vm15 = vweird.f32 %v12524_v11  ;;  %vm5635_vm14 = vweird.f32 %v12598_v5 }
0x106c   :  { %v5663_v40 = vpop.permute.xlu1 %5662  ;;  %v12868_v10 = vsel %vm5609_vm13, %v5611_v24, %v5607_v2  ;;  %v5638_v29 = vand.u32 2147483647, %v12524_v11  ;;  %v5640_v32 = vand.u32 2147483648, %v12524_v11  ;;  %v12874_v44 = vsel %vm5594_vm8, %v5596_v20, %v5592_v8  ;;  %vm5636_vm12 = vmor %vm5634_vm15, %vm5635_vm14 }
0x106d   :  { %v5661_v52 = vpop.permute.xlu0 %5660  ;;  %v9084_v4 = vpop.eup %9083  ;;  %v5673_v28 = vrot.slane %v5663_v40, 1  ;;  %v4988_v48 = vmul.f32 %v12514_v30, %v12461_v9  ;;  %v4990_v22 = vmul.f32 %v12516_v27, %v12585_v18  ;;  %v4991_v38 = vmul.f32 %v12698_v57, %v12510_v25 }
0x106e   :  { %v5672_v62 = vrot.slane %v5661_v52, 1  ;;  %v9086_v16 = vpop.eup %9085  ;;  %v5702_v19 = vmul.f32 %v9084_v4, %v12803_v42  ;;  %v5633_v4 = vadd.f32 %v12598_v5, %v5632_v21  ;;  %v5641_v11 = vor.u32 1.1754944e-38, %v5640_v32 }
0x106f   :  { %9089 = vtanh.f32 %v5673_v28  ;;  %v5701_v34 = vmul.f32 %v9086_v16, %v12815_v50  ;;  %v9088_v43 = vpop.eup %9087  ;;  %vm5639_vm9 = vcmp.eq.f32.partialorder %v5638_v29, 8.507059e+37  ;;  %vm14959_vm5 = vcmask 1041409  }
0x1070   :  { %9091 = vtanh.f32 %v5672_v62  ;;  %5722 = vrot.lane.b32.xlu2 %v5703_v17, %s9512_s29  ;;  %v5706_v52 = vmul.f32 %v9088_v43, %v12864_v14  ;;  %v5637_v62 = vsel %vm5636_vm12, %v12598_v5, %v5633_v4  ;;  %v4989_v4 = vmul.f32 %v12400_v7, %v12633_v47 }
0x1071   :  { %5720 = vrot.lane.b32.xlu1 %v5702_v19, %s9512_s29  ;;  %5718 = vrot.lane.b32.xlu0 %v5701_v34, %s9512_s29  ;;  %v12882_v16 = vsel %vm5639_vm9, %v5641_v11, %v5637_v62  ;;  %v4973_v19 = vpop.permute.xlu2 %4972  ;;  %vm14960_vm11 = vcmask 1043459   ;;  %vm14961_vm2 = vcmask 1045509   ;;  %vm14962_vm10 = vcmask 1044484  }
0x1072   :  { %vm14963_vm6 = vcmask 1046534   ;;  %vm14964_vm13 = vcmask 1046528  }
0x1074   :  { %v4977_v43 = vpop.permute.xlu1 %4976 }
0x1075   :  { %v5667_v35 = vpop.permute.xlu0 %5666  ;;  %v9090_v61 = vpop.eup %9089  ;;  %v4994_v27 = vmul.f32 %v4977_v43, %v12560_v33 }
0x1076   :  { %v5675_v60 = vrot.slane %v5667_v35, 1  ;;  %v9092_v40 = vpop.eup %9091  ;;  %v5705_v55 = vmul.f32 %v9090_v61, %v12868_v10  ;;  %v5692_v61 = vmul.f32 0.0, %v12700_v1 }
0x1077   :  { %v5704_v28 = vmul.f32 %v9092_v40, %v12874_v44 }
0x1078   :  { %9093 = vtanh.f32 %v5675_v60  ;;  %5728 = vrot.lane.b32.xlu2 %v5706_v52, %s9512_s29  ;;  %v5695_v52 = vmul.f32 0.0, %v12766_v37 }
0x1079   :  { %5726 = vrot.lane.b32.xlu1 %v5705_v55, %s9512_s29  ;;  %5724 = vrot.lane.b32.xlu0 %v5704_v28, %s9512_s29  ;;  %v4979_v12 = vpop.permute.xlu2 %4978 }
0x107d   :  { %v4975_v0 = vpop.permute.xlu0 %4974 }
0x107e   :  { %v9094_v54 = vpop.eup %9093  ;;  %v4993_v24 = vmul.f32 %v4975_v0, %v12651_v53  ;;  %v4992_v0 = vmul.f32 %v4973_v19, %v12691_v31 }
0x107f   :  { %v5707_v17 = vmul.f32 %v9094_v54, %v12882_v16 }
0x1081   :  { %5730 = vrot.lane.b32.xlu0 %v5707_v17, %s9512_s29  ;;  %v5698_v17 = vmul.f32 0.0, %v12864_v14 }
0x10b0   :  { %v5013_v34 = vpop.permute.xlu0 %5012 }
0x10b1   :  { %v5036_v39 = vadd.f32 %v5013_v34, %v4988_v48 }
0x10b2   :  { %v5017_v5 = vpop.permute.xlu2 %5016 }
0x10b3   :  { %9095 = vtanh.f32 %v5036_v39  ;;  %v5038_v56 = vadd.f32 %v5017_v5, %v4990_v22 }
0x10b5   :  { %9097 = vtanh.f32 %v5038_v56  ;;  %v4995_v56 = vmul.f32 %v4979_v12, %v12731_v41  ;;  %v5697_v12 = vmul.f32 0.0, %v12868_v10 }
0x10b8   :  { %v5019_v13 = vpop.permute.xlu0 %5018 }
0x10b9   :  { %v9096_v26 = vpop.eup %9095  ;;  %v5039_v2 = vadd.f32 %v5019_v13, %v4991_v38 }
0x10ba   :  { %v5023_v20 = vpop.permute.xlu2 %5022  ;;  %5084 = vrot.lane.b32.xlu1 %v9096_v26, %s9512_s29 }
0x10bb   :  { %v9098_v30 = vpop.eup %9097  ;;  %9099 = vtanh.f32 %v5039_v2  ;;  %v5041_v21 = vadd.f32 %v5023_v20, %v4993_v24  ;;  %v5694_v24 = vmul.f32 0.0, %v12803_v42  ;;  %v5693_v2 = vmul.f32 0.0, %v12815_v50 }
0x10bc   :  { %5088 = vrot.lane.b32.xlu0 %v9098_v30, %s9512_s29 }
0x10bd   :  { %9101 = vtanh.f32 %v5041_v21 }
0x10c0   :  { %v5025_v8 = vpop.permute.xlu0 %5024 }
0x10c1   :  { %v9100_v35 = vpop.eup %9099  ;;  %v5042_v57 = vadd.f32 %v5025_v8, %v4994_v27  ;;  %v5696_v8 = vmul.f32 0.0, %v12874_v44 }
0x10c2   :  { %v5717_v60 = vpop.permute.xlu2 %5716  ;;  %5090 = vrot.lane.b32.xlu1 %v9100_v35, %s9512_s29 }
0x10c3   :  { %v9102_v29 = vpop.eup %9101  ;;  %9103 = vtanh.f32 %v5042_v57  ;;  %v12898_v32 = vadd.f32 %v5717_v60, %v5692_v61 }
0x10c4   :  { %5094 = vrot.lane.b32.xlu0 %v9102_v29, %s9512_s29 }
0x10c5   :  { %9105 = vtanh.f32 %v12898_v32 }
0x10c9   :  { %v9104_v40 = vpop.eup %9103 }
0x10ca   :  { %v5723_v55 = vpop.permute.xlu2 %5722  ;;  %5096 = vrot.lane.b32.xlu1 %v9104_v40, %s9512_s29 }
0x10cb   :  { %v9106_v28 = vpop.eup %9105  ;;  %v12906_v11 = vadd.f32 %v5723_v55, %v5695_v52  ;;  %v5015_v62 = vpop.permute.xlu1 %5014  ;;  %v5699_v52 = vmul.f32 0.0, %v12882_v16 }
0x10cc   :  { %v5037_v54 = vadd.f32 %v5015_v62, %v4989_v4  ;;  %5788 = vrot.lane.b32.xlu0 %v9106_v28, %s9512_s29 }
0x10cd   :  { %9107 = vtanh.f32 %v12906_v11 }
0x10ce   :  { %9109 = vtanh.f32 %v5037_v54  ;;  %v5233_v54 = vld [vmem:[%s14703_s3] sm:$0xff] }
0x10d2   :  { %v5729_v48 = vpop.permute.xlu2 %5728 }
0x10d3   :  { %v9108_v34 = vpop.eup %9107  ;;  %v12912_v39 = vadd.f32 %v5729_v48, %v5698_v17  ;;  %v5021_v7 = vpop.permute.xlu1 %5020 }
0x10d4   :  { %v9110_v22 = vpop.eup %9109  ;;  %v5040_v5 = vadd.f32 %v5021_v7, %v4992_v0  ;;  %5794 = vrot.lane.b32.xlu0 %v9108_v34, %s9512_s29  ;;  %v5060_v0 = vrot.slane %v12461_v9, 1  ;;  %v5062_v7 = vrot.slane %v12585_v18, 1  ;;  %v5065_v9 = vrot.slane %v12651_v53, 1 }
0x10d5   :  { %9111 = vtanh.f32 %v12912_v39  ;;  %5086 = vrot.lane.b32.xlu2 %v9110_v22, %s9512_s29  ;;  %v12948_v22 = vld [vmem:[#allocation1] sm:$0xff] }
0x10d6   :  { %9113 = vtanh.f32 %v5040_v5  ;;  %v5061_v5 = vrot.slane %v12633_v47, 1 }
0x10db   :  { %v9112_v38 = vpop.eup %9111  ;;  %v5027_v13 = vpop.permute.xlu1 %5026 }
0x10dc   :  { %v9114_v26 = vpop.eup %9113  ;;  %v5043_v19 = vadd.f32 %v5027_v13, %v4995_v56  ;;  %5800 = vrot.lane.b32.xlu0 %v9112_v38, %s9512_s29 }
0x10dd   :  { %5092 = vrot.lane.b32.xlu2 %v9114_v26, %s9512_s29 }
0x10de   :  { %9115 = vtanh.f32 %v5043_v19  ;;  %v5063_v19 = vrot.slane %v12510_v25, 1 }
0x10e3   :  { %v5721_v20 = vpop.permute.xlu1 %5720  ;;  %v5719_v30 = vpop.permute.xlu0 %5718 }
0x10e4   :  { %v9116_v21 = vpop.eup %9115  ;;  %v12922_v43 = vadd.f32 %v5721_v20, %v5694_v24  ;;  %v12924_v27 = vadd.f32 %v5719_v30, %v5693_v2  ;;  %v5064_v20 = vrot.slane %v12691_v31, 1 }
0x10e5   :  { %5098 = vrot.lane.b32.xlu2 %v9116_v21, %s9512_s29 }
0x10e6   :  { %9117 = vtanh.f32 %v12922_v43 }
0x10e7   :  { %9119 = vtanh.f32 %v12924_v27 }
0x10eb   :  { %v5727_v35 = vpop.permute.xlu1 %5726  ;;  %v5725_v57 = vpop.permute.xlu0 %5724 }
0x10ec   :  { %v9118_v61 = vpop.eup %9117  ;;  %v12931_v60 = vadd.f32 %v5727_v35, %v5697_v12  ;;  %v12933_v29 = vadd.f32 %v5725_v57, %v5696_v8  ;;  %v5066_v12 = vrot.slane %v12560_v33, 1  ;;  %v5067_v57 = vrot.slane %v12731_v41, 1 }
0x10ed   :  { %v9120_v40 = vpop.eup %9119  ;;  %5792 = vrot.lane.b32.xlu2 %v9118_v61, %s9512_s29 }
0x10ee   :  { %9121 = vtanh.f32 %v12931_v60  ;;  %5790 = vrot.lane.b32.xlu1 %v9120_v40, %s9512_s29 }
0x10ef   :  { %9123 = vtanh.f32 %v12933_v29 }
0x10f3   :  { %v5731_v55 = vpop.permute.xlu0 %5730 }
0x10f4   :  { %v9122_v4 = vpop.eup %9121  ;;  %v5747_v28 = vadd.f32 %v5731_v55, %v5699_v52  ;;  %v5764_v55 = vrot.slane %v12700_v1, 1  ;;  %v5768_v1 = vrot.slane %v12874_v44, 1 }
0x10f5   :  { %v9124_v62 = vpop.eup %9123  ;;  %5798 = vrot.lane.b32.xlu2 %v9122_v4, %s9512_s29 }
0x10f6   :  { %9125 = vtanh.f32 %v5747_v28  ;;  %5796 = vrot.lane.b32.xlu1 %v9124_v62, %s9512_s29 }
0x10fc   :  { %v9126_v17 = vpop.eup %9125 }
0x10fd   :  { %5822 = vperm.xlu2 %8548, %v5233_v54  }
0x10fe   :  { %5802 = vrot.lane.b32.xlu1 %v9126_v17, %s9512_s29 }
0x112c   :  { %v5085_v48 = vpop.permute.xlu1 %5084 }
0x112d   :  { %v5108_v34 = vmul.f32 %v5085_v48, %v5060_v0 }
0x112e   :  { %v5089_v56 = vpop.permute.xlu0 %5088 }
0x112f   :  { %5124 = vst [vmem:[#allocation1] ss:$9 sm:$0xff] %v5108_v34  ;;  %v5087_v38 = vpop.permute.xlu2 %5086  ;;  %v5110_v13 = vmul.f32 %v5089_v56, %v5062_v7  ;;  %v14958_v7 = vmov 3  }
0x1130   :  { %v5109_v26 = vmul.f32 %v5087_v38, %v5061_v5 }
0x1131   :  { %5128 = vst [vmem:[#allocation1 + $0x2] ss:$9 sm:$0xff] %v5110_v13 }
0x1132   :  { %5126 = vst [vmem:[#allocation1 + $0x1] ss:$9 sm:$0xff] %v5109_v26 }
0x1134   :  { %v5091_v24 = vpop.permute.xlu1 %5090 }
0x1135   :  { %v5111_v2 = vmul.f32 %v5091_v24, %v5063_v19  ;;  %v6001_v19 = vld [vmem:[#allocation3 + $0x1] ss:$4 sm:$0x3] }
0x1136   :  { %v5095_v18 = vpop.permute.xlu0 %5094 }
0x1137   :  { %5130 = vst [vmem:[#allocation1 + $0x3] ss:$9 sm:$0xff] %v5111_v2  ;;  %v5093_v30 = vpop.permute.xlu2 %5092  ;;  %v5113_v21 = vmul.f32 %v5095_v18, %v5065_v9 }
0x1138   :  { %v5112_v47 = vmul.f32 %v5093_v30, %v5064_v20 }
0x1139   :  { %5134 = vst [vmem:[#allocation1 + $0x5] ss:$9 sm:$0xff] %v5113_v21 }
0x113a   :  { %5132 = vst [vmem:[#allocation1 + $0x4] ss:$9 sm:$0xff] %v5112_v47 }
0x113c   :  { %v5097_v8 = vpop.permute.xlu1 %5096 }
0x113d   :  { %v5114_v35 = vmul.f32 %v5097_v8, %v5066_v12 }
0x113e   :  { %v5789_v31 = vpop.permute.xlu0 %5788 }
0x113f   :  { %5136 = vst [vmem:[#allocation1 + $0x6] ss:$9 sm:$0xff] %v5114_v35  ;;  %v5099_v25 = vpop.permute.xlu2 %5098  ;;  %v5812_v4 = vmul.f32 %v5789_v31, %v5764_v55  ;;  %v6011_v55 = vld [vmem:[#allocation3 + $0x29] ss:$4 sm:$0x3] }
0x1140   :  { %v5115_v61 = vmul.f32 %v5099_v25, %v5067_v57 }
0x1142   :  { %5138 = vst [vmem:[#allocation1 + $0x7] ss:$9 sm:$0xff] %v5115_v61 }
0x1146   :  { %v5795_v40 = vpop.permute.xlu0 %5794 }
0x1147   :  { %v5793_v41 = vpop.permute.xlu2 %5792 }
0x1149   :  { %v12956_v53 = vld [vmem:[#allocation1] sm:$0xff] }
0x114a   :  { %5165 = vst [vmem:[#allocation1] ss:$9 sm:$0xff] %v5108_v34 }
0x114b   :  { %5167 = vst [vmem:[#allocation1 + $0x1] ss:$9 sm:$0xff] %v5109_v26 }
0x114c   :  { %5169 = vst [vmem:[#allocation1 + $0x2] ss:$9 sm:$0xff] %v5110_v13 }
0x114d   :  { %5171 = vst [vmem:[#allocation1 + $0x3] ss:$9 sm:$0xff] %v5111_v2 }
0x114e   :  { %5173 = vst [vmem:[#allocation1 + $0x4] ss:$9 sm:$0xff] %v5112_v47  ;;  %v5801_v54 = vpop.permute.xlu0 %5800  ;;  %v6003_v47 = vld [vmem:[#allocation3 + $0x9] ss:$4 sm:$0x3] }
0x114f   :  { %5175 = vst [vmem:[#allocation1 + $0x5] ss:$9 sm:$0xff] %v5113_v21  ;;  %v6005_v21 = vld [vmem:[#allocation3 + $0x11] ss:$4 sm:$0x3] }
0x1150   :  { %5177 = vst [vmem:[#allocation1 + $0x6] ss:$9 sm:$0xff] %v5114_v35 }
0x1151   :  { %5179 = vst [vmem:[#allocation1 + $0x7] ss:$9 sm:$0xff] %v5115_v61 }
0x1158   :  { %v12958_v33 = vld [vmem:[#allocation1] sm:$0xff] }
0x1159   :  { %5833 = vst [vmem:[#allocation1] ss:$9 sm:$0xff] %v12898_v32  ;;  %v5766_v32 = vrot.slane %v12803_v42, 1 }
0x115a   :  { %5835 = vst [vmem:[#allocation1 + $0x1] ss:$9 sm:$0xff] %v12924_v27  ;;  %v5767_v27 = vrot.slane %v12766_v37, 1 }
0x115b   :  { %5837 = vst [vmem:[#allocation1 + $0x2] ss:$9 sm:$0xff] %v12922_v43  ;;  %v5799_v43 = vpop.permute.xlu2 %5798 }
0x115c   :  { %5839 = vst [vmem:[#allocation1 + $0x3] ss:$9 sm:$0xff] %v12906_v11  ;;  %v5814_v11 = vmul.f32 %v5793_v41, %v5766_v32  ;;  %v6009_v32 = vld [vmem:[#allocation3 + $0x21] ss:$4 sm:$0x3] }
0x115d   :  { %5841 = vst [vmem:[#allocation1 + $0x4] ss:$9 sm:$0xff] %v12933_v29  ;;  %v5769_v29 = vrot.slane %v12868_v10, 1  ;;  %v5771_v10 = vrot.slane %v12882_v16, 1 }
0x115e   :  { %5843 = vst [vmem:[#allocation1 + $0x5] ss:$9 sm:$0xff] %v12931_v60  ;;  %v5765_v60 = vrot.slane %v12815_v50, 1 }
0x115f   :  { %5845 = vst [vmem:[#allocation1 + $0x6] ss:$9 sm:$0xff] %v12912_v39  ;;  %v5815_v39 = vmul.f32 %v5795_v40, %v5767_v27  ;;  %v5817_v42 = vmul.f32 %v5799_v43, %v5769_v29  ;;  %v6007_v40 = vld [vmem:[#allocation3 + $0x19] ss:$4 sm:$0x3] }
0x1160   :  { %5847 = vst [vmem:[#allocation1 + $0x7] ss:$9 sm:$0xff] %v5747_v28  ;;  %v5791_v52 = vpop.permute.xlu1 %5790  ;;  %v5770_v28 = vrot.slane %v12864_v14, 1  ;;  %v12980_v14 = vsel %vm308_vm7, 0, %v14958_v7 }
0x1161   :  { %v5813_v0 = vmul.f32 %v5791_v52, %v5765_v60  ;;  %v6013_v60 = vld [vmem:[#allocation3 + $0x31] ss:$4 sm:$0x3] }
0x1162   :  { %v5818_v37 = vmul.f32 %v5801_v54, %v5770_v28  ;;  %v6015_v28 = vld [vmem:[#allocation3 + $0x39] ss:$4 sm:$0x3] }
0x1163   :  { %v12982_v44 = vpop.permute.xlu2 %5822 }
0x1164   :  { %vm5824_vm4 = vcmp.gt.s32.totalorder %v12982_v44, %v12980_v14 }
0x1167   :  { %v12970_v62 = vld [vmem:[#allocation1] sm:$0xff] }
0x1168   :  { %5861 = vst [vmem:[#allocation1] ss:$9 sm:$0xff] %v5812_v4  ;;  %v5797_v17 = vpop.permute.xlu1 %5796 }
0x1169   :  { %5865 = vst [vmem:[#allocation1 + $0x2] ss:$9 sm:$0xff] %v5814_v11  ;;  %v5816_v48 = vmul.f32 %v5797_v17, %v5768_v1 }
0x116a   :  { %5867 = vst [vmem:[#allocation1 + $0x3] ss:$9 sm:$0xff] %v5815_v39 }
0x116b   :  { %5871 = vst [vmem:[#allocation1 + $0x5] ss:$9 sm:$0xff] %v5817_v42 }
0x116c   :  { %5873 = vst [vmem:[#allocation1 + $0x6] ss:$9 sm:$0xff] %v5818_v37 }
0x116d   :  { %5863 = vst [vmem:[#allocation1 + $0x1] ss:$9 sm:$0xff] %v5813_v0 }
0x116e   :  { %5869 = vst [vmem:[#allocation1 + $0x4] ss:$9 sm:$0xff] %v5816_v48 }
0x1170   :  { %v5803_v50 = vpop.permute.xlu1 %5802 }
0x1171   :  { %v5819_v34 = vmul.f32 %v5803_v50, %v5771_v10 }
0x1173   :  { %5875 = vst [vmem:[#allocation1 + $0x7] ss:$9 sm:$0xff] %v5819_v34 }
0x117a   :  { %v5876_v5 = vld [vmem:[#allocation1] sm:$0xff] }
0x117b   :  { %5885 = vst [vmem:[#allocation1] ss:$9 sm:$0xff] %v5812_v4  ;;  %v12989_v56 = vsel %vm5824_vm4, %v5876_v5, 0.0 }
0x117c   :  { %5887 = vst [vmem:[#allocation1 + $0x1] ss:$9 sm:$0xff] %v5813_v0  ;;  %8472 = vmatmul.msk.f32.vlgmr.msrb.gmra.mxu2 %vm203_vm0, %v12989_v56  ;;  %8473 = vmatmul.msk.f32.vlgmr.msrb.gmra.mxu3 %vm203_vm0, %v12989_v56 }
0x117d   :  { %5889 = vst [vmem:[#allocation1 + $0x2] ss:$9 sm:$0xff] %v5814_v11 }
0x117e   :  { %5891 = vst [vmem:[#allocation1 + $0x3] ss:$9 sm:$0xff] %v5815_v39 }
0x117f   :  { %5893 = vst [vmem:[#allocation1 + $0x4] ss:$9 sm:$0xff] %v5816_v48 }
0x1180   :  { %5895 = vst [vmem:[#allocation1 + $0x5] ss:$9 sm:$0xff] %v5817_v42 }
0x1181   :  { %5897 = vst [vmem:[#allocation1 + $0x6] ss:$9 sm:$0xff] %v5818_v37 }
0x1182   :  { %5899 = vst [vmem:[#allocation1 + $0x7] ss:$9 sm:$0xff] %v5819_v34 }
0x1189   :  { %v12995_v16 = vld [vmem:[#allocation1] sm:$0xff] }
0x118a   :  { %5932 = vst [vmem:[#allocation1] ss:$9 sm:$0xff] %v5812_v4 }
0x118b   :  { %5934 = vst [vmem:[#allocation1 + $0x1] ss:$9 sm:$0xff] %v5813_v0 }
0x118c   :  { %5936 = vst [vmem:[#allocation1 + $0x2] ss:$9 sm:$0xff] %v5814_v11 }
0x118d   :  { %5938 = vst [vmem:[#allocation1 + $0x3] ss:$9 sm:$0xff] %v5815_v39 }
0x118e   :  { %5940 = vst [vmem:[#allocation1 + $0x4] ss:$9 sm:$0xff] %v5816_v48 }
0x118f   :  { %5942 = vst [vmem:[#allocation1 + $0x5] ss:$9 sm:$0xff] %v5817_v42 }
0x1190   :  { %5944 = vst [vmem:[#allocation1 + $0x6] ss:$9 sm:$0xff] %v5818_v37 }
0x1191   :  { %5946 = vst [vmem:[#allocation1 + $0x7] ss:$9 sm:$0xff] %v5819_v34 }
0x11ff   :  { %v6056_v38 = vpop.f32.mrf.mxu3  ;;  %v6036_v26 = vpop.f32.mrf.mxu2 }
0x1200   :  { %v6061_v13 = vrot.slane %v6056_v38, 7 }
0x1202   :  { %v6062_v24 = vsel %vm370_vm1, %v6036_v26, %v6061_v13  ;;  %v6065_v2 = vsel %vm375_vm3, %v6036_v26, %v6061_v13  ;;  %v6063_v9 = vsel %vm14959_vm5, %v6036_v26, %v6061_v13  ;;  %v6067_v12 = vsel %vm14960_vm11, %v6036_v26, %v6061_v13 }
0x1203   :  { %v6085_v20 = vadd.f32 %v6062_v24, %v6001_v19  ;;  %v6066_v18 = vrot.slane %v6065_v2, 2  ;;  %v6064_v30 = vrot.slane %v6063_v9, 1  ;;  %v6071_v57 = vsel %vm14961_vm2, %v6036_v26, %v6061_v13 }
0x1204   :  { %v6069_v25 = vsel %vm14962_vm10, %v6036_v26, %v6061_v13  ;;  %v6068_v61 = vrot.slane %v6067_v12, 3  ;;  %v6072_v31 = vrot.slane %v6071_v57, 5  ;;  %v6073_v4 = vsel %vm14963_vm6, %v6036_v26, %v6061_v13 }
0x1205   :  { %6253 = vrot.lane.b32.xlu0 %v6085_v20, %s9512_s29  ;;  %v6087_v8 = vadd.f32 %v6066_v18, %v6005_v21  ;;  %v6086_v35 = vadd.f32 %v6064_v30, %v6003_v47  ;;  %v6070_v41 = vrot.slane %v6069_v25, 4  ;;  %v6075_v11 = vsel %vm14964_vm13, %v6061_v13, %v6036_v26 }
0x1206   :  { %v6088_v52 = vadd.f32 %v6068_v61, %v6007_v40  ;;  %v6090_v27 = vadd.f32 %v6072_v31, %v6011_v55  ;;  %v6074_v29 = vrot.slane %v6073_v4, 6  ;;  %v6076_v54 = vrot.slane %v6075_v11, 7 }
0x1207   :  { %6257 = vrot.lane.b32.xlu2 %v6087_v8, %s9512_s29  ;;  %6255 = vrot.lane.b32.xlu1 %v6086_v35, %s9512_s29  ;;  %v6089_v43 = vadd.f32 %v6070_v41, %v6009_v32  ;;  %v8474_v17 = vmul.f32 -1.442695, %v6085_v20  ;;  %v8475_v42 = vmul.f32 -1.442695, %v6086_v35  ;;  %v8476_v0 = vmul.f32 -1.442695, %v6087_v8 }
0x1208   :  { %v6091_v39 = vadd.f32 %v6074_v29, %v6013_v60  ;;  %v6092_v1 = vadd.f32 %v6076_v54, %v6015_v28  ;;  %v8477_v37 = vmul.f32 -1.442695, %v6088_v52  ;;  %v8479_v7 = vmul.f32 -1.442695, %v6090_v27 }
0x1209   :  { %9127 = vpow2.f32 %v8474_v17  ;;  %v8478_v34 = vmul.f32 -1.442695, %v6089_v43 }
0x120a   :  { %9129 = vpow2.f32 %v8475_v42  ;;  %v8480_v38 = vmul.f32 -1.442695, %v6091_v39  ;;  %v8481_v26 = vmul.f32 -1.442695, %v6092_v1 }
0x120b   :  { %9131 = vpow2.f32 %v8476_v0 }
0x120c   :  { %9133 = vpow2.f32 %v8477_v37 }
0x120d   :  { %6259 = vrot.lane.b32.xlu0 %v6088_v52, %s9512_s29 }
0x120f   :  { %6263 = vrot.lane.b32.xlu2 %v6090_v27, %s9512_s29  ;;  %6261 = vrot.lane.b32.xlu1 %v6089_v43, %s9512_s29  ;;  %v9128_v48 = vpop.eup %9127 }
0x1210   :  { %v13017_v50 = vadd.f32 1.0, %v9128_v48  ;;  %v9130_v5 = vpop.eup %9129 }
0x1211   :  { %v13020_v19 = vadd.f32 1.0, %v9130_v5 }
0x1212   :  { %9135 = vrcp.f32 %v13017_v50  ;;  %v6136_v14 = vand.u32 2147483648, %v13017_v50  ;;  %v6134_v27 = vand.u32 2147483647, %v13017_v50  ;;  %vm6130_vm8 = vweird.f32 %v13017_v50 }
0x1213   :  { %9137 = vpow2.f32 %v8478_v34  ;;  %v6149_v37 = vand.u32 2147483647, %v13020_v19  ;;  %v6151_v48 = vand.u32 2147483648, %v13020_v19  ;;  %vm6145_vm12 = vweird.f32 %v13020_v19 }
0x1214   :  { %9139 = vpow2.f32 %v8479_v7  ;;  %v6137_v28 = vor.u32 1.1754944e-38, %v6136_v14  ;;  %vm13075_vm15 = vcmp.eq.f32.partialorder %v6134_v27, 8.507059e+37 }
0x1215   :  { %6265 = vrot.lane.b32.xlu0 %v6091_v39, %s9512_s29  ;;  %9141 = vpow2.f32 %v8480_v38  ;;  %v6152_v27 = vor.u32 1.1754944e-38, %v6151_v48  ;;  %vm13124_vm2 = vcmp.eq.f32.partialorder %v6149_v37, 8.507059e+37 }
0x1216   :  { %9143 = vpow2.f32 %v8481_v26 }
0x1217   :  { %5849 = vrot.lane.b32.xlu2 %v12970_v62, %s9512_s29  ;;  %6267 = vrot.lane.b32.xlu1 %v6092_v1, %s9512_s29  ;;  %v9132_v62 = vpop.eup %9131  ;;  %9145 = vrcp.f32 %v13020_v19 }
0x1218   :  { %v9134_v13 = vpop.eup %9133  ;;  %v13022_v24 = vadd.f32 1.0, %v9132_v62 }
0x1219   :  { %v13026_v9 = vadd.f32 1.0, %v9134_v13  ;;  %v13028_v20 = vpop.eup %9135 }
0x121a   :  { %v9138_v18 = vpop.eup %9137  ;;  %9147 = vrcp.f32 %v13022_v24  ;;  %v6126_v47 = vmul.f32 %v13028_v20, %v13017_v50  ;;  %vm6131_vm14 = vweird.f32 %v13028_v20  ;;  %v6166_v5 = vand.u32 2147483648, %v13022_v24 }
0x121b   :  { %v9140_v30 = vpop.eup %9139  ;;  %9149 = vrcp.f32 %v13026_v9  ;;  %v13035_v12 = vadd.f32 1.0, %v9138_v18  ;;  %vm6160_vm9 = vweird.f32 %v13022_v24  ;;  %vm13111_vm5 = vmor %vm6130_vm8, %vm6131_vm14 }
0x121c   :  { %v9142_v21 = vpop.eup %9141  ;;  %v13037_v35 = vadd.f32 1.0, %v9140_v30  ;;  %v6127_v55 = vsub.f32 1.0, %v6126_v47  ;;  %v6164_v47 = vand.u32 2147483647, %v13022_v24 }
0x121d   :  { %v9144_v8 = vpop.eup %9143  ;;  %v13041_v61 = vadd.f32 1.0, %v9142_v21  ;;  %9151 = vrcp.f32 %v13035_v12  ;;  %vm6190_vm14 = vweird.f32 %v13035_v12 }
0x121e   :  { %v13039_v25 = vpop.eup %9145  ;;  %v13057_v4 = vadd.f32 1.0, %v9144_v8  ;;  %9153 = vrcp.f32 %v13037_v35  ;;  %v6128_v54 = vmul.f32 %v13028_v20, %v6127_v55  ;;  %v6179_v8 = vand.u32 2147483647, %v13026_v9 }
0x121f   :  { %v6141_v43 = vmul.f32 %v13039_v25, %v13020_v19  ;;  %9155 = vrcp.f32 %v13041_v61  ;;  %vm6146_vm11 = vweird.f32 %v13039_v25  ;;  %vm13135_vm13 = vcmp.eq.f32.partialorder %v6164_v47, 8.507059e+37 }
0x1220   :  { %v13048_v41 = vpop.eup %9147  ;;  %9157 = vrcp.f32 %v13057_v4  ;;  %v6129_v26 = vadd.f32 %v13028_v20, %v6128_v54  ;;  %vm13152_vm8 = vmor %vm6145_vm12, %vm6146_vm11 }
0x1221   :  { %v13054_v32 = vpop.eup %9149  ;;  %v6156_v11 = vmul.f32 %v13048_v41, %v13022_v24  ;;  %v6142_v0 = vsub.f32 1.0, %v6141_v43  ;;  %vm6161_vm10 = vweird.f32 %v13048_v41  ;;  %v6194_v24 = vand.u32 2147483647, %v13035_v12 }
0x1222   :  { %v6171_v60 = vmul.f32 %v13054_v32, %v13026_v9  ;;  %vm6176_vm6 = vweird.f32 %v13054_v32  ;;  %vm13171_vm12 = vmor %vm6160_vm9, %vm6161_vm10  ;;  %vm6205_vm10 = vweird.f32 %v13037_v35 }
0x1223   :  { %v13081_v34 = vpop.eup %9151  ;;  %v6157_v7 = vsub.f32 1.0, %v6156_v11  ;;  %v13116_v11 = vor.u32 1.1754944e-38, %v6166_v5 }
0x1224   :  { %v13085_v38 = vpop.eup %9153  ;;  %v6172_v18 = vsub.f32 1.0, %v6171_v60  ;;  %v6186_v55 = vmul.f32 %v13081_v34, %v13035_v12  ;;  %v6133_v60 = vsel %vm13111_vm5, %v13028_v20, %v6129_v26  ;;  %vm6191_vm11 = vweird.f32 %v13081_v34 }
0x1225   :  { %v13092_v30 = vpop.eup %9155  ;;  %v6158_v43 = vmul.f32 %v13048_v41, %v6157_v7  ;;  %vm6206_vm9 = vweird.f32 %v13085_v38  ;;  %v6211_v7 = vand.u32 2147483648, %v13037_v35 }
0x1226   :  { %v13105_v14 = vpop.eup %9157  ;;  %v6187_v5 = vsub.f32 1.0, %v6186_v55 }
0x1261   :  { %v13015_v10 = vpop.permute.xlu2 %6257 }
0x1269   :  { %v13024_v2 = vpop.permute.xlu2 %6263 }
0x1271   :  { %v5850_v57 = vpop.permute.xlu2 %5849 }
0x1272   :  { %v13046_v31 = vsel %vm5824_vm4, %v5850_v57, 0.0  ;;  %v6271_v57 = vrot.slane %v13015_v10, 1  ;;  %vm6175_vm4 = vweird.f32 %v13026_v9  ;;  %v6274_v10 = vrot.slane %v13024_v2, 1 }
0x1273   :  { %6301 = vrot.lane.b32.xlu0 %v13046_v31, %s9512_s29  ;;  %v6295_v40 = vrot.slane %v13046_v31, 2  ;;  %v6294_v52 = vrot.slane %v13046_v31, 1  ;;  %v6296_v17 = vrot.slane %v13046_v31, 3  ;;  %v6298_v62 = vrot.slane %v13046_v31, 5  ;;  %vm13182_vm5 = vmor %vm6175_vm4, %vm6176_vm6 }
0x1274   :  { %v6297_v13 = vrot.slane %v13046_v31, 4  ;;  %v6299_v48 = vrot.slane %v13046_v31, 6  ;;  %v6231_v2 = vmul.f32 %v13105_v14, %v13057_v4  ;;  %vm6221_vm4 = vweird.f32 %v13092_v30  ;;  %vm13238_vm6 = vmor %vm6205_vm10, %vm6206_vm9 }
0x1275   :  { %6305 = vrot.lane.b32.xlu2 %v6295_v40, %s9512_s29  ;;  %6303 = vrot.lane.b32.xlu1 %v6294_v52, %s9512_s29  ;;  %v6143_v40 = vmul.f32 %v13039_v25, %v6142_v0  ;;  %v6181_v52 = vand.u32 2147483648, %v13026_v9  ;;  %vm14988_vm10 = vcmask 1041409  }
0x1277   :  { %v6254_v29 = vpop.permute.xlu0 %6253  ;;  %v6144_v37 = vadd.f32 %v13039_v25, %v6143_v40  ;;  %v6182_v55 = vor.u32 1.1754944e-38, %v6181_v52  ;;  %v6188_v52 = vmul.f32 %v13081_v34, %v6187_v5 }
0x1278   :  { %v6269_v39 = vrot.slane %v6254_v29, 1  ;;  %v6201_v29 = vmul.f32 %v13085_v38, %v13037_v35 }
0x1279   :  { %v6256_v1 = vpop.permute.xlu1 %6255  ;;  %v6148_v19 = vsel %vm13152_vm8, %v13039_v25, %v6144_v37 }
0x127a   :  { %9159 = vtanh.f32 %v6269_v39  ;;  %v6270_v21 = vrot.slane %v6256_v1, 1  ;;  %v6173_v39 = vmul.f32 %v13054_v32, %v6172_v18  ;;  %v6216_v1 = vmul.f32 %v13092_v30, %v13041_v61 }
0x127b   :  { %6307 = vrot.lane.b32.xlu0 %v6296_v17, %s9512_s29  ;;  %v6202_v26 = vsub.f32 1.0, %v6201_v29  ;;  %v6300_v18 = vrot.slane %v13046_v31, 7  ;;  %v6196_v29 = vand.u32 2147483648, %v13035_v12  ;;  %v13200_v37 = vsel %vm13124_vm2, %v6152_v27, %v6148_v19  ;;  %vm13224_vm2 = vmor %vm6190_vm14, %vm6191_vm11 }
0x127c   :  { %9161 = vtanh.f32 %v6270_v21  ;;  %v6174_v47 = vadd.f32 %v13054_v32, %v6173_v39  ;;  %vm6235_vm11 = vweird.f32 %v13057_v4 }
0x127d   :  { %6311 = vrot.lane.b32.xlu2 %v6298_v62, %s9512_s29  ;;  %6309 = vrot.lane.b32.xlu1 %v6297_v13, %s9512_s29  ;;  %9163 = vtanh.f32 %v6271_v57  ;;  %v13141_v62 = vsel %vm13075_vm15, %v6137_v28, %v6133_v60  ;;  %v6159_v13 = vadd.f32 %v13048_v41, %v6158_v43  ;;  %v6217_v57 = vsub.f32 1.0, %v6216_v1 }
0x127e   :  { %vm13156_vm15 = vcmp.eq.f32.partialorder %v6179_v8, 8.507059e+37  ;;  %v6178_v9 = vsel %vm13182_vm5, %v13054_v32, %v6174_v47  ;;  %v6232_v32 = vsub.f32 1.0, %v6231_v2  ;;  %vm6236_vm5 = vweird.f32 %v13105_v14 }
0x127f   :  { %v6260_v54 = vpop.permute.xlu0 %6259  ;;  %v6163_v1 = vsel %vm13171_vm12, %v13048_v41, %v6159_v13  ;;  %v6189_v13 = vadd.f32 %v13081_v34, %v6188_v52  ;;  %v13212_v50 = vsel %vm13156_vm15, %v6182_v55, %v6178_v9  ;;  %vm6195_vm15 = vcmp.eq.f32.partialorder %v6194_v24, 8.507059e+37  ;;  %vm6237_vm9 = vmor %vm6235_vm11, %vm6236_vm5 }
0x1280   :  { %v9160_v17 = vpop.eup %9159  ;;  %v6272_v0 = vrot.slane %v6260_v54, 1  ;;  %v6209_v54 = vand.u32 2147483647, %v13037_v35  ;;  %v6224_v35 = vand.u32 2147483647, %v13041_v61  ;;  %v6233_v42 = vmul.f32 %v13105_v14, %v6232_v32 }
0x1281   :  { %v6262_v20 = vpop.permute.xlu1 %6261  ;;  %v6333_v21 = vmul.f32 %v9160_v17, %v13141_v62  ;;  %v6203_v17 = vmul.f32 %v13085_v38, %v6202_v26  ;;  %v13208_v26 = vsel %vm13135_vm13, %v13116_v11, %v6163_v1  ;;  %v6193_v28 = vsel %vm13224_vm2, %v13081_v34, %v6189_v13 }
0x1282   :  { %9165 = vtanh.f32 %v6272_v0  ;;  %v6273_v40 = vrot.slane %v6262_v20, 1  ;;  %v9162_v43 = vpop.eup %9161  ;;  %v6218_v0 = vmul.f32 %v13092_v30, %v6217_v57  ;;  %vm6220_vm13 = vweird.f32 %v13041_v61 }
0x1283   :  { %6313 = vrot.lane.b32.xlu0 %v6299_v48, %s9512_s29  ;;  %v9164_v60 = vpop.eup %9163  ;;  %v6334_v41 = vmul.f32 %v9162_v43, %v13200_v37  ;;  %vm13247_vm8 = vmor %vm6220_vm13, %vm6221_vm4  ;;  %vm6210_vm14 = vcmp.eq.f32.partialorder %v6209_v54, 8.507059e+37  ;;  %v6212_v43 = vor.u32 1.1754944e-38, %v6211_v7  ;;  %vm6225_vm12 = vcmp.eq.f32.partialorder %v6224_v35, 8.507059e+37 }
0x1284   :  { %9167 = vtanh.f32 %v6273_v40  ;;  %v6335_v27 = vmul.f32 %v9164_v60, %v13208_v26  ;;  %v6219_v47 = vadd.f32 %v13092_v30, %v6218_v0  ;;  %v6226_v40 = vand.u32 2147483648, %v13041_v61 }
0x1285   :  { %6315 = vrot.lane.b32.xlu1 %v6300_v18, %s9512_s29  ;;  %6349 = vrot.lane.b32.xlu2 %v6333_v21, %s9512_s29  ;;  %9169 = vtanh.f32 %v6274_v10  ;;  %v6204_v21 = vadd.f32 %v13085_v38, %v6203_v17  ;;  %v6197_v10 = vor.u32 1.1754944e-38, %v6196_v29  ;;  %v6234_v24 = vadd.f32 %v13105_v14, %v6233_v42 }
0x1286   :  { %v6223_v61 = vsel %vm13247_vm8, %v13092_v30, %v6219_v47  ;;  %v6227_v25 = vor.u32 1.1754944e-38, %v6226_v40  ;;  %v6241_v54 = vand.u32 2147483648, %v13057_v4  ;;  %v6239_v1 = vand.u32 2147483647, %v13057_v4 }
0x1287   :  { %v6266_v39 = vpop.permute.xlu0 %6265  ;;  %v6208_v8 = vsel %vm13238_vm6, %v13085_v38, %v6204_v21  ;;  %v13257_v2 = vsel %vm6195_vm15, %v6197_v10, %v6193_v28  ;;  %v6238_v9 = vsel %vm6237_vm9, %v13105_v14, %v6234_v24  ;;  %v13280_v21 = vld [vmem:[#allocation1] sm:$0xff]  ;;  %vm14989_vm6 = vcmask 1043459  }
0x1288   :  { %v9166_v20 = vpop.eup %9165  ;;  %v6275_v48 = vrot.slane %v6266_v39, 1  ;;  %v13262_v60 = vsel %vm6210_vm14, %v6212_v43, %v6208_v8  ;;  %v13264_v38 = vsel %vm6225_vm12, %v6227_v25, %v6223_v61  ;;  %v6242_v0 = vor.u32 1.1754944e-38, %v6241_v54 }
0x1289   :  { %v6268_v5 = vpop.permute.xlu1 %6267  ;;  %v6336_v18 = vmul.f32 %v9166_v20, %v13212_v50  ;;  %vm6240_vm4 = vcmp.eq.f32.partialorder %v6239_v1, 8.507059e+37  ;;  %vm14990_vm13 = vcmask 1045509   ;;  %vm14991_vm8 = vcmask 1044484  }
0x128a   :  { %9171 = vtanh.f32 %v6275_v48  ;;  %v6276_v57 = vrot.slane %v6268_v5, 1  ;;  %v9168_v55 = vpop.eup %9167  ;;  %v13275_v20 = vsel %vm6240_vm4, %v6242_v0, %v6238_v9  ;;  %vm14992_vm15 = vcmask 1046534  }
0x128b   :  { %6351 = vrot.lane.b32.xlu0 %v6334_v41, %s9512_s29  ;;  %v9170_v34 = vpop.eup %9169  ;;  %v6337_v29 = vmul.f32 %v9168_v55, %v13257_v2  ;;  %vm14993_vm14 = vcmask 1046528  }
0x128c   :  { %9173 = vtanh.f32 %v6276_v57  ;;  %v6338_v30 = vmul.f32 %v9170_v34, %v13262_v60 }
0x128d   :  { %6353 = vrot.lane.b32.xlu1 %v6335_v27, %s9512_s29  ;;  %6355 = vrot.lane.b32.xlu2 %v6336_v18, %s9512_s29 }
0x1290   :  { %v9172_v52 = vpop.eup %9171 }
0x1291   :  { %v6339_v39 = vmul.f32 %v9172_v52, %v13264_v38 }
0x1292   :  { %v9174_v17 = vpop.eup %9173 }
0x1293   :  { %6357 = vrot.lane.b32.xlu0 %v6337_v29, %s9512_s29  ;;  %v6340_v48 = vmul.f32 %v9174_v17, %v13275_v20 }
0x1295   :  { %6359 = vrot.lane.b32.xlu1 %v6338_v30, %s9512_s29  ;;  %6361 = vrot.lane.b32.xlu2 %v6339_v39, %s9512_s29 }
0x129b   :  { %6363 = vrot.lane.b32.xlu0 %v6340_v48, %s9512_s29 }
0x12cf   :  { %v6306_v5 = vpop.permute.xlu2 %6305 }
0x12d0   :  { %v6327_v8 = vmul.f32 %v6306_v5, %v13208_v26 }
0x12d7   :  { %v6312_v41 = vpop.permute.xlu2 %6311 }
0x12d8   :  { %v6330_v30 = vmul.f32 %v6312_v41, %v13262_v60 }
0x12df   :  { %v6350_v13 = vpop.permute.xlu2 %6349 }
0x12e5   :  { %v6302_v4 = vpop.permute.xlu0 %6301 }
0x12e6   :  { %v6325_v32 = vmul.f32 %v6302_v4, %v13141_v62 }
0x12e7   :  { %v6304_v27 = vpop.permute.xlu1 %6303  ;;  %v6356_v14 = vpop.permute.xlu2 %6355 }
0x12e8   :  { %v6373_v18 = vadd.f32 %v6350_v13, %v6325_v32  ;;  %v6326_v19 = vmul.f32 %v6304_v27, %v13200_v37  ;;  %v6398_v32 = vrot.slane %v13200_v37, 1  ;;  %v6404_v37 = vrot.slane %v13275_v20, 1 }
0x12ea   :  { %9175 = vtanh.f32 %v6373_v18  ;;  %6463 = vst [vmem:[#allocation1] ss:$9 sm:$0xff] %v6373_v18 }
0x12ed   :  { %v6308_v47 = vpop.permute.xlu0 %6307 }
0x12ee   :  { %v6328_v57 = vmul.f32 %v6308_v47, %v13212_v50 }
0x12ef   :  { %v6310_v11 = vpop.permute.xlu1 %6309  ;;  %v6362_v35 = vpop.permute.xlu2 %6361 }
0x12f0   :  { %v9176_v7 = vpop.eup %9175  ;;  %v6376_v40 = vadd.f32 %v6356_v14, %v6328_v57  ;;  %v6329_v29 = vmul.f32 %v6310_v11, %v13257_v2  ;;  %v6397_v14 = vrot.slane %v13141_v62, 1 }
0x12f1   :  { %6421 = vrot.lane.b32.xlu1 %v9176_v7, %s9512_s29  ;;  %v6401_v7 = vrot.slane %v13257_v2, 1  ;;  %v6399_v2 = vrot.slane %v13208_v26, 1 }
0x12f2   :  { %9177 = vtanh.f32 %v6376_v40  ;;  %6469 = vst [vmem:[#allocation1 + $0x3] ss:$9 sm:$0xff] %v6376_v40 }
0x12f5   :  { %v6314_v28 = vpop.permute.xlu0 %6313 }
0x12f6   :  { %v6331_v12 = vmul.f32 %v6314_v28, %v13264_v38 }
0x12f7   :  { %v6316_v42 = vpop.permute.xlu1 %6315 }
0x12f8   :  { %v9178_v55 = vpop.eup %9177  ;;  %v6379_v10 = vadd.f32 %v6362_v35, %v6331_v12  ;;  %v6332_v0 = vmul.f32 %v6316_v42, %v13275_v20  ;;  %v6400_v12 = vrot.slane %v13212_v50, 1  ;;  %v6402_v50 = vrot.slane %v13262_v60, 1 }
0x12f9   :  { %6427 = vrot.lane.b32.xlu1 %v9178_v55, %s9512_s29 }
0x12fa   :  { %9179 = vtanh.f32 %v6379_v10  ;;  %6475 = vst [vmem:[#allocation1 + $0x6] ss:$9 sm:$0xff] %v6379_v10  ;;  %v6403_v10 = vrot.slane %v13264_v38, 1 }
0x12fd   :  { %v6352_v34 = vpop.permute.xlu0 %6351 }
0x12fe   :  { %v6374_v61 = vadd.f32 %v6352_v34, %v6326_v19 }
0x12ff   :  { %v6354_v52 = vpop.permute.xlu1 %6353 }
0x1300   :  { %v9180_v43 = vpop.eup %9179  ;;  %9181 = vtanh.f32 %v6374_v61  ;;  %6465 = vst [vmem:[#allocation1 + $0x1] ss:$9 sm:$0xff] %v6374_v61  ;;  %v6375_v25 = vadd.f32 %v6354_v52, %v6327_v8 }
0x1301   :  { %6433 = vrot.lane.b32.xlu1 %v9180_v43, %s9512_s29 }
0x1302   :  { %9183 = vtanh.f32 %v6375_v25  ;;  %6467 = vst [vmem:[#allocation1 + $0x2] ss:$9 sm:$0xff] %v6375_v25  ;;  %v14987_v25 = vmov 2  }
0x1303   :  { %v13310_v20 = vsel %vm308_vm7, 1, %v14987_v25 }
0x1304   :  { %vm6454_vm2 = vcmp.gt.s32.totalorder %v12982_v44, %v13310_v20 }
0x1305   :  { %v6358_v24 = vpop.permute.xlu0 %6357 }
0x1306   :  { %v9182_v54 = vpop.eup %9181  ;;  %v6377_v39 = vadd.f32 %v6358_v24, %v6329_v29 }
0x1307   :  { %v6360_v1 = vpop.permute.xlu1 %6359  ;;  %6423 = vrot.lane.b32.xlu2 %v9182_v54, %s9512_s29  ;;  %v6631_v54 = vld [vmem:[#allocation3 + $0x2] ss:$4 sm:$0x3] }
0x1308   :  { %v9184_v9 = vpop.eup %9183  ;;  %9185 = vtanh.f32 %v6377_v39  ;;  %6471 = vst [vmem:[#allocation1 + $0x4] ss:$9 sm:$0xff] %v6377_v39  ;;  %v6378_v17 = vadd.f32 %v6360_v1, %v6330_v30 }
0x1309   :  { %6425 = vrot.lane.b32.xlu0 %v9184_v9, %s9512_s29 }
0x130a   :  { %9187 = vtanh.f32 %v6378_v17  ;;  %6473 = vst [vmem:[#allocation1 + $0x5] ss:$9 sm:$0xff] %v6378_v17 }
0x130d   :  { %v6364_v48 = vpop.permute.xlu0 %6363 }
0x130e   :  { %v9186_v5 = vpop.eup %9185  ;;  %v6380_v13 = vadd.f32 %v6364_v48, %v6332_v0  ;;  %v6635_v48 = vld [vmem:[#allocation3 + $0x12] ss:$4 sm:$0x3] }
0x130f   :  { %6429 = vrot.lane.b32.xlu2 %v9186_v5, %s9512_s29  ;;  %v6633_v5 = vld [vmem:[#allocation3 + $0xa] ss:$4 sm:$0x3] }
0x1310   :  { %v9188_v41 = vpop.eup %9187  ;;  %9189 = vtanh.f32 %v6380_v13  ;;  %6477 = vst [vmem:[#allocation1 + $0x7] ss:$9 sm:$0xff] %v6380_v13 }
0x1311   :  { %6431 = vrot.lane.b32.xlu0 %v9188_v41, %s9512_s29 }
0x1316   :  { %v9190_v4 = vpop.eup %9189 }
0x1317   :  { %6435 = vrot.lane.b32.xlu2 %v9190_v4, %s9512_s29  ;;  %v13299_v47 = vld [vmem:[#allocation1] sm:$0xff] }
0x1361   :  { %v6424_v27 = vpop.permute.xlu2 %6423 }
0x1362   :  { %v6446_v18 = vmul.f32 %v6424_v27, %v6398_v32 }
0x1363   :  { %v6422_v57 = vpop.permute.xlu1 %6421 }
0x1364   :  { %6493 = vst [vmem:[#allocation1 + $0x1] ss:$9 sm:$0xff] %v6446_v18  ;;  %v6445_v11 = vmul.f32 %v6422_v57, %v6397_v14 }
0x1366   :  { %6491 = vst [vmem:[#allocation1] ss:$9 sm:$0xff] %v6445_v11 }
0x1369   :  { %v6430_v40 = vpop.permute.xlu2 %6429 }
0x136a   :  { %v6449_v28 = vmul.f32 %v6430_v40, %v6401_v7  ;;  %v6641_v40 = vld [vmem:[#allocation3 + $0x2a] ss:$4 sm:$0x3] }
0x136b   :  { %v6428_v35 = vpop.permute.xlu1 %6427 }
0x136c   :  { %6499 = vst [vmem:[#allocation1 + $0x4] ss:$9 sm:$0xff] %v6449_v28  ;;  %v6448_v42 = vmul.f32 %v6428_v35, %v6400_v12 }
0x136e   :  { %6497 = vst [vmem:[#allocation1 + $0x3] ss:$9 sm:$0xff] %v6448_v42 }
0x1371   :  { %v6436_v55 = vpop.permute.xlu2 %6435 }
0x1372   :  { %v6452_v62 = vmul.f32 %v6436_v55, %v6404_v37 }
0x1373   :  { %v6434_v19 = vpop.permute.xlu1 %6433 }
0x1374   :  { %6505 = vst [vmem:[#allocation1 + $0x7] ss:$9 sm:$0xff] %v6452_v62  ;;  %v6451_v34 = vmul.f32 %v6434_v19, %v6403_v10  ;;  %v6643_v10 = vld [vmem:[#allocation3 + $0x32] ss:$4 sm:$0x3] }
0x1376   :  { %6503 = vst [vmem:[#allocation1 + $0x6] ss:$9 sm:$0xff] %v6451_v34 }
0x137b   :  { %v6426_v8 = vpop.permute.xlu0 %6425 }
0x137c   :  { %v6447_v61 = vmul.f32 %v6426_v8, %v6399_v2 }
0x137e   :  { %6495 = vst [vmem:[#allocation1 + $0x2] ss:$9 sm:$0xff] %v6447_v61 }
0x1383   :  { %v6432_v52 = vpop.permute.xlu0 %6431 }
0x1384   :  { %v6450_v43 = vmul.f32 %v6432_v52, %v6402_v50 }
0x1386   :  { %6501 = vst [vmem:[#allocation1 + $0x5] ss:$9 sm:$0xff] %v6450_v43 }
0x138d   :  { %v6506_v38 = vld [vmem:[#allocation1] sm:$0xff] }
0x138e   :  { %6515 = vst [vmem:[#allocation1] ss:$9 sm:$0xff] %v6445_v11  ;;  %v13318_v26 = vsel %vm6454_vm2, %v6506_v38, %v12989_v56 }
0x138f   :  { %6517 = vst [vmem:[#allocation1 + $0x1] ss:$9 sm:$0xff] %v6446_v18  ;;  %8482 = vmatmul.msk.f32.vlgmr.msra.gmra.mxu0 %vm203_vm0, %v13318_v26  ;;  %8483 = vmatmul.msk.f32.vlgmr.msra.gmra.mxu1 %vm203_vm0, %v13318_v26 }
0x1390   :  { %6519 = vst [vmem:[#allocation1 + $0x2] ss:$9 sm:$0xff] %v6447_v61 }
0x1391   :  { %6521 = vst [vmem:[#allocation1 + $0x3] ss:$9 sm:$0xff] %v6448_v42 }
0x1392   :  { %6523 = vst [vmem:[#allocation1 + $0x4] ss:$9 sm:$0xff] %v6449_v28 }
0x1393   :  { %6525 = vst [vmem:[#allocation1 + $0x5] ss:$9 sm:$0xff] %v6450_v43 }
0x1394   :  { %6527 = vst [vmem:[#allocation1 + $0x6] ss:$9 sm:$0xff] %v6451_v34 }
0x1395   :  { %6529 = vst [vmem:[#allocation1 + $0x7] ss:$9 sm:$0xff] %v6452_v62 }
0x139c   :  { %v13324_v60 = vld [vmem:[#allocation1] sm:$0xff] }
0x139d   :  { %6562 = vst [vmem:[#allocation1] ss:$9 sm:$0xff] %v6445_v11  ;;  %v6637_v11 = vld [vmem:[#allocation3 + $0x1a] ss:$4 sm:$0x3] }
0x139e   :  { %6564 = vst [vmem:[#allocation1 + $0x1] ss:$9 sm:$0xff] %v6446_v18 }
0x139f   :  { %6566 = vst [vmem:[#allocation1 + $0x2] ss:$9 sm:$0xff] %v6447_v61 }
0x13a0   :  { %6568 = vst [vmem:[#allocation1 + $0x3] ss:$9 sm:$0xff] %v6448_v42 }
0x13a1   :  { %6570 = vst [vmem:[#allocation1 + $0x4] ss:$9 sm:$0xff] %v6449_v28  ;;  %v6639_v28 = vld [vmem:[#allocation3 + $0x22] ss:$4 sm:$0x3] }
0x13a2   :  { %6572 = vst [vmem:[#allocation1 + $0x5] ss:$9 sm:$0xff] %v6450_v43 }
0x13a3   :  { %6574 = vst [vmem:[#allocation1 + $0x6] ss:$9 sm:$0xff] %v6451_v34  ;;  %v6645_v34 = vld [vmem:[#allocation3 + $0x3a] ss:$4 sm:$0x3] }
0x13a4   :  { %6576 = vst [vmem:[#allocation1 + $0x7] ss:$9 sm:$0xff] %v6452_v62 }
0x140c   :  { %v6686_v56 = vpop.f32.mrf.mxu1  ;;  %v6666_v24 = vpop.f32.mrf.mxu0 }
0x140d   :  { %v6691_v29 = vrot.slane %v6686_v56, 7 }
0x140f   :  { %v6692_v30 = vsel %vm370_vm1, %v6666_v24, %v6691_v29  ;;  %v6695_v39 = vsel %vm375_vm3, %v6666_v24, %v6691_v29  ;;  %v6693_v1 = vsel %vm14988_vm10, %v6666_v24, %v6691_v29  ;;  %v6697_v13 = vsel %vm14989_vm6, %v6666_v24, %v6691_v29 }
0x1410   :  { %v6715_v9 = vadd.f32 %v6692_v30, %v6631_v54  ;;  %v6696_v17 = vrot.slane %v6695_v39, 2  ;;  %v6694_v0 = vrot.slane %v6693_v1, 1  ;;  %v6701_v32 = vsel %vm14990_vm13, %v6666_v24, %v6691_v29 }
0x1411   :  { %v6699_v27 = vsel %vm14991_vm8, %v6666_v24, %v6691_v29  ;;  %v6698_v18 = vrot.slane %v6697_v13, 3  ;;  %v6702_v14 = vrot.slane %v6701_v32, 5  ;;  %v6703_v12 = vsel %vm14992_vm15, %v6666_v24, %v6691_v29 }
0x1412   :  { %6883 = vrot.lane.b32.xlu0 %v6715_v9, %s9512_s29  ;;  %v6717_v41 = vadd.f32 %v6696_v17, %v6635_v48  ;;  %v6716_v4 = vadd.f32 %v6694_v0, %v6633_v5  ;;  %v6700_v57 = vrot.slane %v6699_v27, 4  ;;  %v6705_v37 = vsel %vm14993_vm14, %v6691_v29, %v6666_v24 }
0x1413   :  { %v6718_v7 = vadd.f32 %v6698_v18, %v6637_v11  ;;  %v6720_v35 = vadd.f32 %v6702_v14, %v6641_v40  ;;  %v6704_v55 = vrot.slane %v6703_v12, 6  ;;  %v6706_v62 = vrot.slane %v6705_v37, 7 }
0x1414   :  { %6887 = vrot.lane.b32.xlu2 %v6717_v41, %s9512_s29  ;;  %6885 = vrot.lane.b32.xlu1 %v6716_v4, %s9512_s29  ;;  %v6719_v42 = vadd.f32 %v6700_v57, %v6639_v28  ;;  %v8484_v8 = vmul.f32 -1.442695, %v6715_v9  ;;  %v8485_v61 = vmul.f32 -1.442695, %v6716_v4  ;;  %v8486_v50 = vmul.f32 -1.442695, %v6717_v41 }
0x1415   :  { %v6721_v19 = vadd.f32 %v6704_v55, %v6643_v10  ;;  %v6722_v2 = vadd.f32 %v6706_v62, %v6645_v34  ;;  %v8487_v52 = vmul.f32 -1.442695, %v6718_v7  ;;  %v8489_v29 = vmul.f32 -1.442695, %v6720_v35 }
0x1416   :  { %9191 = vpow2.f32 %v8484_v8  ;;  %v8488_v56 = vmul.f32 -1.442695, %v6719_v42 }
0x1417   :  { %9193 = vpow2.f32 %v8485_v61  ;;  %v8490_v54 = vmul.f32 -1.442695, %v6721_v19  ;;  %v8491_v39 = vmul.f32 -1.442695, %v6722_v2 }
0x1418   :  { %9195 = vpow2.f32 %v8486_v50 }
0x1419   :  { %9197 = vpow2.f32 %v8487_v52 }
0x141a   :  { %6889 = vrot.lane.b32.xlu0 %v6718_v7, %s9512_s29 }
0x141c   :  { %6893 = vrot.lane.b32.xlu2 %v6720_v35, %s9512_s29  ;;  %6891 = vrot.lane.b32.xlu1 %v6719_v42, %s9512_s29  ;;  %v9192_v43 = vpop.eup %9191 }
0x141d   :  { %v13346_v38 = vadd.f32 1.0, %v9192_v43  ;;  %v9194_v24 = vpop.eup %9193 }
0x141e   :  { %v13349_v1 = vadd.f32 1.0, %v9194_v24 }
0x141f   :  { %9199 = vrcp.f32 %v13346_v38  ;;  %v6766_v20 = vand.u32 2147483648, %v13346_v38  ;;  %vm6760_vm12 = vweird.f32 %v13346_v38 }
0x1420   :  { %9201 = vpow2.f32 %v8488_v56  ;;  %v6779_v56 = vand.u32 2147483647, %v13349_v1  ;;  %vm6775_vm9 = vweird.f32 %v13349_v1 }
0x1421   :  { %9203 = vpow2.f32 %v8489_v29  ;;  %v6767_v8 = vor.u32 1.1754944e-38, %v6766_v20  ;;  %v6781_v29 = vand.u32 2147483648, %v13349_v1 }
0x1422   :  { %6895 = vrot.lane.b32.xlu0 %v6721_v19, %s9512_s29  ;;  %9205 = vpow2.f32 %v8490_v54  ;;  %vm13454_vm13 = vcmp.eq.f32.partialorder %v6779_v56, 8.507059e+37 }
0x1423   :  { %9207 = vpow2.f32 %v8491_v39 }
0x1424   :  { %6479 = vrot.lane.b32.xlu2 %v13299_v47, %s9512_s29  ;;  %6897 = vrot.lane.b32.xlu1 %v6722_v2, %s9512_s29  ;;  %v9196_v47 = vpop.eup %9195  ;;  %9209 = vrcp.f32 %v13349_v1 }
0x1425   :  { %v9198_v30 = vpop.eup %9197  ;;  %v13351_v9 = vadd.f32 1.0, %v9196_v47 }
0x1426   :  { %v13355_v0 = vadd.f32 1.0, %v9198_v30  ;;  %v13357_v48 = vpop.eup %9199 }
0x1427   :  { %v9202_v5 = vpop.eup %9201  ;;  %9211 = vrcp.f32 %v13351_v9  ;;  %v6756_v4 = vmul.f32 %v13357_v48, %v13346_v38  ;;  %vm6761_vm11 = vweird.f32 %v13357_v48  ;;  %v6796_v47 = vand.u32 2147483648, %v13351_v9 }
0x1428   :  { %v9204_v13 = vpop.eup %9203  ;;  %9213 = vrcp.f32 %v13355_v0  ;;  %v13364_v32 = vadd.f32 1.0, %v9202_v5  ;;  %vm6790_vm4 = vweird.f32 %v13351_v9  ;;  %v6811_v20 = vand.u32 2147483648, %v13355_v0  ;;  %vm13441_vm10 = vmor %vm6760_vm12, %vm6761_vm11 }
0x1429   :  { %v9206_v41 = vpop.eup %9205  ;;  %v13366_v18 = vadd.f32 1.0, %v9204_v13  ;;  %v6757_v35 = vsub.f32 1.0, %v6756_v4 }
0x142a   :  { %v9208_v27 = vpop.eup %9207  ;;  %v13370_v11 = vadd.f32 1.0, %v9206_v41  ;;  %9215 = vrcp.f32 %v13364_v32  ;;  %vm6820_vm11 = vweird.f32 %v13364_v32 }
0x142b   :  { %v13368_v57 = vpop.eup %9209  ;;  %v13387_v37 = vadd.f32 1.0, %v9208_v27  ;;  %9217 = vrcp.f32 %v13366_v18  ;;  %v6758_v19 = vmul.f32 %v13357_v48, %v6757_v35 }
0x142c   :  { %v6771_v55 = vmul.f32 %v13368_v57, %v13349_v1  ;;  %9219 = vrcp.f32 %v13370_v11  ;;  %vm6776_vm6 = vweird.f32 %v13368_v57  ;;  %v6856_v52 = vand.u32 2147483648, %v13370_v11 }
0x142d   :  { %v13378_v40 = vpop.eup %9211  ;;  %9221 = vrcp.f32 %v13387_v37  ;;  %v6759_v13 = vadd.f32 %v13357_v48, %v6758_v19  ;;  %v13446_v19 = vor.u32 1.1754944e-38, %v6796_v47  ;;  %vm13482_vm12 = vmor %vm6775_vm9, %vm6776_vm6 }
0x142e   :  { %v13384_v42 = vpop.eup %9213  ;;  %v6786_v62 = vmul.f32 %v13378_v40, %v13351_v9  ;;  %v6772_v43 = vsub.f32 1.0, %v6771_v55  ;;  %vm6791_vm8 = vweird.f32 %v13378_v40 }
0x142f   :  { %v6801_v34 = vmul.f32 %v13384_v42, %v13355_v0  ;;  %vm6806_vm15 = vweird.f32 %v13384_v42  ;;  %vm13501_vm9 = vmor %vm6790_vm4, %vm6791_vm8  ;;  %vm6835_vm8 = vweird.f32 %v13366_v18 }
0x1430   :  { %v13411_v24 = vpop.eup %9215  ;;  %v6787_v54 = vsub.f32 1.0, %v6786_v62  ;;  %v6773_v35 = vmul.f32 %v13368_v57, %v6772_v43  ;;  %v6782_v62 = vor.u32 1.1754944e-38, %v6781_v29 }
0x1431   :  { %v13415_v30 = vpop.eup %9217  ;;  %v6802_v41 = vsub.f32 1.0, %v6801_v34  ;;  %vm6821_vm6 = vweird.f32 %v13411_v24 }
0x1432   :  { %v13422_v4 = vpop.eup %9219  ;;  %v6831_v34 = vmul.f32 %v13415_v30, %v13366_v18  ;;  %v6774_v56 = vadd.f32 %v13368_v57, %v6773_v35  ;;  %vm6836_vm4 = vweird.f32 %v13415_v30 }
0x1433   :  { %v13435_v55 = vpop.eup %9221  ;;  %v6846_v43 = vmul.f32 %v13422_v4, %v13370_v11 }
0x1434   :  { %v6778_v1 = vsel %vm13482_vm12, %v13368_v57, %v6774_v56 }
0x1435   :  { %v6847_v35 = vsub.f32 1.0, %v6846_v43 }
0x146e   :  { %v13344_v25 = vpop.permute.xlu2 %6887 }
0x1476   :  { %v13353_v17 = vpop.permute.xlu2 %6893 }
0x147e   :  { %v6480_v14 = vpop.permute.xlu2 %6479 }
0x147f   :  { %v13376_v7 = vsel %vm6454_vm2, %v6480_v14, %v13046_v31  ;;  %v6764_v31 = vand.u32 2147483647, %v13346_v38  ;;  %v6794_v14 = vand.u32 2147483647, %v13351_v9  ;;  %vm6805_vm2 = vweird.f32 %v13355_v0 }
0x1480   :  { %6931 = vrot.lane.b32.xlu0 %v13376_v7, %s9512_s29  ;;  %v6925_v28 = vrot.slane %v13376_v7, 2  ;;  %v6924_v12 = vrot.slane %v13376_v7, 1  ;;  %v6926_v50 = vrot.slane %v13376_v7, 3  ;;  %v6928_v39 = vrot.slane %v13376_v7, 5 }
0x1481   :  { %vm13405_vm5 = vcmp.eq.f32.partialorder %v6764_v31, 8.507059e+37  ;;  %v6927_v5 = vrot.slane %v13376_v7, 4  ;;  %v6816_v31 = vmul.f32 %v13411_v24, %v13364_v32  ;;  %v6929_v47 = vrot.slane %v13376_v7, 6 }
0x1482   :  { %6935 = vrot.lane.b32.xlu2 %v6925_v28, %s9512_s29  ;;  %6933 = vrot.lane.b32.xlu1 %v6924_v12, %s9512_s29  ;;  %v6809_v28 = vand.u32 2147483647, %v13355_v0  ;;  %v6901_v12 = vrot.slane %v13344_v25, 1  ;;  %vm13465_vm14 = vcmp.eq.f32.partialorder %v6794_v14, 8.507059e+37  ;;  %v6824_v9 = vand.u32 2147483647, %v13364_v32 }
0x1484   :  { %v6884_v10 = vpop.permute.xlu0 %6883 }
0x1485   :  { %v6899_v2 = vrot.slane %v6884_v10, 1  ;;  %v6788_v10 = vmul.f32 %v13378_v40, %v6787_v54 }
0x1486   :  { %v6886_v61 = vpop.permute.xlu1 %6885 }
0x1487   :  { %9223 = vtanh.f32 %v6899_v2  ;;  %v6900_v27 = vrot.slane %v6886_v61, 1  ;;  %v6763_v61 = vsel %vm13441_vm10, %v13357_v48, %v6759_v13  ;;  %vm13512_vm10 = vmor %vm6805_vm2, %vm6806_vm15  ;;  %vm6851_vm2 = vweird.f32 %v13422_v4 }
0x1488   :  { %6937 = vrot.lane.b32.xlu0 %v6926_v50, %s9512_s29  ;;  %v6803_v50 = vmul.f32 %v13384_v42, %v6802_v41  ;;  %v13471_v13 = vsel %vm13405_vm5, %v6767_v8, %v6763_v61  ;;  %v6789_v41 = vadd.f32 %v13378_v40, %v6788_v10  ;;  %vm13486_vm5 = vcmp.eq.f32.partialorder %v6809_v28, 8.507059e+37  ;;  %vm13568_vm15 = vmor %vm6835_vm8, %vm6836_vm4 }
0x1489   :  { %9225 = vtanh.f32 %v6900_v27  ;;  %v6832_v27 = vsub.f32 1.0, %v6831_v34  ;;  %v6904_v10 = vrot.slane %v13353_v17, 1  ;;  %v6861_v17 = vmul.f32 %v13435_v55, %v13387_v37 }
0x148a   :  { %6941 = vrot.lane.b32.xlu2 %v6928_v39, %s9512_s29  ;;  %6939 = vrot.lane.b32.xlu1 %v6927_v5, %s9512_s29  ;;  %9227 = vtanh.f32 %v6901_v12  ;;  %v6817_v5 = vsub.f32 1.0, %v6816_v31  ;;  %v6930_v12 = vrot.slane %v13376_v7, 7  ;;  %v6804_v14 = vadd.f32 %v13384_v42, %v6803_v50 }
0x148b   :  { %v6812_v31 = vor.u32 1.1754944e-38, %v6811_v20  ;;  %v6826_v61 = vand.u32 2147483648, %v13364_v32  ;;  %v6839_v50 = vand.u32 2147483647, %v13366_v18  ;;  %v6841_v39 = vand.u32 2147483648, %v13366_v18 }
0x148c   :  { %v6890_v2 = vpop.permute.xlu0 %6889  ;;  %v6818_v20 = vmul.f32 %v13411_v24, %v6817_v5  ;;  %v6808_v0 = vsel %vm13512_vm10, %v13384_v42, %v6804_v14  ;;  %v6862_v42 = vsub.f32 1.0, %v6861_v17  ;;  %v6854_v18 = vand.u32 2147483647, %v13370_v11 }
0x148d   :  { %v9224_v29 = vpop.eup %9223  ;;  %v6902_v54 = vrot.slane %v6890_v2, 1  ;;  %v13542_v38 = vsel %vm13486_vm5, %v6812_v31, %v6808_v0  ;;  %v6827_v28 = vor.u32 1.1754944e-38, %v6826_v61  ;;  %vm6825_vm5 = vcmp.eq.f32.partialorder %v6824_v9, 8.507059e+37 }
0x148e   :  { %v6892_v48 = vpop.permute.xlu1 %6891  ;;  %v6963_v25 = vmul.f32 %v9224_v29, %v13471_v13  ;;  %v6842_v61 = vor.u32 1.1754944e-38, %v6841_v39  ;;  %vm6866_vm10 = vweird.f32 %v13435_v55  ;;  %v13617_v39 = vld [vmem:[#allocation1] sm:$0xff] }
0x148f   :  { %9229 = vtanh.f32 %v6902_v54  ;;  %v6903_v2 = vrot.slane %v6892_v48, 1  ;;  %v9226_v34 = vpop.eup %9225  ;;  %v6793_v54 = vsel %vm13501_vm9, %v13378_v40, %v6789_v41  ;;  %v6833_v48 = vmul.f32 %v13415_v30, %v6832_v27 }
0x1490   :  { %6943 = vrot.lane.b32.xlu0 %v6929_v47, %s9512_s29  ;;  %v9228_v43 = vpop.eup %9227  ;;  %v6848_v47 = vmul.f32 %v13422_v4, %v6847_v35  ;;  %v6819_v41 = vadd.f32 %v13411_v24, %v6818_v20  ;;  %v13538_v27 = vsel %vm13465_vm14, %v13446_v19, %v6793_v54  ;;  %vm6850_vm14 = vweird.f32 %v13370_v11 }
0x1491   :  { %9231 = vtanh.f32 %v6903_v2  ;;  %v6834_v35 = vadd.f32 %v13415_v30, %v6833_v48  ;;  %vm13577_vm12 = vmor %vm6850_vm14, %vm6851_vm2  ;;  %vm6855_vm9 = vcmp.eq.f32.partialorder %v6854_v18, 8.507059e+37  ;;  %v6869_v48 = vand.u32 2147483647, %v13387_v37 }
0x1492   :  { %6945 = vrot.lane.b32.xlu1 %v6930_v12, %s9512_s29  ;;  %6979 = vrot.lane.b32.xlu2 %v6963_v25, %s9512_s29  ;;  %v13530_v12 = vsel %vm13454_vm13, %v6782_v62, %v6778_v1  ;;  %9233 = vtanh.f32 %v6904_v10  ;;  %v6965_v62 = vmul.f32 %v9228_v43, %v13538_v27  ;;  %v6849_v2 = vadd.f32 %v13422_v4, %v6848_v47  ;;  %vm13554_vm13 = vmor %vm6820_vm11, %vm6821_vm6 }
0x1493   :  { %v6964_v40 = vmul.f32 %v9226_v34, %v13530_v12  ;;  %v6823_v31 = vsel %vm13554_vm13, %v13411_v24, %v6819_v41  ;;  %v6863_v10 = vmul.f32 %v13435_v55, %v6862_v42  ;;  %v6838_v17 = vsel %vm13568_vm15, %v13415_v30, %v6834_v35 }
0x1494   :  { %v6896_v29 = vpop.permute.xlu0 %6895  ;;  %vm6840_vm11 = vcmp.eq.f32.partialorder %v6839_v50, 8.507059e+37  ;;  %v6853_v11 = vsel %vm13577_vm12, %v13422_v4, %v6849_v2  ;;  %v13587_v57 = vsel %vm6825_vm5, %v6827_v28, %v6823_v31  ;;  %v6857_v43 = vor.u32 1.1754944e-38, %v6856_v52 }
0x1495   :  { %v9230_v56 = vpop.eup %9229  ;;  %v6905_v5 = vrot.slane %v6896_v29, 1  ;;  %v6864_v9 = vadd.f32 %v13435_v55, %v6863_v10  ;;  %v13592_v54 = vsel %vm6840_vm11, %v6842_v61, %v6838_v17  ;;  %v6871_v50 = vand.u32 2147483648, %v13387_v37 }
0x1496   :  { %v6898_v25 = vpop.permute.xlu1 %6897  ;;  %v6966_v14 = vmul.f32 %v9230_v56, %v13542_v38  ;;  %v13594_v30 = vsel %vm6855_vm9, %v6857_v43, %v6853_v11  ;;  %vm6865_vm6 = vweird.f32 %v13387_v37  ;;  %vm6870_vm2 = vcmp.eq.f32.partialorder %v6869_v48, 8.507059e+37  ;;  %v13612_v37 = vld [vmem:[%s14702_s2] sm:$0xff]  ;;  %s9531_s2 = smov 96  }
0x1497   :  { %9235 = vtanh.f32 %v6905_v5  ;;  %v6906_v8 = vrot.slane %v6898_v25, 1  ;;  %v9232_v1 = vpop.eup %9231  ;;  %vm6867_vm4 = vmor %vm6865_vm6, %vm6866_vm10  ;;  %v6872_v5 = vor.u32 1.1754944e-38, %v6871_v50  ;;  %vm796_vm13 = vcmp.gt.s32.totalorder %v13612_v37, 0 }
0x1498   :  { %6981 = vrot.lane.b32.xlu0 %v6964_v40, %s9512_s29  ;;  %v9234_v24 = vpop.eup %9233  ;;  %v6967_v29 = vmul.f32 %v9232_v1, %v13587_v57  ;;  %v6868_v47 = vsel %vm6867_vm4, %v13435_v55, %v6864_v9  ;;  %v15016_v41 = vmov 0   ;;  %vm844_vm8 = vcmp.gt.s32.totalorder %v13612_v37, 7 }
0x1499   :  { %9237 = vtanh.f32 %v6906_v8  ;;  %v6968_v4 = vmul.f32 %v9234_v24, %v13592_v54  ;;  %v13605_v25 = vsel %vm6870_vm2, %v6872_v5, %v6868_v47  ;;  %v797_v42 = vsel %vm796_vm13, 1, %v15016_v41 }
0x149a   :  { %6983 = vrot.lane.b32.xlu1 %v6965_v62, %s9512_s29  ;;  %6985 = vrot.lane.b32.xlu2 %v6966_v14, %s9512_s29  ;;  %vm835_vm14 = vcmask 253952   ;;  %vm1428_vm5 = vcmp.gt.s32.totalorder %v13612_v37, 1  ;;  %vm910_vm9 = vcmask 516352   ;;  %vm15019_vm2 = vcmask 1045509  }
0x149b   :  { %vm15020_vm13 = vcmask 1041409  }
0x149d   :  { %v9236_v34 = vpop.eup %9235 }
0x149e   :  { %v6969_v0 = vmul.f32 %v9236_v34, %v13594_v30 }
0x149f   :  { %v9238_v56 = vpop.eup %9237 }
0x14a0   :  { %6987 = vrot.lane.b32.xlu0 %v6967_v29, %s9512_s29  ;;  %v6970_v40 = vmul.f32 %v9238_v56, %v13605_v25 }
0x14a2   :  { %6989 = vrot.lane.b32.xlu1 %v6968_v4, %s9512_s29  ;;  %6991 = vrot.lane.b32.xlu2 %v6969_v0, %s9512_s29 }
0x14a8   :  { %6993 = vrot.lane.b32.xlu0 %v6970_v40, %s9512_s29 }
0x14b0   :  { %799 = vperm.xlu0 %8547, %v797_v42   ;;  %v845_v42 = vsel %vm844_vm8, 1, %v15016_v41  ;;  %vm15021_vm8 = vcmask 1044484  }
0x14dc   :  { %v6936_v55 = vpop.permute.xlu2 %6935 }
0x14dd   :  { %v6957_v29 = vmul.f32 %v6936_v55, %v13538_v27 }
0x14e4   :  { %v6942_v62 = vpop.permute.xlu2 %6941 }
0x14e5   :  { %v6960_v5 = vmul.f32 %v6942_v62, %v13592_v54 }
0x14ec   :  { %v6980_v14 = vpop.permute.xlu2 %6979 }
0x14f2   :  { %v6932_v35 = vpop.permute.xlu0 %6931 }
0x14f3   :  { %v6955_v2 = vmul.f32 %v6932_v35, %v13471_v13 }
0x14f4   :  { %v6934_v8 = vpop.permute.xlu1 %6933  ;;  %v6986_v52 = vpop.permute.xlu2 %6985 }
0x14f5   :  { %v7003_v19 = vadd.f32 %v6980_v14, %v6955_v2  ;;  %v6956_v61 = vmul.f32 %v6934_v8, %v13530_v12 }
0x14f7   :  { %9239 = vtanh.f32 %v7003_v19  ;;  %7093 = vst [vmem:[#allocation1] ss:$9 sm:$0xff] %v7003_v19 }
0x14fa   :  { %v6938_v31 = vpop.permute.xlu0 %6937 }
0x14fb   :  { %v6958_v32 = vmul.f32 %v6938_v31, %v13542_v38 }
0x14fc   :  { %v6940_v18 = vpop.permute.xlu1 %6939  ;;  %v6992_v24 = vpop.permute.xlu2 %6991 }
0x14fd   :  { %v9240_v10 = vpop.eup %9239  ;;  %v7006_v1 = vadd.f32 %v6986_v52, %v6958_v32  ;;  %v6959_v48 = vmul.f32 %v6940_v18, %v13587_v57  ;;  %v15017_v18 = vld [vmem:[#allocation17_spill] sm:$0xff] }
0x14fe   :  { %7051 = vrot.lane.b32.xlu1 %v9240_v10, %s9512_s29 }
0x14ff   :  { %9241 = vtanh.f32 %v7006_v1  ;;  %7099 = vst [vmem:[#allocation1 + $0x3] ss:$9 sm:$0xff] %v7006_v1 }
0x1502   :  { %v6944_v28 = vpop.permute.xlu0 %6943 }
0x1503   :  { %v6961_v20 = vmul.f32 %v6944_v28, %v13594_v30 }
0x1504   :  { %v6946_v17 = vpop.permute.xlu1 %6945 }
0x1505   :  { %v9242_v11 = vpop.eup %9241  ;;  %v7009_v34 = vadd.f32 %v6992_v24, %v6961_v20  ;;  %v6962_v2 = vmul.f32 %v6946_v17, %v13605_v25 }
0x1506   :  { %7057 = vrot.lane.b32.xlu1 %v9242_v11, %s9512_s29 }
0x1507   :  { %9243 = vtanh.f32 %v7009_v34  ;;  %7105 = vst [vmem:[#allocation1 + $0x6] ss:$9 sm:$0xff] %v7009_v34  ;;  %v7028_v34 = vrot.slane %v13530_v12, 1  ;;  %v7030_v12 = vrot.slane %v13542_v38, 1  ;;  %v7029_v38 = vrot.slane %v13538_v27, 1 }
0x1508   :  { %v7032_v27 = vrot.slane %v13592_v54, 1 }
0x150a   :  { %v6982_v43 = vpop.permute.xlu0 %6981 }
0x150b   :  { %v7004_v9 = vadd.f32 %v6982_v43, %v6956_v61 }
0x150c   :  { %v6984_v50 = vpop.permute.xlu1 %6983 }
0x150d   :  { %v9244_v4 = vpop.eup %9243  ;;  %9245 = vtanh.f32 %v7004_v9  ;;  %7095 = vst [vmem:[#allocation1 + $0x1] ss:$9 sm:$0xff] %v7004_v9  ;;  %v7005_v0 = vadd.f32 %v6984_v50, %v6957_v29  ;;  %v7027_v29 = vrot.slane %v13471_v13, 1  ;;  %v7034_v13 = vrot.slane %v13605_v25, 1 }
0x150e   :  { %7063 = vrot.lane.b32.xlu1 %v9244_v4, %s9512_s29 }
0x150f   :  { %9247 = vtanh.f32 %v7005_v0  ;;  %7097 = vst [vmem:[#allocation1 + $0x2] ss:$9 sm:$0xff] %v7005_v0  ;;  %v7031_v0 = vrot.slane %v13587_v57, 1 }
0x1512   :  { %v6988_v47 = vpop.permute.xlu0 %6987 }
0x1513   :  { %v9246_v56 = vpop.eup %9245  ;;  %v7007_v40 = vadd.f32 %v6988_v47, %v6959_v48 }
0x1514   :  { %v6990_v55 = vpop.permute.xlu1 %6989  ;;  %7053 = vrot.lane.b32.xlu2 %v9246_v56, %s9512_s29 }
0x1515   :  { %v9248_v14 = vpop.eup %9247  ;;  %9249 = vtanh.f32 %v7007_v40  ;;  %7101 = vst [vmem:[#allocation1 + $0x4] ss:$9 sm:$0xff] %v7007_v40  ;;  %v7008_v35 = vadd.f32 %v6990_v55, %v6960_v5  ;;  %v7033_v55 = vrot.slane %v13594_v30, 1 }
0x1516   :  { %847 = vperm.xlu1 %8549, %v845_v42   ;;  %7055 = vrot.lane.b32.xlu0 %v9248_v14, %s9512_s29 }
0x1517   :  { %9251 = vtanh.f32 %v7008_v35  ;;  %7103 = vst [vmem:[#allocation1 + $0x5] ss:$9 sm:$0xff] %v7008_v35 }
0x151a   :  { %v6994_v8 = vpop.permute.xlu0 %6993 }
0x151b   :  { %v9250_v19 = vpop.eup %9249  ;;  %v7010_v62 = vadd.f32 %v6994_v8, %v6962_v2 }
0x151c   :  { %7059 = vrot.lane.b32.xlu2 %v9250_v19, %s9512_s29 }
0x151d   :  { %v9252_v52 = vpop.eup %9251  ;;  %9253 = vtanh.f32 %v7010_v62  ;;  %7107 = vst [vmem:[#allocation1 + $0x7] ss:$9 sm:$0xff] %v7010_v62 }
0x151e   :  { %7061 = vrot.lane.b32.xlu0 %v9252_v52, %s9512_s29 }
0x1522   :  { %v13638_v32 = vpop.permute.xlu0 %799 }
0x1523   :  { %v9254_v31 = vpop.eup %9253  ;;  %vm801_vm15 = vcmp.eq.s32.totalorder %v13638_v32, 1 }
0x1524   :  { %7065 = vrot.lane.b32.xlu2 %v9254_v31, %s9512_s29  ;;  %v819_v10 = vsel %vm801_vm15, %v15017_v18, 0.0  ;;  %v13656_v50 = vld [vmem:[#allocation1] sm:$0xff] }
0x1525   :  { %836 = vst.msk [vmem:[#allocation4] sm:$0x1] %vm835_vm14, %v819_v10  ;;  %v821_v1 = vrot.slane %v819_v10, 1  ;;  %v822_v28 = vrot.slane %v819_v10, 2  ;;  %v823_v20 = vrot.slane %v819_v10, 3  ;;  %v824_v24 = vrot.slane %v819_v10, 4 }
0x1526   :  { %v825_v17 = vrot.slane %v819_v10, 5  ;;  %v826_v11 = vrot.slane %v819_v10, 6 }
0x1527   :  { %837 = vst.msk [vmem:[#allocation4 + $0x8] sm:$0x1] %vm835_vm14, %v821_v1 }
0x1528   :  { %838 = vst.msk [vmem:[#allocation4 + $0x10] sm:$0x1] %vm835_vm14, %v822_v28 }
0x1529   :  { %839 = vst.msk [vmem:[#allocation4 + $0x18] sm:$0x1] %vm835_vm14, %v823_v20 }
0x152a   :  { %840 = vst.msk [vmem:[#allocation4 + $0x20] sm:$0x1] %vm835_vm14, %v824_v24 }
0x152b   :  { %841 = vst.msk [vmem:[#allocation4 + $0x28] sm:$0x1] %vm835_vm14, %v825_v17 }
0x152c   :  { %866 = vrot.lane.b32.xlu2 %v10416_v51, %s9531_s2  ;;  %v827_v51 = vrot.slane %v819_v10, 7  ;;  %842 = vst.msk [vmem:[#allocation4 + $0x30] sm:$0x1] %vm835_vm14, %v826_v11 }
0x152e   :  { %843 = vst.msk [vmem:[#allocation4 + $0x38] sm:$0x1] %vm835_vm14, %v827_v51 }
0x156e   :  { %v7054_v61 = vpop.permute.xlu2 %7053 }
0x156f   :  { %v13653_v43 = vmul.f32 %v7054_v61, %v7028_v34  ;;  %v15018_v34 = vmov 1  }
0x1570   :  { %v7052_v9 = vpop.permute.xlu1 %7051  ;;  %v13692_v61 = vsel %vm308_vm7, 2, %v15018_v34  ;;  %vm1475_vm7 = vcmp.gt.s32.totalorder %v13612_v37, 6 }
0x1571   :  { %v13658_v4 = vmul.f32 %v7052_v9, %v7027_v29  ;;  %7123 = vst [vmem:[#allocation1 + $0x1] ss:$9 sm:$0xff] %v13653_v43  ;;  %vm7084_vm11 = vcmp.gt.s32.totalorder %v12982_v44, %v13692_v61 }
0x1573   :  { %7121 = vst [vmem:[#allocation1] ss:$9 sm:$0xff] %v13658_v4 }
0x1576   :  { %v7060_v48 = vpop.permute.xlu2 %7059 }
0x1577   :  { %v13663_v47 = vmul.f32 %v7060_v48, %v7031_v0  ;;  %v1429_v48 = vsel %vm1428_vm5, 1, %v15016_v41 }
0x1578   :  { %v7058_v56 = vpop.permute.xlu1 %7057 }
0x1579   :  { %v13666_v5 = vmul.f32 %v7058_v56, %v7030_v12  ;;  %7129 = vst [vmem:[#allocation1 + $0x4] ss:$9 sm:$0xff] %v13663_v47 }
0x157b   :  { %7127 = vst [vmem:[#allocation1 + $0x3] ss:$9 sm:$0xff] %v13666_v5 }
0x157e   :  { %v7066_v40 = vpop.permute.xlu2 %7065 }
0x157f   :  { %v13671_v42 = vmul.f32 %v7066_v40, %v7034_v13 }
0x1580   :  { %v7064_v57 = vpop.permute.xlu1 %7063 }
0x1581   :  { %v13674_v14 = vmul.f32 %v7064_v57, %v7033_v55  ;;  %7135 = vst [vmem:[#allocation1 + $0x7] ss:$9 sm:$0xff] %v13671_v42 }
0x1583   :  { %7133 = vst [vmem:[#allocation1 + $0x6] ss:$9 sm:$0xff] %v13674_v14 }
0x1586   :  { %v867_v8 = vpop.permute.xlu2 %866 }
0x1588   :  { %v13679_v35 = vpop.permute.xlu1 %847  ;;  %v7056_v2 = vpop.permute.xlu0 %7055 }
0x1589   :  { %vm849_vm12 = vcmp.eq.s32.totalorder %v13679_v35, 1  ;;  %v7077_v25 = vmul.f32 %v7056_v2, %v7029_v38 }
0x158a   :  { %v869_v19 = vsel %vm849_vm12, %v867_v8, 0.0 }
0x158b   :  { %v878_v30 = vperm.slane %v869_v19, 0  ;;  %v872_v62 = vrot.slane %v869_v19, 2  ;;  %v871_v52 = vrot.slane %v869_v19, 1  ;;  %7125 = vst [vmem:[#allocation1 + $0x2] ss:$9 sm:$0xff] %v7077_v25  ;;  %v873_v10 = vrot.slane %v869_v19, 3 }
0x158c   :  { %v875_v20 = vrot.slane %v869_v19, 5  ;;  %v874_v24 = vrot.slane %v869_v19, 4  ;;  %v876_v54 = vrot.slane %v869_v19, 6  ;;  %v877_v29 = vrot.slane %v869_v19, 7 }
0x158d   :  { %886 = vrot.lane.b32.xlu0 %v878_v30, %s9532_s27  ;;  %v880_v31 = vperm.slane %v872_v62, 0  ;;  %v879_v18 = vperm.slane %v871_v52, 0  ;;  %v881_v17 = vperm.slane %v873_v10, 0 }
0x158e   :  { %v883_v51 = vperm.slane %v875_v20, 0  ;;  %v882_v11 = vperm.slane %v874_v24, 0  ;;  %v884_v15 = vperm.slane %v876_v54, 0  ;;  %v885_v12 = vperm.slane %v877_v29, 0 }
0x158f   :  { %890 = vrot.lane.b32.xlu2 %v880_v31, %s9532_s27  ;;  %888 = vrot.lane.b32.xlu1 %v879_v18, %s9532_s27 }
0x1590   :  { %v7062_v1 = vpop.permute.xlu0 %7061 }
0x1591   :  { %v7080_v28 = vmul.f32 %v7062_v1, %v7032_v27 }
0x1593   :  { %7131 = vst [vmem:[#allocation1 + $0x5] ss:$9 sm:$0xff] %v7080_v28 }
0x1595   :  { %892 = vrot.lane.b32.xlu0 %v881_v17, %s9532_s27 }
0x1597   :  { %896 = vrot.lane.b32.xlu2 %v883_v51, %s9532_s27  ;;  %894 = vrot.lane.b32.xlu1 %v882_v11, %s9532_s27 }
0x159a   :  { %v7136_v9 = vld [vmem:[#allocation1] sm:$0xff] }
0x159b   :  { %v7138_v0 = vsel %vm7084_vm11, %v7136_v9, %v13318_v26  ;;  %7139 = vst [vmem:[#allocation1] ss:$9 sm:$0xff] %v13658_v4  ;;  %v1476_v26 = vsel %vm1475_vm7, 1, %v15016_v41 }
0x159c   :  { %8492 = vmatmul.msk.f32.vlgmr.msra.gmra.mxu2 %vm203_vm0, %v7138_v0  ;;  %7141 = vst [vmem:[#allocation1 + $0x1] ss:$9 sm:$0xff] %v13653_v43  ;;  %8493 = vmatmul.msk.f32.vlgmr.msra.gmra.mxu3 %vm203_vm0, %v7138_v0 }
0x159d   :  { %7143 = vst [vmem:[#allocation1 + $0x2] ss:$9 sm:$0xff] %v7077_v25  ;;  %898 = vrot.lane.b32.xlu0 %v884_v15, %s9532_s27 }
0x159e   :  { %7145 = vst [vmem:[#allocation1 + $0x3] ss:$9 sm:$0xff] %v13666_v5 }
0x159f   :  { %7147 = vst [vmem:[#allocation1 + $0x4] ss:$9 sm:$0xff] %v13663_v47  ;;  %1431 = vperm.xlu2 %8548, %v1429_v48   ;;  %900 = vrot.lane.b32.xlu1 %v885_v12, %s9532_s27 }
0x15a0   :  { %7149 = vst [vmem:[#allocation1 + $0x5] ss:$9 sm:$0xff] %v7080_v28 }
0x15a1   :  { %7151 = vst [vmem:[#allocation1 + $0x6] ss:$9 sm:$0xff] %v13674_v14 }
0x15a2   :  { %7153 = vst [vmem:[#allocation1 + $0x7] ss:$9 sm:$0xff] %v13671_v42 }
0x15a7   :  { %1478 = vperm.xlu1 %8549, %v1476_v26  }
0x15a9   :  { %v13718_v56 = vld [vmem:[#allocation1] sm:$0xff] }
0x15aa   :  { %7180 = vst [vmem:[#allocation1] ss:$9 sm:$0xff] %v13658_v4 }
0x15ab   :  { %7182 = vst [vmem:[#allocation1 + $0x1] ss:$9 sm:$0xff] %v13653_v43 }
0x15ac   :  { %7184 = vst [vmem:[#allocation1 + $0x2] ss:$9 sm:$0xff] %v7077_v25 }
0x15ad   :  { %7186 = vst [vmem:[#allocation1 + $0x3] ss:$9 sm:$0xff] %v13666_v5 }
0x15ae   :  { %7188 = vst [vmem:[#allocation1 + $0x4] ss:$9 sm:$0xff] %v13663_v47 }
0x15af   :  { %1497 = vrot.lane.b32.xlu1 %v10764_v49, %s9531_s2  ;;  %7190 = vst [vmem:[#allocation1 + $0x5] ss:$9 sm:$0xff] %v7080_v28  ;;  %v5141_v49 = vsel %vm849_vm12, %v12956_v53, 0.0  ;;  %vm15022_vm12 = vcmask 1046528  }
0x15b0   :  { %7192 = vst [vmem:[#allocation1 + $0x6] ss:$9 sm:$0xff] %v13674_v14  ;;  %v5144_v13 = vrot.slane %v5141_v49, 2  ;;  %v5147_v43 = vrot.slane %v5141_v49, 5  ;;  %v5143_v5 = vrot.slane %v5141_v49, 1  ;;  %v5145_v55 = vrot.slane %v5141_v49, 3 }
0x15b1   :  { %7194 = vst [vmem:[#allocation1 + $0x7] ss:$9 sm:$0xff] %v13671_v42  ;;  %v5146_v38 = vrot.slane %v5141_v49, 4  ;;  %v5148_v19 = vrot.slane %v5141_v49, 6  ;;  %v5149_v62 = vrot.slane %v5141_v49, 7 }
0x15e9   :  { %v891_v40 = vpop.permute.xlu2 %890 }
0x15ea   :  { %913 = vst.msk [vmem:[#allocation4 + $0x17] sm:$0x1] %vm910_vm9, %v891_v40 }
0x15eb   :  { %5159 = vst.msk [vmem:[#allocation4 + $0x17] sm:$0x1] %vm835_vm14, %v5144_v13  ;;  %v9384_v13 = vld [vmem:[%s14703_s3] sm:$0xff] }
0x15ec   :  { %vm5926_vm4 = vcmp.gt.s32.totalorder %v9384_v13, 3  ;;  %vm6556_vm5 = vcmp.gt.s32.totalorder %v9384_v13, 2  ;;  %vm5879_vm7 = vcmp.gt.s32.totalorder %v9384_v13, 0 }
0x15f1   :  { %v897_v4 = vpop.permute.xlu2 %896 }
0x15f2   :  { %916 = vst.msk [vmem:[#allocation4 + $0x2f] sm:$0x1] %vm910_vm9, %v897_v4 }
0x15f3   :  { %5162 = vst.msk [vmem:[#allocation4 + $0x2f] sm:$0x1] %vm835_vm14, %v5147_v43 }
0x15f9   :  { %v13737_v42 = vpop.permute.xlu2 %1431 }
0x15fa   :  { %vm1433_vm10 = vcmp.eq.s32.totalorder %v13737_v42, 1 }
0x15fb   :  { %v1451_v14 = vsel %vm1433_vm10, %v10475_v3, 0.0 }
0x15fc   :  { %v1453_v2 = vrot.slane %v1451_v14, 1  ;;  %v1454_v8 = vrot.slane %v1451_v14, 2  ;;  %v1455_v25 = vrot.slane %v1451_v14, 3  ;;  %1467 = vst.msk [vmem:[#allocation4 + $0x1] sm:$0x1] %vm835_vm14, %v1451_v14  ;;  %v1456_v3 = vrot.slane %v1451_v14, 4 }
0x15fd   :  { %v1457_v31 = vrot.slane %v1451_v14, 5  ;;  %v1458_v18 = vrot.slane %v1451_v14, 6  ;;  %v1459_v27 = vrot.slane %v1451_v14, 7 }
0x15fe   :  { %1468 = vst.msk [vmem:[#allocation4 + $0x9] sm:$0x1] %vm835_vm14, %v1453_v2 }
0x15ff   :  { %v887_v47 = vpop.permute.xlu0 %886  ;;  %1469 = vst.msk [vmem:[#allocation4 + $0x11] sm:$0x1] %vm835_vm14, %v1454_v8 }
0x1600   :  { %911 = vst.msk [vmem:[#allocation4 + $0x7] sm:$0x1] %vm910_vm9, %v887_v47 }
0x1601   :  { %5157 = vst.msk [vmem:[#allocation4 + $0x7] sm:$0x1] %vm835_vm14, %v5141_v49  ;;  %v889_v53 = vpop.permute.xlu1 %888 }
0x1602   :  { %912 = vst.msk [vmem:[#allocation4 + $0xf] sm:$0x1] %vm910_vm9, %v889_v53 }
0x1603   :  { %5158 = vst.msk [vmem:[#allocation4 + $0xf] sm:$0x1] %vm835_vm14, %v5143_v5 }
0x1604   :  { %1470 = vst.msk [vmem:[#allocation4 + $0x19] sm:$0x1] %vm835_vm14, %v1455_v25 }
0x1605   :  { %1471 = vst.msk [vmem:[#allocation4 + $0x21] sm:$0x1] %vm835_vm14, %v1456_v3 }
0x1606   :  { %1472 = vst.msk [vmem:[#allocation4 + $0x29] sm:$0x1] %vm835_vm14, %v1457_v31 }
0x1607   :  { %v893_v57 = vpop.permute.xlu0 %892  ;;  %1473 = vst.msk [vmem:[#allocation4 + $0x31] sm:$0x1] %vm835_vm14, %v1458_v18 }
0x1608   :  { %914 = vst.msk [vmem:[#allocation4 + $0x1f] sm:$0x1] %vm910_vm9, %v893_v57  ;;  %v5927_v57 = vsel %vm5926_vm4, 1, %v15016_v41  ;;  %vm2735_vm4 = vcmp.gt.s32.totalorder %v13612_v37, 4 }
0x1609   :  { %5160 = vst.msk [vmem:[#allocation4 + $0x1f] sm:$0x1] %vm835_vm14, %v5145_v55  ;;  %v895_v35 = vpop.permute.xlu1 %894  ;;  %v2736_v8 = vsel %vm2735_vm4, 1, %v15016_v41 }
0x160a   :  { %915 = vst.msk [vmem:[#allocation4 + $0x27] sm:$0x1] %vm910_vm9, %v895_v35  ;;  %v5880_v35 = vsel %vm5879_vm7, 1, %v15016_v41 }
0x160b   :  { %5161 = vst.msk [vmem:[#allocation4 + $0x27] sm:$0x1] %vm835_vm14, %v5146_v38  ;;  %v6557_v38 = vsel %vm6556_vm5, 1, %v15016_v41 }
0x160c   :  { %1474 = vst.msk [vmem:[#allocation4 + $0x39] sm:$0x1] %vm835_vm14, %v1459_v27 }
0x160f   :  { %v899_v30 = vpop.permute.xlu0 %898 }
0x1610   :  { %917 = vst.msk [vmem:[#allocation4 + $0x37] sm:$0x1] %vm910_vm9, %v899_v30 }
0x1611   :  { %5163 = vst.msk [vmem:[#allocation4 + $0x37] sm:$0x1] %vm835_vm14, %v5148_v19  ;;  %v901_v52 = vpop.permute.xlu1 %900 }
0x1612   :  { %918 = vst.msk [vmem:[#allocation4 + $0x3f] sm:$0x1] %vm910_vm9, %v901_v52 }
0x1613   :  { %5164 = vst.msk [vmem:[#allocation4 + $0x3f] sm:$0x1] %vm835_vm14, %v5149_v62 }
0x1619   :  { %v13759_v10 = vpop.permute.xlu1 %1478 }
0x161a   :  { %vm1480_vm6 = vcmp.eq.s32.totalorder %v13759_v10, 1 }
0x161f   :  { %v7304_v9 = vpop.f32.mrf.mxu3  ;;  %v13772_v49 = vpop.f32.mrf.mxu2 }
0x1620   :  { %v13767_v15 = vrot.slane %v7304_v9, 7 }
0x1621   :  { %v1498_v1 = vpop.permute.xlu1 %1497 }
0x1622   :  { %v1500_v28 = vsel %vm1480_vm6, %v1498_v1, 0.0  ;;  %v13780_v43 = vsel %vm375_vm3, %v13772_v49, %v13767_v15  ;;  %v13785_v4 = vsel %vm15019_vm2, %v13772_v49, %v13767_v15  ;;  %v13790_v47 = vsel %vm15020_vm13, %v13772_v49, %v13767_v15 }
0x1623   :  { %v1509_v20 = vperm.slane %v1500_v28, 0  ;;  %v1503_v24 = vrot.slane %v1500_v28, 2  ;;  %v1502_v17 = vrot.slane %v1500_v28, 1  ;;  %v1504_v34 = vrot.slane %v1500_v28, 3 }
0x1624   :  { %v1506_v54 = vrot.slane %v1500_v28, 5  ;;  %v1505_v29 = vrot.slane %v1500_v28, 4  ;;  %v1507_v26 = vrot.slane %v1500_v28, 6  ;;  %v1508_v40 = vrot.slane %v1500_v28, 7 }
0x1625   :  { %1517 = vrot.lane.b32.xlu2 %v1509_v20, %s9532_s27  ;;  %v1511_v51 = vperm.slane %v1503_v24, 0  ;;  %v1510_v11 = vperm.slane %v1502_v17, 0  ;;  %v1512_v0 = vperm.slane %v1504_v34, 0  ;;  %v13795_v5 = vsel %vm15021_vm8, %v13772_v49, %v13767_v15 }
0x1626   :  { %v1514_v48 = vperm.slane %v1506_v54, 0  ;;  %v1513_v12 = vperm.slane %v1505_v29, 0  ;;  %v1515_v53 = vperm.slane %v1507_v26, 0  ;;  %v13800_v55 = vsel %vm15022_vm12, %v13767_v15, %v13772_v49 }
0x1627   :  { %1521 = vrot.lane.b32.xlu1 %v1511_v51, %s9532_s27  ;;  %1519 = vrot.lane.b32.xlu0 %v1510_v11, %s9532_s27  ;;  %v1516_v14 = vperm.slane %v1508_v40, 0  ;;  %vm6509_vm2 = vcmp.gt.s32.totalorder %v9384_v13, 1  ;;  %vm2058_vm13 = vcmp.gt.s32.totalorder %v13612_v37, 2  ;;  %vm2688_vm8 = vcmp.gt.s32.totalorder %v13612_v37, 3 }
0x1628   :  { %v6510_v2 = vsel %vm6509_vm2, 1, %v15016_v41  ;;  %vm2105_vm12 = vcmp.gt.s32.totalorder %v13612_v37, 5  ;;  %v2689_v25 = vsel %vm2688_vm8, 1, %v15016_v41 }
0x1629   :  { %v2106_v19 = vsel %vm2105_vm12, 1, %v15016_v41 }
0x162d   :  { %1523 = vrot.lane.b32.xlu2 %v1512_v0, %s9532_s27 }
0x162f   :  { %1527 = vrot.lane.b32.xlu1 %v1514_v48, %s9532_s27  ;;  %1525 = vrot.lane.b32.xlu0 %v1513_v12, %s9532_s27 }
0x1635   :  { %1529 = vrot.lane.b32.xlu2 %v1515_v53, %s9532_s27 }
0x1637   :  { %5929 = vperm.xlu1 %8549, %v5927_v57   ;;  %1531 = vrot.lane.b32.xlu0 %v1516_v14, %s9532_s27 }
0x163d   :  { %6559 = vperm.xlu2 %8548, %v6557_v38  }
0x163f   :  { %5948 = vrot.lane.b32.xlu1 %v13280_v21, %s9531_s2  ;;  %5882 = vperm.xlu0 %8547, %v5880_v35   ;;  %v2059_v21 = vsel %vm2058_vm13, 1, %v15016_v41 }
0x1645   :  { %6512 = vperm.xlu2 %8548, %v6510_v2  }
0x1647   :  { %2738 = vperm.xlu1 %8549, %v2736_v8   ;;  %6578 = vrot.lane.b32.xlu0 %v13617_v39, %s9531_s2 }
0x164d   :  { %2061 = vperm.xlu2 %8548, %v2059_v21  }
0x164f   :  { %2691 = vperm.xlu1 %8549, %v2689_v25   ;;  %2108 = vperm.xlu0 %8547, %v2106_v19  }
0x1655   :  { %2757 = vrot.lane.b32.xlu2 %v11443_v46, %s9531_s2  ;;  %v4571_v46 = vsel %vm1480_vm6, %v12254_v45, 0.0 }
0x1656   :  { %v4574_v41 = vrot.slane %v4571_v46, 2  ;;  %v4573_v30 = vrot.slane %v4571_v46, 1  ;;  %v4577_v18 = vrot.slane %v4571_v46, 5  ;;  %v4576_v27 = vrot.slane %v4571_v46, 4 }
0x1657   :  { %3993 = vrot.lane.b32.xlu1 %v12099_v58, %s9531_s2  ;;  %2127 = vrot.lane.b32.xlu0 %v11116_v36, %s9531_s2  ;;  %v4575_v58 = vrot.slane %v4571_v46, 3  ;;  %v4579_v20 = vrot.slane %v4571_v46, 7 }
0x165d   :  { %4611 = vrot.lane.b32.xlu2 %v12948_v22, %s9531_s2  ;;  %v4578_v22 = vrot.slane %v4571_v46, 6 }
0x165f   :  { %3375 = vrot.lane.b32.xlu0 %v11771_v23, %s9531_s2 }
0x1667   :  { %5181 = vrot.lane.b32.xlu0 %v12958_v33, %s9531_s2 }
0x167f   :  { %v1518_v37 = vpop.permute.xlu2 %1517 }
0x1680   :  { %1541 = vst.msk [vmem:[#allocation4 + $0x6] sm:$0x1] %vm910_vm9, %v1518_v37 }
0x1681   :  { %4587 = vst.msk [vmem:[#allocation4 + $0x6] sm:$0x1] %vm835_vm14, %v4571_v46 }
0x1687   :  { %v1524_v36 = vpop.permute.xlu2 %1523 }
0x1688   :  { %1544 = vst.msk [vmem:[#allocation4 + $0x1e] sm:$0x1] %vm910_vm9, %v1524_v36 }
0x1689   :  { %4590 = vst.msk [vmem:[#allocation4 + $0x1e] sm:$0x1] %vm835_vm14, %v4575_v58 }
0x168f   :  { %v1530_v23 = vpop.permute.xlu2 %1529 }
0x1690   :  { %1547 = vst.msk [vmem:[#allocation4 + $0x36] sm:$0x1] %vm910_vm9, %v1530_v23 }
0x1691   :  { %4593 = vst.msk [vmem:[#allocation4 + $0x36] sm:$0x1] %vm835_vm14, %v4578_v22 }
0x1697   :  { %v13841_v33 = vpop.permute.xlu2 %6559 }
0x1698   :  { %vm6561_vm4 = vcmp.eq.s32.totalorder %v13841_v33, 1 }
0x1699   :  { %v1522_v45 = vpop.permute.xlu1 %1521  ;;  %v1520_v39 = vpop.permute.xlu0 %1519 }
0x169a   :  { %1543 = vst.msk [vmem:[#allocation4 + $0x16] sm:$0x1] %vm910_vm9, %v1522_v45 }
0x169b   :  { %4589 = vst.msk [vmem:[#allocation4 + $0x16] sm:$0x1] %vm835_vm14, %v4574_v41 }
0x169c   :  { %1542 = vst.msk [vmem:[#allocation4 + $0xe] sm:$0x1] %vm910_vm9, %v1520_v39 }
0x169d   :  { %4588 = vst.msk [vmem:[#allocation4 + $0xe] sm:$0x1] %vm835_vm14, %v4573_v30 }
0x169f   :  { %v13847_v3 = vpop.permute.xlu2 %6512 }
0x16a0   :  { %vm6514_vm6 = vcmp.eq.s32.totalorder %v13847_v3, 1  ;;  %v7314_v3 = vrot.slane %v13780_v43, 2 }
0x16a1   :  { %v6532_v62 = vsel %vm6514_vm6, %v13324_v60, 0.0  ;;  %v1528_v52 = vpop.permute.xlu1 %1527  ;;  %v1526_v31 = vpop.permute.xlu0 %1525 }
0x16a2   :  { %6548 = vst.msk [vmem:[#allocation5 + $0x1] sm:$0x1] %vm835_vm14, %v6532_v62  ;;  %v6534_v24 = vrot.slane %v6532_v62, 1  ;;  %v6536_v17 = vrot.slane %v6532_v62, 3  ;;  %v6537_v51 = vrot.slane %v6532_v62, 4  ;;  %v6535_v29 = vrot.slane %v6532_v62, 2 }
0x16a3   :  { %1546 = vst.msk [vmem:[#allocation4 + $0x2e] sm:$0x1] %vm910_vm9, %v1528_v52  ;;  %v6538_v12 = vrot.slane %v6532_v62, 5  ;;  %v6540_v26 = vrot.slane %v6532_v62, 7 }
0x16a4   :  { %4592 = vst.msk [vmem:[#allocation4 + $0x2e] sm:$0x1] %vm835_vm14, %v4577_v18 }
0x16a5   :  { %1545 = vst.msk [vmem:[#allocation4 + $0x26] sm:$0x1] %vm910_vm9, %v1526_v31 }
0x16a6   :  { %4591 = vst.msk [vmem:[#allocation4 + $0x26] sm:$0x1] %vm835_vm14, %v4576_v27 }
0x16a7   :  { %v13858_v10 = vpop.permute.xlu2 %2061  ;;  %6549 = vst.msk [vmem:[#allocation5 + $0x5] sm:$0x1] %vm835_vm14, %v6534_v24 }
0x16a8   :  { %vm2063_vm5 = vcmp.eq.s32.totalorder %v13858_v10, 1  ;;  %6551 = vst.msk [vmem:[#allocation5 + $0xd] sm:$0x1] %vm835_vm14, %v6536_v17 }
0x16a9   :  { %v13864_v60 = vsel %vm2063_vm5, %v10827_v6, 0.0  ;;  %v13866_v1 = vpop.permute.xlu1 %5929  ;;  %v1532_v28 = vpop.permute.xlu0 %1531  ;;  %v6539_v6 = vrot.slane %v6532_v62, 6  ;;  %6552 = vst.msk [vmem:[#allocation5 + $0x11] sm:$0x1] %vm835_vm14, %v6537_v51 }
0x16aa   :  { %2097 = vst.msk [vmem:[#allocation4 + $0x2] sm:$0x1] %vm835_vm14, %v13864_v60  ;;  %vm5931_vm7 = vcmp.eq.s32.totalorder %v13866_v1, 1  ;;  %v2083_v40 = vrot.slane %v13864_v60, 1  ;;  %v2085_v53 = vrot.slane %v13864_v60, 3  ;;  %v2086_v57 = vrot.slane %v13864_v60, 4 }
0x16ab   :  { %1548 = vst.msk [vmem:[#allocation4 + $0x3e] sm:$0x1] %vm910_vm9, %v1532_v28  ;;  %v2087_v2 = vrot.slane %v13864_v60, 5  ;;  %v2088_v25 = vrot.slane %v13864_v60, 6  ;;  %v2089_v58 = vrot.slane %v13864_v60, 7 }
0x16ac   :  { %4594 = vst.msk [vmem:[#allocation4 + $0x3e] sm:$0x1] %vm835_vm14, %v4579_v20 }
0x16ad   :  { %6554 = vst.msk [vmem:[#allocation5 + $0x19] sm:$0x1] %vm835_vm14, %v6539_v6 }
0x16ae   :  { %6550 = vst.msk [vmem:[#allocation5 + $0x9] sm:$0x1] %vm835_vm14, %v6535_v29 }
0x16af   :  { %6553 = vst.msk [vmem:[#allocation5 + $0x15] sm:$0x1] %vm835_vm14, %v6538_v12  ;;  %v2758_v8 = vpop.permute.xlu2 %2757 }
0x16b0   :  { %6555 = vst.msk [vmem:[#allocation5 + $0x1d] sm:$0x1] %vm835_vm14, %v6540_v26 }
0x16b1   :  { %v5949_v11 = vpop.permute.xlu1 %5948  ;;  %v13873_v34 = vpop.permute.xlu0 %5882  ;;  %2098 = vst.msk [vmem:[#allocation4 + $0xa] sm:$0x1] %vm835_vm14, %v2083_v40 }
0x16b2   :  { %v13878_v54 = vsel %vm5931_vm7, %v5949_v11, 0.0  ;;  %vm5884_vm2 = vcmp.eq.s32.totalorder %v13873_v34, 1  ;;  %2100 = vst.msk [vmem:[#allocation4 + $0x1a] sm:$0x1] %vm835_vm14, %v2085_v53 }
0x16b3   :  { %v13885_v9 = vsel %vm5884_vm2, %v12995_v16, 0.0  ;;  %v5960_v0 = vperm.slane %v13878_v54, 0  ;;  %v5953_v48 = vrot.slane %v13878_v54, 1  ;;  %v2084_v16 = vrot.slane %v13864_v60, 2  ;;  %2101 = vst.msk [vmem:[#allocation4 + $0x22] sm:$0x1] %vm835_vm14, %v2086_v57 }
0x16b4   :  { %5918 = vst.msk [vmem:[#allocation5] sm:$0x1] %vm835_vm14, %v13885_v9  ;;  %v5954_v35 = vrot.slane %v13878_v54, 2  ;;  %v5955_v39 = vrot.slane %v13878_v54, 3  ;;  %v5905_v30 = vrot.slane %v13885_v9, 2  ;;  %v5908_v62 = vrot.slane %v13885_v9, 5 }
0x16b5   :  { %5968 = vrot.lane.b32.xlu1 %v5960_v0, %s9532_s27  ;;  %v5961_v13 = vperm.slane %v5953_v48, 0  ;;  %2099 = vst.msk [vmem:[#allocation4 + $0x12] sm:$0x1] %vm835_vm14, %v2084_v16  ;;  %v5910_v52 = vrot.slane %v13885_v9, 7  ;;  %v5904_v27 = vrot.slane %v13885_v9, 1  ;;  %v5906_v60 = vrot.slane %v13885_v9, 3 }
0x16b6   :  { %v5962_v36 = vperm.slane %v5954_v35, 0  ;;  %2102 = vst.msk [vmem:[#allocation4 + $0x2a] sm:$0x1] %vm835_vm14, %v2087_v2  ;;  %v5963_v28 = vperm.slane %v5955_v39, 0  ;;  %v5907_v20 = vrot.slane %v13885_v9, 4 }
0x16b7   :  { %5970 = vrot.lane.b32.xlu2 %v5961_v13, %s9532_s27  ;;  %2103 = vst.msk [vmem:[#allocation4 + $0x32] sm:$0x1] %vm835_vm14, %v2088_v25 }
0x16b8   :  { %2104 = vst.msk [vmem:[#allocation4 + $0x3a] sm:$0x1] %vm835_vm14, %v2089_v58  ;;  %v13992_v58 = vsel %vm6561_vm4, %v13718_v56, 0.0 }
0x16b9   :  { %v13903_v14 = vpop.permute.xlu1 %2738  ;;  %v6579_v38 = vpop.permute.xlu0 %6578  ;;  %5920 = vst.msk [vmem:[#allocation5 + $0x8] sm:$0x1] %vm835_vm14, %v5905_v30  ;;  %v7158_v44 = vrot.slane %v13992_v58, 1  ;;  %v7159_v56 = vrot.slane %v13992_v58, 2  ;;  %v7310_v30 = vsel %vm370_vm1, %v13772_v49, %v13767_v15  ;;  %vm15024_vm1 = vcmask 1046534  }
0x16ba   :  { %vm2740_vm13 = vcmp.eq.s32.totalorder %v13903_v14, 1  ;;  %v13911_v21 = vsel %vm6561_vm4, %v6579_v38, 0.0  ;;  %5923 = vst.msk [vmem:[#allocation5 + $0x14] sm:$0x1] %vm835_vm14, %v5908_v62  ;;  %v7160_v62 = vrot.slane %v13992_v58, 3 }
0x16bb   :  { %v13917_v19 = vsel %vm2740_vm13, %v2758_v8, 0.0  ;;  %v6590_v37 = vperm.slane %v13911_v21, 0  ;;  %v6583_v46 = vrot.slane %v13911_v21, 1  ;;  %v6584_v23 = vrot.slane %v13911_v21, 2  ;;  %5925 = vst.msk [vmem:[#allocation5 + $0x1c] sm:$0x1] %vm835_vm14, %v5910_v52 }
0x16bc   :  { %v6585_v24 = vrot.slane %v13911_v21, 3  ;;  %5919 = vst.msk [vmem:[#allocation5 + $0x4] sm:$0x1] %vm835_vm14, %v5904_v27 }
0x16bd   :  { %6598 = vrot.lane.b32.xlu0 %v6590_v37, %s9532_s27  ;;  %v6591_v22 = vperm.slane %v6583_v46, 0  ;;  %v6592_v18 = vperm.slane %v6584_v23, 0  ;;  %5921 = vst.msk [vmem:[#allocation5 + $0xc] sm:$0x1] %vm835_vm14, %v5906_v60  ;;  %v7195_v60 = vld [vmem:[#allocation1] sm:$0xff] }
0x16be   :  { %5922 = vst.msk [vmem:[#allocation5 + $0x10] sm:$0x1] %vm835_vm14, %v5907_v20  ;;  %v6593_v11 = vperm.slane %v6585_v24, 0  ;;  %v7255_v20 = vld [vmem:[#allocation3 + $0x1b] ss:$4 sm:$0x3]  ;;  %v7321_v24 = vsel %vm15024_vm1, %v13772_v49, %v13767_v15 }
0x16bf   :  { %5972 = vrot.lane.b32.xlu2 %v5962_v36, %s9532_s27  ;;  %6600 = vrot.lane.b32.xlu1 %v6591_v22, %s9532_s27 }
0x16c1   :  { %v2692_v41 = vpop.permute.xlu1 %2691  ;;  %v13931_v45 = vpop.permute.xlu0 %2108 }
0x16c2   :  { %vm2693_vm8 = vcmp.eq.s32.totalorder %v2692_v41, 1  ;;  %vm2110_vm12 = vcmp.eq.s32.totalorder %v13931_v45, 1 }
0x16c3   :  { %v2711_v31 = vsel %vm2693_vm8, %v11159_v59, 0.0  ;;  %v5909_v59 = vrot.slane %v13885_v9, 6 }
0x16c4   :  { %2727 = vst.msk [vmem:[#allocation4 + $0x3] sm:$0x1] %vm835_vm14, %v2711_v31  ;;  %v2713_v29 = vrot.slane %v2711_v31, 1  ;;  %v2714_v0 = vrot.slane %v2711_v31, 2  ;;  %v2715_v48 = vrot.slane %v2711_v31, 3  ;;  %v2716_v12 = vrot.slane %v2711_v31, 4 }
0x16c5   :  { %6602 = vrot.lane.b32.xlu0 %v6592_v18, %s9532_s27  ;;  %5924 = vst.msk [vmem:[#allocation5 + $0x18] sm:$0x1] %vm835_vm14, %v5909_v59  ;;  %v2717_v26 = vrot.slane %v2711_v31, 5  ;;  %v2718_v13 = vrot.slane %v2711_v31, 6  ;;  %v2719_v16 = vrot.slane %v2711_v31, 7 }
0x16c6   :  { %2728 = vst.msk [vmem:[#allocation4 + $0xb] sm:$0x1] %vm835_vm14, %v2713_v29  ;;  %v7249_v31 = vld [vmem:[#allocation3 + $0x3] ss:$4 sm:$0x3]  ;;  %v5956_v29 = vrot.slane %v13878_v54, 4 }
0x16c7   :  { %5974 = vrot.lane.b32.xlu2 %v5963_v28, %s9532_s27  ;;  %2729 = vst.msk [vmem:[#allocation4 + $0x13] sm:$0x1] %vm835_vm14, %v2714_v0  ;;  %v7333_v18 = vadd.f32 %v7310_v30, %v7249_v31  ;;  %v7257_v30 = vld [vmem:[#allocation3 + $0x23] ss:$4 sm:$0x3] }
0x16c8   :  { %2730 = vst.msk [vmem:[#allocation4 + $0x1b] sm:$0x1] %vm835_vm14, %v2715_v48  ;;  %v5964_v0 = vperm.slane %v5956_v29, 0  ;;  %v6587_v29 = vrot.slane %v13911_v21, 5 }
0x16c9   :  { %v2128_v17 = vpop.permute.xlu0 %2127  ;;  %2731 = vst.msk [vmem:[#allocation4 + $0x23] sm:$0x1] %vm835_vm14, %v2716_v12  ;;  %v13976_v57 = vpop.permute.xlu1 %3993 }
0x16ca   :  { %v13956_v51 = vsel %vm2110_vm12, %v2128_v17, 0.0  ;;  %2732 = vst.msk [vmem:[#allocation4 + $0x2b] sm:$0x1] %vm835_vm14, %v2717_v26  ;;  %v7322_v17 = vrot.slane %v7321_v24, 6 }
0x16cb   :  { %2733 = vst.msk [vmem:[#allocation4 + $0x33] sm:$0x1] %vm835_vm14, %v2718_v13 }
0x16cc   :  { %2734 = vst.msk [vmem:[#allocation4 + $0x3b] sm:$0x1] %vm835_vm14, %v2719_v16 }
0x16cd   :  { %6604 = vrot.lane.b32.xlu0 %v6593_v11, %s9532_s27  ;;  %v7261_v11 = vld [vmem:[#allocation3 + $0x33] ss:$4 sm:$0x3] }
0x16cf   :  { %7109 = vrot.lane.b32.xlu2 %v13656_v50, %s9512_s29  ;;  %v13972_v50 = vpop.permute.xlu2 %4611 }
0x16d1   :  { %v3376_v6 = vpop.permute.xlu0 %3375 }
0x16d2   :  { %v13963_v9 = vsel %vm2693_vm8, %v3376_v6, 0.0  ;;  %v14023_v6 = vadd.f32 %v7322_v17, %v7261_v11 }
0x16d9   :  { %v13979_v35 = vpop.permute.xlu0 %5181 }
0x1711   :  { %v5971_v40 = vpop.permute.xlu2 %5970 }
0x1712   :  { %5993 = vst.msk [vmem:[#allocation5 + $0x7] sm:$0x1] %vm910_vm9, %v5971_v40 }
0x1719   :  { %v5973_v53 = vpop.permute.xlu2 %5972 }
0x171a   :  { %5994 = vst.msk [vmem:[#allocation5 + $0xb] sm:$0x1] %vm910_vm9, %v5973_v53 }
0x1721   :  { %v5975_v38 = vpop.permute.xlu2 %5974 }
0x1722   :  { %5995 = vst.msk [vmem:[#allocation5 + $0xf] sm:$0x1] %vm910_vm9, %v5975_v38 }
0x1727   :  { %v5969_v2 = vpop.permute.xlu1 %5968 }
0x1728   :  { %5992 = vst.msk [vmem:[#allocation5 + $0x3] sm:$0x1] %vm910_vm9, %v5969_v2 }
0x1729   :  { %v7110_v8 = vpop.permute.xlu2 %7109 }
0x172a   :  { %v7112_v25 = vsel %vm7084_vm11, %v7110_v8, %v13376_v7  ;;  %vm15023_vm11 = vcmask 1043459  }
0x172b   :  { %7549 = vrot.lane.b32.xlu0 %v7112_v25, %s9512_s29  ;;  %v7543_v37 = vrot.slane %v7112_v25, 2  ;;  %v7542_v46 = vrot.slane %v7112_v25, 1  ;;  %v7544_v61 = vrot.slane %v7112_v25, 3  ;;  %v7546_v22 = vrot.slane %v7112_v25, 5 }
0x172c   :  { %v7545_v33 = vrot.slane %v7112_v25, 4  ;;  %v7547_v41 = vrot.slane %v7112_v25, 6  ;;  %v7548_v39 = vrot.slane %v7112_v25, 7  ;;  %v7315_v27 = vsel %vm15023_vm11, %v13772_v49, %v13767_v15 }
0x172d   :  { %7553 = vrot.lane.b32.xlu2 %v7543_v37, %s9512_s29  ;;  %7551 = vrot.lane.b32.xlu1 %v7542_v46, %s9512_s29  ;;  %v7316_v28 = vrot.slane %v7315_v27, 3  ;;  %v7312_v46 = vrot.slane %v13790_v47, 1  ;;  %v7324_v27 = vrot.slane %v13800_v55, 7 }
0x172f   :  { %v6599_v36 = vpop.permute.xlu0 %6598  ;;  %v7336_v59 = vadd.f32 %v7316_v28, %v7255_v20  ;;  %v7263_v20 = vld [vmem:[#allocation3 + $0x3b] ss:$4 sm:$0x3] }
0x1730   :  { %6622 = vst.msk [vmem:[#allocation5 + $0x2] sm:$0x1] %vm910_vm9, %v6599_v36  ;;  %v14084_v24 = vadd.f32 %v7324_v27, %v7263_v20 }
0x1731   :  { %7172 = vst.msk [vmem:[#allocation5 + $0x2] sm:$0x1] %vm835_vm14, %v13992_v58  ;;  %v6601_v7 = vpop.permute.xlu1 %6600 }
0x1732   :  { %6623 = vst.msk [vmem:[#allocation5 + $0x6] sm:$0x1] %vm910_vm9, %v6601_v7  ;;  %v7251_v7 = vld [vmem:[#allocation3 + $0xb] ss:$4 sm:$0x3] }
0x1733   :  { %7173 = vst.msk [vmem:[#allocation5 + $0x6] sm:$0x1] %vm835_vm14, %v7158_v44  ;;  %7555 = vrot.lane.b32.xlu0 %v7544_v61, %s9512_s29  ;;  %v6588_v44 = vrot.slane %v13911_v21, 6  ;;  %v14058_v61 = vadd.f32 %v7312_v46, %v7251_v7  ;;  %v5958_v46 = vrot.slane %v13878_v54, 6 }
0x1735   :  { %7559 = vrot.lane.b32.xlu2 %v7546_v22, %s9512_s29  ;;  %7557 = vrot.lane.b32.xlu1 %v7545_v33, %s9512_s29  ;;  %v7253_v22 = vld [vmem:[#allocation3 + $0x13] ss:$4 sm:$0x3]  ;;  %v6596_v47 = vperm.slane %v6588_v44, 0  ;;  %v5966_v7 = vperm.slane %v5958_v46, 0 }
0x1736   :  { %v14060_v33 = vadd.f32 %v7314_v3, %v7253_v22 }
0x1737   :  { %v6603_v23 = vpop.permute.xlu0 %6602 }
0x1738   :  { %6624 = vst.msk [vmem:[#allocation5 + $0xa] sm:$0x1] %vm910_vm9, %v6603_v23  ;;  %v7318_v23 = vrot.slane %v13795_v5, 4 }
0x1739   :  { %7174 = vst.msk [vmem:[#allocation5 + $0xa] sm:$0x1] %vm835_vm14, %v7159_v56  ;;  %v8494_v56 = vmul.f32 -1.442695, %v7333_v18 }
0x173b   :  { %7561 = vrot.lane.b32.xlu0 %v7547_v41, %s9512_s29  ;;  %v7320_v41 = vrot.slane %v13785_v4, 5  ;;  %9255 = vpow2.f32 %v8494_v56 }
0x173d   :  { %7563 = vrot.lane.b32.xlu1 %v7548_v39, %s9512_s29  ;;  %v5959_v39 = vrot.slane %v13878_v54, 7 }
0x173f   :  { %v6605_v52 = vpop.permute.xlu0 %6604  ;;  %v5967_v5 = vperm.slane %v5959_v39, 0 }
0x1740   :  { %6625 = vst.msk [vmem:[#allocation5 + $0xe] sm:$0x1] %vm910_vm9, %v6605_v52  ;;  %v7259_v52 = vld [vmem:[#allocation3 + $0x2b] ss:$4 sm:$0x3] }
0x1741   :  { %7175 = vst.msk [vmem:[#allocation5 + $0xe] sm:$0x1] %vm835_vm14, %v7160_v62  ;;  %v14072_v62 = vadd.f32 %v7318_v23, %v7257_v30  ;;  %v14074_v31 = vadd.f32 %v7320_v41, %v7259_v52 }
0x1743   :  { %7501 = vrot.lane.b32.xlu0 %v7333_v18, %s9512_s29  ;;  %v8497_v18 = vmul.f32 -1.442695, %v7336_v59 }
0x1745   :  { %7196 = vrot.lane.b32.xlu1 %v7195_v60, %s9531_s2  ;;  %v9256_v60 = vpop.eup %9255  ;;  %9257 = vpow2.f32 %v8497_v18 }
0x1746   :  { %v7365_v17 = vadd.f32 1.0, %v9256_v60 }
0x1748   :  { %9259 = vrcp.f32 %v7365_v17  ;;  %vm7378_vm4 = vweird.f32 %v7365_v17 }
0x174b   :  { %7507 = vrot.lane.b32.xlu0 %v7336_v59, %s9512_s29  ;;  %v9258_v11 = vpop.eup %9257 }
0x1753   :  { %7513 = vrot.lane.b32.xlu0 %v14023_v6, %s9512_s29 }
0x175b   :  { %5976 = vrot.lane.b32.xlu0 %v5964_v0, %s9532_s27 }
0x179d   :  { %v14029_v48 = vpop.permute.xlu0 %7549 }
0x179f   :  { %v14031_v12 = vpop.permute.xlu1 %7551 }
0x17a5   :  { %v14033_v26 = vpop.permute.xlu0 %7555 }
0x17a7   :  { %v14035_v15 = vpop.permute.xlu1 %7557 }
0x17ad   :  { %v14037_v49 = vpop.permute.xlu0 %7561 }
0x17af   :  { %v14039_v13 = vpop.permute.xlu1 %7563 }
0x17b5   :  { %v14041_v16 = vpop.permute.xlu0 %7501 }
0x17b7   :  { %v7197_v40 = vpop.permute.xlu1 %7196 }
0x17b8   :  { %v14045_v53 = vsel %vm6514_vm6, %v7197_v40, 0.0  ;;  %v7368_v40 = vadd.f32 1.0, %v9258_v11 }
0x17b9   :  { %v7208_v38 = vperm.slane %v14045_v53, 0  ;;  %v7204_v2 = vrot.slane %v14045_v53, 4  ;;  %v7201_v8 = vrot.slane %v14045_v53, 1  ;;  %v7203_v28 = vrot.slane %v14045_v53, 3 }
0x17ba   :  { %v7202_v59 = vrot.slane %v14045_v53, 2  ;;  %9261 = vrcp.f32 %v7368_v40  ;;  %v7206_v39 = vrot.slane %v14045_v53, 6 }
0x17bb   :  { %7216 = vrot.lane.b32.xlu1 %v7208_v38, %s9532_s27  ;;  %v7212_v25 = vperm.slane %v7204_v2, 0  ;;  %v7209_v37 = vperm.slane %v7201_v8, 0  ;;  %v7211_v55 = vperm.slane %v7203_v28, 0  ;;  %v6595_v38 = vperm.slane %v6587_v29, 0  ;;  %v9260_v2 = vpop.eup %9259 }
0x17bc   :  { %v7210_v0 = vperm.slane %v7202_v59, 0  ;;  %v8500_v8 = vmul.f32 -1.442695, %v14023_v6  ;;  %v7517_v6 = vrot.slane %v14041_v16, 1  ;;  %vm7379_vm6 = vweird.f32 %v9260_v2 }
0x17bd   :  { %7224 = vrot.lane.b32.xlu0 %v7212_v25, %s9532_s27  ;;  %7218 = vrot.lane.b32.xlu2 %v7209_v37, %s9532_s27  ;;  %v14054_v36 = vpop.permute.xlu0 %7507  ;;  %v6586_v25 = vrot.slane %v13911_v21, 4  ;;  %v7374_v37 = vmul.f32 %v9260_v2, %v7365_v17  ;;  %v7214_v27 = vperm.slane %v7206_v39, 0  ;;  %v7205_v16 = vrot.slane %v14045_v53, 5  ;;  %vm7380_vm8 = vmor %vm7378_vm4, %vm7379_vm6 }
0x17be   :  { %9263 = vpow2.f32 %v8500_v8  ;;  %v7520_v60 = vrot.slane %v14054_v36, 1  ;;  %v7429_v8 = vand.u32 2147483648, %v7368_v40  ;;  %vm7423_vm6 = vweird.f32 %v7368_v40 }
0x17bf   :  { %v6594_v3 = vperm.slane %v6586_v25, 0  ;;  %v7375_v44 = vsub.f32 1.0, %v7374_v37  ;;  %9265 = vtanh.f32 %v7517_v6  ;;  %v7213_v11 = vperm.slane %v7205_v16, 0 }
0x17c0   :  { %v9262_v22 = vpop.eup %9261  ;;  %v7427_v25 = vand.u32 2147483647, %v7368_v40  ;;  %v6589_v36 = vrot.slane %v13911_v21, 7 }
0x17c1   :  { %v7376_v23 = vmul.f32 %v9260_v2, %v7375_v44  ;;  %v7419_v41 = vmul.f32 %v9262_v22, %v7368_v40  ;;  %vm7424_vm1 = vweird.f32 %v9262_v22 }
0x17c2   :  { %vm7425_vm4 = vmor %vm7423_vm6, %vm7424_vm1  ;;  %v6597_v44 = vperm.slane %v6589_v36, 0 }
0x17c3   :  { %7503 = vrot.lane.b32.xlu1 %v14058_v61, %s9512_s29  ;;  %v7420_v18 = vsub.f32 1.0, %v7419_v41  ;;  %v2769_v41 = vperm.slane %v13917_v19, 0 }
0x17c4   :  { %v9264_v56 = vpop.eup %9263 }
0x17c5   :  { %6610 = vrot.lane.b32.xlu0 %v6596_v47, %s9532_s27  ;;  %7505 = vrot.lane.b32.xlu2 %v14060_v33, %s9512_s29  ;;  %v14068_v43 = vpop.permute.xlu0 %7513  ;;  %v5957_v47 = vrot.slane %v13878_v54, 5  ;;  %v14101_v52 = vadd.f32 1.0, %v9264_v56  ;;  %v7382_v54 = vand.u32 2147483647, %v7365_v17  ;;  %v7421_v20 = vmul.f32 %v9262_v22, %v7420_v18 }
0x17c6   :  { %v7523_v21 = vrot.slane %v14068_v43, 1  ;;  %v8499_v56 = vmul.f32 -1.442695, %v14074_v31 }
0x17c7   :  { %v5965_v30 = vperm.slane %v5957_v47, 0  ;;  %9267 = vrcp.f32 %v14101_v52  ;;  %vm7383_vm11 = vcmp.eq.f32.partialorder %v7382_v54, 8.507059e+37  ;;  %v8496_v47 = vmul.f32 -1.442695, %v14060_v33 }
0x17c8   :  { %9269 = vtanh.f32 %v7520_v60  ;;  %v7474_v33 = vand.u32 2147483648, %v14101_v52  ;;  %vm7468_vm1 = vweird.f32 %v14101_v52 }
0x17c9   :  { %9271 = vpow2.f32 %v8496_v47 }
0x17ca   :  { %9273 = vtanh.f32 %v7523_v21 }
0x17cb   :  { %7509 = vrot.lane.b32.xlu1 %v14072_v62, %s9512_s29  ;;  %9275 = vpow2.f32 %v8499_v56 }
0x17cd   :  { %5982 = vrot.lane.b32.xlu0 %v5967_v5, %s9532_s27  ;;  %7511 = vrot.lane.b32.xlu2 %v14074_v31, %s9512_s29  ;;  %v5977_v4 = vpop.permute.xlu0 %5976  ;;  %v7377_v5 = vadd.f32 %v9260_v2, %v7376_v23 }
0x17ce   :  { %5996 = vst.msk [vmem:[#allocation5 + $0x13] sm:$0x1] %vm910_vm9, %v5977_v4  ;;  %v7384_v4 = vand.u32 2147483648, %v7365_v17 }
0x17cf   :  { %v7381_v28 = vsel %vm7380_vm8, %v9260_v2, %v7377_v5  ;;  %vm7428_vm8 = vcmp.eq.f32.partialorder %v7427_v25, 8.507059e+37  ;;  %v7472_v5 = vand.u32 2147483647, %v14101_v52 }
0x17d0   :  { %v7385_v59 = vor.u32 1.1754944e-38, %v7384_v4 }
0x17d2   :  { %v14108_v29 = vsel %vm7383_vm11, %v7385_v59, %v7381_v28  ;;  %v2763_v28 = vrot.slane %v13917_v19, 2 }
0x17d3   :  { %7515 = vrot.lane.b32.xlu1 %v14084_v24, %s9512_s29 }
0x17d4   :  { %v2771_v59 = vperm.slane %v2763_v28, 0 }
0x17d5   :  { %7222 = vrot.lane.b32.xlu2 %v7211_v55, %s9532_s27  ;;  %v9266_v55 = vpop.eup %9265 }
0x17d6   :  { %v7581_v17 = vmul.f32 %v9266_v55, %v14108_v29 }
0x17db   :  { %7220 = vrot.lane.b32.xlu1 %v7210_v0, %s9532_s27  ;;  %v7422_v0 = vadd.f32 %v9262_v22, %v7421_v20 }
0x17dd   :  { %6608 = vrot.lane.b32.xlu2 %v6595_v38, %s9532_s27  ;;  %v9268_v38 = vpop.eup %9267  ;;  %v7426_v2 = vsel %vm7425_vm4, %v9262_v22, %v7422_v0  ;;  %vm7473_vm4 = vcmp.eq.f32.partialorder %v7472_v5, 8.507059e+37  ;;  %v8501_v5 = vmul.f32 -1.442695, %v14084_v24 }
0x17de   :  { %v7464_v37 = vmul.f32 %v9268_v38, %v14101_v52  ;;  %v9270_v46 = vpop.eup %9269  ;;  %vm7469_vm11 = vweird.f32 %v9268_v38  ;;  %v8495_v52 = vmul.f32 -1.442695, %v14058_v61 }
0x17df   :  { %v9272_v39 = vpop.eup %9271  ;;  %vm7470_vm6 = vmor %vm7468_vm1, %vm7469_vm11 }
0x17e0   :  { %v7465_v6 = vsub.f32 1.0, %v7464_v37  ;;  %v9274_v18 = vpop.eup %9273  ;;  %v7367_v31 = vadd.f32 1.0, %v9272_v39 }
0x17e1   :  { %v9276_v16 = vpop.eup %9275 }
0x17e2   :  { %v7466_v22 = vmul.f32 %v9268_v38, %v7465_v6  ;;  %9277 = vrcp.f32 %v7367_v31  ;;  %v7370_v20 = vadd.f32 1.0, %v9276_v16  ;;  %v7414_v47 = vand.u32 2147483648, %v7367_v31 }
0x17e3   :  { %6606 = vrot.lane.b32.xlu1 %v6594_v3, %s9532_s27  ;;  %v7430_v3 = vor.u32 1.1754944e-38, %v7429_v8  ;;  %9279 = vpow2.f32 %v8495_v52  ;;  %v7412_v6 = vand.u32 2147483647, %v7367_v31 }
0x17e4   :  { %v7467_v23 = vadd.f32 %v9268_v38, %v7466_v22  ;;  %9281 = vrcp.f32 %v7370_v20  ;;  %v7415_v56 = vor.u32 1.1754944e-38, %v7414_v47 }
0x17e5   :  { %5980 = vrot.lane.b32.xlu2 %v5966_v7, %s9532_s27  ;;  %v14115_v7 = vsel %vm7428_vm8, %v7430_v3, %v7426_v2  ;;  %vm7408_vm8 = vweird.f32 %v7367_v31  ;;  %vm7413_vm1 = vcmp.eq.f32.partialorder %v7412_v6, 8.507059e+37 }
0x17e6   :  { %v7584_v40 = vmul.f32 %v9270_v46, %v14115_v7  ;;  %v7471_v43 = vsel %vm7470_vm6, %v9268_v38, %v7467_v23  ;;  %v8498_v38 = vmul.f32 -1.442695, %v14072_v62  ;;  %v7648_v32 = vrot.slane %v14115_v7, 1 }
0x17e8   :  { %v9278_v55 = vpop.eup %9277  ;;  %9283 = vpow2.f32 %v8498_v38 }
0x17e9   :  { %v9280_v61 = vpop.eup %9279 }
0x17ea   :  { %v9282_v25 = vpop.eup %9281  ;;  %v14147_v46 = vadd.f32 1.0, %v9280_v61 }
0x17eb   :  { %5978 = vrot.lane.b32.xlu1 %v5965_v30, %s9532_s27  ;;  %v14125_v30 = vpop.permute.xlu2 %7553  ;;  %v7449_v37 = vmul.f32 %v9282_v25, %v7370_v20  ;;  %vm7454_vm6 = vweird.f32 %v9282_v25 }
0x17ec   :  { %9285 = vrcp.f32 %v14147_v46 }
0x17ed   :  { %7228 = vrot.lane.b32.xlu2 %v7214_v27, %s9532_s27  ;;  %v7475_v27 = vor.u32 1.1754944e-38, %v7474_v33 }
0x17ee   :  { %v9284_v62 = vpop.eup %9283 }
0x17ef   :  { %v14130_v4 = vsel %vm7473_vm4, %v7475_v27, %v7471_v43  ;;  %v14151_v22 = vadd.f32 1.0, %v9284_v62  ;;  %v7459_v27 = vand.u32 2147483648, %v7370_v20  ;;  %vm7453_vm4 = vweird.f32 %v7370_v20 }
0x17f0   :  { %v7587_v54 = vmul.f32 %v9274_v18, %v14130_v4  ;;  %v7162_v62 = vrot.slane %v13992_v58, 5  ;;  %v7579_v42 = vmul.f32 %v14037_v49, %v14130_v4 }
0x17f1   :  { %v7460_v28 = vor.u32 1.1754944e-38, %v7459_v27 }
0x17f2   :  { %v14153_v23 = vpop.eup %9285 }
0x17f3   :  { %7226 = vrot.lane.b32.xlu1 %v7213_v11, %s9532_s27  ;;  %v14134_v60 = vpop.permute.xlu2 %7559  ;;  %v7404_v11 = vmul.f32 %v9278_v55, %v7367_v31  ;;  %v7389_v16 = vmul.f32 %v14153_v23, %v14147_v46 }
0x17f5   :  { %7597 = vrot.lane.b32.xlu2 %v7581_v17, %s9512_s29  ;;  %v14142_v17 = vsel %vm2063_vm5, %v13976_v57, 0.0  ;;  %v7405_v8 = vsub.f32 1.0, %v7404_v11  ;;  %vm7409_vm5 = vweird.f32 %v9278_v55 }
0x17f6   :  { %v4005_v36 = vperm.slane %v14142_v17, 0  ;;  %vm7410_vm11 = vmor %vm7408_vm8, %vm7409_vm5  ;;  %v4002_v1 = vrot.slane %v14142_v17, 5 }
0x17f7   :  { %v7406_v2 = vmul.f32 %v9278_v55, %v7405_v8  ;;  %vm7455_vm5 = vmor %vm7453_vm4, %vm7454_vm6 }
0x17f9   :  { %v7407_v57 = vadd.f32 %v9278_v55, %v7406_v2 }
0x17fb   :  { %6612 = vrot.lane.b32.xlu1 %v6597_v44, %s9532_s27  ;;  %v7450_v44 = vsub.f32 1.0, %v7449_v37  ;;  %v7207_v37 = vrot.slane %v14045_v53, 7  ;;  %v7397_v53 = vand.u32 2147483647, %v14147_v46 }
0x17fd   :  { %7603 = vrot.lane.b32.xlu2 %v7584_v40, %s9512_s29  ;;  %v7411_v40 = vsel %vm7410_vm11, %v9278_v55, %v7407_v57  ;;  %v7451_v21 = vmul.f32 %v9282_v25, %v7450_v44  ;;  %vm7394_vm11 = vweird.f32 %v14153_v23  ;;  %vm7398_vm4 = vcmp.eq.f32.partialorder %v7397_v53, 8.507059e+37 }
0x17fe   :  { %v14155_v39 = vsel %vm7413_vm1, %v7415_v56, %v7411_v40  ;;  %v7399_v40 = vand.u32 2147483648, %v14147_v46  ;;  %vm7393_vm1 = vweird.f32 %v14147_v46  ;;  %v7215_v56 = vperm.slane %v7207_v37, 0 }
0x17ff   :  { %v7452_v18 = vadd.f32 %v9282_v25, %v7451_v21  ;;  %v7163_v21 = vrot.slane %v13992_v58, 6  ;;  %vm7395_vm6 = vmor %vm7393_vm1, %vm7394_vm11 }
0x1801   :  { %v7456_v52 = vsel %vm7455_vm5, %v9282_v25, %v7452_v18 }
0x1805   :  { %2777 = vrot.lane.b32.xlu2 %v2769_v41, %s9532_s27 }
0x180d   :  { %7609 = vrot.lane.b32.xlu2 %v7587_v54, %s9512_s29  ;;  %v7457_v54 = vand.u32 2147483647, %v7370_v20 }
0x180f   :  { %vm7458_vm8 = vcmp.eq.f32.partialorder %v7457_v54, 8.507059e+37 }
0x1810   :  { %v14166_v20 = vsel %vm7458_vm8, %v7460_v28, %v7456_v52  ;;  %v7444_v28 = vand.u32 2147483648, %v14151_v22  ;;  %vm7438_vm8 = vweird.f32 %v14151_v22 }
0x1815   :  { %2781 = vrot.lane.b32.xlu2 %v2771_v59, %s9532_s27  ;;  %v7390_v59 = vsub.f32 1.0, %v7389_v16 }
0x1817   :  { %v7219_v0 = vpop.permute.xlu2 %7218  ;;  %v7391_v25 = vmul.f32 %v14153_v23, %v7390_v59  ;;  %v7442_v59 = vand.u32 2147483647, %v14151_v22 }
0x1818   :  { %7241 = vst.msk [vmem:[#allocation5 + $0x5] sm:$0x1] %vm910_vm9, %v7219_v0 }
0x1819   :  { %v7392_v57 = vadd.f32 %v14153_v23, %v7391_v25  ;;  %vm7443_vm1 = vcmp.eq.f32.partialorder %v7442_v59, 8.507059e+37  ;;  %v2133_v25 = vrot.slane %v13956_v51, 2 }
0x181d   :  { %4013 = vrot.lane.b32.xlu2 %v4005_v36, %s9532_s27 }
0x181f   :  { %v7506_v3 = vpop.permute.xlu2 %7505 }
0x1820   :  { %v7519_v10 = vrot.slane %v7506_v3, 1 }
0x1822   :  { %9287 = vtanh.f32 %v7519_v10 }
0x1823   :  { %9289 = vrcp.f32 %v14151_v22 }
0x1827   :  { %v7512_v41 = vpop.permute.xlu2 %7511 }
0x1828   :  { %v9288_v33 = vpop.eup %9287  ;;  %v7522_v43 = vrot.slane %v7512_v41, 1  ;;  %v7396_v41 = vsel %vm7395_vm6, %v14153_v23, %v7392_v57 }
0x1829   :  { %v7583_v31 = vmul.f32 %v9288_v33, %v14155_v39  ;;  %v14164_v55 = vpop.eup %9289 }
0x182a   :  { %9291 = vtanh.f32 %v7522_v43  ;;  %v7434_v36 = vmul.f32 %v14164_v55, %v14151_v22  ;;  %v2132_v43 = vrot.slane %v13956_v51, 1  ;;  %vm7439_vm5 = vweird.f32 %v14164_v55 }
0x182b   :  { %7601 = vrot.lane.b32.xlu1 %v7583_v31, %s9512_s29  ;;  %9293 = vpow2.f32 %v8501_v5  ;;  %v7400_v5 = vor.u32 1.1754944e-38, %v7399_v40  ;;  %vm7440_vm11 = vmor %vm7438_vm8, %vm7439_vm5 }
0x182c   :  { %v7435_v44 = vsub.f32 1.0, %v7434_v36 }
0x182d   :  { %v7217_v24 = vpop.permute.xlu1 %7216  ;;  %v14194_v31 = vsel %vm7398_vm4, %v7400_v5, %v7396_v41 }
0x182e   :  { %7240 = vst.msk [vmem:[#allocation5 + $0x1] sm:$0x1] %vm910_vm9, %v7217_v24  ;;  %v7436_v33 = vmul.f32 %v14164_v55, %v7435_v44 }
0x182f   :  { %v7223_v11 = vpop.permute.xlu2 %7222  ;;  %v7225_v0 = vpop.permute.xlu0 %7224 }
0x1830   :  { %v9292_v38 = vpop.eup %9291  ;;  %7243 = vst.msk [vmem:[#allocation5 + $0xd] sm:$0x1] %vm910_vm9, %v7223_v11  ;;  %v7437_v54 = vadd.f32 %v14164_v55, %v7436_v33  ;;  %v2140_v11 = vperm.slane %v2132_v43, 0 }
0x1831   :  { %7244 = vst.msk [vmem:[#allocation5 + $0x11] sm:$0x1] %vm910_vm9, %v7225_v0  ;;  %v7586_v61 = vmul.f32 %v9292_v38, %v14166_v20  ;;  %v9294_v8 = vpop.eup %9293 }
0x1832   :  { %v14176_v3 = vadd.f32 1.0, %v9294_v8  ;;  %v7441_v0 = vsel %vm7440_vm11, %v14164_v55, %v7437_v54  ;;  %v2141_v55 = vperm.slane %v2133_v25, 0  ;;  %v7576_v54 = vmul.f32 %v14033_v26, %v14115_v7 }
0x1833   :  { %7607 = vrot.lane.b32.xlu1 %v7586_v61, %s9512_s29  ;;  %v7445_v61 = vor.u32 1.1754944e-38, %v7444_v28  ;;  %v2762_v28 = vrot.slane %v13917_v19, 1 }
0x1834   :  { %vm7483_vm4 = vweird.f32 %v14176_v3  ;;  %v7487_v33 = vand.u32 2147483647, %v14176_v3 }
0x1835   :  { %v7504_v2 = vpop.permute.xlu1 %7503 }
0x1836   :  { %v7518_v10 = vrot.slane %v7504_v2, 1  ;;  %v14209_v2 = vsel %vm7443_vm1, %v7445_v61, %v7441_v0  ;;  %vm7488_vm8 = vcmp.eq.f32.partialorder %v7487_v33, 8.507059e+37  ;;  %v14245_v61 = vsel %vm2740_vm13, %v11487_v63, 0.0 }
0x1837   :  { %v6609_v47 = vpop.permute.xlu2 %6608  ;;  %v6611_v6 = vpop.permute.xlu0 %6610  ;;  %v3387_v63 = vperm.slane %v13963_v9, 0  ;;  %v3338_v49 = vrot.slane %v14245_v61, 2  ;;  %v2136_v33 = vrot.slane %v13956_v51, 5 }
0x1838   :  { %9295 = vtanh.f32 %v7518_v10  ;;  %6627 = vst.msk [vmem:[#allocation5 + $0x16] sm:$0x1] %vm910_vm9, %v6609_v47  ;;  %v3380_v47 = vrot.slane %v13963_v9, 1 }
0x1839   :  { %7177 = vst.msk [vmem:[#allocation5 + $0x16] sm:$0x1] %vm835_vm14, %v7162_v62  ;;  %9297 = vrcp.f32 %v14176_v3 }
0x183a   :  { %6628 = vst.msk [vmem:[#allocation5 + $0x1a] sm:$0x1] %vm910_vm9, %v6611_v6  ;;  %v7573_v6 = vmul.f32 %v14029_v48, %v14108_v29  ;;  %v3388_v5 = vperm.slane %v3380_v47, 0 }
0x183b   :  { %7178 = vst.msk [vmem:[#allocation5 + $0x1a] sm:$0x1] %vm835_vm14, %v7163_v21  ;;  %7230 = vrot.lane.b32.xlu1 %v7215_v56, %s9532_s27  ;;  %v2139_v21 = vperm.slane %v13956_v51, 0  ;;  %v7489_v56 = vand.u32 2147483648, %v14176_v3 }
0x183d   :  { %v7510_v46 = vpop.permute.xlu1 %7509  ;;  %v7490_v43 = vor.u32 1.1754944e-38, %v7489_v56  ;;  %v4000_v56 = vrot.slane %v14142_v17, 3 }
0x183e   :  { %v9296_v18 = vpop.eup %9295  ;;  %v7521_v27 = vrot.slane %v7510_v46, 1 }
0x183f   :  { %v5981_v23 = vpop.permute.xlu2 %5980  ;;  %v5983_v16 = vpop.permute.xlu0 %5982  ;;  %v7582_v52 = vmul.f32 %v9296_v18, %v14194_v31  ;;  %v7161_v18 = vrot.slane %v13992_v58, 4 }
0x1840   :  { %v9298_v24 = vpop.eup %9297  ;;  %9299 = vtanh.f32 %v7521_v27  ;;  %5998 = vst.msk [vmem:[#allocation5 + $0x1b] sm:$0x1] %vm910_vm9, %v5981_v23 }
0x1841   :  { %5999 = vst.msk [vmem:[#allocation5 + $0x1f] sm:$0x1] %vm910_vm9, %v5983_v16  ;;  %7599 = vrot.lane.b32.xlu0 %v7582_v52, %s9512_s29  ;;  %v7479_v38 = vmul.f32 %v9298_v24, %v14176_v3  ;;  %vm7484_vm6 = vweird.f32 %v9298_v24 }
0x1842   :  { %vm7485_vm5 = vmor %vm7483_vm4, %vm7484_vm6 }
0x1843   :  { %2149 = vrot.lane.b32.xlu1 %v2140_v11, %s9532_s27  ;;  %v7480_v22 = vsub.f32 1.0, %v7479_v38  ;;  %v2770_v11 = vperm.slane %v2762_v28, 0  ;;  %v14240_v38 = vsel %vm1433_vm10, %v13972_v50, 0.0 }
0x1845   :  { %v7516_v8 = vpop.permute.xlu1 %7515  ;;  %v7481_v44 = vmul.f32 %v9298_v24, %v7480_v22  ;;  %v3998_v22 = vrot.slane %v14142_v17, 1 }
0x1846   :  { %v9300_v36 = vpop.eup %9299  ;;  %v7524_v57 = vrot.slane %v7516_v8, 1  ;;  %v4616_v8 = vrot.slane %v14240_v38, 1 }
0x1847   :  { %v7229_v37 = vpop.permute.xlu2 %7228  ;;  %v7585_v10 = vmul.f32 %v9300_v36, %v14209_v2  ;;  %v7482_v40 = vadd.f32 %v9298_v24, %v7481_v44 }
0x1848   :  { %7246 = vst.msk [vmem:[#allocation5 + $0x19] sm:$0x1] %vm910_vm9, %v7229_v37  ;;  %9301 = vtanh.f32 %v7524_v57  ;;  %v4624_v50 = vperm.slane %v4616_v8, 0  ;;  %v7164_v37 = vrot.slane %v13992_v58, 7  ;;  %v4006_v57 = vperm.slane %v3998_v22, 0 }
0x1849   :  { %7605 = vrot.lane.b32.xlu0 %v7585_v10, %s9512_s29  ;;  %v7486_v48 = vsel %vm7485_vm5, %v9298_v24, %v7482_v40  ;;  %v2134_v58 = vrot.slane %v13956_v51, 3 }
0x184a   :  { %v14228_v23 = vsel %vm7488_vm8, %v7490_v43, %v7486_v48  ;;  %v4001_v48 = vrot.slane %v14142_v17, 4 }
0x184b   :  { %2151 = vrot.lane.b32.xlu1 %v2141_v55, %s9532_s27  ;;  %v2142_v47 = vperm.slane %v2134_v58, 0 }
0x184d   :  { %v7221_v62 = vpop.permute.xlu1 %7220 }
0x184e   :  { %7242 = vst.msk [vmem:[#allocation5 + $0x9] sm:$0x1] %vm910_vm9, %v7221_v62  ;;  %v9302_v46 = vpop.eup %9301 }
0x184f   :  { %v7598_v53 = vpop.permute.xlu2 %7597  ;;  %v7588_v16 = vmul.f32 %v9302_v46, %v14228_v23  ;;  %v7575_v46 = vmul.f32 %v14125_v30, %v14155_v39 }
0x1850   :  { %v7621_v41 = vadd.f32 %v7598_v53, %v7573_v6  ;;  %v3999_v6 = vrot.slane %v14142_v17, 2  ;;  %v2135_v53 = vrot.slane %v13956_v51, 4 }
0x1851   :  { %2147 = vrot.lane.b32.xlu0 %v2139_v21, %s9532_s27 }
0x1852   :  { %9303 = vtanh.f32 %v7621_v41  ;;  %v4007_v40 = vperm.slane %v3999_v6, 0  ;;  %v2143_v21 = vperm.slane %v2135_v53, 0  ;;  %v4008_v41 = vperm.slane %v4000_v56, 0 }
0x1853   :  { %3397 = vrot.lane.b32.xlu1 %v3388_v5, %s9532_s27  ;;  %v2144_v5 = vperm.slane %v2136_v33, 0  ;;  %v7580_v53 = vmul.f32 %v14039_v13, %v14228_v23 }
0x1855   :  { %v6607_v27 = vpop.permute.xlu1 %6606 }
0x1856   :  { %6626 = vst.msk [vmem:[#allocation5 + $0x12] sm:$0x1] %vm910_vm9, %v6607_v27  ;;  %v4009_v27 = vperm.slane %v4001_v48, 0 }
0x1857   :  { %7176 = vst.msk [vmem:[#allocation5 + $0x12] sm:$0x1] %vm835_vm14, %v7161_v18  ;;  %v7604_v3 = vpop.permute.xlu2 %7603 }
0x1858   :  { %v9304_v52 = vpop.eup %9303  ;;  %v7624_v24 = vadd.f32 %v7604_v3, %v7576_v54  ;;  %v2137_v54 = vrot.slane %v13956_v51, 6  ;;  %v7578_v3 = vmul.f32 %v14134_v60, %v14166_v20  ;;  %v7645_v60 = vrot.slane %v14108_v29, 1 }
0x1859   :  { %7611 = vrot.lane.b32.xlu0 %v7588_v16, %s9512_s29  ;;  %7669 = vrot.lane.b32.xlu2 %v9304_v52, %s9512_s29  ;;  %v7577_v29 = vmul.f32 %v14035_v15, %v14209_v2  ;;  %v3381_v15 = vrot.slane %v13963_v9, 2 }
0x185a   :  { %9305 = vtanh.f32 %v7624_v24  ;;  %v2145_v28 = vperm.slane %v2137_v54, 0 }
0x185b   :  { %v3389_v6 = vperm.slane %v3381_v15, 0 }
0x185d   :  { %v5979_v59 = vpop.permute.xlu1 %5978 }
0x185e   :  { %5997 = vst.msk [vmem:[#allocation5 + $0x17] sm:$0x1] %vm910_vm9, %v5979_v59 }
0x185f   :  { %v2778_v26 = vpop.permute.xlu2 %2777 }
0x1860   :  { %v9306_v0 = vpop.eup %9305  ;;  %2801 = vst.msk [vmem:[#allocation4 + $0x4] sm:$0x1] %vm910_vm9, %v2778_v26  ;;  %v7574_v26 = vmul.f32 %v14031_v12, %v14194_v31 }
0x1861   :  { %3351 = vst.msk [vmem:[#allocation4 + $0x4] sm:$0x1] %vm835_vm14, %v14245_v61  ;;  %2779 = vrot.lane.b32.xlu0 %v2770_v11, %s9532_s27  ;;  %7675 = vrot.lane.b32.xlu2 %v9306_v0, %s9512_s29  ;;  %v15025_v11 = vld [vmem:[#allocation18_spill] sm:$0xff] }
0x1862   :  { %v14296_v0 = vsel %vm2110_vm12, %v15025_v11, 0.0 }
0x1863   :  { %v3955_v45 = vrot.slane %v14296_v0, 1 }
0x1865   :  { %v7227_v25 = vpop.permute.xlu1 %7226 }
0x1866   :  { %7245 = vst.msk [vmem:[#allocation5 + $0x15] sm:$0x1] %vm910_vm9, %v7227_v25 }
0x1867   :  { %v7610_v14 = vpop.permute.xlu2 %7609 }
0x1868   :  { %v7627_v36 = vadd.f32 %v7610_v14, %v7579_v42 }
0x1869   :  { %3395 = vrot.lane.b32.xlu0 %v3387_v63, %s9532_s27  ;;  %4633 = vrot.lane.b32.xlu2 %v4624_v50, %s9532_s27  ;;  %v4623_v50 = vperm.slane %v14240_v38, 0 }
0x186a   :  { %9307 = vtanh.f32 %v7627_v36  ;;  %v14304_v36 = vsel %vm801_vm15, %v13979_v35, 0.0  ;;  %vm7834_vm15 = vcmask 519168  }
0x186b   :  { %v5186_v12 = vrot.slane %v14304_v36, 1 }
0x186d   :  { %v6613_v10 = vpop.permute.xlu1 %6612 }
0x186e   :  { %6629 = vst.msk [vmem:[#allocation5 + $0x1e] sm:$0x1] %vm910_vm9, %v6613_v10 }
0x186f   :  { %7179 = vst.msk [vmem:[#allocation5 + $0x1e] sm:$0x1] %vm835_vm14, %v7164_v37  ;;  %v2782_v55 = vpop.permute.xlu2 %2781 }
0x1870   :  { %v9308_v44 = vpop.eup %9307  ;;  %2803 = vst.msk [vmem:[#allocation4 + $0x14] sm:$0x1] %vm910_vm9, %v2782_v55 }
0x1871   :  { %3353 = vst.msk [vmem:[#allocation4 + $0x14] sm:$0x1] %vm835_vm14, %v3338_v49  ;;  %4015 = vrot.lane.b32.xlu0 %v4006_v57, %s9532_s27  ;;  %7681 = vrot.lane.b32.xlu2 %v9308_v44, %s9512_s29  ;;  %v5194_v57 = vperm.slane %v5186_v12, 0  ;;  %v3956_v44 = vrot.slane %v14296_v0, 2 }
0x1877   :  { %v4014_v62 = vpop.permute.xlu2 %4013 }
0x1878   :  { %4037 = vst.msk [vmem:[#allocation4 + $0x2] sm:$0x1] %vm910_vm9, %v4014_v62 }
0x1879   :  { %2153 = vrot.lane.b32.xlu2 %v2142_v47, %s9532_s27 }
0x1881   :  { %4017 = vrot.lane.b32.xlu2 %v4007_v40, %s9532_s27  ;;  %v5187_v40 = vrot.slane %v14304_v36, 2 }
0x1883   :  { %v5195_v48 = vperm.slane %v5187_v40, 0 }
0x1889   :  { %2155 = vrot.lane.b32.xlu2 %v2143_v21, %s9532_s27  ;;  %v7651_v21 = vrot.slane %v14130_v4, 1  ;;  %v3337_v4 = vrot.slane %v14245_v61, 1 }
0x1891   :  { %4019 = vrot.lane.b32.xlu2 %v4008_v41, %s9532_s27 }
0x1899   :  { %2157 = vrot.lane.b32.xlu2 %v2144_v5, %s9532_s27 }
0x189d   :  { %v7602_v43 = vpop.permute.xlu1 %7601 }
0x189e   :  { %v7623_v18 = vadd.f32 %v7602_v43, %v7575_v46  ;;  %v3382_v46 = vrot.slane %v13963_v9, 3  ;;  %v3957_v43 = vrot.slane %v14296_v0, 3 }
0x18a0   :  { %9309 = vtanh.f32 %v7623_v18  ;;  %v3390_v54 = vperm.slane %v3382_v46, 0  ;;  %v7647_v46 = vrot.slane %v14155_v39, 1  ;;  %v7646_v39 = vrot.slane %v14194_v31, 1 }
0x18a1   :  { %4021 = vrot.lane.b32.xlu2 %v4009_v27, %s9532_s27 }
0x18a5   :  { %v7608_v16 = vpop.permute.xlu1 %7607 }
0x18a6   :  { %v9310_v52 = vpop.eup %9309  ;;  %v7626_v24 = vadd.f32 %v7608_v16, %v7578_v3  ;;  %v5188_v3 = vrot.slane %v14304_v36, 3 }
0x18a7   :  { %7673 = vrot.lane.b32.xlu1 %v9310_v52, %s9512_s29 }
0x18a8   :  { %9311 = vtanh.f32 %v7626_v24  ;;  %v5193_v24 = vperm.slane %v14304_v36, 0 }
0x18a9   :  { %2159 = vrot.lane.b32.xlu2 %v2145_v28, %s9532_s27  ;;  %v5196_v28 = vperm.slane %v5188_v3, 0 }
0x18ad   :  { %v7231_v30 = vpop.permute.xlu1 %7230 }
0x18ae   :  { %v9312_v59 = vpop.eup %9311  ;;  %7247 = vst.msk [vmem:[#allocation5 + $0x1d] sm:$0x1] %vm910_vm9, %v7231_v30  ;;  %v2764_v30 = vrot.slane %v13917_v19, 3 }
0x18af   :  { %7679 = vrot.lane.b32.xlu1 %v9312_v59, %s9512_s29  ;;  %v3383_v59 = vrot.slane %v13963_v9, 4 }
0x18b3   :  { %v7670_v8 = vpop.permute.xlu2 %7669  ;;  %v7600_v25 = vpop.permute.xlu0 %7599 }
0x18b4   :  { %v14298_v42 = vmul.f32 %v7670_v8, %v7645_v60  ;;  %v7622_v14 = vadd.f32 %v7600_v25, %v7574_v26  ;;  %v3958_v26 = vrot.slane %v14296_v0, 4  ;;  %v2772_v8 = vperm.slane %v2764_v30, 0 }
0x18b5   :  { %v2150_v63 = vpop.permute.xlu1 %2149  ;;  %v3391_v25 = vperm.slane %v3383_v59, 0 }
0x18b6   :  { %7709 = vst [vmem:[#allocation1] ss:$9 sm:$0xff] %v14298_v42  ;;  %9313 = vtanh.f32 %v7622_v14  ;;  %v4617_v14 = vrot.slane %v14240_v38, 2 }
0x18b7   :  { %2172 = vst.msk [vmem:[#allocation4 + $0xd] sm:$0x1] %vm910_vm9, %v2150_v63  ;;  %4631 = vrot.lane.b32.xlu1 %v4623_v50, %s9532_s27  ;;  %v5189_v63 = vrot.slane %v14304_v36, 4 }
0x18b8   :  { %3970 = vst.msk [vmem:[#allocation4 + $0xd] sm:$0x1] %vm835_vm14, %v3955_v45  ;;  %v4625_v45 = vperm.slane %v4617_v14, 0 }
0x18b9   :  { %v5197_v12 = vperm.slane %v5189_v63, 0 }
0x18bb   :  { %v7676_v35 = vpop.permute.xlu2 %7675  ;;  %v7606_v22 = vpop.permute.xlu0 %7605 }
0x18bc   :  { %v9314_v37 = vpop.eup %9313  ;;  %v14315_v10 = vmul.f32 %v7676_v35, %v7648_v32  ;;  %v7625_v49 = vadd.f32 %v7606_v22, %v7577_v29  ;;  %v2765_v29 = vrot.slane %v13917_v19, 4  ;;  %v3384_v32 = vrot.slane %v13963_v9, 5 }
0x18bd   :  { %v2152_v55 = vpop.permute.xlu1 %2151  ;;  %7671 = vrot.lane.b32.xlu0 %v9314_v37, %s9512_s29  ;;  %v3959_v35 = vrot.slane %v14296_v0, 5 }
0x18be   :  { %7715 = vst [vmem:[#allocation1 + $0x3] ss:$9 sm:$0xff] %v14315_v10  ;;  %9315 = vtanh.f32 %v7625_v49  ;;  %v2773_v37 = vperm.slane %v2765_v29, 0  ;;  %v3392_v49 = vperm.slane %v3384_v32, 0 }
0x18bf   :  { %2173 = vst.msk [vmem:[#allocation4 + $0x15] sm:$0x1] %vm910_vm9, %v2152_v55  ;;  %5203 = vrot.lane.b32.xlu1 %v5194_v57, %s9532_s27  ;;  %v4618_v55 = vrot.slane %v14240_v38, 3  ;;  %v5190_v57 = vrot.slane %v14304_v36, 5 }
0x18c0   :  { %3971 = vst.msk [vmem:[#allocation4 + $0x15] sm:$0x1] %vm835_vm14, %v3956_v44 }
0x18c1   :  { %v4626_v15 = vperm.slane %v4618_v55, 0 }
0x18c3   :  { %v4634_v7 = vpop.permute.xlu2 %4633  ;;  %v2148_v58 = vpop.permute.xlu0 %2147 }
0x18c4   :  { %v9316_v62 = vpop.eup %9315  ;;  %4656 = vst.msk [vmem:[#allocation4 + $0x9] sm:$0x1] %vm910_vm9, %v4634_v7  ;;  %v5198_v7 = vperm.slane %v5190_v57, 0 }
0x18c5   :  { %2171 = vst.msk [vmem:[#allocation4 + $0x5] sm:$0x1] %vm910_vm9, %v2148_v58  ;;  %v3398_v47 = vpop.permute.xlu1 %3397  ;;  %7677 = vrot.lane.b32.xlu0 %v9316_v62, %s9512_s29  ;;  %v2766_v58 = vrot.slane %v13917_v19, 5  ;;  %v3385_v62 = vrot.slane %v13963_v9, 6 }
0x18c6   :  { %3969 = vst.msk [vmem:[#allocation4 + $0x5] sm:$0x1] %vm835_vm14, %v14296_v0 }
0x18c7   :  { %3420 = vst.msk [vmem:[#allocation4 + $0xb] sm:$0x1] %vm910_vm9, %v3398_v47  ;;  %3399 = vrot.lane.b32.xlu1 %v3389_v6, %s9532_s27  ;;  %v3960_v47 = vrot.slane %v14296_v0, 6  ;;  %v2774_v40 = vperm.slane %v2766_v58, 0  ;;  %v2138_v58 = vrot.slane %v13956_v51, 7 }
0x18cb   :  { %v7682_v56 = vpop.permute.xlu2 %7681  ;;  %v7612_v41 = vpop.permute.xlu0 %7611 }
0x18cc   :  { %v14335_v33 = vmul.f32 %v7682_v56, %v7651_v21  ;;  %v7628_v5 = vadd.f32 %v7612_v41, %v7580_v53  ;;  %v3393_v53 = vperm.slane %v3385_v62, 0  ;;  %v4619_v21 = vrot.slane %v14240_v38, 4 }
0x18cd   :  { %v2767_v41 = vrot.slane %v13917_v19, 6 }
0x18ce   :  { %7721 = vst [vmem:[#allocation1 + $0x6] ss:$9 sm:$0xff] %v14335_v33  ;;  %9317 = vtanh.f32 %v7628_v5  ;;  %v4627_v56 = vperm.slane %v4619_v21, 0 }
0x18cf   :  { %5205 = vrot.lane.b32.xlu1 %v5195_v48, %s9532_s27  ;;  %v2775_v5 = vperm.slane %v2767_v41, 0  ;;  %v4620_v48 = vrot.slane %v14240_v38, 5 }
0x18d3   :  { %v2154_v18 = vpop.permute.xlu2 %2153  ;;  %v2780_v27 = vpop.permute.xlu0 %2779 }
0x18d4   :  { %v9318_v13 = vpop.eup %9317  ;;  %2174 = vst.msk [vmem:[#allocation4 + $0x1d] sm:$0x1] %vm910_vm9, %v2154_v18 }
0x18d5   :  { %3972 = vst.msk [vmem:[#allocation4 + $0x1d] sm:$0x1] %vm835_vm14, %v3957_v43  ;;  %7683 = vrot.lane.b32.xlu0 %v9318_v13, %s9512_s29  ;;  %v2768_v13 = vrot.slane %v13917_v19, 7  ;;  %v7649_v19 = vrot.slane %v14209_v2, 1 }
0x18d6   :  { %2802 = vst.msk [vmem:[#allocation4 + $0xc] sm:$0x1] %vm910_vm9, %v2780_v27  ;;  %v4628_v27 = vperm.slane %v4620_v48, 0 }
0x18d7   :  { %3352 = vst.msk [vmem:[#allocation4 + $0xc] sm:$0x1] %vm835_vm14, %v3337_v4  ;;  %3401 = vrot.lane.b32.xlu1 %v3390_v54, %s9532_s27  ;;  %v7650_v4 = vrot.slane %v14166_v20, 1 }
0x18db   :  { %v4018_v16 = vpop.permute.xlu2 %4017  ;;  %v3396_v52 = vpop.permute.xlu0 %3395 }
0x18dc   :  { %4039 = vst.msk [vmem:[#allocation4 + $0x12] sm:$0x1] %vm910_vm9, %v4018_v16  ;;  %v2776_v16 = vperm.slane %v2768_v13, 0 }
0x18dd   :  { %3419 = vst.msk [vmem:[#allocation4 + $0x3] sm:$0x1] %vm910_vm9, %v3396_v52  ;;  %5201 = vrot.lane.b32.xlu0 %v5193_v24, %s9532_s27 }
0x18df   :  { %5207 = vrot.lane.b32.xlu1 %v5196_v28, %s9532_s27 }
0x18e3   :  { %v2156_v60 = vpop.permute.xlu2 %2155  ;;  %v4016_v11 = vpop.permute.xlu0 %4015 }
0x18e4   :  { %2175 = vst.msk [vmem:[#allocation4 + $0x25] sm:$0x1] %vm910_vm9, %v2156_v60 }
0x18e5   :  { %3973 = vst.msk [vmem:[#allocation4 + $0x25] sm:$0x1] %vm835_vm14, %v3958_v26  ;;  %2783 = vrot.lane.b32.xlu0 %v2772_v8, %s9532_s27 }
0x18e6   :  { %4038 = vst.msk [vmem:[#allocation4 + $0xa] sm:$0x1] %vm910_vm9, %v4016_v11  ;;  %v7652_v11 = vrot.slane %v14228_v23, 1  ;;  %v3339_v23 = vrot.slane %v14245_v61, 3 }
0x18e7   :  { %3403 = vrot.lane.b32.xlu1 %v3391_v25, %s9532_s27 }
0x18eb   :  { %v4020_v50 = vpop.permute.xlu2 %4019 }
0x18ec   :  { %4040 = vst.msk [vmem:[#allocation4 + $0x1a] sm:$0x1] %vm910_vm9, %v4020_v50 }
0x18ed   :  { %4635 = vrot.lane.b32.xlu0 %v4625_v45, %s9532_s27 }
0x18ef   :  { %5209 = vrot.lane.b32.xlu1 %v5197_v12, %s9532_s27 }
0x18f3   :  { %v2158_v22 = vpop.permute.xlu2 %2157 }
0x18f4   :  { %2176 = vst.msk [vmem:[#allocation4 + $0x2d] sm:$0x1] %vm910_vm9, %v2158_v22 }
0x18f5   :  { %3974 = vst.msk [vmem:[#allocation4 + $0x2d] sm:$0x1] %vm835_vm14, %v3959_v35  ;;  %2785 = vrot.lane.b32.xlu0 %v2773_v37, %s9532_s27 }
0x18f7   :  { %3405 = vrot.lane.b32.xlu1 %v3392_v49, %s9532_s27  ;;  %v3340_v49 = vrot.slane %v14245_v61, 4 }
0x18fb   :  { %v4022_v44 = vpop.permute.xlu2 %4021 }
0x18fc   :  { %4041 = vst.msk [vmem:[#allocation4 + $0x22] sm:$0x1] %vm910_vm9, %v4022_v44 }
0x18fd   :  { %4637 = vrot.lane.b32.xlu0 %v4626_v15, %s9532_s27 }
0x18ff   :  { %5211 = vrot.lane.b32.xlu1 %v5198_v7, %s9532_s27  ;;  %v4010_v7 = vperm.slane %v4002_v1, 0 }
0x1903   :  { %v2160_v6 = vpop.permute.xlu2 %2159 }
0x1904   :  { %2177 = vst.msk [vmem:[#allocation4 + $0x35] sm:$0x1] %vm910_vm9, %v2160_v6  ;;  %v2146_v6 = vperm.slane %v2138_v58, 0 }
0x1905   :  { %3975 = vst.msk [vmem:[#allocation4 + $0x35] sm:$0x1] %vm835_vm14, %v3960_v47  ;;  %2787 = vrot.lane.b32.xlu0 %v2774_v40, %s9532_s27  ;;  %v4003_v40 = vrot.slane %v14142_v17, 6 }
0x1907   :  { %3407 = vrot.lane.b32.xlu1 %v3393_v53, %s9532_s27  ;;  %v3341_v53 = vrot.slane %v14245_v61, 5  ;;  %v4011_v51 = vperm.slane %v4003_v40, 0 }
0x190d   :  { %4639 = vrot.lane.b32.xlu0 %v4627_v56, %s9532_s27 }
0x1915   :  { %2789 = vrot.lane.b32.xlu0 %v2775_v5, %s9532_s27  ;;  %v3342_v5 = vrot.slane %v14245_v61, 6 }
0x1919   :  { %v7674_v43 = vpop.permute.xlu1 %7673 }
0x191a   :  { %v7695_v18 = vmul.f32 %v7674_v43, %v7647_v46  ;;  %v3343_v43 = vrot.slane %v14245_v61, 7 }
0x191c   :  { %7713 = vst [vmem:[#allocation1 + $0x2] ss:$9 sm:$0xff] %v7695_v18 }
0x191d   :  { %4641 = vrot.lane.b32.xlu0 %v4628_v27, %s9532_s27 }
0x1921   :  { %v7680_v54 = vpop.permute.xlu1 %7679 }
0x1922   :  { %v7698_v3 = vmul.f32 %v7680_v54, %v7650_v4 }
0x1924   :  { %7719 = vst [vmem:[#allocation1 + $0x5] ss:$9 sm:$0xff] %v7698_v3 }
0x1925   :  { %2791 = vrot.lane.b32.xlu0 %v2776_v16, %s9532_s27 }
0x1929   :  { %v4632_v52 = vpop.permute.xlu1 %4631 }
0x192a   :  { %4655 = vst.msk [vmem:[#allocation4 + $0x1] sm:$0x1] %vm910_vm9, %v4632_v52 }
0x192f   :  { %v7672_v24 = vpop.permute.xlu0 %7671 }
0x1930   :  { %v7694_v28 = vmul.f32 %v7672_v24, %v7646_v39 }
0x1931   :  { %v5204_v30 = vpop.permute.xlu1 %5203 }
0x1932   :  { %7711 = vst [vmem:[#allocation1 + $0x1] ss:$9 sm:$0xff] %v7694_v28 }
0x1933   :  { %5226 = vst.msk [vmem:[#allocation4 + $0x8] sm:$0x1] %vm910_vm9, %v5204_v30 }
0x1937   :  { %v7678_v20 = vpop.permute.xlu0 %7677 }
0x1938   :  { %v7697_v59 = vmul.f32 %v7678_v20, %v7649_v19 }
0x1939   :  { %v3400_v26 = vpop.permute.xlu1 %3399 }
0x193a   :  { %7717 = vst [vmem:[#allocation1 + $0x4] ss:$9 sm:$0xff] %v7697_v59 }
0x193b   :  { %3421 = vst.msk [vmem:[#allocation4 + $0x13] sm:$0x1] %vm910_vm9, %v3400_v26 }
0x1941   :  { %v5206_v60 = vpop.permute.xlu1 %5205 }
0x1942   :  { %5227 = vst.msk [vmem:[#allocation4 + $0x10] sm:$0x1] %vm910_vm9, %v5206_v60 }
0x1947   :  { %v7684_v31 = vpop.permute.xlu0 %7683 }
0x1948   :  { %v7700_v8 = vmul.f32 %v7684_v31, %v7652_v11  ;;  %v5191_v11 = vrot.slane %v14304_v36, 6 }
0x1949   :  { %v3402_v25 = vpop.permute.xlu1 %3401 }
0x194a   :  { %7723 = vst [vmem:[#allocation1 + $0x7] ss:$9 sm:$0xff] %v7700_v8 }
0x194b   :  { %3422 = vst.msk [vmem:[#allocation4 + $0x1b] sm:$0x1] %vm910_vm9, %v3402_v25  ;;  %v5199_v25 = vperm.slane %v5191_v11, 0 }
0x194f   :  { %v5202_v14 = vpop.permute.xlu0 %5201 }
0x1950   :  { %5225 = vst.msk [vmem:[#allocation4] sm:$0x1] %vm910_vm9, %v5202_v14  ;;  %v4621_v14 = vrot.slane %v14240_v38, 6 }
0x1951   :  { %v5208_v2 = vpop.permute.xlu1 %5207  ;;  %v7724_v63 = vld [vmem:[#allocation1] sm:$0xff] }
0x1952   :  { %5228 = vst.msk [vmem:[#allocation4 + $0x18] sm:$0x1] %vm910_vm9, %v5208_v2  ;;  %v7726_v12 = vsel %vm5931_vm7, %v7724_v63, 0.0  ;;  %v3386_v2 = vrot.slane %v13963_v9, 7  ;;  %v4622_v63 = vrot.slane %v14240_v38, 7 }
0x1953   :  { %7750 = vst [vmem:[#allocation1] ss:$9 sm:$0xff] %v14298_v42  ;;  %v7728_v29 = vrot.slane %v7726_v12, 1  ;;  %v7730_v35 = vrot.slane %v7726_v12, 3  ;;  %v7732_v22 = vrot.slane %v7726_v12, 5  ;;  %v7731_v37 = vrot.slane %v7726_v12, 4 }
0x1954   :  { %7752 = vst [vmem:[#allocation1 + $0x1] ss:$9 sm:$0xff] %v7694_v28  ;;  %v7733_v57 = vrot.slane %v7726_v12, 6  ;;  %v7734_v44 = vrot.slane %v7726_v12, 7 }
0x1955   :  { %7754 = vst [vmem:[#allocation1 + $0x2] ss:$9 sm:$0xff] %v7695_v18 }
0x1956   :  { %7756 = vst [vmem:[#allocation1 + $0x3] ss:$9 sm:$0xff] %v14315_v10  ;;  %v7729_v10 = vrot.slane %v7726_v12, 2 }
0x1957   :  { %v2784_v50 = vpop.permute.xlu0 %2783  ;;  %7758 = vst [vmem:[#allocation1 + $0x4] ss:$9 sm:$0xff] %v7697_v59  ;;  %v3961_v59 = vrot.slane %v14296_v0, 7 }
0x1958   :  { %2804 = vst.msk [vmem:[#allocation4 + $0x1c] sm:$0x1] %vm910_vm9, %v2784_v50  ;;  %v3394_v50 = vperm.slane %v3386_v2, 0 }
0x1959   :  { %3354 = vst.msk [vmem:[#allocation4 + $0x1c] sm:$0x1] %vm835_vm14, %v3339_v23  ;;  %v3404_v45 = vpop.permute.xlu1 %3403  ;;  %v4629_v23 = vperm.slane %v4621_v14, 0  ;;  %v14499_v14 = vld [vmem:[#allocation4] sm:$0xff] }
0x195a   :  { %3423 = vst.msk [vmem:[#allocation4 + $0x23] sm:$0x1] %vm910_vm9, %v3404_v45  ;;  %v4630_v45 = vperm.slane %v4622_v63, 0 }
0x195b   :  { %7760 = vst [vmem:[#allocation1 + $0x5] ss:$9 sm:$0xff] %v7698_v3 }
0x195c   :  { %7762 = vst [vmem:[#allocation1 + $0x6] ss:$9 sm:$0xff] %v14335_v33 }
0x195d   :  { %7764 = vst [vmem:[#allocation1 + $0x7] ss:$9 sm:$0xff] %v7700_v8 }
0x195e   :  { %7742 = vst.msk [vmem:[#allocation5 + $0x3] sm:$0x1] %vm835_vm14, %v7726_v12  ;;  %v5192_v12 = vrot.slane %v14304_v36, 7 }
0x195f   :  { %v4636_v42 = vpop.permute.xlu0 %4635  ;;  %7744 = vst.msk [vmem:[#allocation5 + $0xb] sm:$0x1] %vm835_vm14, %v7729_v10 }
0x1960   :  { %4657 = vst.msk [vmem:[#allocation4 + $0x11] sm:$0x1] %vm910_vm9, %v4636_v42  ;;  %v4004_v42 = vrot.slane %v14142_v17, 7  ;;  %v5200_v9 = vperm.slane %v5192_v12, 0 }
0x1961   :  { %v5210_v32 = vpop.permute.xlu1 %5209  ;;  %7743 = vst.msk [vmem:[#allocation5 + $0x7] sm:$0x1] %vm835_vm14, %v7728_v29 }
0x1962   :  { %5229 = vst.msk [vmem:[#allocation4 + $0x20] sm:$0x1] %vm910_vm9, %v5210_v32  ;;  %v4012_v10 = vperm.slane %v4004_v42, 0 }
0x1963   :  { %7745 = vst.msk [vmem:[#allocation5 + $0xf] sm:$0x1] %vm835_vm14, %v7730_v35 }
0x1964   :  { %v7765_v33 = vld [vmem:[#allocation1] sm:$0xff]  ;;  %7747 = vst.msk [vmem:[#allocation5 + $0x17] sm:$0x1] %vm835_vm14, %v7732_v22 }
0x1965   :  { %7766 = vrot.lane.b32.xlu2 %v7765_v33, %s9531_s2  ;;  %7746 = vst.msk [vmem:[#allocation5 + $0x13] sm:$0x1] %vm835_vm14, %v7731_v37 }
0x1966   :  { %7748 = vst.msk [vmem:[#allocation5 + $0x1b] sm:$0x1] %vm835_vm14, %v7733_v57 }
0x1967   :  { %v2786_v55 = vpop.permute.xlu0 %2785  ;;  %7749 = vst.msk [vmem:[#allocation5 + $0x1f] sm:$0x1] %vm835_vm14, %v7734_v44 }
0x1968   :  { %2805 = vst.msk [vmem:[#allocation4 + $0x24] sm:$0x1] %vm910_vm9, %v2786_v55  ;;  %v14481_v55 = vld [vmem:[#allocation4 + $0x10] sm:$0xff] }
0x1969   :  { %3355 = vst.msk [vmem:[#allocation4 + $0x24] sm:$0x1] %vm835_vm14, %v3340_v49  ;;  %v3406_v15 = vpop.permute.xlu1 %3405 }
0x196a   :  { %3424 = vst.msk [vmem:[#allocation4 + $0x2b] sm:$0x1] %vm910_vm9, %v3406_v15 }
0x196d   :  { %4023 = vrot.lane.b32.xlu2 %v4010_v7, %s9532_s27 }
0x196f   :  { %v4638_v62 = vpop.permute.xlu0 %4637 }
0x1970   :  { %4658 = vst.msk [vmem:[#allocation4 + $0x19] sm:$0x1] %vm910_vm9, %v4638_v62 }
0x1971   :  { %v5212_v47 = vpop.permute.xlu1 %5211 }
0x1972   :  { %5230 = vst.msk [vmem:[#allocation4 + $0x28] sm:$0x1] %vm910_vm9, %v5212_v47 }
0x1975   :  { %2161 = vrot.lane.b32.xlu2 %v2146_v6, %s9532_s27 }
0x1977   :  { %v2788_v21 = vpop.permute.xlu0 %2787 }
0x1978   :  { %2806 = vst.msk [vmem:[#allocation4 + $0x2c] sm:$0x1] %vm910_vm9, %v2788_v21 }
0x1979   :  { %3356 = vst.msk [vmem:[#allocation4 + $0x2c] sm:$0x1] %vm835_vm14, %v3341_v53  ;;  %v3408_v56 = vpop.permute.xlu1 %3407 }
0x197a   :  { %3425 = vst.msk [vmem:[#allocation4 + $0x33] sm:$0x1] %vm910_vm9, %v3408_v56 }
0x197d   :  { %4025 = vrot.lane.b32.xlu2 %v4011_v51, %s9532_s27 }
0x197f   :  { %v4640_v41 = vpop.permute.xlu0 %4639 }
0x1980   :  { %4659 = vst.msk [vmem:[#allocation4 + $0x21] sm:$0x1] %vm910_vm9, %v4640_v41 }
0x1987   :  { %v2790_v48 = vpop.permute.xlu0 %2789 }
0x1988   :  { %2807 = vst.msk [vmem:[#allocation4 + $0x34] sm:$0x1] %vm910_vm9, %v2790_v48 }
0x1989   :  { %3357 = vst.msk [vmem:[#allocation4 + $0x34] sm:$0x1] %vm835_vm14, %v3342_v5 }
0x198f   :  { %v4642_v46 = vpop.permute.xlu0 %4641 }
0x1990   :  { %4660 = vst.msk [vmem:[#allocation4 + $0x29] sm:$0x1] %vm910_vm9, %v4642_v46 }
0x1997   :  { %v2792_v18 = vpop.permute.xlu0 %2791 }
0x1998   :  { %2808 = vst.msk [vmem:[#allocation4 + $0x3c] sm:$0x1] %vm910_vm9, %v2792_v18 }
0x1999   :  { %3358 = vst.msk [vmem:[#allocation4 + $0x3c] sm:$0x1] %vm835_vm14, %v3343_v43 }
0x19bf   :  { %v7767_v27 = vpop.permute.xlu2 %7766 }
0x19c0   :  { %v7769_v13 = vsel %vm5884_vm2, %v7767_v27, 0.0 }
0x19c1   :  { %v7778_v4 = vperm.slane %v7769_v13, 0  ;;  %v7772_v54 = vrot.slane %v7769_v13, 2  ;;  %v7771_v3 = vrot.slane %v7769_v13, 1  ;;  %v7773_v61 = vrot.slane %v7769_v13, 3 }
0x19c2   :  { %v7775_v24 = vrot.slane %v7769_v13, 5  ;;  %v7774_v28 = vrot.slane %v7769_v13, 4  ;;  %v7776_v20 = vrot.slane %v7769_v13, 6  ;;  %v7777_v60 = vrot.slane %v7769_v13, 7 }
0x19c3   :  { %7786 = vrot.lane.b32.xlu0 %v7778_v4, %s9532_s27  ;;  %v7780_v16 = vperm.slane %v7772_v54, 0  ;;  %v7779_v52 = vperm.slane %v7771_v3, 0  ;;  %v7781_v30 = vperm.slane %v7773_v61, 0 }
0x19c4   :  { %v7783_v34 = vperm.slane %v7775_v24, 0  ;;  %v7782_v19 = vperm.slane %v7774_v28, 0  ;;  %v7784_v31 = vperm.slane %v7776_v20, 0  ;;  %v7785_v8 = vperm.slane %v7777_v60, 0 }
0x19c5   :  { %7790 = vrot.lane.b32.xlu2 %v7780_v16, %s9532_s27  ;;  %7788 = vrot.lane.b32.xlu1 %v7779_v52, %s9532_s27 }
0x19c7   :  { %v4024_v39 = vpop.permute.xlu2 %4023 }
0x19c8   :  { %4042 = vst.msk [vmem:[#allocation4 + $0x2a] sm:$0x1] %vm910_vm9, %v4024_v39 }
0x19cb   :  { %7792 = vrot.lane.b32.xlu0 %v7781_v30, %s9532_s27 }
0x19cd   :  { %7796 = vrot.lane.b32.xlu2 %v7783_v34, %s9532_s27  ;;  %7794 = vrot.lane.b32.xlu1 %v7782_v19, %s9532_s27 }
0x19cf   :  { %v2162_v26 = vpop.permute.xlu2 %2161 }
0x19d0   :  { %2178 = vst.msk [vmem:[#allocation4 + $0x3d] sm:$0x1] %vm910_vm9, %v2162_v26 }
0x19d1   :  { %3976 = vst.msk [vmem:[#allocation4 + $0x3d] sm:$0x1] %vm835_vm14, %v3961_v59 }
0x19d3   :  { %7798 = vrot.lane.b32.xlu0 %v7784_v31, %s9532_s27 }
0x19d5   :  { %7800 = vrot.lane.b32.xlu2 %v7785_v8, %s9532_s27  ;;  %5213 = vrot.lane.b32.xlu1 %v5199_v25, %s9532_s27 }
0x19d7   :  { %v4026_v0 = vpop.permute.xlu2 %4025 }
0x19d8   :  { %4043 = vst.msk [vmem:[#allocation4 + $0x32] sm:$0x1] %vm910_vm9, %v4026_v0 }
0x19db   :  { %4643 = vrot.lane.b32.xlu0 %v4629_v23, %s9532_s27 }
0x19dd   :  { %3409 = vrot.lane.b32.xlu2 %v3394_v50, %s9532_s27  ;;  %4645 = vrot.lane.b32.xlu1 %v4630_v45, %s9532_s27  ;;  %v14502_v45 = vld [vmem:[#allocation4 + $0x8] sm:$0xff] }
0x19e3   :  { %4027 = vrot.lane.b32.xlu0 %v4012_v10, %s9532_s27 }
0x19e5   :  { %5215 = vrot.lane.b32.xlu2 %v5200_v9, %s9532_s27 }
0x1a1f   :  { %v7791_v38 = vpop.permute.xlu2 %7790 }
0x1a20   :  { %7812 = vst.msk [vmem:[#allocation5 + $0x8] sm:$0x1] %vm910_vm9, %v7791_v38 }
0x1a27   :  { %v7797_v29 = vpop.permute.xlu2 %7796  ;;  %v7828_v32 = vld [vmem:[#allocation5 + $0x8] sm:$0xf] }
0x1a28   :  { %7815 = vst.msk [vmem:[#allocation5 + $0x14] sm:$0x1] %vm910_vm9, %v7797_v29  ;;  %v7849_v35 = vsel %vm7834_vm15, %v7828_v32, 0.0 }
0x1a29   :  { %v7850_v22 = vrot.slane %v7849_v35, 4 }
0x1a2b   :  { %v7851_v17 = vadd.f32 %v7850_v22, %v7849_v35 }
0x1a2d   :  { %v7852_v37 = vrot.slane %v7851_v17, 2 }
0x1a2f   :  { %v7801_v36 = vpop.permute.xlu2 %7800  ;;  %v7853_v33 = vadd.f32 %v7852_v37, %v7851_v17  ;;  %v7831_v57 = vld [vmem:[#allocation5 + $0x14] sm:$0xf] }
0x1a30   :  { %7817 = vst.msk [vmem:[#allocation5 + $0x1c] sm:$0x1] %vm910_vm9, %v7801_v36  ;;  %v7870_v47 = vsel %vm7834_vm15, %v7831_v57, 0.0 }
0x1a31   :  { %v7854_v1 = vrot.slane %v7853_v33, 1  ;;  %v7871_v6 = vrot.slane %v7870_v47, 4 }
0x1a33   :  { %v7855_v49 = vadd.f32 %v7854_v1, %v7853_v33  ;;  %v7872_v56 = vadd.f32 %v7871_v6, %v7870_v47 }
0x1a35   :  { %v7787_v44 = vpop.permute.xlu0 %7786  ;;  %v7893_v15 = vmul.f32 %v7855_v49, %v14481_v55  ;;  %v7873_v27 = vrot.slane %v7872_v56, 2 }
0x1a36   :  { %7810 = vst.msk [vmem:[#allocation5] sm:$0x1] %vm910_vm9, %v7787_v44 }
0x1a37   :  { %v7789_v7 = vpop.permute.xlu1 %7788  ;;  %v3410_v58 = vpop.permute.xlu2 %3409  ;;  %v7905_v62 = vsel %vm203_vm0, %v7893_v15, 0.0  ;;  %v7833_v13 = vld [vmem:[#allocation5 + $0x1c] sm:$0xf]  ;;  %v7874_v28 = vadd.f32 %v7873_v27, %v7872_v56 }
0x1a38   :  { %7811 = vst.msk [vmem:[#allocation5 + $0x4] sm:$0x1] %vm910_vm9, %v7789_v7  ;;  %7906 = vadd.xlane.f32.xlu2 %v7905_v62  ;;  %v7884_v39 = vsel %vm7834_vm15, %v7833_v13, 0.0  ;;  %v14510_v7 = vld [vmem:[#allocation4 + $0x18] sm:$0xff] }
0x1a39   :  { %3426 = vst.msk [vmem:[#allocation4 + $0x3b] sm:$0x1] %vm910_vm9, %v3410_v58  ;;  %v7885_v60 = vrot.slane %v7884_v39, 4  ;;  %v7875_v0 = vrot.slane %v7874_v28, 1  ;;  %v14512_v58 = vld [vmem:[#allocation4 + $0x28] sm:$0xff] }
0x1a3b   :  { %v7886_v42 = vadd.f32 %v7885_v60, %v7884_v39  ;;  %v7876_v35 = vadd.f32 %v7875_v0, %v7874_v28 }
0x1a3d   :  { %v7793_v40 = vpop.permute.xlu0 %7792  ;;  %v7826_v53 = vld [vmem:[#allocation5] sm:$0xf]  ;;  %v7887_v49 = vrot.slane %v7886_v42, 2  ;;  %v7896_v47 = vmul.f32 %v7876_v35, %v14512_v58 }
0x1a3e   :  { %7813 = vst.msk [vmem:[#allocation5 + $0xc] sm:$0x1] %vm910_vm9, %v7793_v40  ;;  %v7835_v21 = vsel %vm7834_vm15, %v7826_v53, 0.0  ;;  %v14516_v53 = vld [vmem:[#allocation4 + $0x20] sm:$0xff] }
0x1a3f   :  { %v7795_v51 = vpop.permute.xlu1 %7794  ;;  %v5216_v41 = vpop.permute.xlu2 %5215  ;;  %v7836_v5 = vrot.slane %v7835_v21, 4  ;;  %v7827_v48 = vld [vmem:[#allocation5 + $0x4] sm:$0xf] }
0x1a40   :  { %7814 = vst.msk [vmem:[#allocation5 + $0x10] sm:$0x1] %vm910_vm9, %v7795_v51  ;;  %v7842_v46 = vsel %vm7834_vm15, %v7827_v48, 0.0  ;;  %v7914_v48 = vsel %vm203_vm0, %v7896_v47, 0.0 }
0x1a41   :  { %5232 = vst.msk [vmem:[#allocation4 + $0x38] sm:$0x1] %vm910_vm9, %v5216_v41  ;;  %v7837_v43 = vadd.f32 %v7836_v5, %v7835_v21  ;;  %v7843_v18 = vrot.slane %v7842_v46, 4  ;;  %v7888_v21 = vadd.f32 %v7887_v49, %v7886_v42 }
0x1a43   :  { %v7838_v4 = vrot.slane %v7837_v43, 2  ;;  %v7844_v54 = vadd.f32 %v7843_v18, %v7842_v46  ;;  %v7889_v18 = vrot.slane %v7888_v21, 1 }
0x1a45   :  { %v7799_v3 = vpop.permute.xlu0 %7798  ;;  %v7839_v16 = vadd.f32 %v7838_v4, %v7837_v43  ;;  %v7845_v52 = vrot.slane %v7844_v54, 2  ;;  %v7829_v61 = vld [vmem:[#allocation5 + $0xc] sm:$0xf] }
0x1a46   :  { %7816 = vst.msk [vmem:[#allocation5 + $0x18] sm:$0x1] %vm910_vm9, %v7799_v3  ;;  %v7856_v24 = vsel %vm7834_vm15, %v7829_v61, 0.0 }
0x1a47   :  { %v5214_v30 = vpop.permute.xlu1 %5213  ;;  %v7840_v34 = vrot.slane %v7839_v16, 1  ;;  %v7846_v19 = vadd.f32 %v7845_v52, %v7844_v54  ;;  %v7857_v20 = vrot.slane %v7856_v24, 4  ;;  %v7830_v59 = vld [vmem:[#allocation5 + $0x10] sm:$0xf]  ;;  %v7890_v54 = vadd.f32 %v7889_v18, %v7888_v21 }
0x1a48   :  { %5231 = vst.msk [vmem:[#allocation4 + $0x30] sm:$0x1] %vm910_vm9, %v5214_v30  ;;  %v7863_v26 = vsel %vm7834_vm15, %v7830_v59, 0.0 }
0x1a49   :  { %v7841_v11 = vadd.f32 %v7840_v34, %v7839_v16  ;;  %v7847_v31 = vrot.slane %v7846_v19, 1  ;;  %v7858_v8 = vadd.f32 %v7857_v20, %v7856_v24  ;;  %v7864_v25 = vrot.slane %v7863_v26, 4 }
0x1a4b   :  { %v7891_v2 = vmul.f32 %v7841_v11, %v14499_v14  ;;  %v7848_v63 = vadd.f32 %v7847_v31, %v7846_v19  ;;  %v7859_v23 = vrot.slane %v7858_v8, 2  ;;  %v7865_v50 = vadd.f32 %v7864_v25, %v7863_v26 }
0x1a4d   :  { %v4644_v12 = vpop.permute.xlu0 %4643  ;;  %v7899_v10 = vsel %vm203_vm0, %v7891_v2, 0.0  ;;  %v7892_v9 = vmul.f32 %v7848_v63, %v14502_v45  ;;  %v7860_v38 = vadd.f32 %v7859_v23, %v7858_v8  ;;  %v7866_v29 = vrot.slane %v7865_v50, 2  ;;  %v7832_v32 = vld [vmem:[#allocation5 + $0x18] sm:$0xf] }
0x1a4e   :  { %4661 = vst.msk [vmem:[#allocation4 + $0x31] sm:$0x1] %vm910_vm9, %v4644_v12  ;;  %7900 = vadd.xlane.f32.xlu0 %v7899_v10  ;;  %v7877_v22 = vsel %vm7834_vm15, %v7832_v32, 0.0 }
0x1a4f   :  { %v4646_v17 = vpop.permute.xlu1 %4645  ;;  %v7902_v37 = vsel %vm203_vm0, %v7892_v9, 0.0  ;;  %v7861_v36 = vrot.slane %v7860_v38, 1  ;;  %v7867_v33 = vadd.f32 %v7866_v29, %v7865_v50  ;;  %v7878_v1 = vrot.slane %v7877_v22, 4 }
0x1a50   :  { %4662 = vst.msk [vmem:[#allocation4 + $0x39] sm:$0x1] %vm910_vm9, %v4646_v17  ;;  %7903 = vadd.xlane.f32.xlu1 %v7902_v37 }
0x1a51   :  { %v7862_v57 = vadd.f32 %v7861_v36, %v7860_v38  ;;  %v7868_v44 = vrot.slane %v7867_v33, 1  ;;  %v7879_v15 = vadd.f32 %v7878_v1, %v7877_v22 }
0x1a53   :  { %v7894_v62 = vmul.f32 %v7862_v57, %v14510_v7  ;;  %v7869_v6 = vadd.f32 %v7868_v44, %v7867_v33  ;;  %v7880_v40 = vrot.slane %v7879_v15, 2 }
0x1a55   :  { %v4028_v56 = vpop.permute.xlu0 %4027  ;;  %v7908_v51 = vsel %vm203_vm0, %v7894_v62, 0.0  ;;  %v7895_v41 = vmul.f32 %v7869_v6, %v14516_v53  ;;  %v7881_v5 = vadd.f32 %v7880_v40, %v7879_v15  ;;  %v14523_v13 = vld [vmem:[#allocation4 + $0x30] sm:$0xff] }
0x1a56   :  { %4044 = vst.msk [vmem:[#allocation4 + $0x3a] sm:$0x1] %vm910_vm9, %v4028_v56  ;;  %7909 = vadd.xlane.f32.xlu2 %v7908_v51 }
0x1a57   :  { %v7911_v46 = vsel %vm203_vm0, %v7895_v41, 0.0  ;;  %v7882_v43 = vrot.slane %v7881_v5, 1 }
0x1a58   :  { %7915 = vadd.xlane.f32.xlu1 %v7914_v48  ;;  %7912 = vadd.xlane.f32.xlu0 %v7911_v46 }
0x1a59   :  { %v7883_v27 = vadd.f32 %v7882_v43, %v7881_v5 }
0x1a5b   :  { %v7897_v4 = vmul.f32 %v7883_v27, %v14523_v13 }
0x1a5d   :  { %v7917_v3 = vsel %vm203_vm0, %v7897_v4, 0.0  ;;  %v14527_v16 = vld [vmem:[#allocation4 + $0x38] sm:$0xff] }
0x1a5e   :  { %7918 = vadd.xlane.f32.xlu2 %v7917_v3  ;;  %v7898_v52 = vmul.f32 %v7890_v54, %v14527_v16 }
0x1a60   :  { %v7920_v61 = vsel %vm203_vm0, %v7898_v52, 0.0 }
0x1a61   :  { %7921 = vadd.xlane.f32.xlu0 %v7920_v61 }
0x1aab   :  { %v7907_v39 = vpop.xlane.xlu2 %7906 }
0x1aac   :  { %v7935_v24 = vrot.slane %v7907_v39, 4 }
0x1aae   :  { %v7936_v28 = vmax.f32 %v7907_v39, %v7935_v24 }
0x1ab0   :  { %v7937_v30 = vrot.slane %v7936_v28, 2 }
0x1ab2   :  { %v7938_v34 = vmax.f32 %v7936_v28, %v7937_v30 }
0x1ab4   :  { %v7939_v19 = vrot.slane %v7938_v34, 1 }
0x1ab6   :  { %v7940_v20 = vmax.f32 %v7938_v34, %v7939_v19 }
0x1ab8   :  { %v7973_v59 = vsub.f32 %v7907_v39, %v7940_v20 }
0x1aba   :  { %v7983_v26 = vmul.f32 1.442695, %v7973_v59 }
0x1abc   :  { %9319 = vpow2.f32 %v7983_v26 }
0x1ac1   :  { %v7901_v31 = vpop.xlane.xlu0 %7900 }
0x1ac2   :  { %v14531_v60 = vpop.eup %9319  ;;  %v7923_v8 = vrot.slane %v7901_v31, 4 }
0x1ac3   :  { %v8007_v11 = vrot.slane %v14531_v60, 4  ;;  %v7904_v0 = vpop.xlane.xlu1 %7903 }
0x1ac4   :  { %v7924_v2 = vmax.f32 %v7901_v31, %v7923_v8  ;;  %v7929_v63 = vrot.slane %v7904_v0, 4 }
0x1ac5   :  { %v8008_v25 = vadd.f32 %v14531_v60, %v8007_v11 }
0x1ac6   :  { %v7925_v50 = vrot.slane %v7924_v2, 2  ;;  %v7930_v42 = vmax.f32 %v7904_v0, %v7929_v63 }
0x1ac7   :  { %v8009_v23 = vrot.slane %v8008_v25, 2 }
0x1ac8   :  { %v7926_v10 = vmax.f32 %v7924_v2, %v7925_v50  ;;  %v7931_v9 = vrot.slane %v7930_v42, 2 }
0x1ac9   :  { %v8010_v12 = vadd.f32 %v8009_v23, %v8008_v25  ;;  %v7910_v29 = vpop.xlane.xlu2 %7909 }
0x1aca   :  { %v7927_v32 = vrot.slane %v7926_v10, 1  ;;  %v7932_v35 = vmax.f32 %v7930_v42, %v7931_v9  ;;  %v7941_v22 = vrot.slane %v7910_v29, 4 }
0x1acb   :  { %v8011_v38 = vrot.slane %v8010_v12, 1  ;;  %v7916_v37 = vpop.xlane.xlu1 %7915  ;;  %v7913_v36 = vpop.xlane.xlu0 %7912 }
0x1acc   :  { %v7928_v33 = vmax.f32 %v7926_v10, %v7927_v32  ;;  %v7933_v1 = vrot.slane %v7932_v35, 1  ;;  %v7942_v49 = vmax.f32 %v7910_v29, %v7941_v22  ;;  %v7953_v57 = vrot.slane %v7916_v37, 4 }
0x1acd   :  { %v14535_v17 = vadd.f32 %v8011_v38, %v8010_v12  ;;  %v7947_v6 = vrot.slane %v7913_v36, 4 }
0x1ace   :  { %v7971_v44 = vsub.f32 %v7901_v31, %v7928_v33  ;;  %v7934_v15 = vmax.f32 %v7932_v35, %v7933_v1  ;;  %v7943_v62 = vrot.slane %v7942_v49, 2  ;;  %v7954_v47 = vmax.f32 %v7916_v37, %v7953_v57 }
0x1acf   :  { %9321 = vrcp.f32 %v14535_v17  ;;  %v7948_v41 = vmax.f32 %v7913_v36, %v7947_v6  ;;  %vm8078_vm9 = vweird.f32 %v14535_v17 }
0x1ad0   :  { %v7979_v40 = vmul.f32 1.442695, %v7971_v44  ;;  %v7972_v21 = vsub.f32 %v7904_v0, %v7934_v15  ;;  %v7944_v56 = vmax.f32 %v7942_v49, %v7943_v62  ;;  %v7955_v51 = vrot.slane %v7954_v47, 2 }
0x1ad1   :  { %v7919_v5 = vpop.xlane.xlu2 %7918  ;;  %v7949_v18 = vrot.slane %v7948_v41, 2 }
0x1ad2   :  { %9323 = vpow2.f32 %v7979_v40  ;;  %v7981_v48 = vmul.f32 1.442695, %v7972_v21  ;;  %v7945_v46 = vrot.slane %v7944_v56, 1  ;;  %v7956_v43 = vmax.f32 %v7954_v47, %v7955_v51 }
0x1ad3   :  { %v7959_v27 = vrot.slane %v7919_v5, 4  ;;  %v7950_v61 = vmax.f32 %v7948_v41, %v7949_v18 }
0x1ad4   :  { %9325 = vpow2.f32 %v7981_v48  ;;  %v7946_v4 = vmax.f32 %v7944_v56, %v7945_v46  ;;  %v7922_v54 = vpop.xlane.xlu0 %7921  ;;  %v7957_v52 = vrot.slane %v7956_v43, 1 }
0x1ad5   :  { %v14538_v3 = vpop.eup %9321  ;;  %v7960_v39 = vmax.f32 %v7919_v5, %v7959_v27  ;;  %v7965_v24 = vrot.slane %v7922_v54, 4  ;;  %v7951_v34 = vrot.slane %v7950_v61, 1  ;;  %v8082_v27 = vand.u32 2147483647, %v14535_v17 }
0x1ad6   :  { %v7974_v28 = vsub.f32 %v7910_v29, %v7946_v4  ;;  %v7958_v30 = vmax.f32 %v7956_v43, %v7957_v52  ;;  %v8074_v26 = vmul.f32 %v14538_v3, %v14535_v17  ;;  %vm8079_vm14 = vweird.f32 %v14538_v3 }
0x1ad7   :  { %v7961_v19 = vrot.slane %v7960_v39, 2  ;;  %v7966_v20 = vmax.f32 %v7922_v54, %v7965_v24  ;;  %v7952_v25 = vmax.f32 %v7950_v61, %v7951_v34  ;;  %v8084_v43 = vand.u32 2147483648, %v14535_v17  ;;  %vm8080_vm10 = vmor %vm8078_vm9, %vm8079_vm14 }
0x1ad8   :  { %v14540_v59 = vpop.eup %9323  ;;  %v7985_v11 = vmul.f32 1.442695, %v7974_v28  ;;  %v7976_v8 = vsub.f32 %v7916_v37, %v7958_v30  ;;  %v8075_v10 = vsub.f32 1.0, %v8074_v26  ;;  %vm8083_vm7 = vcmp.eq.f32.partialorder %v8082_v27, 8.507059e+37 }
0x1ad9   :  { %v7995_v31 = vrot.slane %v14540_v59, 4  ;;  %v7962_v0 = vmax.f32 %v7960_v39, %v7961_v19  ;;  %v7967_v63 = vrot.slane %v7966_v20, 2  ;;  %v7975_v12 = vsub.f32 %v7913_v36, %v7952_v25 }
0x1ada   :  { %v14545_v2 = vpop.eup %9325  ;;  %9327 = vpow2.f32 %v7985_v11  ;;  %v7989_v42 = vmul.f32 1.442695, %v7976_v8  ;;  %v8076_v57 = vmul.f32 %v14538_v3, %v8075_v10  ;;  %v8085_v24 = vor.u32 1.1754944e-38, %v8084_v43 }
0x1adb   :  { %v7996_v23 = vadd.f32 %v14540_v59, %v7995_v31  ;;  %v8001_v50 = vrot.slane %v14545_v2, 4  ;;  %v7963_v9 = vrot.slane %v7962_v0, 1  ;;  %v7968_v38 = vmax.f32 %v7966_v20, %v7967_v63 }
0x1adc   :  { %9329 = vpow2.f32 %v7989_v42  ;;  %v7987_v35 = vmul.f32 1.442695, %v7975_v12  ;;  %v8077_v48 = vadd.f32 %v14538_v3, %v8076_v57 }
0x1add   :  { %v7997_v29 = vrot.slane %v7996_v23, 2  ;;  %v8002_v32 = vadd.f32 %v14545_v2, %v8001_v50  ;;  %v7964_v22 = vmax.f32 %v7962_v0, %v7963_v9  ;;  %v7969_v37 = vrot.slane %v7968_v38, 1 }
0x1ade   :  { %9331 = vpow2.f32 %v7987_v35  ;;  %v8081_v39 = vsel %vm8080_vm10, %v14538_v3, %v8077_v48 }
0x1adf   :  { %v7998_v33 = vadd.f32 %v7997_v29, %v7996_v23  ;;  %v8003_v1 = vrot.slane %v8002_v32, 2  ;;  %v7977_v44 = vsub.f32 %v7919_v5, %v7964_v22  ;;  %v7970_v15 = vmax.f32 %v7968_v38, %v7969_v37 }
0x1ae0   :  { %v14550_v49 = vpop.eup %9327  ;;  %v8086_v20 = vsel %vm8083_vm7, %v8085_v24, %v8081_v39 }
0x1ae1   :  { %v7999_v36 = vrot.slane %v7998_v33, 1  ;;  %v8004_v62 = vadd.f32 %v8003_v1, %v8002_v32  ;;  %v8013_v47 = vrot.slane %v14550_v49, 4  ;;  %v7991_v6 = vmul.f32 1.442695, %v7977_v44 }
0x1ae2   :  { %v7978_v40 = vsub.f32 %v7922_v54, %v7970_v15  ;;  %v14554_v21 = vpop.eup %9329  ;;  %v8087_v42 = vmul.f32 %v14531_v60, %v8086_v20 }
0x1ae3   :  { %v14557_v56 = vadd.f32 %v7999_v36, %v7998_v33  ;;  %v8005_v51 = vrot.slane %v8004_v62, 1  ;;  %v8014_v41 = vadd.f32 %v14550_v49, %v8013_v47  ;;  %v8025_v5 = vrot.slane %v14554_v21, 4 }
0x1ae4   :  { %9333 = vpow2.f32 %v7991_v6  ;;  %v7993_v46 = vmul.f32 1.442695, %v7978_v40  ;;  %v14565_v18 = vpop.eup %9331  ;;  %v8165_v15 = vmul.f32 %v8087_v42, %v14481_v55 }
0x1ae5   :  { %9335 = vrcp.f32 %v14557_v56  ;;  %v8006_v4 = vadd.f32 %v8005_v51, %v8004_v62  ;;  %v8015_v54 = vrot.slane %v8014_v41, 2  ;;  %v8026_v52 = vadd.f32 %v14554_v21, %v8025_v5 }
0x1ae6   :  { %v8019_v61 = vrot.slane %v14565_v18, 4  ;;  %9337 = vpow2.f32 %v7993_v46  ;;  %vm8048_vm2 = vweird.f32 %v14557_v56  ;;  %v8052_v9 = vand.u32 2147483647, %v14557_v56 }
0x1ae7   :  { %9339 = vrcp.f32 %v8006_v4  ;;  %v8016_v28 = vadd.f32 %v8015_v54, %v8014_v41  ;;  %v8027_v30 = vrot.slane %v8026_v52, 2  ;;  %v8054_v22 = vand.u32 2147483648, %v14557_v56 }
0x1ae8   :  { %v8020_v34 = vadd.f32 %v14565_v18, %v8019_v61  ;;  %v8067_v57 = vand.u32 2147483647, %v8006_v4  ;;  %v8069_v44 = vand.u32 2147483648, %v8006_v4  ;;  %vm8053_vm1 = vcmp.eq.f32.partialorder %v8052_v9, 8.507059e+37 }
0x1ae9   :  { %v8017_v26 = vrot.slane %v8016_v28, 1  ;;  %v8028_v11 = vadd.f32 %v8027_v30, %v8026_v52  ;;  %v8055_v48 = vor.u32 1.1754944e-38, %v8054_v22  ;;  %vm8063_vm6 = vweird.f32 %v8006_v4  ;;  %v8234_v52 = vld [vmem:[%s14710_s10 + $0x38] sm:$0xff] }
0x1aea   :  { %v14574_v19 = vpop.eup %9333  ;;  %v8021_v31 = vrot.slane %v8020_v34, 2  ;;  %vm8068_vm5 = vcmp.eq.f32.partialorder %v8067_v57, 8.507059e+37  ;;  %8265 = vmatpush.msrb.mxu0 %v8234_v52  ;;  %v8229_v57 = vld [vmem:[%s14710_s10 + $0x10] sm:$0xff] }
0x1aeb   :  { %v9336_v17 = vpop.eup %9335  ;;  %v8031_v25 = vrot.slane %v14574_v19, 4  ;;  %v14580_v3 = vadd.f32 %v8017_v26, %v8016_v28  ;;  %v8029_v63 = vrot.slane %v8028_v11, 1 }
0x1aec   :  { %v8044_v8 = vmul.f32 %v9336_v17, %v14557_v56  ;;  %v14578_v0 = vpop.eup %9337  ;;  %v8022_v23 = vadd.f32 %v8021_v31, %v8020_v34  ;;  %vm8049_vm13 = vweird.f32 %v9336_v17  ;;  %v8070_v56 = vor.u32 1.1754944e-38, %v8069_v44 }
0x1aed   :  { %v9340_v50 = vpop.eup %9339  ;;  %v8032_v10 = vadd.f32 %v14574_v19, %v8031_v25  ;;  %9341 = vrcp.f32 %v14580_v3  ;;  %v14587_v32 = vadd.f32 %v8029_v63, %v8028_v11  ;;  %v8037_v35 = vrot.slane %v14578_v0, 4  ;;  %vm14595_vm12 = vmor %vm8048_vm2, %vm8049_vm13  ;;  %v8232_v11 = vld [vmem:[%s14710_s10 + $0x28] sm:$0xff] }
0x1aee   :  { %v8045_v12 = vsub.f32 1.0, %v8044_v8  ;;  %v8059_v38 = vmul.f32 %v9340_v50, %v8006_v4  ;;  %v8023_v60 = vrot.slane %v8022_v23, 1  ;;  %vm8064_vm11 = vweird.f32 %v9340_v50  ;;  %v8233_v4 = vld [vmem:[%s14710_s10 + $0x30] sm:$0xff] }
0x1aef   :  { %v8033_v33 = vrot.slane %v8032_v10, 2  ;;  %9343 = vrcp.f32 %v14587_v32  ;;  %v8038_v51 = vadd.f32 %v14578_v0, %v8037_v35  ;;  %vm8065_vm4 = vmor %vm8063_vm6, %vm8064_vm11  ;;  %v8097_v27 = vand.u32 2147483647, %v14580_v3  ;;  %8266 = vmatpush.msrb.mxu0 %v8233_v4 }
0x1af0   :  { %v8046_v29 = vmul.f32 %v9336_v17, %v8045_v12  ;;  %v8060_v37 = vsub.f32 1.0, %v8059_v38  ;;  %v14601_v6 = vadd.f32 %v8023_v60, %v8022_v23  ;;  %v8099_v54 = vand.u32 2147483648, %v14580_v3 }
0x1af1   :  { %v8034_v40 = vadd.f32 %v8033_v33, %v8032_v10  ;;  %v8039_v30 = vrot.slane %v8038_v51, 2  ;;  %v14615_v34 = vsel %vm203_vm0, %v8165_v15, 0.0  ;;  %v8127_v26 = vand.u32 2147483647, %v14587_v32  ;;  %8267 = vmatpush.msrb.mxu0 %v8232_v11 }
0x1af2   :  { %v8047_v1 = vadd.f32 %v9336_v17, %v8046_v29  ;;  %v8061_v62 = vmul.f32 %v9340_v50, %v8060_v37  ;;  %9345 = vrcp.f32 %v14601_v6  ;;  %vm8093_vm15 = vweird.f32 %v14580_v3  ;;  %v8230_v29 = vld [vmem:[%s14710_s10 + $0x18] sm:$0xff] }
0x1af3   :  { %v9342_v41 = vpop.eup %9341  ;;  %v8035_v28 = vrot.slane %v8034_v40, 1  ;;  %vm14627_vm14 = vcmp.eq.f32.partialorder %v8097_v27, 8.507059e+37  ;;  %v8129_v23 = vand.u32 2147483648, %v14587_v32  ;;  %v8100_v12 = vor.u32 1.1754944e-38, %v8099_v54 }
0x1af4   :  { %v8051_v47 = vsel %vm14595_vm12, %v9336_v17, %v8047_v1  ;;  %v8062_v55 = vadd.f32 %v9340_v50, %v8061_v62  ;;  %v8089_v5 = vmul.f32 %v9342_v41, %v14580_v3  ;;  %vm8094_vm8 = vweird.f32 %v9342_v41 }
0x1af5   :  { %v8056_v46 = vsel %vm8053_vm1, %v8055_v48, %v8051_v47  ;;  %v9344_v61 = vpop.eup %9343  ;;  %v14624_v25 = vadd.f32 %v8035_v28, %v8034_v40  ;;  %v8040_v10 = vadd.f32 %v8039_v30, %v8038_v51  ;;  %vm8095_vm9 = vmor %vm8093_vm15, %vm8094_vm8  ;;  %vm8123_vm7 = vweird.f32 %v14587_v32  ;;  %v8228_v40 = vld [vmem:[%s14710_s10 + $0x8] sm:$0xff] }
0x1af6   :  { %v8066_v43 = vsel %vm8065_vm4, %v9340_v50, %v8062_v55  ;;  %v8090_v24 = vsub.f32 1.0, %v8089_v5  ;;  %v8119_v20 = vmul.f32 %v9344_v61, %v14587_v32  ;;  %v8057_v31 = vmul.f32 %v14540_v59, %v8056_v46  ;;  %v8231_v50 = vld [vmem:[%s14710_s10 + $0x20] sm:$0xff] }
0x1af7   :  { %v8071_v39 = vsel %vm8068_vm5, %v8070_v56, %v8066_v43  ;;  %9347 = vrcp.f32 %v14624_v25  ;;  %vm8124_vm10 = vweird.f32 %v9344_v61  ;;  %vm14644_vm2 = vcmp.eq.f32.partialorder %v8127_v26, 8.507059e+37  ;;  %8268 = vmatpush.msrb.mxu0 %v8231_v50  ;;  %v8227_v43 = vld [vmem:[%s14710_s10] sm:$0xff] }
0x1af8   :  { %v8072_v17 = vmul.f32 %v14545_v2, %v8071_v39  ;;  %v8091_v8 = vmul.f32 %v9342_v41, %v8090_v24  ;;  %v8120_v2 = vsub.f32 1.0, %v8119_v20  ;;  %v9346_v42 = vpop.eup %9345  ;;  %v8163_v35 = vmul.f32 %v8057_v31, %v14499_v14  ;;  %vm8125_vm13 = vmor %vm8123_vm7, %vm8124_vm10 }
0x1af9   :  { %v8104_v38 = vmul.f32 %v9346_v42, %v14601_v6  ;;  %v8130_v33 = vor.u32 1.1754944e-38, %v8129_v23  ;;  %v8112_v32 = vand.u32 2147483647, %v14601_v6  ;;  %v8114_v44 = vand.u32 2147483648, %v14601_v6  ;;  %8269 = vmatpush.msrb.mxu0 %v8230_v29 }
0x1afa   :  { %v8092_v59 = vadd.f32 %v9342_v41, %v8091_v8  ;;  %v8164_v3 = vmul.f32 %v8072_v17, %v14502_v45  ;;  %v8121_v9 = vmul.f32 %v9344_v61, %v8120_v2  ;;  %v8041_v15 = vrot.slane %v8040_v10, 1 }
0x1afb   :  { %v8105_v1 = vsub.f32 1.0, %v8104_v38  ;;  %vm8109_vm12 = vweird.f32 %v9346_v42  ;;  %8270 = vmatpush.msrb.mxu0 %v8229_v57  ;;  %vm8108_vm11 = vweird.f32 %v14601_v6  ;;  %vm8113_vm6 = vcmp.eq.f32.partialorder %v8112_v32, 8.507059e+37 }
0x1afc   :  { %v8096_v22 = vsel %vm8095_vm9, %v9342_v41, %v8092_v59  ;;  %v8122_v60 = vadd.f32 %v9344_v61, %v8121_v9  ;;  %v8178_v36 = vsel %vm203_vm0, %v8164_v3, 0.0  ;;  %v8186_v41 = vrot.slane %v14615_v34, 4  ;;  %vm8110_vm1 = vmor %vm8108_vm11, %vm8109_vm12 }
0x1afd   :  { %v8101_v45 = vsel %vm14627_vm14, %v8100_v12, %v8096_v22  ;;  %v8106_v47 = vmul.f32 %v9346_v42, %v8105_v1  ;;  %v9348_v51 = vpop.eup %9347  ;;  %v8179_v27 = vrot.slane %v8178_v36, 4  ;;  %v8115_v54 = vor.u32 1.1754944e-38, %v8114_v44  ;;  %8271 = vmatpush.msrb.mxu0 %v8228_v40 }
0x1afe   :  { %v8102_v14 = vmul.f32 %v14550_v49, %v8101_v45  ;;  %v8126_v62 = vsel %vm8125_vm13, %v9344_v61, %v8122_v60  ;;  %v8171_v49 = vsel %vm203_vm0, %v8163_v35, 0.0  ;;  %v8134_v46 = vmul.f32 %v9348_v51, %v14624_v25 }
0x1aff   :  { %v8131_v55 = vsel %vm14644_vm2, %v8130_v33, %v8126_v62  ;;  %v8107_v5 = vadd.f32 %v9346_v42, %v8106_v47  ;;  %v8172_v52 = vrot.slane %v8171_v49, 4  ;;  %v8142_v6 = vand.u32 2147483647, %v14624_v25  ;;  %8272 = vmatpush.msrb.mxu0 %v8227_v43 }
0x1b00   :  { %v8166_v48 = vmul.f32 %v8102_v14, %v14510_v7  ;;  %v8132_v56 = vmul.f32 %v14554_v21, %v8131_v55  ;;  %v8042_v7 = vadd.f32 %v8041_v15, %v8040_v10  ;;  %v8135_v61 = vsub.f32 1.0, %v8134_v46 }
0x1b01   :  { %v8111_v4 = vsel %vm8110_vm1, %v9346_v42, %v8107_v5  ;;  %v8144_v24 = vand.u32 2147483648, %v14624_v25  ;;  %vm8139_vm4 = vweird.f32 %v9348_v51  ;;  %v8180_v20 = vadd.f32 %v8179_v27, %v8178_v36 }
0x1b02   :  { %v8192_v21 = vsel %vm203_vm0, %v8166_v48, 0.0  ;;  %v8116_v39 = vsel %vm8113_vm6, %v8115_v54, %v8111_v4  ;;  %9349 = vrcp.f32 %v8042_v7  ;;  %v8168_v28 = vmul.f32 %v8132_v56, %v14512_v58 }
0x1b03   :  { %v8117_v30 = vmul.f32 %v14565_v18, %v8116_v39  ;;  %v8136_v17 = vmul.f32 %v9348_v51, %v8135_v61  ;;  %v8193_v26 = vrot.slane %v8192_v21, 4  ;;  %vm8138_vm5 = vweird.f32 %v14624_v25 }
0x1b04   :  { %v8187_v8 = vadd.f32 %v8186_v41, %v14615_v34  ;;  %v8173_v63 = vadd.f32 %v8172_v52, %v8171_v49  ;;  %vm8140_vm8 = vmor %vm8138_vm5, %vm8139_vm4  ;;  %v8145_v2 = vor.u32 1.1754944e-38, %v8144_v24  ;;  %vm8143_vm15 = vcmp.eq.f32.partialorder %v8142_v6, 8.507059e+37 }
0x1b05   :  { %v8167_v11 = vmul.f32 %v8117_v30, %v14516_v53  ;;  %v8137_v31 = vadd.f32 %v9348_v51, %v8136_v17  ;;  %v8206_v18 = vsel %vm203_vm0, %v8168_v28, 0.0  ;;  %v8181_v42 = vrot.slane %v8180_v20, 2 }
0x1b06   :  { %v8194_v12 = vadd.f32 %v8193_v26, %v8192_v21  ;;  %v8174_v25 = vrot.slane %v8173_v63, 2  ;;  %v8207_v9 = vrot.slane %v8206_v18, 4  ;;  %v8159_v35 = vand.u32 2147483648, %v8042_v7 }
0x1b07   :  { %v8141_v23 = vsel %vm8140_vm8, %v9348_v51, %v8137_v31  ;;  %v8199_v58 = vsel %vm203_vm0, %v8167_v11, 0.0  ;;  %v8182_v22 = vadd.f32 %v8181_v42, %v8180_v20  ;;  %v8188_v37 = vrot.slane %v8187_v8, 2  ;;  %v8550_v42 = vld [vmem:[%s14711_s11] ss:$0 sm:$0xff] }
0x1b08   :  { %v9350_v50 = vpop.eup %9349  ;;  %v8146_v59 = vsel %vm8143_vm15, %v8145_v2, %v8141_v23  ;;  %v8200_v10 = vrot.slane %v8199_v58, 4  ;;  %v8195_v45 = vrot.slane %v8194_v12, 2  ;;  %v8157_v33 = vand.u32 2147483647, %v8042_v7 }
0x1b09   :  { %v8147_v53 = vmul.f32 %v14574_v19, %v8146_v59  ;;  %v8149_v3 = vmul.f32 %v9350_v50, %v8042_v7  ;;  %vm8154_vm14 = vweird.f32 %v9350_v50  ;;  %v8175_v57 = vadd.f32 %v8174_v25, %v8173_v63 }
0x1b0a   :  { %v8201_v29 = vadd.f32 %v8200_v10, %v8199_v58  ;;  %v8208_v14 = vadd.f32 %v8207_v9, %v8206_v18  ;;  %vm8153_vm9 = vweird.f32 %v8042_v7  ;;  %v8160_v15 = vor.u32 1.1754944e-38, %v8159_v35 }
0x1b0b   :  { %v8150_v34 = vsub.f32 1.0, %v8149_v3  ;;  %v8169_v38 = vmul.f32 %v8147_v53, %v14523_v13  ;;  %vm8155_vm10 = vmor %vm8153_vm9, %vm8154_vm14  ;;  %v8183_v36 = vrot.slane %v8182_v22, 1  ;;  %v8196_v13 = vadd.f32 %v8195_v45, %v8194_v12 }
0x1b0c   :  { %v8202_v44 = vrot.slane %v8201_v29, 2  ;;  %vm8158_vm7 = vcmp.eq.f32.partialorder %v8157_v33, 8.507059e+37  ;;  %v8189_v40 = vadd.f32 %v8188_v37, %v8187_v8  ;;  %v8176_v41 = vrot.slane %v8175_v57, 1 }
0x1b0d   :  { %v8151_v60 = vmul.f32 %v9350_v50, %v8150_v34  ;;  %v8213_v1 = vsel %vm203_vm0, %v8169_v38, 0.0  ;;  %v8209_v49 = vrot.slane %v8208_v14, 2  ;;  %v8184_v5 = vadd.f32 %v8183_v36, %v8182_v22 }
0x1b0e   :  { %v8214_v32 = vrot.slane %v8213_v1, 4  ;;  %v8203_v55 = vadd.f32 %v8202_v44, %v8201_v29  ;;  %v8197_v46 = vrot.slane %v8196_v13, 1  ;;  %v8190_v27 = vrot.slane %v8189_v40, 1 }
0x1b0f   :  { %v8152_v19 = vadd.f32 %v9350_v50, %v8151_v60  ;;  %v8177_v54 = vadd.f32 %v8176_v41, %v8175_v57  ;;  %v8210_v7 = vadd.f32 %v8209_v49, %v8208_v14  ;;  %vm15032_vm2 = vcmask 1041409  }
0x1b10   :  { %v8215_v62 = vadd.f32 %v8214_v32, %v8213_v1  ;;  %v8204_v52 = vrot.slane %v8203_v55, 1  ;;  %v8198_v21 = vadd.f32 %v8197_v46, %v8196_v13  ;;  %v8191_v24 = vadd.f32 %v8190_v27, %v8189_v40 }
0x1b11   :  { %v8156_v47 = vsel %vm8155_vm10, %v9350_v50, %v8152_v19  ;;  %v8247_v6 = vsel %vm15032_vm2, %v8184_v5, %v8177_v54  ;;  %v8211_v28 = vrot.slane %v8210_v7, 1  ;;  %vm15033_vm13 = vcmask 1043459  }
0x1b12   :  { %v8161_v51 = vsel %vm8158_vm7, %v8160_v15, %v8156_v47  ;;  %v8216_v56 = vrot.slane %v8215_v62, 2  ;;  %v8205_v30 = vadd.f32 %v8204_v52, %v8203_v55  ;;  %v8248_v20 = vsel %vm375_vm3, %v8191_v24, %v8247_v6 }
0x1b13   :  { %v8162_v48 = vmul.f32 %v14578_v0, %v8161_v51  ;;  %v8212_v11 = vadd.f32 %v8211_v28, %v8210_v7  ;;  %vm15034_vm12 = vcmask 1044484   ;;  %vm8253_vm11 = vcmask 1047559  }
0x1b14   :  { %v8217_v4 = vadd.f32 %v8216_v56, %v8215_v62  ;;  %vm15035_vm1 = vcmask 1045509   ;;  %vm15036_vm6 = vcmask 1046534   ;;  %vm8277_vm3 = vcmask 23552  }
0x1b15   :  { %v8170_v43 = vmul.f32 %v8162_v48, %v14527_v16  ;;  %v8249_v16 = vsel %vm15033_vm13, %v8198_v21, %v8248_v20 }
0x1b16   :  { %v8218_v17 = vrot.slane %v8217_v4, 1  ;;  %v8250_v63 = vsel %vm15034_vm12, %v8205_v30, %v8249_v16 }
0x1b17   :  { %v8220_v61 = vsel %vm203_vm0, %v8170_v43, 0.0  ;;  %v8251_v58 = vsel %vm15035_vm1, %v8212_v11, %v8250_v63 }
0x1b18   :  { %v8221_v39 = vrot.slane %v8220_v61, 4  ;;  %v8219_v8 = vadd.f32 %v8218_v17, %v8217_v4 }
0x1b1a   :  { %v8222_v0 = vadd.f32 %v8221_v39, %v8220_v61  ;;  %v8252_v18 = vsel %vm15036_vm6, %v8219_v8, %v8251_v58 }
0x1b1c   :  { %v8223_v26 = vrot.slane %v8222_v0, 2 }
0x1b1e   :  { %v8224_v31 = vadd.f32 %v8223_v26, %v8222_v0 }
0x1b20   :  { %v8225_v2 = vrot.slane %v8224_v31, 1 }
0x1b22   :  { %v8226_v23 = vadd.f32 %v8225_v2, %v8224_v31 }
0x1b24   :  { %v8254_v50 = vsel %vm8253_vm11, %v8226_v23, %v8252_v18 }
0x1b25   :  { %8502 = vmatmul.msk.f32.vlgmr.msrb.gmra.mxu0 %vm203_vm0, %v8254_v50 }
0x1ba2   :  { %v8274_v59 = vpop.f32.mrf.mxu0 }
0x1ba3   :  { %v8275_v12 = vadd.f32 %v8550_v42, %v8274_v59 }
0x1ba5   :  { %8278 = vst.msk [vmem:[%s14712_s12] sm:$0xff] %vm8277_vm3, %v8275_v12 }
0x1ba6   :  { %8283 = vsyncpa [#allocation7], 1 }
0x1ba7   :  { %8284 = vsyncpa [#allocation9], 1 }
0x1ba8   :  { %8285 = vsyncpa [#allocation12], 1 }

</bundles_post_ra>
